<compile_context>
chip_gen: v6e
topology: v6e:2x2x1
jax: 0.10.0
libtpu: 0.0.40
codegen_flags: <defaults>
</compile_context>

<pallas_src>
import jax
import jax.numpy as jnp
from jax.experimental import pallas as pl
from jax.experimental.pallas import tpu as pltpu


# ---------------------------------------------------------------------------
# Small helpers
# ---------------------------------------------------------------------------
def _round_up(x, m):
    return ((x + m - 1) // m) * m


def _choose_tile_m(M, cap=1024):
    """Largest divisor of M that is <= cap and a multiple of 8 (M itself if small)."""
    if M <= cap:
        return M
    for d in range(cap - cap % 8, 7, -8):
        if M % d == 0:
            return d
    return 8


def _pack_gates_w(w, H, Hp, Kp):
    """PyTorch gate-major weight (4H, K) -> transposed, per-gate padded (Kp, 4Hp)."""
    K = w.shape[1]
    w = w.reshape(4, H, K)
    w = jnp.pad(w, ((0, 0), (0, Hp - H), (0, Kp - K)))
    return jnp.transpose(w, (2, 0, 1)).reshape(Kp, 4 * Hp)


def _pack_gates_b(b, H, Hp):
    """PyTorch gate-major bias (4H,) -> per-gate padded (4Hp,)."""
    return jnp.pad(b.reshape(4, H), ((0, 0), (0, Hp - H))).reshape(4 * Hp)


# ---------------------------------------------------------------------------
# Pallas kernels: input / classifier projections
# ---------------------------------------------------------------------------
def proj1_kernel(x_ref, w_ref, b_ref, o_ref):
    """o = x @ w + b  (single input slab)."""
    o_ref[...] = (
        jnp.dot(x_ref[...], w_ref[...], preferred_element_type=jnp.float32)
        + b_ref[...]
    ).astype(o_ref.dtype)


def proj2_kernel(xa_ref, xb_ref, wa_ref, wb_ref, b_ref, o_ref):
    """o = xa @ wa + xb @ wb + b  (two input slabs; avoids a feature concat)."""
    acc = jnp.dot(xa_ref[...], wa_ref[...], preferred_element_type=jnp.float32)
    acc = acc + jnp.dot(xb_ref[...], wb_ref[...], preferred_element_type=jnp.float32)
    o_ref[...] = (acc + b_ref[...]).astype(o_ref.dtype)


def input_projection(xs, ws, bias):
    """gi = sum_k xs[k] @ ws[k] + bias, tiled over M with a parallel grid.

    xs: list of (M, K_k) bf16; ws: list of (K_k, N) bf16; bias: (1, N) f32.
    Returns (M, N) bf16  (gate inputs kept bf16 to halve HBM store + reload traffic).
    """
    M = xs[0].shape[0]
    N = ws[0].shape[1]
    tile_m = _choose_tile_m(M)          # decoupled from the recurrence chunk size
    nm = M // tile_m
    kernel = proj1_kernel if len(xs) == 1 else proj2_kernel

    in_specs = [pl.BlockSpec((tile_m, x.shape[1]), lambda i: (i, 0)) for x in xs]
    in_specs += [pl.BlockSpec((w.shape[0], N), lambda i: (0, 0)) for w in ws]
    in_specs.append(pl.BlockSpec((1, N), lambda i: (0, 0)))

    return pl.pallas_call(
        kernel,
        out_shape=jax.ShapeDtypeStruct((M, N), jnp.bfloat16),
        grid_spec=pltpu.PrefetchScalarGridSpec(
            num_scalar_prefetch=0,
            grid=(nm,),
            in_specs=in_specs,
            out_specs=pl.BlockSpec((tile_m, N), lambda i: (i, 0)),
        ),
        compiler_params=pltpu.CompilerParams(
            dimension_semantics=("parallel",)),
    )(*xs, *ws, bias)


# ---------------------------------------------------------------------------
# Pallas kernel: fused bidirectional LSTM recurrence (time-chunked)
# ---------------------------------------------------------------------------
def bilstm_layer(gi, whh_f, whh_b, *, seq_len, Hp, tc):
    """Run the fused bidirectional recurrence.

    gi : (Tp, Bp, 8Hp) bf16 precomputed gate inputs (fwd | bwd halves), Tp = nc*tc.
    whh_*: (Hp, 4Hp) bf16 recurrent weights (transposed, gate-padded).
    Returns (hs_f, hs_b, hn_f, hn_b):
      hs_* : (Tp, Bp, Hp) bf16 hidden sequences in natural time order
      hn_* : (Bp, Hp) bf16 final hidden state per direction (fwd @ t=T-1, bwd @ t=0).
    """
    Tp, Bp, _ = gi.shape
    nc = Tp // tc
    needs_mask = (seq_len != Tp)
    # Full unroll only when per-step live gate tensors are small (vreg pressure).
    unroll = True if (Bp * 4 * Hp * 4) <= 32768 else 2

    def kernel(gi_f_ref, gi_b_ref, whh_f_ref, whh_b_ref,
               hs_f_ref, hs_b_ref, hn_f_ref, hn_b_ref,
               hf, cf, hb, cb):
        chunk = pl.program_id(0)

        @pl.when(chunk == 0)
        def _():
            hf[...] = jnp.zeros_like(hf)
            cf[...] = jnp.zeros_like(cf)
            hb[...] = jnp.zeros_like(hb)
            cb[...] = jnp.zeros_like(cb)

        def cell(gi_t, h_prev, c_prev, whh_ref):
            # h_prev is bf16 (feeds MXU directly); gates / c stay f32.
            gates = gi_t.astype(jnp.float32) + jnp.dot(
                h_prev, whh_ref[...], preferred_element_type=jnp.float32)
            i_g = jax.nn.sigmoid(gates[:, 0 * Hp:1 * Hp])
            f_g = jax.nn.sigmoid(gates[:, 1 * Hp:2 * Hp])
            g_g = jnp.tanh(gates[:, 2 * Hp:3 * Hp])
            o_g = jax.nn.sigmoid(gates[:, 3 * Hp:4 * Hp])
            c_new = f_g * c_prev + i_g * g_g
            h_new = o_g * jnp.tanh(c_new)
            return h_new.astype(jnp.bfloat16), c_new

        def fwd_step(i):
            h_new, c_new = cell(gi_f_ref[i], hf[...], cf[...], whh_f_ref)
            hf[...] = h_new
            cf[...] = c_new
            hs_f_ref[i] = h_new

        def bwd_step(j):
            h_new, c_new = cell(gi_b_ref[j], hb[...], cb[...], whh_b_ref)
            hb[...] = h_new
            cb[...] = c_new
            hs_b_ref[j] = h_new

        def body(i, carry):
            j = tc - 1 - i
            if needs_mask:
                # cdiv chunking: skip padded timesteps (state unchanged, hs <- 0).
                t_f = chunk * tc + i
                t_b = (nc - 1 - chunk) * tc + j

                @pl.when(t_f < seq_len)
                def _():
                    fwd_step(i)

                @pl.when(t_f >= seq_len)
                def _():
                    hs_f_ref[i] = jnp.zeros((Bp, Hp), hs_f_ref.dtype)

                @pl.when(t_b < seq_len)
                def _():
                    bwd_step(j)

                @pl.when(t_b >= seq_len)
                def _():
                    hs_b_ref[j] = jnp.zeros((Bp, Hp), hs_b_ref.dtype)
            else:
                fwd_step(i)
                bwd_step(j)
            return carry

        jax.lax.fori_loop(0, tc, body, 0, unroll=unroll)

        # Emit h_n directly (fwd state after t=T-1, bwd state after t=0).
        @pl.when(chunk == nc - 1)
        def _():
            hn_f_ref[...] = hf[...]
            hn_b_ref[...] = hb[...]

    return pl.pallas_call(
        kernel,
        out_shape=(jax.ShapeDtypeStruct((Tp, Bp, Hp), jnp.bfloat16),
                   jax.ShapeDtypeStruct((Tp, Bp, Hp), jnp.bfloat16),
                   jax.ShapeDtypeStruct((Bp, Hp), jnp.bfloat16),
                   jax.ShapeDtypeStruct((Bp, Hp), jnp.bfloat16)),
        grid_spec=pltpu.PrefetchScalarGridSpec(
            num_scalar_prefetch=0,
            grid=(nc,),
            in_specs=[
                # forward gate half, chunk c
                pl.BlockSpec((tc, Bp, 4 * Hp), lambda c: (c, 0, 0)),
                # backward gate half, reversed chunk (no [::-1] copies in HBM)
                pl.BlockSpec((tc, Bp, 4 * Hp), lambda c: (nc - 1 - c, 0, 1)),
                pl.BlockSpec((Hp, 4 * Hp), lambda c: (0, 0)),
                pl.BlockSpec((Hp, 4 * Hp), lambda c: (0, 0)),
            ],
            out_specs=[
                pl.BlockSpec((tc, Bp, Hp), lambda c: (c, 0, 0)),
                pl.BlockSpec((tc, Bp, Hp), lambda c: (nc - 1 - c, 0, 0)),
                pl.BlockSpec((Bp, Hp), lambda c: (0, 0)),
                pl.BlockSpec((Bp, Hp), lambda c: (0, 0)),
            ],
            scratch_shapes=[
                pltpu.VMEM((Bp, Hp), jnp.bfloat16),   # hf (bf16: feeds MXU, halves scratch)
                pltpu.VMEM((Bp, Hp), jnp.float32),    # cf
                pltpu.VMEM((Bp, Hp), jnp.bfloat16),   # hb
                pltpu.VMEM((Bp, Hp), jnp.float32),    # cb
            ],
        ),
        compiler_params=pltpu.CompilerParams(
            dimension_semantics=("arbitrary",),       # recurrence: strictly sequential
            vmem_limit_bytes=48 * 1024 * 1024,        # headroom on v7x's 64 MiB VMEM
        ),
    )(gi, gi, whh_f, whh_b)


# ---------------------------------------------------------------------------
# Parameter init (PyTorch-like) and one-time packing
# ---------------------------------------------------------------------------
def init_params(key, vocab_size, embedding_dim, hidden_dim, num_layers,
                num_classes, bidirectional=True):
    num_dirs = 2 if bidirectional else 1
    params = {}
    k = key

    def nxt():
        nonlocal k
        k, sub = jax.random.split(k)
        return sub

    scale = 1.0 / jnp.sqrt(hidden_dim)

    emb = jax.random.normal(nxt(), (vocab_size, embedding_dim), jnp.float32) * 0.1
    emb = emb.at[0].set(0.0)  # padding_idx=0
    params["embedding"] = emb

    for layer in range(num_layers):
        d_in = embedding_dim if layer == 0 else hidden_dim * num_dirs
        for tag in ["fwd", "bwd"][:num_dirs]:
            w_ih = jax.random.uniform(nxt(), (4 * hidden_dim, d_in),
                                      jnp.float32, -scale, scale)
            w_hh = jax.random.uniform(nxt(), (4 * hidden_dim, hidden_dim),
                                      jnp.float32, -scale, scale)
            b_ih = jax.random.uniform(nxt(), (4 * hidden_dim,),
                                      jnp.float32, -scale, scale)
            b_hh = jax.random.uniform(nxt(), (4 * hidden_dim,),
                                      jnp.float32, -scale, scale)
            params[f"l{layer}_{tag}"] = (w_ih, w_hh, b_ih, b_hh)

    fc_in = hidden_dim * num_dirs
    params["fc_w"] = jax.random.uniform(nxt(), (num_classes, fc_in),
                                        jnp.float32, -1.0 / jnp.sqrt(fc_in),
                                        1.0 / jnp.sqrt(fc_in))
    params["fc_b"] = jnp.zeros((num_classes,), jnp.float32)
    return params


def prepare_packed_params(params, hidden_dim, num_layers, bidirectional=True):
    """One-time weight packing (padding / transposes / bf16 casts hoisted out of fwd)."""
    H = hidden_dim
    Hp = _round_up(H, 128)

    emb = params["embedding"]
    E = emb.shape[1]
    Ep = _round_up(E, 128)
    emb_p = jnp.pad(emb, ((0, 0), (0, Ep - E))).astype(jnp.bfloat16)

    layers = []
    for layer in range(num_layers):
        w_ih_f, w_hh_f, b_ih_f, b_hh_f = params[f"l{layer}_fwd"]
        if bidirectional:
            w_ih_b, w_hh_b, b_ih_b, b_hh_b = params[f"l{layer}_bwd"]
        else:
            # TODO(synk): dedicated unidirectional kernel; mirroring fwd weights keeps
            # results correct but wastes the discarded backward-direction compute.
            w_ih_b, w_hh_b, b_ih_b, b_hh_b = w_ih_f, w_hh_f, b_ih_f, b_hh_f

        bias = jnp.concatenate([
            _pack_gates_b(b_ih_f + b_hh_f, H, Hp),
            _pack_gates_b(b_ih_b + b_hh_b, H, Hp),
        ]).reshape(1, 8 * Hp).astype(jnp.float32)

        if layer == 0:
            w_in = (jnp.concatenate([
                _pack_gates_w(w_ih_f, H, Hp, Ep),
                _pack_gates_w(w_ih_b, H, Hp, Ep)], axis=1).astype(jnp.bfloat16),)
        elif bidirectional:
            # Inputs are (hs_f, hs_b); split each direction's W_ih across the two slabs
            # instead of concatenating hidden sequences in HBM.
            wa = jnp.concatenate([
                _pack_gates_w(w_ih_f[:, :H], H, Hp, Hp),
                _pack_gates_w(w_ih_b[:, :H], H, Hp, Hp)], axis=1).astype(jnp.bfloat16)
            wb = jnp.concatenate([
                _pack_gates_w(w_ih_f[:, H:], H, Hp, Hp),
                _pack_gates_w(w_ih_b[:, H:], H, Hp, Hp)], axis=1).astype(jnp.bfloat16)
            w_in = (wa, wb)
        else:
            w_in = (jnp.concatenate([
                _pack_gates_w(w_ih_f, H, Hp, Hp),
                _pack_gates_w(w_ih_b, H, Hp, Hp)], axis=1).astype(jnp.bfloat16),)

        layers.append(dict(
            w_in=w_in, bias=bias,
            whh_f=_pack_gates_w(w_hh_f, H, Hp, Hp).astype(jnp.bfloat16),
            whh_b=_pack_gates_w(w_hh_b, H, Hp, Hp).astype(jnp.bfloat16),
        ))

    fc_w, fc_b = params["fc_w"], params["fc_b"]
    C = fc_w.shape[0]
    Cp = _round_up(C, 128)
    fc_wt = jnp.pad(jnp.transpose(fc_w), ((0, 0), (0, Cp - C)))   # (H*dirs, Cp)
    if bidirectional:
        fc_wf = jnp.pad(fc_wt[:H], ((0, Hp - H), (0, 0))).astype(jnp.bfloat16)
        fc_wb = jnp.pad(fc_wt[H:], ((0, Hp - H), (0, 0))).astype(jnp.bfloat16)
    else:
        fc_wf = jnp.pad(fc_wt, ((0, Hp - H), (0, 0))).astype(jnp.bfloat16)
        fc_wb = None
    fc_bias = jnp.pad(fc_b, (0, Cp - C)).reshape(1, Cp).astype(jnp.float32)

    return dict(embedding=emb_p, layers=layers,
                fc_wf=fc_wf, fc_wb=fc_wb, fc_b=fc_bias,
                H=H, Hp=Hp, E=E, Ep=Ep, C=C, Cp=Cp,
                num_layers=num_layers, bidirectional=bidirectional)


# ---------------------------------------------------------------------------
# Forward pass
# ---------------------------------------------------------------------------
def lstm_model_forward(tokens, packed):
    """tokens: (B, T) int32 -> logits (B, num_classes). Eval-mode (dropout = identity)."""
    B, T = tokens.shape
    Hp = packed["Hp"]
    Ep = packed["Ep"]
    Bp = _round_up(B, 8)

    # Time chunking: fixed-ish chunk size, cdiv grid, masked tail inside the kernel.
    tc = min(16, T)
    nc = pl.cdiv(T, tc)
    Tp = nc * tc

    # Embedding lookup (gather glue in plain JAX), time-major, padded, bf16.
    x = jnp.take(packed["embedding"], tokens, axis=0)      # (B, T, Ep) bf16
    x = jnp.transpose(x, (1, 0, 2))                         # (T, B, Ep) time-major
    x = jnp.pad(x, ((0, Tp - T), (0, Bp - B), (0, 0)))      # (Tp, Bp, Ep)

    xs = [x.reshape(Tp * Bp, Ep)]    # 2D view(s) of the current layer input (free reshape)
    hn_f = hn_b = None

    for lp in packed["layers"]:
        # Hoisted input projection (parallel grid, large M tiles, bf16 output).
        gi2d = input_projection(xs, list(lp["w_in"]), lp["bias"])
        gi = gi2d.reshape(Tp, Bp, 8 * Hp)

        # Fused bidirectional recurrence (sequential grid over time chunks).
        hs_f, hs_b, hn_f, hn_b = bilstm_layer(
            gi, lp["whh_f"], lp["whh_b"], seq_len=T, Hp=Hp, tc=tc)

        if packed["bidirectional"]:
            xs = [hs_f.reshape(Tp * Bp, Hp), hs_b.reshape(Tp * Bp, Hp)]
        else:
            xs = [hs_f.reshape(Tp * Bp, Hp)]

    # Final classifier. nn.Dropout(0.5) is identity in eval mode.
    C, Cp = packed["C"], packed["Cp"]
    if packed["bidirectional"]:
        logits_p = pl.pallas_call(
            proj2_kernel,
            out_shape=jax.ShapeDtypeStruct((Bp, Cp), jnp.float32),
        )(hn_f, hn_b, packed["fc_wf"], packed["fc_wb"], packed["fc_b"])
    else:
        logits_p = pl.pallas_call(
            proj1_kernel,
            out_shape=jax.ShapeDtypeStruct((Bp, Cp), jnp.float32),
        )(hn_f, packed["fc_wf"], packed["fc_b"])

    return logits_p[:B, :C]


if __name__ == "__main__":
    # Small, deterministic configuration.
    VOCAB = 50
    EMB = 16
    HID = 32
    LAYERS = 2
    CLASSES = 2
    B, T = 2, 8

    key = jax.random.PRNGKey(0)
    k_tok, k_par = jax.random.split(key)

    tokens = jax.random.randint(k_tok, (B, T), 0, VOCAB, dtype=jnp.int32)
    params = init_params(k_par, VOCAB, EMB, HID, LAYERS, CLASSES,
                         bidirectional=True)
    packed = prepare_packed_params(params, HID, LAYERS, bidirectional=True)

    fwd = jax.jit(lambda t: lstm_model_forward(t, packed))
    logits = jax.block_until_ready(fwd(tokens))
    assert logits.shape == (B, CLASSES)
    print("KERNEL_OK")
</pallas_src>

<mosaic_0001>
module attributes {stable_mosaic.version = 11 : i64} {
  func.func @proj1_kernel(%arg0: i32, %arg1: memref<64x128xbf16, #tpu.memory_space<vmem>>, %arg2: memref<128x1024xbf16, #tpu.memory_space<vmem>>, %arg3: memref<1x1024xf32, #tpu.memory_space<vmem>>, %arg4: memref<64x1024xbf16, #tpu.memory_space<vmem>>) attributes {dimension_semantics = [#tpu.dimension_semantics<parallel>], iteration_bounds = array<i64: 1>, scalar_prefetch = 0 : i64, scratch_operands = 0 : i64, tpu.core_type = #tpu.core_type<tc>, window_params = [{transform_indices = @transform_0, window_bounds = array<i64: 64, 128>}, {pipeline_mode = #tpu.pipeline_mode<synchronous>, transform_indices = @transform_1, window_bounds = array<i64: 128, 1024>}, {pipeline_mode = #tpu.pipeline_mode<synchronous>, transform_indices = @transform_2, window_bounds = array<i64: 1, 1024>}, {transform_indices = @transform_3, window_bounds = array<i64: 64, 1024>}]} {
    %c0 = arith.constant 0 : index
    %c0_0 = arith.constant 0 : index
    %0 = vector.load %arg1[%c0, %c0_0] : memref<64x128xbf16, #tpu.memory_space<vmem>>, vector<64x128xbf16>
    %c0_1 = arith.constant 0 : index
    %c0_2 = arith.constant 0 : index
    %1 = vector.load %arg2[%c0_1, %c0_2] : memref<128x1024xbf16, #tpu.memory_space<vmem>>, vector<128x1024xbf16>
    %cst = arith.constant dense<0.000000e+00> : vector<64x1024xf32>
    %2 = tpu.matmul %0, %1, %cst {dimension_numbers = #tpu.dot_dimension_numbers<[1], [0], [0], [1], [0, 0, 1, 1], [], []>} : vector<64x128xbf16>, vector<128x1024xbf16>, vector<64x1024xf32> -> vector<64x1024xf32>
    %c0_3 = arith.constant 0 : index
    %c0_4 = arith.constant 0 : index
    %3 = vector.load %arg3[%c0_3, %c0_4] : memref<1x1024xf32, #tpu.memory_space<vmem>>, vector<1x1024xf32>
    %4 = vector.broadcast %3 : vector<1x1024xf32> to vector<64x1024xf32>
    %5 = arith.addf %2, %4 : vector<64x1024xf32>
    %6 = arith.truncf %5 : vector<64x1024xf32> to vector<64x1024xbf16>
    %c0_5 = arith.constant 0 : index
    %c0_6 = arith.constant 0 : index
    %7 = vector.load %arg4[%c0_5, %c0_6] : memref<64x1024xbf16, #tpu.memory_space<vmem>>, vector<64x1024xbf16>
    tpu.vector_store %arg4[%c0_5, %c0_6], %6 {strides = array<i32>} : memref<64x1024xbf16, #tpu.memory_space<vmem>>, vector<64x1024xbf16>,
    return
  }
  func.func @transform_0(%arg0: i32) -> (i32, i32) {
    %c0_i32 = arith.constant 0 : i32
    %c0_i32_0 = arith.constant 0 : i32
    return %arg0, %c0_i32 : i32, i32
  }
  func.func @transform_1(%arg0: i32) -> (i32, i32) {
    %c0_i32 = arith.constant 0 : i32
    %c0_i32_0 = arith.constant 0 : i32
    %c0_i32_1 = arith.constant 0 : i32
    return %c0_i32, %c0_i32_0 : i32, i32
  }
  func.func @transform_2(%arg0: i32) -> (i32, i32) {
    %c0_i32 = arith.constant 0 : i32
    %c0_i32_0 = arith.constant 0 : i32
    %c0_i32_1 = arith.constant 0 : i32
    return %c0_i32, %c0_i32_0 : i32, i32
  }
  func.func @transform_3(%arg0: i32) -> (i32, i32) {
    %c0_i32 = arith.constant 0 : i32
    %c0_i32_0 = arith.constant 0 : i32
    return %arg0, %c0_i32 : i32, i32
  }
}

module attributes {stable_mosaic.version = 11 : i64} {
  func.func @proj2_kernel(%arg0: i32, %arg1: memref<64x128xbf16, #tpu.memory_space<vmem>>, %arg2: memref<64x128xbf16, #tpu.memory_space<vmem>>, %arg3: memref<128x1024xbf16, #tpu.memory_space<vmem>>, %arg4: memref<128x1024xbf16, #tpu.memory_space<vmem>>, %arg5: memref<1x1024xf32, #tpu.memory_space<vmem>>, %arg6: memref<64x1024xbf16, #tpu.memory_space<vmem>>) attributes {dimension_semantics = [#tpu.dimension_semantics<parallel>], iteration_bounds = array<i64: 1>, scalar_prefetch = 0 : i64, scratch_operands = 0 : i64, tpu.core_type = #tpu.core_type<tc>, window_params = [{transform_indices = @transform_0, window_bounds = array<i64: 64, 128>}, {transform_indices = @transform_1, window_bounds = array<i64: 64, 128>}, {pipeline_mode = #tpu.pipeline_mode<synchronous>, transform_indices = @transform_2, window_bounds = array<i64: 128, 1024>}, {pipeline_mode = #tpu.pipeline_mode<synchronous>, transform_indices = @transform_3, window_bounds = array<i64: 128, 1024>}, {pipeline_mode = #tpu.pipeline_mode<synchronous>, transform_indices = @transform_4, window_bounds = array<i64: 1, 1024>}, {transform_indices = @transform_5, window_bounds = array<i64: 64, 1024>}]} {
    %c0 = arith.constant 0 : index
    %c0_0 = arith.constant 0 : index
    %0 = vector.load %arg1[%c0, %c0_0] : memref<64x128xbf16, #tpu.memory_space<vmem>>, vector<64x128xbf16>
    %c0_1 = arith.constant 0 : index
    %c0_2 = arith.constant 0 : index
    %1 = vector.load %arg3[%c0_1, %c0_2] : memref<128x1024xbf16, #tpu.memory_space<vmem>>, vector<128x1024xbf16>
    %cst = arith.constant dense<0.000000e+00> : vector<64x1024xf32>
    %2 = tpu.matmul %0, %1, %cst {dimension_numbers = #tpu.dot_dimension_numbers<[1], [0], [0], [1], [0, 0, 1, 1], [], []>} : vector<64x128xbf16>, vector<128x1024xbf16>, vector<64x1024xf32> -> vector<64x1024xf32>
    %c0_3 = arith.constant 0 : index
    %c0_4 = arith.constant 0 : index
    %3 = vector.load %arg2[%c0_3, %c0_4] : memref<64x128xbf16, #tpu.memory_space<vmem>>, vector<64x128xbf16>
    %c0_5 = arith.constant 0 : index
    %c0_6 = arith.constant 0 : index
    %4 = vector.load %arg4[%c0_5, %c0_6] : memref<128x1024xbf16, #tpu.memory_space<vmem>>, vector<128x1024xbf16>
    %cst_7 = arith.constant dense<0.000000e+00> : vector<64x1024xf32>
    %5 = tpu.matmul %3, %4, %cst_7 {dimension_numbers = #tpu.dot_dimension_numbers<[1], [0], [0], [1], [0, 0, 1, 1], [], []>} : vector<64x128xbf16>, vector<128x1024xbf16>, vector<64x1024xf32> -> vector<64x1024xf32>
    %6 = arith.addf %2, %5 : vector<64x1024xf32>
    %c0_8 = arith.constant 0 : index
    %c0_9 = arith.constant 0 : index
    %7 = vector.load %arg5[%c0_8, %c0_9] : memref<1x1024xf32, #tpu.memory_space<vmem>>, vector<1x1024xf32>
    %8 = vector.broadcast %7 : vector<1x1024xf32> to vector<64x1024xf32>
    %9 = arith.addf %6, %8 : vector<64x1024xf32>
    %10 = arith.truncf %9 : vector<64x1024xf32> to vector<64x1024xbf16>
    %c0_10 = arith.constant 0 : index
    %c0_11 = arith.constant 0 : index
    %11 = vector.load %arg6[%c0_10, %c0_11] : memref<64x1024xbf16, #tpu.memory_space<vmem>>, vector<64x1024xbf16>
    tpu.vector_store %arg6[%c0_10, %c0_11], %10 {strides = array<i32>} : memref<64x1024xbf16, #tpu.memory_space<vmem>>, vector<64x1024xbf16>,
    return
  }
  func.func @transform_0(%arg0: i32) -> (i32, i32) {
    %c0_i32 = arith.constant 0 : i32
    %c0_i32_0 = arith.constant 0 : i32
    return %arg0, %c0_i32 : i32, i32
  }
  func.func @transform_1(%arg0: i32) -> (i32, i32) {
    %c0_i32 = arith.constant 0 : i32
    %c0_i32_0 = arith.constant 0 : i32
    return %arg0, %c0_i32 : i32, i32
  }
  func.func @transform_2(%arg0: i32) -> (i32, i32) {
    %c0_i32 = arith.constant 0 : i32
    %c0_i32_0 = arith.constant 0 : i32
    %c0_i32_1 = arith.constant 0 : i32
    return %c0_i32, %c0_i32_0 : i32, i32
  }
  func.func @transform_3(%arg0: i32) -> (i32, i32) {
    %c0_i32 = arith.constant 0 : i32
    %c0_i32_0 = arith.constant 0 : i32
    %c0_i32_1 = arith.constant 0 : i32
    return %c0_i32, %c0_i32_0 : i32, i32
  }
  func.func @transform_4(%arg0: i32) -> (i32, i32) {
    %c0_i32 = arith.constant 0 : i32
    %c0_i32_0 = arith.constant 0 : i32
    %c0_i32_1 = arith.constant 0 : i32
    return %c0_i32, %c0_i32_0 : i32, i32
  }
  func.func @transform_5(%arg0: i32) -> (i32, i32) {
    %c0_i32 = arith.constant 0 : i32
    %c0_i32_0 = arith.constant 0 : i32
    return %arg0, %c0_i32 : i32, i32
  }
}

module attributes {stable_mosaic.version = 11 : i64} {
  func.func @kernel(%arg0: i32, %arg1: memref<8x8x512xbf16, #tpu.memory_space<vmem>>, %arg2: memref<8x8x512xbf16, #tpu.memory_space<vmem>>, %arg3: memref<128x512xbf16, #tpu.memory_space<vmem>>, %arg4: memref<128x512xbf16, #tpu.memory_space<vmem>>, %arg5: memref<8x8x128xbf16, #tpu.memory_space<vmem>>, %arg6: memref<8x8x128xbf16, #tpu.memory_space<vmem>>, %arg7: memref<8x128xbf16, #tpu.memory_space<vmem>>, %arg8: memref<8x128xbf16, #tpu.memory_space<vmem>>, %arg9: memref<8x128xbf16, #tpu.memory_space<vmem>>, %arg10: memref<8x128xf32, #tpu.memory_space<vmem>>, %arg11: memref<8x128xbf16, #tpu.memory_space<vmem>>, %arg12: memref<8x128xf32, #tpu.memory_space<vmem>>) attributes {dimension_semantics = [#tpu.dimension_semantics<arbitrary>], iteration_bounds = array<i64: 1>, scalar_prefetch = 0 : i64, scratch_operands = 4 : i64, tpu.core_type = #tpu.core_type<tc>, window_params = [{transform_indices = @transform_0, window_bounds = array<i64: 8, 8, 512>}, {transform_indices = @transform_1, window_bounds = array<i64: 8, 8, 512>}, {pipeline_mode = #tpu.pipeline_mode<synchronous>, transform_indices = @transform_2, window_bounds = array<i64: 128, 512>}, {pipeline_mode = #tpu.pipeline_mode<synchronous>, transform_indices = @transform_3, window_bounds = array<i64: 128, 512>}, {transform_indices = @transform_4, window_bounds = array<i64: 8, 8, 128>}, {transform_indices = @transform_5, window_bounds = array<i64: 8, 8, 128>}, {pipeline_mode = #tpu.pipeline_mode<synchronous>, transform_indices = @transform_6, window_bounds = array<i64: 8, 128>}, {pipeline_mode = #tpu.pipeline_mode<synchronous>, transform_indices = @transform_7, window_bounds = array<i64: 8, 128>}]} {
    %c0_i32 = arith.constant 0 : i32
    %0 = arith.cmpi eq, %arg0, %c0_i32 : i32
    %1 = arith.extui %0 : i1 to i32
    %c0_i32_0 = arith.constant 0 : i32
    %2 = arith.cmpi ne, %1, %c0_i32_0 : i32
    scf.if %2 {
      %cst_298 = arith.constant 0.000000e+00 : bf16
      %670 = vector.broadcast %cst_298 : bf16 to vector<8x128xbf16>
      %c0_299 = arith.constant 0 : index
      %c0_300 = arith.constant 0 : index
      %671 = vector.load %arg9[%c0_299, %c0_300] : memref<8x128xbf16, #tpu.memory_space<vmem>>, vector<8x128xbf16>
      tpu.vector_store %arg9[%c0_299, %c0_300], %670 {strides = array<i32>} : memref<8x128xbf16, #tpu.memory_space<vmem>>, vector<8x128xbf16>,
      %cst_301 = arith.constant 0.000000e+00 : f32
      %672 = vector.broadcast %cst_301 : f32 to vector<8x128xf32>
      %c0_302 = arith.constant 0 : index
      %c0_303 = arith.constant 0 : index
      %673 = vector.load %arg10[%c0_302, %c0_303] : memref<8x128xf32, #tpu.memory_space<vmem>>, vector<8x128xf32>
      tpu.vector_store %arg10[%c0_302, %c0_303], %672 {strides = array<i32>} : memref<8x128xf32, #tpu.memory_space<vmem>>, vector<8x128xf32>,
      %cst_304 = arith.constant 0.000000e+00 : bf16
      %674 = vector.broadcast %cst_304 : bf16 to vector<8x128xbf16>
      %c0_305 = arith.constant 0 : index
      %c0_306 = arith.constant 0 : index
      %675 = vector.load %arg11[%c0_305, %c0_306] : memref<8x128xbf16, #tpu.memory_space<vmem>>, vector<8x128xbf16>
      tpu.vector_store %arg11[%c0_305, %c0_306], %674 {strides = array<i32>} : memref<8x128xbf16, #tpu.memory_space<vmem>>, vector<8x128xbf16>,
      %cst_307 = arith.constant 0.000000e+00 : f32
      %676 = vector.broadcast %cst_307 : f32 to vector<8x128xf32>
      %c0_308 = arith.constant 0 : index
      %c0_309 = arith.constant 0 : index
      %677 = vector.load %arg12[%c0_308, %c0_309] : memref<8x128xf32, #tpu.memory_space<vmem>>, vector<8x128xf32>
      tpu.vector_store %arg12[%c0_308, %c0_309], %676 {strides = array<i32>} : memref<8x128xf32, #tpu.memory_space<vmem>>, vector<8x128xf32>,
    } else {
    }
    %c0_i32_1 = arith.constant 0 : i32
    %c7_i32 = arith.constant 7 : i32
    %3 = arith.subi %c7_i32, %c0_i32_1 : i32
    %4 = arith.index_cast %c0_i32_1 : i32 to index
    %c0 = arith.constant 0 : index
    %c0_2 = arith.constant 0 : index
    %5 = vector.load %arg1[%4, %c0, %c0_2] : memref<8x8x512xbf16, #tpu.memory_space<vmem>>, vector<1x8x512xbf16>
    %6 = vector.shape_cast %5 : vector<1x8x512xbf16> to vector<8x512xbf16>
    %c0_3 = arith.constant 0 : index
    %c0_4 = arith.constant 0 : index
    %7 = vector.load %arg9[%c0_3, %c0_4] : memref<8x128xbf16, #tpu.memory_space<vmem>>, vector<8x128xbf16>
    %c0_5 = arith.constant 0 : index
    %c0_6 = arith.constant 0 : index
    %8 = vector.load %arg10[%c0_5, %c0_6] : memref<8x128xf32, #tpu.memory_space<vmem>>, vector<8x128xf32>
    %9 = arith.extf %6 : vector<8x512xbf16> to vector<8x512xf32>
    %c0_7 = arith.constant 0 : index
    %c0_8 = arith.constant 0 : index
    %10 = vector.load %arg3[%c0_7, %c0_8] : memref<128x512xbf16, #tpu.memory_space<vmem>>, vector<128x512xbf16>
    %cst = arith.constant dense<0.000000e+00> : vector<8x512xf32>
    %11 = tpu.matmul %7, %10, %cst {dimension_numbers = #tpu.dot_dimension_numbers<[1], [0], [0], [1], [0, 0, 1, 1], [], []>} : vector<8x128xbf16>, vector<128x512xbf16>, vector<8x512xf32> -> vector<8x512xf32>
    %12 = arith.addf %9, %11 : vector<8x512xf32>
    %13 = vector.extract_strided_slice %12 {offsets = [0, 0], sizes = [8, 128], strides = [1, 1]} : vector<8x512xf32> to vector<8x128xf32>
    %14 = arith.negf %13 : vector<8x128xf32>
    %15 = math.exp %14 : vector<8x128xf32>
    %cst_9 = arith.constant 1.000000e+00 : f32
    %16 = vector.broadcast %cst_9 : f32 to vector<8x128xf32>
    %17 = arith.addf %16, %15 : vector<8x128xf32>
    %18 = arith.divf %16, %17 : vector<8x128xf32>
    %19 = vector.extract_strided_slice %12 {offsets = [0, 128], sizes = [8, 128], strides = [1, 1]} : vector<8x512xf32> to vector<8x128xf32>
    %20 = arith.negf %19 : vector<8x128xf32>
    %21 = math.exp %20 : vector<8x128xf32>
    %cst_10 = arith.constant 1.000000e+00 : f32
    %22 = vector.broadcast %cst_10 : f32 to vector<8x128xf32>
    %23 = arith.addf %22, %21 : vector<8x128xf32>
    %24 = arith.divf %22, %23 : vector<8x128xf32>
    %25 = vector.extract_strided_slice %12 {offsets = [0, 256], sizes = [8, 128], strides = [1, 1]} : vector<8x512xf32> to vector<8x128xf32>
    %26 = math.tanh %25 : vector<8x128xf32>
    %27 = vector.extract_strided_slice %12 {offsets = [0, 384], sizes = [8, 128], strides = [1, 1]} : vector<8x512xf32> to vector<8x128xf32>
    %28 = arith.negf %27 : vector<8x128xf32>
    %29 = math.exp %28 : vector<8x128xf32>
    %cst_11 = arith.constant 1.000000e+00 : f32
    %30 = vector.broadcast %cst_11 : f32 to vector<8x128xf32>
    %31 = arith.addf %30, %29 : vector<8x128xf32>
    %32 = arith.divf %30, %31 : vector<8x128xf32>
    %33 = arith.mulf %24, %8 : vector<8x128xf32>
    %34 = arith.mulf %18, %26 : vector<8x128xf32>
    %35 = arith.addf %33, %34 : vector<8x128xf32>
    %36 = math.tanh %35 : vector<8x128xf32>
    %37 = arith.mulf %32, %36 : vector<8x128xf32>
    %38 = arith.truncf %37 : vector<8x128xf32> to vector<8x128xbf16>
    %c0_12 = arith.constant 0 : index
    %c0_13 = arith.constant 0 : index
    %39 = vector.load %arg9[%c0_12, %c0_13] : memref<8x128xbf16, #tpu.memory_space<vmem>>, vector<8x128xbf16>
    tpu.vector_store %arg9[%c0_12, %c0_13], %38 {strides = array<i32>} : memref<8x128xbf16, #tpu.memory_space<vmem>>, vector<8x128xbf16>,
    %c0_14 = arith.constant 0 : index
    %c0_15 = arith.constant 0 : index
    %40 = vector.load %arg10[%c0_14, %c0_15] : memref<8x128xf32, #tpu.memory_space<vmem>>, vector<8x128xf32>
    tpu.vector_store %arg10[%c0_14, %c0_15], %35 {strides = array<i32>} : memref<8x128xf32, #tpu.memory_space<vmem>>, vector<8x128xf32>,
    %41 = arith.index_cast %c0_i32_1 : i32 to index
    %c0_16 = arith.constant 0 : index
    %c0_17 = arith.constant 0 : index
    %42 = vector.load %arg5[%41, %c0_16, %c0_17] : memref<8x8x128xbf16, #tpu.memory_space<vmem>>, vector<1x8x128xbf16>
    %43 = vector.shape_cast %42 : vector<1x8x128xbf16> to vector<8x128xbf16>
    %44 = vector.shape_cast %38 : vector<8x128xbf16> to vector<1x8x128xbf16>
    tpu.vector_store %arg5[%41, %c0_16, %c0_17], %44 {strides = array<i32>} : memref<8x8x128xbf16, #tpu.memory_space<vmem>>, vector<1x8x128xbf16>,
    %45 = arith.index_cast %3 : i32 to index
    %c0_18 = arith.constant 0 : index
    %c0_19 = arith.constant 0 : index
    %46 = vector.load %arg2[%45, %c0_18, %c0_19] : memref<8x8x512xbf16, #tpu.memory_space<vmem>>, vector<1x8x512xbf16>
    %47 = vector.shape_cast %46 : vector<1x8x512xbf16> to vector<8x512xbf16>
    %c0_20 = arith.constant 0 : index
    %c0_21 = arith.constant 0 : index
    %48 = vector.load %arg11[%c0_20, %c0_21] : memref<8x128xbf16, #tpu.memory_space<vmem>>, vector<8x128xbf16>
    %c0_22 = arith.constant 0 : index
    %c0_23 = arith.constant 0 : index
    %49 = vector.load %arg12[%c0_22, %c0_23] : memref<8x128xf32, #tpu.memory_space<vmem>>, vector<8x128xf32>
    %50 = arith.extf %47 : vector<8x512xbf16> to vector<8x512xf32>
    %c0_24 = arith.constant 0 : index
    %c0_25 = arith.constant 0 : index
    %51 = vector.load %arg4[%c0_24, %c0_25] : memref<128x512xbf16, #tpu.memory_space<vmem>>, vector<128x512xbf16>
    %cst_26 = arith.constant dense<0.000000e+00> : vector<8x512xf32>
    %52 = tpu.matmul %48, %51, %cst_26 {dimension_numbers = #tpu.dot_dimension_numbers<[1], [0], [0], [1], [0, 0, 1, 1], [], []>} : vector<8x128xbf16>, vector<128x512xbf16>, vector<8x512xf32> -> vector<8x512xf32>
    %53 = arith.addf %50, %52 : vector<8x512xf32>
    %54 = vector.extract_strided_slice %53 {offsets = [0, 0], sizes = [8, 128], strides = [1, 1]} : vector<8x512xf32> to vector<8x128xf32>
    %55 = arith.negf %54 : vector<8x128xf32>
    %56 = math.exp %55 : vector<8x128xf32>
    %cst_27 = arith.constant 1.000000e+00 : f32
    %57 = vector.broadcast %cst_27 : f32 to vector<8x128xf32>
    %58 = arith.addf %57, %56 : vector<8x128xf32>
    %59 = arith.divf %57, %58 : vector<8x128xf32>
    %60 = vector.extract_strided_slice %53 {offsets = [0, 128], sizes = [8, 128], strides = [1, 1]} : vector<8x512xf32> to vector<8x128xf32>
    %61 = arith.negf %60 : vector<8x128xf32>
    %62 = math.exp %61 : vector<8x128xf32>
    %cst_28 = arith.constant 1.000000e+00 : f32
    %63 = vector.broadcast %cst_28 : f32 to vector<8x128xf32>
    %64 = arith.addf %63, %62 : vector<8x128xf32>
    %65 = arith.divf %63, %64 : vector<8x128xf32>
    %66 = vector.extract_strided_slice %53 {offsets = [0, 256], sizes = [8, 128], strides = [1, 1]} : vector<8x512xf32> to vector<8x128xf32>
    %67 = math.tanh %66 : vector<8x128xf32>
    %68 = vector.extract_strided_slice %53 {offsets = [0, 384], sizes = [8, 128], strides = [1, 1]} : vector<8x512xf32> to vector<8x128xf32>
    %69 = arith.negf %68 : vector<8x128xf32>
    %70 = math.exp %69 : vector<8x128xf32>
    %cst_29 = arith.constant 1.000000e+00 : f32
    %71 = vector.broadcast %cst_29 : f32 to vector<8x128xf32>
    %72 = arith.addf %71, %70 : vector<8x128xf32>
    %73 = arith.divf %71, %72 : vector<8x128xf32>
    %74 = arith.mulf %65, %49 : vector<8x128xf32>
    %75 = arith.mulf %59, %67 : vector<8x128xf32>
    %76 = arith.addf %74, %75 : vector<8x128xf32>
    %77 = math.tanh %76 : vector<8x128xf32>
    %78 = arith.mulf %73, %77 : vector<8x128xf32>
    %79 = arith.truncf %78 : vector<8x128xf32> to vector<8x128xbf16>
    %c0_30 = arith.constant 0 : index
    %c0_31 = arith.constant 0 : index
    %80 = vector.load %arg11[%c0_30, %c0_31] : memref<8x128xbf16, #tpu.memory_space<vmem>>, vector<8x128xbf16>
    tpu.vector_store %arg11[%c0_30, %c0_31], %79 {strides = array<i32>} : memref<8x128xbf16, #tpu.memory_space<vmem>>, vector<8x128xbf16>,
    %c0_32 = arith.constant 0 : index
    %c0_33 = arith.constant 0 : index
    %81 = vector.load %arg12[%c0_32, %c0_33] : memref<8x128xf32, #tpu.memory_space<vmem>>, vector<8x128xf32>
    tpu.vector_store %arg12[%c0_32, %c0_33], %76 {strides = array<i32>} : memref<8x128xf32, #tpu.memory_space<vmem>>, vector<8x128xf32>,
    %82 = arith.index_cast %3 : i32 to index
    %c0_34 = arith.constant 0 : index
    %c0_35 = arith.constant 0 : index
    %83 = vector.load %arg6[%82, %c0_34, %c0_35] : memref<8x8x128xbf16, #tpu.memory_space<vmem>>, vector<1x8x128xbf16>
    %84 = vector.shape_cast %83 : vector<1x8x128xbf16> to vector<8x128xbf16>
    %85 = vector.shape_cast %79 : vector<8x128xbf16> to vector<1x8x128xbf16>
    tpu.vector_store %arg6[%82, %c0_34, %c0_35], %85 {strides = array<i32>} : memref<8x8x128xbf16, #tpu.memory_space<vmem>>, vector<1x8x128xbf16>,
    %c1_i32 = arith.constant 1 : i32
    %c7_i32_36 = arith.constant 7 : i32
    %86 = arith.subi %c7_i32_36, %c1_i32 : i32
    %87 = arith.index_cast %c1_i32 : i32 to index
    %c0_37 = arith.constant 0 : index
    %c0_38 = arith.constant 0 : index
    %88 = vector.load %arg1[%87, %c0_37, %c0_38] : memref<8x8x512xbf16, #tpu.memory_space<vmem>>, vector<1x8x512xbf16>
    %89 = vector.shape_cast %88 : vector<1x8x512xbf16> to vector<8x512xbf16>
    %c0_39 = arith.constant 0 : index
    %c0_40 = arith.constant 0 : index
    %90 = vector.load %arg9[%c0_39, %c0_40] : memref<8x128xbf16, #tpu.memory_space<vmem>>, vector<8x128xbf16>
    %c0_41 = arith.constant 0 : index
    %c0_42 = arith.constant 0 : index
    %91 = vector.load %arg10[%c0_41, %c0_42] : memref<8x128xf32, #tpu.memory_space<vmem>>, vector<8x128xf32>
    %92 = arith.extf %89 : vector<8x512xbf16> to vector<8x512xf32>
    %c0_43 = arith.constant 0 : index
    %c0_44 = arith.constant 0 : index
    %93 = vector.load %arg3[%c0_43, %c0_44] : memref<128x512xbf16, #tpu.memory_space<vmem>>, vector<128x512xbf16>
    %cst_45 = arith.constant dense<0.000000e+00> : vector<8x512xf32>
    %94 = tpu.matmul %90, %93, %cst_45 {dimension_numbers = #tpu.dot_dimension_numbers<[1], [0], [0], [1], [0, 0, 1, 1], [], []>} : vector<8x128xbf16>, vector<128x512xbf16>, vector<8x512xf32> -> vector<8x512xf32>
    %95 = arith.addf %92, %94 : vector<8x512xf32>
    %96 = vector.extract_strided_slice %95 {offsets = [0, 0], sizes = [8, 128], strides = [1, 1]} : vector<8x512xf32> to vector<8x128xf32>
    %97 = arith.negf %96 : vector<8x128xf32>
    %98 = math.exp %97 : vector<8x128xf32>
    %cst_46 = arith.constant 1.000000e+00 : f32
    %99 = vector.broadcast %cst_46 : f32 to vector<8x128xf32>
    %100 = arith.addf %99, %98 : vector<8x128xf32>
    %101 = arith.divf %99, %100 : vector<8x128xf32>
    %102 = vector.extract_strided_slice %95 {offsets = [0, 128], sizes = [8, 128], strides = [1, 1]} : vector<8x512xf32> to vector<8x128xf32>
    %103 = arith.negf %102 : vector<8x128xf32>
    %104 = math.exp %103 : vector<8x128xf32>
    %cst_47 = arith.constant 1.000000e+00 : f32
    %105 = vector.broadcast %cst_47 : f32 to vector<8x128xf32>
    %106 = arith.addf %105, %104 : vector<8x128xf32>
    %107 = arith.divf %105, %106 : vector<8x128xf32>
    %108 = vector.extract_strided_slice %95 {offsets = [0, 256], sizes = [8, 128], strides = [1, 1]} : vector<8x512xf32> to vector<8x128xf32>
    %109 = math.tanh %108 : vector<8x128xf32>
    %110 = vector.extract_strided_slice %95 {offsets = [0, 384], sizes = [8, 128], strides = [1, 1]} : vector<8x512xf32> to vector<8x128xf32>
    %111 = arith.negf %110 : vector<8x128xf32>
    %112 = math.exp %111 : vector<8x128xf32>
    %cst_48 = arith.constant 1.000000e+00 : f32
    %113 = vector.broadcast %cst_48 : f32 to vector<8x128xf32>
    %114 = arith.addf %113, %112 : vector<8x128xf32>
    %115 = arith.divf %113, %114 : vector<8x128xf32>
    %116 = arith.mulf %107, %91 : vector<8x128xf32>
    %117 = arith.mulf %101, %109 : vector<8x128xf32>
    %118 = arith.addf %116, %117 : vector<8x128xf32>
    %119 = math.tanh %118 : vector<8x128xf32>
    %120 = arith.mulf %115, %119 : vector<8x128xf32>
    %121 = arith.truncf %120 : vector<8x128xf32> to vector<8x128xbf16>
    %c0_49 = arith.constant 0 : index
    %c0_50 = arith.constant 0 : index
    %122 = vector.load %arg9[%c0_49, %c0_50] : memref<8x128xbf16, #tpu.memory_space<vmem>>, vector<8x128xbf16>
    tpu.vector_store %arg9[%c0_49, %c0_50], %121 {strides = array<i32>} : memref<8x128xbf16, #tpu.memory_space<vmem>>, vector<8x128xbf16>,
    %c0_51 = arith.constant 0 : index
    %c0_52 = arith.constant 0 : index
    %123 = vector.load %arg10[%c0_51, %c0_52] : memref<8x128xf32, #tpu.memory_space<vmem>>, vector<8x128xf32>
    tpu.vector_store %arg10[%c0_51, %c0_52], %118 {strides = array<i32>} : memref<8x128xf32, #tpu.memory_space<vmem>>, vector<8x128xf32>,
    %124 = arith.index_cast %c1_i32 : i32 to index
    %c0_53 = arith.constant 0 : index
    %c0_54 = arith.constant 0 : index
    %125 = vector.load %arg5[%124, %c0_53, %c0_54] : memref<8x8x128xbf16, #tpu.memory_space<vmem>>, vector<1x8x128xbf16>
    %126 = vector.shape_cast %125 : vector<1x8x128xbf16> to vector<8x128xbf16>
    %127 = vector.shape_cast %121 : vector<8x128xbf16> to vector<1x8x128xbf16>
    tpu.vector_store %arg5[%124, %c0_53, %c0_54], %127 {strides = array<i32>} : memref<8x8x128xbf16, #tpu.memory_space<vmem>>, vector<1x8x128xbf16>,
    %128 = arith.index_cast %86 : i32 to index
    %c0_55 = arith.constant 0 : index
    %c0_56 = arith.constant 0 : index
    %129 = vector.load %arg2[%128, %c0_55, %c0_56] : memref<8x8x512xbf16, #tpu.memory_space<vmem>>, vector<1x8x512xbf16>
    %130 = vector.shape_cast %129 : vector<1x8x512xbf16> to vector<8x512xbf16>
    %c0_57 = arith.constant 0 : index
    %c0_58 = arith.constant 0 : index
    %131 = vector.load %arg11[%c0_57, %c0_58] : memref<8x128xbf16, #tpu.memory_space<vmem>>, vector<8x128xbf16>
    %c0_59 = arith.constant 0 : index
    %c0_60 = arith.constant 0 : index
    %132 = vector.load %arg12[%c0_59, %c0_60] : memref<8x128xf32, #tpu.memory_space<vmem>>, vector<8x128xf32>
    %133 = arith.extf %130 : vector<8x512xbf16> to vector<8x512xf32>
    %c0_61 = arith.constant 0 : index
    %c0_62 = arith.constant 0 : index
    %134 = vector.load %arg4[%c0_61, %c0_62] : memref<128x512xbf16, #tpu.memory_space<vmem>>, vector<128x512xbf16>
    %cst_63 = arith.constant dense<0.000000e+00> : vector<8x512xf32>
    %135 = tpu.matmul %131, %134, %cst_63 {dimension_numbers = #tpu.dot_dimension_numbers<[1], [0], [0], [1], [0, 0, 1, 1], [], []>} : vector<8x128xbf16>, vector<128x512xbf16>, vector<8x512xf32> -> vector<8x512xf32>
    %136 = arith.addf %133, %135 : vector<8x512xf32>
    %137 = vector.extract_strided_slice %136 {offsets = [0, 0], sizes = [8, 128], strides = [1, 1]} : vector<8x512xf32> to vector<8x128xf32>
    %138 = arith.negf %137 : vector<8x128xf32>
    %139 = math.exp %138 : vector<8x128xf32>
    %cst_64 = arith.constant 1.000000e+00 : f32
    %140 = vector.broadcast %cst_64 : f32 to vector<8x128xf32>
    %141 = arith.addf %140, %139 : vector<8x128xf32>
    %142 = arith.divf %140, %141 : vector<8x128xf32>
    %143 = vector.extract_strided_slice %136 {offsets = [0, 128], sizes = [8, 128], strides = [1, 1]} : vector<8x512xf32> to vector<8x128xf32>
    %144 = arith.negf %143 : vector<8x128xf32>
    %145 = math.exp %144 : vector<8x128xf32>
    %cst_65 = arith.constant 1.000000e+00 : f32
    %146 = vector.broadcast %cst_65 : f32 to vector<8x128xf32>
    %147 = arith.addf %146, %145 : vector<8x128xf32>
    %148 = arith.divf %146, %147 : vector<8x128xf32>
    %149 = vector.extract_strided_slice %136 {offsets = [0, 256], sizes = [8, 128], strides = [1, 1]} : vector<8x512xf32> to vector<8x128xf32>
    %150 = math.tanh %149 : vector<8x128xf32>
    %151 = vector.extract_strided_slice %136 {offsets = [0, 384], sizes = [8, 128], strides = [1, 1]} : vector<8x512xf32> to vector<8x128xf32>
    %152 = arith.negf %151 : vector<8x128xf32>
    %153 = math.exp %152 : vector<8x128xf32>
    %cst_66 = arith.constant 1.000000e+00 : f32
    %154 = vector.broadcast %cst_66 : f32 to vector<8x128xf32>
    %155 = arith.addf %154, %153 : vector<8x128xf32>
    %156 = arith.divf %154, %155 : vector<8x128xf32>
    %157 = arith.mulf %148, %132 : vector<8x128xf32>
    %158 = arith.mulf %142, %150 : vector<8x128xf32>
    %159 = arith.addf %157, %158 : vector<8x128xf32>
    %160 = math.tanh %159 : vector<8x128xf32>
    %161 = arith.mulf %156, %160 : vector<8x128xf32>
    %162 = arith.truncf %161 : vector<8x128xf32> to vector<8x128xbf16>
    %c0_67 = arith.constant 0 : index
    %c0_68 = arith.constant 0 : index
    %163 = vector.load %arg11[%c0_67, %c0_68] : memref<8x128xbf16, #tpu.memory_space<vmem>>, vector<8x128xbf16>
    tpu.vector_store %arg11[%c0_67, %c0_68], %162 {strides = array<i32>} : memref<8x128xbf16, #tpu.memory_space<vmem>>, vector<8x128xbf16>,
    %c0_69 = arith.constant 0 : index
    %c0_70 = arith.constant 0 : index
    %164 = vector.load %arg12[%c0_69, %c0_70] : memref<8x128xf32, #tpu.memory_space<vmem>>, vector<8x128xf32>
    tpu.vector_store %arg12[%c0_69, %c0_70], %159 {strides = array<i32>} : memref<8x128xf32, #tpu.memory_space<vmem>>, vector<8x128xf32>,
    %165 = arith.index_cast %86 : i32 to index
    %c0_71 = arith.constant 0 : index
    %c0_72 = arith.constant 0 : index
    %166 = vector.load %arg6[%165, %c0_71, %c0_72] : memref<8x8x128xbf16, #tpu.memory_space<vmem>>, vector<1x8x128xbf16>
    %167 = vector.shape_cast %166 : vector<1x8x128xbf16> to vector<8x128xbf16>
    %168 = vector.shape_cast %162 : vector<8x128xbf16> to vector<1x8x128xbf16>
    tpu.vector_store %arg6[%165, %c0_71, %c0_72], %168 {strides = array<i32>} : memref<8x8x128xbf16, #tpu.memory_space<vmem>>, vector<1x8x128xbf16>,
    %c2_i32 = arith.constant 2 : i32
    %c7_i32_73 = arith.constant 7 : i32
    %169 = arith.subi %c7_i32_73, %c2_i32 : i32
    %170 = arith.index_cast %c2_i32 : i32 to index
    %c0_74 = arith.constant 0 : index
    %c0_75 = arith.constant 0 : index
    %171 = vector.load %arg1[%170, %c0_74, %c0_75] : memref<8x8x512xbf16, #tpu.memory_space<vmem>>, vector<1x8x512xbf16>
    %172 = vector.shape_cast %171 : vector<1x8x512xbf16> to vector<8x512xbf16>
    %c0_76 = arith.constant 0 : index
    %c0_77 = arith.constant 0 : index
    %173 = vector.load %arg9[%c0_76, %c0_77] : memref<8x128xbf16, #tpu.memory_space<vmem>>, vector<8x128xbf16>
    %c0_78 = arith.constant 0 : index
    %c0_79 = arith.constant 0 : index
    %174 = vector.load %arg10[%c0_78, %c0_79] : memref<8x128xf32, #tpu.memory_space<vmem>>, vector<8x128xf32>
    %175 = arith.extf %172 : vector<8x512xbf16> to vector<8x512xf32>
    %c0_80 = arith.constant 0 : index
    %c0_81 = arith.constant 0 : index
    %176 = vector.load %arg3[%c0_80, %c0_81] : memref<128x512xbf16, #tpu.memory_space<vmem>>, vector<128x512xbf16>
    %cst_82 = arith.constant dense<0.000000e+00> : vector<8x512xf32>
    %177 = tpu.matmul %173, %176, %cst_82 {dimension_numbers = #tpu.dot_dimension_numbers<[1], [0], [0], [1], [0, 0, 1, 1], [], []>} : vector<8x128xbf16>, vector<128x512xbf16>, vector<8x512xf32> -> vector<8x512xf32>
    %178 = arith.addf %175, %177 : vector<8x512xf32>
    %179 = vector.extract_strided_slice %178 {offsets = [0, 0], sizes = [8, 128], strides = [1, 1]} : vector<8x512xf32> to vector<8x128xf32>
    %180 = arith.negf %179 : vector<8x128xf32>
    %181 = math.exp %180 : vector<8x128xf32>
    %cst_83 = arith.constant 1.000000e+00 : f32
    %182 = vector.broadcast %cst_83 : f32 to vector<8x128xf32>
    %183 = arith.addf %182, %181 : vector<8x128xf32>
    %184 = arith.divf %182, %183 : vector<8x128xf32>
    %185 = vector.extract_strided_slice %178 {offsets = [0, 128], sizes = [8, 128], strides = [1, 1]} : vector<8x512xf32> to vector<8x128xf32>
    %186 = arith.negf %185 : vector<8x128xf32>
    %187 = math.exp %186 : vector<8x128xf32>
    %cst_84 = arith.constant 1.000000e+00 : f32
    %188 = vector.broadcast %cst_84 : f32 to vector<8x128xf32>
    %189 = arith.addf %188, %187 : vector<8x128xf32>
    %190 = arith.divf %188, %189 : vector<8x128xf32>
    %191 = vector.extract_strided_slice %178 {offsets = [0, 256], sizes = [8, 128], strides = [1, 1]} : vector<8x512xf32> to vector<8x128xf32>
    %192 = math.tanh %191 : vector<8x128xf32>
    %193 = vector.extract_strided_slice %178 {offsets = [0, 384], sizes = [8, 128], strides = [1, 1]} : vector<8x512xf32> to vector<8x128xf32>
    %194 = arith.negf %193 : vector<8x128xf32>
    %195 = math.exp %194 : vector<8x128xf32>
    %cst_85 = arith.constant 1.000000e+00 : f32
    %196 = vector.broadcast %cst_85 : f32 to vector<8x128xf32>
    %197 = arith.addf %196, %195 : vector<8x128xf32>
    %198 = arith.divf %196, %197 : vector<8x128xf32>
    %199 = arith.mulf %190, %174 : vector<8x128xf32>
    %200 = arith.mulf %184, %192 : vector<8x128xf32>
    %201 = arith.addf %199, %200 : vector<8x128xf32>
    %202 = math.tanh %201 : vector<8x128xf32>
    %203 = arith.mulf %198, %202 : vector<8x128xf32>
    %204 = arith.truncf %203 : vector<8x128xf32> to vector<8x128xbf16>
    %c0_86 = arith.constant 0 : index
    %c0_87 = arith.constant 0 : index
    %205 = vector.load %arg9[%c0_86, %c0_87] : memref<8x128xbf16, #tpu.memory_space<vmem>>, vector<8x128xbf16>
    tpu.vector_store %arg9[%c0_86, %c0_87], %204 {strides = array<i32>} : memref<8x128xbf16, #tpu.memory_space<vmem>>, vector<8x128xbf16>,
    %c0_88 = arith.constant 0 : index
    %c0_89 = arith.constant 0 : index
    %206 = vector.load %arg10[%c0_88, %c0_89] : memref<8x128xf32, #tpu.memory_space<vmem>>, vector<8x128xf32>
    tpu.vector_store %arg10[%c0_88, %c0_89], %201 {strides = array<i32>} : memref<8x128xf32, #tpu.memory_space<vmem>>, vector<8x128xf32>,
    %207 = arith.index_cast %c2_i32 : i32 to index
    %c0_90 = arith.constant 0 : index
    %c0_91 = arith.constant 0 : index
    %208 = vector.load %arg5[%207, %c0_90, %c0_91] : memref<8x8x128xbf16, #tpu.memory_space<vmem>>, vector<1x8x128xbf16>
    %209 = vector.shape_cast %208 : vector<1x8x128xbf16> to vector<8x128xbf16>
    %210 = vector.shape_cast %204 : vector<8x128xbf16> to vector<1x8x128xbf16>
    tpu.vector_store %arg5[%207, %c0_90, %c0_91], %210 {strides = array<i32>} : memref<8x8x128xbf16, #tpu.memory_space<vmem>>, vector<1x8x128xbf16>,
    %211 = arith.index_cast %169 : i32 to index
    %c0_92 = arith.constant 0 : index
    %c0_93 = arith.constant 0 : index
    %212 = vector.load %arg2[%211, %c0_92, %c0_93] : memref<8x8x512xbf16, #tpu.memory_space<vmem>>, vector<1x8x512xbf16>
    %213 = vector.shape_cast %212 : vector<1x8x512xbf16> to vector<8x512xbf16>
    %c0_94 = arith.constant 0 : index
    %c0_95 = arith.constant 0 : index
    %214 = vector.load %arg11[%c0_94, %c0_95] : memref<8x128xbf16, #tpu.memory_space<vmem>>, vector<8x128xbf16>
    %c0_96 = arith.constant 0 : index
    %c0_97 = arith.constant 0 : index
    %215 = vector.load %arg12[%c0_96, %c0_97] : memref<8x128xf32, #tpu.memory_space<vmem>>, vector<8x128xf32>
    %216 = arith.extf %213 : vector<8x512xbf16> to vector<8x512xf32>
    %c0_98 = arith.constant 0 : index
    %c0_99 = arith.constant 0 : index
    %217 = vector.load %arg4[%c0_98, %c0_99] : memref<128x512xbf16, #tpu.memory_space<vmem>>, vector<128x512xbf16>
    %cst_100 = arith.constant dense<0.000000e+00> : vector<8x512xf32>
    %218 = tpu.matmul %214, %217, %cst_100 {dimension_numbers = #tpu.dot_dimension_numbers<[1], [0], [0], [1], [0, 0, 1, 1], [], []>} : vector<8x128xbf16>, vector<128x512xbf16>, vector<8x512xf32> -> vector<8x512xf32>
    %219 = arith.addf %216, %218 : vector<8x512xf32>
    %220 = vector.extract_strided_slice %219 {offsets = [0, 0], sizes = [8, 128], strides = [1, 1]} : vector<8x512xf32> to vector<8x128xf32>
    %221 = arith.negf %220 : vector<8x128xf32>
    %222 = math.exp %221 : vector<8x128xf32>
    %cst_101 = arith.constant 1.000000e+00 : f32
    %223 = vector.broadcast %cst_101 : f32 to vector<8x128xf32>
    %224 = arith.addf %223, %222 : vector<8x128xf32>
    %225 = arith.divf %223, %224 : vector<8x128xf32>
    %226 = vector.extract_strided_slice %219 {offsets = [0, 128], sizes = [8, 128], strides = [1, 1]} : vector<8x512xf32> to vector<8x128xf32>
    %227 = arith.negf %226 : vector<8x128xf32>
    %228 = math.exp %227 : vector<8x128xf32>
    %cst_102 = arith.constant 1.000000e+00 : f32
    %229 = vector.broadcast %cst_102 : f32 to vector<8x128xf32>
    %230 = arith.addf %229, %228 : vector<8x128xf32>
    %231 = arith.divf %229, %230 : vector<8x128xf32>
    %232 = vector.extract_strided_slice %219 {offsets = [0, 256], sizes = [8, 128], strides = [1, 1]} : vector<8x512xf32> to vector<8x128xf32>
    %233 = math.tanh %232 : vector<8x128xf32>
    %234 = vector.extract_strided_slice %219 {offsets = [0, 384], sizes = [8, 128], strides = [1, 1]} : vector<8x512xf32> to vector<8x128xf32>
    %235 = arith.negf %234 : vector<8x128xf32>
    %236 = math.exp %235 : vector<8x128xf32>
    %cst_103 = arith.constant 1.000000e+00 : f32
    %237 = vector.broadcast %cst_103 : f32 to vector<8x128xf32>
    %238 = arith.addf %237, %236 : vector<8x128xf32>
    %239 = arith.divf %237, %238 : vector<8x128xf32>
    %240 = arith.mulf %231, %215 : vector<8x128xf32>
    %241 = arith.mulf %225, %233 : vector<8x128xf32>
    %242 = arith.addf %240, %241 : vector<8x128xf32>
    %243 = math.tanh %242 : vector<8x128xf32>
    %244 = arith.mulf %239, %243 : vector<8x128xf32>
    %245 = arith.truncf %244 : vector<8x128xf32> to vector<8x128xbf16>
    %c0_104 = arith.constant 0 : index
    %c0_105 = arith.constant 0 : index
    %246 = vector.load %arg11[%c0_104, %c0_105] : memref<8x128xbf16, #tpu.memory_space<vmem>>, vector<8x128xbf16>
    tpu.vector_store %arg11[%c0_104, %c0_105], %245 {strides = array<i32>} : memref<8x128xbf16, #tpu.memory_space<vmem>>, vector<8x128xbf16>,
    %c0_106 = arith.constant 0 : index
    %c0_107 = arith.constant 0 : index
    %247 = vector.load %arg12[%c0_106, %c0_107] : memref<8x128xf32, #tpu.memory_space<vmem>>, vector<8x128xf32>
    tpu.vector_store %arg12[%c0_106, %c0_107], %242 {strides = array<i32>} : memref<8x128xf32, #tpu.memory_space<vmem>>, vector<8x128xf32>,
    %248 = arith.index_cast %169 : i32 to index
    %c0_108 = arith.constant 0 : index
    %c0_109 = arith.constant 0 : index
    %249 = vector.load %arg6[%248, %c0_108, %c0_109] : memref<8x8x128xbf16, #tpu.memory_space<vmem>>, vector<1x8x128xbf16>
    %250 = vector.shape_cast %249 : vector<1x8x128xbf16> to vector<8x128xbf16>
    %251 = vector.shape_cast %245 : vector<8x128xbf16> to vector<1x8x128xbf16>
    tpu.vector_store %arg6[%248, %c0_108, %c0_109], %251 {strides = array<i32>} : memref<8x8x128xbf16, #tpu.memory_space<vmem>>, vector<1x8x128xbf16>,
    %c3_i32 = arith.constant 3 : i32
    %c7_i32_110 = arith.constant 7 : i32
    %252 = arith.subi %c7_i32_110, %c3_i32 : i32
    %253 = arith.index_cast %c3_i32 : i32 to index
    %c0_111 = arith.constant 0 : index
    %c0_112 = arith.constant 0 : index
    %254 = vector.load %arg1[%253, %c0_111, %c0_112] : memref<8x8x512xbf16, #tpu.memory_space<vmem>>, vector<1x8x512xbf16>
    %255 = vector.shape_cast %254 : vector<1x8x512xbf16> to vector<8x512xbf16>
    %c0_113 = arith.constant 0 : index
    %c0_114 = arith.constant 0 : index
    %256 = vector.load %arg9[%c0_113, %c0_114] : memref<8x128xbf16, #tpu.memory_space<vmem>>, vector<8x128xbf16>
    %c0_115 = arith.constant 0 : index
    %c0_116 = arith.constant 0 : index
    %257 = vector.load %arg10[%c0_115, %c0_116] : memref<8x128xf32, #tpu.memory_space<vmem>>, vector<8x128xf32>
    %258 = arith.extf %255 : vector<8x512xbf16> to vector<8x512xf32>
    %c0_117 = arith.constant 0 : index
    %c0_118 = arith.constant 0 : index
    %259 = vector.load %arg3[%c0_117, %c0_118] : memref<128x512xbf16, #tpu.memory_space<vmem>>, vector<128x512xbf16>
    %cst_119 = arith.constant dense<0.000000e+00> : vector<8x512xf32>
    %260 = tpu.matmul %256, %259, %cst_119 {dimension_numbers = #tpu.dot_dimension_numbers<[1], [0], [0], [1], [0, 0, 1, 1], [], []>} : vector<8x128xbf16>, vector<128x512xbf16>, vector<8x512xf32> -> vector<8x512xf32>
    %261 = arith.addf %258, %260 : vector<8x512xf32>
    %262 = vector.extract_strided_slice %261 {offsets = [0, 0], sizes = [8, 128], strides = [1, 1]} : vector<8x512xf32> to vector<8x128xf32>
    %263 = arith.negf %262 : vector<8x128xf32>
    %264 = math.exp %263 : vector<8x128xf32>
    %cst_120 = arith.constant 1.000000e+00 : f32
    %265 = vector.broadcast %cst_120 : f32 to vector<8x128xf32>
    %266 = arith.addf %265, %264 : vector<8x128xf32>
    %267 = arith.divf %265, %266 : vector<8x128xf32>
    %268 = vector.extract_strided_slice %261 {offsets = [0, 128], sizes = [8, 128], strides = [1, 1]} : vector<8x512xf32> to vector<8x128xf32>
    %269 = arith.negf %268 : vector<8x128xf32>
    %270 = math.exp %269 : vector<8x128xf32>
    %cst_121 = arith.constant 1.000000e+00 : f32
    %271 = vector.broadcast %cst_121 : f32 to vector<8x128xf32>
    %272 = arith.addf %271, %270 : vector<8x128xf32>
    %273 = arith.divf %271, %272 : vector<8x128xf32>
    %274 = vector.extract_strided_slice %261 {offsets = [0, 256], sizes = [8, 128], strides = [1, 1]} : vector<8x512xf32> to vector<8x128xf32>
    %275 = math.tanh %274 : vector<8x128xf32>
    %276 = vector.extract_strided_slice %261 {offsets = [0, 384], sizes = [8, 128], strides = [1, 1]} : vector<8x512xf32> to vector<8x128xf32>
    %277 = arith.negf %276 : vector<8x128xf32>
    %278 = math.exp %277 : vector<8x128xf32>
    %cst_122 = arith.constant 1.000000e+00 : f32
    %279 = vector.broadcast %cst_122 : f32 to vector<8x128xf32>
    %280 = arith.addf %279, %278 : vector<8x128xf32>
    %281 = arith.divf %279, %280 : vector<8x128xf32>
    %282 = arith.mulf %273, %257 : vector<8x128xf32>
    %283 = arith.mulf %267, %275 : vector<8x128xf32>
    %284 = arith.addf %282, %283 : vector<8x128xf32>
    %285 = math.tanh %284 : vector<8x128xf32>
    %286 = arith.mulf %281, %285 : vector<8x128xf32>
    %287 = arith.truncf %286 : vector<8x128xf32> to vector<8x128xbf16>
    %c0_123 = arith.constant 0 : index
    %c0_124 = arith.constant 0 : index
    %288 = vector.load %arg9[%c0_123, %c0_124] : memref<8x128xbf16, #tpu.memory_space<vmem>>, vector<8x128xbf16>
    tpu.vector_store %arg9[%c0_123, %c0_124], %287 {strides = array<i32>} : memref<8x128xbf16, #tpu.memory_space<vmem>>, vector<8x128xbf16>,
    %c0_125 = arith.constant 0 : index
    %c0_126 = arith.constant 0 : index
    %289 = vector.load %arg10[%c0_125, %c0_126] : memref<8x128xf32, #tpu.memory_space<vmem>>, vector<8x128xf32>
    tpu.vector_store %arg10[%c0_125, %c0_126], %284 {strides = array<i32>} : memref<8x128xf32, #tpu.memory_space<vmem>>, vector<8x128xf32>,
    %290 = arith.index_cast %c3_i32 : i32 to index
    %c0_127 = arith.constant 0 : index
    %c0_128 = arith.constant 0 : index
    %291 = vector.load %arg5[%290, %c0_127, %c0_128] : memref<8x8x128xbf16, #tpu.memory_space<vmem>>, vector<1x8x128xbf16>
    %292 = vector.shape_cast %291 : vector<1x8x128xbf16> to vector<8x128xbf16>
    %293 = vector.shape_cast %287 : vector<8x128xbf16> to vector<1x8x128xbf16>
    tpu.vector_store %arg5[%290, %c0_127, %c0_128], %293 {strides = array<i32>} : memref<8x8x128xbf16, #tpu.memory_space<vmem>>, vector<1x8x128xbf16>,
    %294 = arith.index_cast %252 : i32 to index
    %c0_129 = arith.constant 0 : index
    %c0_130 = arith.constant 0 : index
    %295 = vector.load %arg2[%294, %c0_129, %c0_130] : memref<8x8x512xbf16, #tpu.memory_space<vmem>>, vector<1x8x512xbf16>
    %296 = vector.shape_cast %295 : vector<1x8x512xbf16> to vector<8x512xbf16>
    %c0_131 = arith.constant 0 : index
    %c0_132 = arith.constant 0 : index
    %297 = vector.load %arg11[%c0_131, %c0_132] : memref<8x128xbf16, #tpu.memory_space<vmem>>, vector<8x128xbf16>
    %c0_133 = arith.constant 0 : index
    %c0_134 = arith.constant 0 : index
    %298 = vector.load %arg12[%c0_133, %c0_134] : memref<8x128xf32, #tpu.memory_space<vmem>>, vector<8x128xf32>
    %299 = arith.extf %296 : vector<8x512xbf16> to vector<8x512xf32>
    %c0_135 = arith.constant 0 : index
    %c0_136 = arith.constant 0 : index
    %300 = vector.load %arg4[%c0_135, %c0_136] : memref<128x512xbf16, #tpu.memory_space<vmem>>, vector<128x512xbf16>
    %cst_137 = arith.constant dense<0.000000e+00> : vector<8x512xf32>
    %301 = tpu.matmul %297, %300, %cst_137 {dimension_numbers = #tpu.dot_dimension_numbers<[1], [0], [0], [1], [0, 0, 1, 1], [], []>} : vector<8x128xbf16>, vector<128x512xbf16>, vector<8x512xf32> -> vector<8x512xf32>
    %302 = arith.addf %299, %301 : vector<8x512xf32>
    %303 = vector.extract_strided_slice %302 {offsets = [0, 0], sizes = [8, 128], strides = [1, 1]} : vector<8x512xf32> to vector<8x128xf32>
    %304 = arith.negf %303 : vector<8x128xf32>
    %305 = math.exp %304 : vector<8x128xf32>
    %cst_138 = arith.constant 1.000000e+00 : f32
    %306 = vector.broadcast %cst_138 : f32 to vector<8x128xf32>
    %307 = arith.addf %306, %305 : vector<8x128xf32>
    %308 = arith.divf %306, %307 : vector<8x128xf32>
    %309 = vector.extract_strided_slice %302 {offsets = [0, 128], sizes = [8, 128], strides = [1, 1]} : vector<8x512xf32> to vector<8x128xf32>
    %310 = arith.negf %309 : vector<8x128xf32>
    %311 = math.exp %310 : vector<8x128xf32>
    %cst_139 = arith.constant 1.000000e+00 : f32
    %312 = vector.broadcast %cst_139 : f32 to vector<8x128xf32>
    %313 = arith.addf %312, %311 : vector<8x128xf32>
    %314 = arith.divf %312, %313 : vector<8x128xf32>
    %315 = vector.extract_strided_slice %302 {offsets = [0, 256], sizes = [8, 128], strides = [1, 1]} : vector<8x512xf32> to vector<8x128xf32>
    %316 = math.tanh %315 : vector<8x128xf32>
    %317 = vector.extract_strided_slice %302 {offsets = [0, 384], sizes = [8, 128], strides = [1, 1]} : vector<8x512xf32> to vector<8x128xf32>
    %318 = arith.negf %317 : vector<8x128xf32>
    %319 = math.exp %318 : vector<8x128xf32>
    %cst_140 = arith.constant 1.000000e+00 : f32
    %320 = vector.broadcast %cst_140 : f32 to vector<8x128xf32>
    %321 = arith.addf %320, %319 : vector<8x128xf32>
    %322 = arith.divf %320, %321 : vector<8x128xf32>
    %323 = arith.mulf %314, %298 : vector<8x128xf32>
    %324 = arith.mulf %308, %316 : vector<8x128xf32>
    %325 = arith.addf %323, %324 : vector<8x128xf32>
    %326 = math.tanh %325 : vector<8x128xf32>
    %327 = arith.mulf %322, %326 : vector<8x128xf32>
    %328 = arith.truncf %327 : vector<8x128xf32> to vector<8x128xbf16>
    %c0_141 = arith.constant 0 : index
    %c0_142 = arith.constant 0 : index
    %329 = vector.load %arg11[%c0_141, %c0_142] : memref<8x128xbf16, #tpu.memory_space<vmem>>, vector<8x128xbf16>
    tpu.vector_store %arg11[%c0_141, %c0_142], %328 {strides = array<i32>} : memref<8x128xbf16, #tpu.memory_space<vmem>>, vector<8x128xbf16>,
    %c0_143 = arith.constant 0 : index
    %c0_144 = arith.constant 0 : index
    %330 = vector.load %arg12[%c0_143, %c0_144] : memref<8x128xf32, #tpu.memory_space<vmem>>, vector<8x128xf32>
    tpu.vector_store %arg12[%c0_143, %c0_144], %325 {strides = array<i32>} : memref<8x128xf32, #tpu.memory_space<vmem>>, vector<8x128xf32>,
    %331 = arith.index_cast %252 : i32 to index
    %c0_145 = arith.constant 0 : index
    %c0_146 = arith.constant 0 : index
    %332 = vector.load %arg6[%331, %c0_145, %c0_146] : memref<8x8x128xbf16, #tpu.memory_space<vmem>>, vector<1x8x128xbf16>
    %333 = vector.shape_cast %332 : vector<1x8x128xbf16> to vector<8x128xbf16>
    %334 = vector.shape_cast %328 : vector<8x128xbf16> to vector<1x8x128xbf16>
    tpu.vector_store %arg6[%331, %c0_145, %c0_146], %334 {strides = array<i32>} : memref<8x8x128xbf16, #tpu.memory_space<vmem>>, vector<1x8x128xbf16>,
    %c4_i32 = arith.constant 4 : i32
    %c7_i32_147 = arith.constant 7 : i32
    %335 = arith.subi %c7_i32_147, %c4_i32 : i32
    %336 = arith.index_cast %c4_i32 : i32 to index
    %c0_148 = arith.constant 0 : index
    %c0_149 = arith.constant 0 : index
    %337 = vector.load %arg1[%336, %c0_148, %c0_149] : memref<8x8x512xbf16, #tpu.memory_space<vmem>>, vector<1x8x512xbf16>
    %338 = vector.shape_cast %337 : vector<1x8x512xbf16> to vector<8x512xbf16>
    %c0_150 = arith.constant 0 : index
    %c0_151 = arith.constant 0 : index
    %339 = vector.load %arg9[%c0_150, %c0_151] : memref<8x128xbf16, #tpu.memory_space<vmem>>, vector<8x128xbf16>
    %c0_152 = arith.constant 0 : index
    %c0_153 = arith.constant 0 : index
    %340 = vector.load %arg10[%c0_152, %c0_153] : memref<8x128xf32, #tpu.memory_space<vmem>>, vector<8x128xf32>
    %341 = arith.extf %338 : vector<8x512xbf16> to vector<8x512xf32>
    %c0_154 = arith.constant 0 : index
    %c0_155 = arith.constant 0 : index
    %342 = vector.load %arg3[%c0_154, %c0_155] : memref<128x512xbf16, #tpu.memory_space<vmem>>, vector<128x512xbf16>
    %cst_156 = arith.constant dense<0.000000e+00> : vector<8x512xf32>
    %343 = tpu.matmul %339, %342, %cst_156 {dimension_numbers = #tpu.dot_dimension_numbers<[1], [0], [0], [1], [0, 0, 1, 1], [], []>} : vector<8x128xbf16>, vector<128x512xbf16>, vector<8x512xf32> -> vector<8x512xf32>
    %344 = arith.addf %341, %343 : vector<8x512xf32>
    %345 = vector.extract_strided_slice %344 {offsets = [0, 0], sizes = [8, 128], strides = [1, 1]} : vector<8x512xf32> to vector<8x128xf32>
    %346 = arith.negf %345 : vector<8x128xf32>
    %347 = math.exp %346 : vector<8x128xf32>
    %cst_157 = arith.constant 1.000000e+00 : f32
    %348 = vector.broadcast %cst_157 : f32 to vector<8x128xf32>
    %349 = arith.addf %348, %347 : vector<8x128xf32>
    %350 = arith.divf %348, %349 : vector<8x128xf32>
    %351 = vector.extract_strided_slice %344 {offsets = [0, 128], sizes = [8, 128], strides = [1, 1]} : vector<8x512xf32> to vector<8x128xf32>
    %352 = arith.negf %351 : vector<8x128xf32>
    %353 = math.exp %352 : vector<8x128xf32>
    %cst_158 = arith.constant 1.000000e+00 : f32
    %354 = vector.broadcast %cst_158 : f32 to vector<8x128xf32>
    %355 = arith.addf %354, %353 : vector<8x128xf32>
    %356 = arith.divf %354, %355 : vector<8x128xf32>
    %357 = vector.extract_strided_slice %344 {offsets = [0, 256], sizes = [8, 128], strides = [1, 1]} : vector<8x512xf32> to vector<8x128xf32>
    %358 = math.tanh %357 : vector<8x128xf32>
    %359 = vector.extract_strided_slice %344 {offsets = [0, 384], sizes = [8, 128], strides = [1, 1]} : vector<8x512xf32> to vector<8x128xf32>
    %360 = arith.negf %359 : vector<8x128xf32>
    %361 = math.exp %360 : vector<8x128xf32>
    %cst_159 = arith.constant 1.000000e+00 : f32
    %362 = vector.broadcast %cst_159 : f32 to vector<8x128xf32>
    %363 = arith.addf %362, %361 : vector<8x128xf32>
    %364 = arith.divf %362, %363 : vector<8x128xf32>
    %365 = arith.mulf %356, %340 : vector<8x128xf32>
    %366 = arith.mulf %350, %358 : vector<8x128xf32>
    %367 = arith.addf %365, %366 : vector<8x128xf32>
    %368 = math.tanh %367 : vector<8x128xf32>
    %369 = arith.mulf %364, %368 : vector<8x128xf32>
    %370 = arith.truncf %369 : vector<8x128xf32> to vector<8x128xbf16>
    %c0_160 = arith.constant 0 : index
    %c0_161 = arith.constant 0 : index
    %371 = vector.load %arg9[%c0_160, %c0_161] : memref<8x128xbf16, #tpu.memory_space<vmem>>, vector<8x128xbf16>
    tpu.vector_store %arg9[%c0_160, %c0_161], %370 {strides = array<i32>} : memref<8x128xbf16, #tpu.memory_space<vmem>>, vector<8x128xbf16>,
    %c0_162 = arith.constant 0 : index
    %c0_163 = arith.constant 0 : index
    %372 = vector.load %arg10[%c0_162, %c0_163] : memref<8x128xf32, #tpu.memory_space<vmem>>, vector<8x128xf32>
    tpu.vector_store %arg10[%c0_162, %c0_163], %367 {strides = array<i32>} : memref<8x128xf32, #tpu.memory_space<vmem>>, vector<8x128xf32>,
    %373 = arith.index_cast %c4_i32 : i32 to index
    %c0_164 = arith.constant 0 : index
    %c0_165 = arith.constant 0 : index
    %374 = vector.load %arg5[%373, %c0_164, %c0_165] : memref<8x8x128xbf16, #tpu.memory_space<vmem>>, vector<1x8x128xbf16>
    %375 = vector.shape_cast %374 : vector<1x8x128xbf16> to vector<8x128xbf16>
    %376 = vector.shape_cast %370 : vector<8x128xbf16> to vector<1x8x128xbf16>
    tpu.vector_store %arg5[%373, %c0_164, %c0_165], %376 {strides = array<i32>} : memref<8x8x128xbf16, #tpu.memory_space<vmem>>, vector<1x8x128xbf16>,
    %377 = arith.index_cast %335 : i32 to index
    %c0_166 = arith.constant 0 : index
    %c0_167 = arith.constant 0 : index
    %378 = vector.load %arg2[%377, %c0_166, %c0_167] : memref<8x8x512xbf16, #tpu.memory_space<vmem>>, vector<1x8x512xbf16>
    %379 = vector.shape_cast %378 : vector<1x8x512xbf16> to vector<8x512xbf16>
    %c0_168 = arith.constant 0 : index
    %c0_169 = arith.constant 0 : index
    %380 = vector.load %arg11[%c0_168, %c0_169] : memref<8x128xbf16, #tpu.memory_space<vmem>>, vector<8x128xbf16>
    %c0_170 = arith.constant 0 : index
    %c0_171 = arith.constant 0 : index
    %381 = vector.load %arg12[%c0_170, %c0_171] : memref<8x128xf32, #tpu.memory_space<vmem>>, vector<8x128xf32>
    %382 = arith.extf %379 : vector<8x512xbf16> to vector<8x512xf32>
    %c0_172 = arith.constant 0 : index
    %c0_173 = arith.constant 0 : index
    %383 = vector.load %arg4[%c0_172, %c0_173] : memref<128x512xbf16, #tpu.memory_space<vmem>>, vector<128x512xbf16>
    %cst_174 = arith.constant dense<0.000000e+00> : vector<8x512xf32>
    %384 = tpu.matmul %380, %383, %cst_174 {dimension_numbers = #tpu.dot_dimension_numbers<[1], [0], [0], [1], [0, 0, 1, 1], [], []>} : vector<8x128xbf16>, vector<128x512xbf16>, vector<8x512xf32> -> vector<8x512xf32>
    %385 = arith.addf %382, %384 : vector<8x512xf32>
    %386 = vector.extract_strided_slice %385 {offsets = [0, 0], sizes = [8, 128], strides = [1, 1]} : vector<8x512xf32> to vector<8x128xf32>
    %387 = arith.negf %386 : vector<8x128xf32>
    %388 = math.exp %387 : vector<8x128xf32>
    %cst_175 = arith.constant 1.000000e+00 : f32
    %389 = vector.broadcast %cst_175 : f32 to vector<8x128xf32>
    %390 = arith.addf %389, %388 : vector<8x128xf32>
    %391 = arith.divf %389, %390 : vector<8x128xf32>
    %392 = vector.extract_strided_slice %385 {offsets = [0, 128], sizes = [8, 128], strides = [1, 1]} : vector<8x512xf32> to vector<8x128xf32>
    %393 = arith.negf %392 : vector<8x128xf32>
    %394 = math.exp %393 : vector<8x128xf32>
    %cst_176 = arith.constant 1.000000e+00 : f32
    %395 = vector.broadcast %cst_176 : f32 to vector<8x128xf32>
    %396 = arith.addf %395, %394 : vector<8x128xf32>
    %397 = arith.divf %395, %396 : vector<8x128xf32>
    %398 = vector.extract_strided_slice %385 {offsets = [0, 256], sizes = [8, 128], strides = [1, 1]} : vector<8x512xf32> to vector<8x128xf32>
    %399 = math.tanh %398 : vector<8x128xf32>
    %400 = vector.extract_strided_slice %385 {offsets = [0, 384], sizes = [8, 128], strides = [1, 1]} : vector<8x512xf32> to vector<8x128xf32>
    %401 = arith.negf %400 : vector<8x128xf32>
    %402 = math.exp %401 : vector<8x128xf32>
    %cst_177 = arith.constant 1.000000e+00 : f32
    %403 = vector.broadcast %cst_177 : f32 to vector<8x128xf32>
    %404 = arith.addf %403, %402 : vector<8x128xf32>
    %405 = arith.divf %403, %404 : vector<8x128xf32>
    %406 = arith.mulf %397, %381 : vector<8x128xf32>
    %407 = arith.mulf %391, %399 : vector<8x128xf32>
    %408 = arith.addf %406, %407 : vector<8x128xf32>
    %409 = math.tanh %408 : vector<8x128xf32>
    %410 = arith.mulf %405, %409 : vector<8x128xf32>
    %411 = arith.truncf %410 : vector<8x128xf32> to vector<8x128xbf16>
    %c0_178 = arith.constant 0 : index
    %c0_179 = arith.constant 0 : index
    %412 = vector.load %arg11[%c0_178, %c0_179] : memref<8x128xbf16, #tpu.memory_space<vmem>>, vector<8x128xbf16>
    tpu.vector_store %arg11[%c0_178, %c0_179], %411 {strides = array<i32>} : memref<8x128xbf16, #tpu.memory_space<vmem>>, vector<8x128xbf16>,
    %c0_180 = arith.constant 0 : index
    %c0_181 = arith.constant 0 : index
    %413 = vector.load %arg12[%c0_180, %c0_181] : memref<8x128xf32, #tpu.memory_space<vmem>>, vector<8x128xf32>
    tpu.vector_store %arg12[%c0_180, %c0_181], %408 {strides = array<i32>} : memref<8x128xf32, #tpu.memory_space<vmem>>, vector<8x128xf32>,
    %414 = arith.index_cast %335 : i32 to index
    %c0_182 = arith.constant 0 : index
    %c0_183 = arith.constant 0 : index
    %415 = vector.load %arg6[%414, %c0_182, %c0_183] : memref<8x8x128xbf16, #tpu.memory_space<vmem>>, vector<1x8x128xbf16>
    %416 = vector.shape_cast %415 : vector<1x8x128xbf16> to vector<8x128xbf16>
    %417 = vector.shape_cast %411 : vector<8x128xbf16> to vector<1x8x128xbf16>
    tpu.vector_store %arg6[%414, %c0_182, %c0_183], %417 {strides = array<i32>} : memref<8x8x128xbf16, #tpu.memory_space<vmem>>, vector<1x8x128xbf16>,
    %c5_i32 = arith.constant 5 : i32
    %c7_i32_184 = arith.constant 7 : i32
    %418 = arith.subi %c7_i32_184, %c5_i32 : i32
    %419 = arith.index_cast %c5_i32 : i32 to index
    %c0_185 = arith.constant 0 : index
    %c0_186 = arith.constant 0 : index
    %420 = vector.load %arg1[%419, %c0_185, %c0_186] : memref<8x8x512xbf16, #tpu.memory_space<vmem>>, vector<1x8x512xbf16>
    %421 = vector.shape_cast %420 : vector<1x8x512xbf16> to vector<8x512xbf16>
    %c0_187 = arith.constant 0 : index
    %c0_188 = arith.constant 0 : index
    %422 = vector.load %arg9[%c0_187, %c0_188] : memref<8x128xbf16, #tpu.memory_space<vmem>>, vector<8x128xbf16>
    %c0_189 = arith.constant 0 : index
    %c0_190 = arith.constant 0 : index
    %423 = vector.load %arg10[%c0_189, %c0_190] : memref<8x128xf32, #tpu.memory_space<vmem>>, vector<8x128xf32>
    %424 = arith.extf %421 : vector<8x512xbf16> to vector<8x512xf32>
    %c0_191 = arith.constant 0 : index
    %c0_192 = arith.constant 0 : index
    %425 = vector.load %arg3[%c0_191, %c0_192] : memref<128x512xbf16, #tpu.memory_space<vmem>>, vector<128x512xbf16>
    %cst_193 = arith.constant dense<0.000000e+00> : vector<8x512xf32>
    %426 = tpu.matmul %422, %425, %cst_193 {dimension_numbers = #tpu.dot_dimension_numbers<[1], [0], [0], [1], [0, 0, 1, 1], [], []>} : vector<8x128xbf16>, vector<128x512xbf16>, vector<8x512xf32> -> vector<8x512xf32>
    %427 = arith.addf %424, %426 : vector<8x512xf32>
    %428 = vector.extract_strided_slice %427 {offsets = [0, 0], sizes = [8, 128], strides = [1, 1]} : vector<8x512xf32> to vector<8x128xf32>
    %429 = arith.negf %428 : vector<8x128xf32>
    %430 = math.exp %429 : vector<8x128xf32>
    %cst_194 = arith.constant 1.000000e+00 : f32
    %431 = vector.broadcast %cst_194 : f32 to vector<8x128xf32>
    %432 = arith.addf %431, %430 : vector<8x128xf32>
    %433 = arith.divf %431, %432 : vector<8x128xf32>
    %434 = vector.extract_strided_slice %427 {offsets = [0, 128], sizes = [8, 128], strides = [1, 1]} : vector<8x512xf32> to vector<8x128xf32>
    %435 = arith.negf %434 : vector<8x128xf32>
    %436 = math.exp %435 : vector<8x128xf32>
    %cst_195 = arith.constant 1.000000e+00 : f32
    %437 = vector.broadcast %cst_195 : f32 to vector<8x128xf32>
    %438 = arith.addf %437, %436 : vector<8x128xf32>
    %439 = arith.divf %437, %438 : vector<8x128xf32>
    %440 = vector.extract_strided_slice %427 {offsets = [0, 256], sizes = [8, 128], strides = [1, 1]} : vector<8x512xf32> to vector<8x128xf32>
    %441 = math.tanh %440 : vector<8x128xf32>
    %442 = vector.extract_strided_slice %427 {offsets = [0, 384], sizes = [8, 128], strides = [1, 1]} : vector<8x512xf32> to vector<8x128xf32>
    %443 = arith.negf %442 : vector<8x128xf32>
    %444 = math.exp %443 : vector<8x128xf32>
    %cst_196 = arith.constant 1.000000e+00 : f32
    %445 = vector.broadcast %cst_196 : f32 to vector<8x128xf32>
    %446 = arith.addf %445, %444 : vector<8x128xf32>
    %447 = arith.divf %445, %446 : vector<8x128xf32>
    %448 = arith.mulf %439, %423 : vector<8x128xf32>
    %449 = arith.mulf %433, %441 : vector<8x128xf32>
    %450 = arith.addf %448, %449 : vector<8x128xf32>
    %451 = math.tanh %450 : vector<8x128xf32>
    %452 = arith.mulf %447, %451 : vector<8x128xf32>
    %453 = arith.truncf %452 : vector<8x128xf32> to vector<8x128xbf16>
    %c0_197 = arith.constant 0 : index
    %c0_198 = arith.constant 0 : index
    %454 = vector.load %arg9[%c0_197, %c0_198] : memref<8x128xbf16, #tpu.memory_space<vmem>>, vector<8x128xbf16>
    tpu.vector_store %arg9[%c0_197, %c0_198], %453 {strides = array<i32>} : memref<8x128xbf16, #tpu.memory_space<vmem>>, vector<8x128xbf16>,
    %c0_199 = arith.constant 0 : index
    %c0_200 = arith.constant 0 : index
    %455 = vector.load %arg10[%c0_199, %c0_200] : memref<8x128xf32, #tpu.memory_space<vmem>>, vector<8x128xf32>
    tpu.vector_store %arg10[%c0_199, %c0_200], %450 {strides = array<i32>} : memref<8x128xf32, #tpu.memory_space<vmem>>, vector<8x128xf32>,
    %456 = arith.index_cast %c5_i32 : i32 to index
    %c0_201 = arith.constant 0 : index
    %c0_202 = arith.constant 0 : index
    %457 = vector.load %arg5[%456, %c0_201, %c0_202] : memref<8x8x128xbf16, #tpu.memory_space<vmem>>, vector<1x8x128xbf16>
    %458 = vector.shape_cast %457 : vector<1x8x128xbf16> to vector<8x128xbf16>
    %459 = vector.shape_cast %453 : vector<8x128xbf16> to vector<1x8x128xbf16>
    tpu.vector_store %arg5[%456, %c0_201, %c0_202], %459 {strides = array<i32>} : memref<8x8x128xbf16, #tpu.memory_space<vmem>>, vector<1x8x128xbf16>,
    %460 = arith.index_cast %418 : i32 to index
    %c0_203 = arith.constant 0 : index
    %c0_204 = arith.constant 0 : index
    %461 = vector.load %arg2[%460, %c0_203, %c0_204] : memref<8x8x512xbf16, #tpu.memory_space<vmem>>, vector<1x8x512xbf16>
    %462 = vector.shape_cast %461 : vector<1x8x512xbf16> to vector<8x512xbf16>
    %c0_205 = arith.constant 0 : index
    %c0_206 = arith.constant 0 : index
    %463 = vector.load %arg11[%c0_205, %c0_206] : memref<8x128xbf16, #tpu.memory_space<vmem>>, vector<8x128xbf16>
    %c0_207 = arith.constant 0 : index
    %c0_208 = arith.constant 0 : index
    %464 = vector.load %arg12[%c0_207, %c0_208] : memref<8x128xf32, #tpu.memory_space<vmem>>, vector<8x128xf32>
    %465 = arith.extf %462 : vector<8x512xbf16> to vector<8x512xf32>
    %c0_209 = arith.constant 0 : index
    %c0_210 = arith.constant 0 : index
    %466 = vector.load %arg4[%c0_209, %c0_210] : memref<128x512xbf16, #tpu.memory_space<vmem>>, vector<128x512xbf16>
    %cst_211 = arith.constant dense<0.000000e+00> : vector<8x512xf32>
    %467 = tpu.matmul %463, %466, %cst_211 {dimension_numbers = #tpu.dot_dimension_numbers<[1], [0], [0], [1], [0, 0, 1, 1], [], []>} : vector<8x128xbf16>, vector<128x512xbf16>, vector<8x512xf32> -> vector<8x512xf32>
    %468 = arith.addf %465, %467 : vector<8x512xf32>
    %469 = vector.extract_strided_slice %468 {offsets = [0, 0], sizes = [8, 128], strides = [1, 1]} : vector<8x512xf32> to vector<8x128xf32>
    %470 = arith.negf %469 : vector<8x128xf32>
    %471 = math.exp %470 : vector<8x128xf32>
    %cst_212 = arith.constant 1.000000e+00 : f32
    %472 = vector.broadcast %cst_212 : f32 to vector<8x128xf32>
    %473 = arith.addf %472, %471 : vector<8x128xf32>
    %474 = arith.divf %472, %473 : vector<8x128xf32>
    %475 = vector.extract_strided_slice %468 {offsets = [0, 128], sizes = [8, 128], strides = [1, 1]} : vector<8x512xf32> to vector<8x128xf32>
    %476 = arith.negf %475 : vector<8x128xf32>
    %477 = math.exp %476 : vector<8x128xf32>
    %cst_213 = arith.constant 1.000000e+00 : f32
    %478 = vector.broadcast %cst_213 : f32 to vector<8x128xf32>
    %479 = arith.addf %478, %477 : vector<8x128xf32>
    %480 = arith.divf %478, %479 : vector<8x128xf32>
    %481 = vector.extract_strided_slice %468 {offsets = [0, 256], sizes = [8, 128], strides = [1, 1]} : vector<8x512xf32> to vector<8x128xf32>
    %482 = math.tanh %481 : vector<8x128xf32>
    %483 = vector.extract_strided_slice %468 {offsets = [0, 384], sizes = [8, 128], strides = [1, 1]} : vector<8x512xf32> to vector<8x128xf32>
    %484 = arith.negf %483 : vector<8x128xf32>
    %485 = math.exp %484 : vector<8x128xf32>
    %cst_214 = arith.constant 1.000000e+00 : f32
    %486 = vector.broadcast %cst_214 : f32 to vector<8x128xf32>
    %487 = arith.addf %486, %485 : vector<8x128xf32>
    %488 = arith.divf %486, %487 : vector<8x128xf32>
    %489 = arith.mulf %480, %464 : vector<8x128xf32>
    %490 = arith.mulf %474, %482 : vector<8x128xf32>
    %491 = arith.addf %489, %490 : vector<8x128xf32>
    %492 = math.tanh %491 : vector<8x128xf32>
    %493 = arith.mulf %488, %492 : vector<8x128xf32>
    %494 = arith.truncf %493 : vector<8x128xf32> to vector<8x128xbf16>
    %c0_215 = arith.constant 0 : index
    %c0_216 = arith.constant 0 : index
    %495 = vector.load %arg11[%c0_215, %c0_216] : memref<8x128xbf16, #tpu.memory_space<vmem>>, vector<8x128xbf16>
    tpu.vector_store %arg11[%c0_215, %c0_216], %494 {strides = array<i32>} : memref<8x128xbf16, #tpu.memory_space<vmem>>, vector<8x128xbf16>,
    %c0_217 = arith.constant 0 : index
    %c0_218 = arith.constant 0 : index
    %496 = vector.load %arg12[%c0_217, %c0_218] : memref<8x128xf32, #tpu.memory_space<vmem>>, vector<8x128xf32>
    tpu.vector_store %arg12[%c0_217, %c0_218], %491 {strides = array<i32>} : memref<8x128xf32, #tpu.memory_space<vmem>>, vector<8x128xf32>,
    %497 = arith.index_cast %418 : i32 to index
    %c0_219 = arith.constant 0 : index
    %c0_220 = arith.constant 0 : index
    %498 = vector.load %arg6[%497, %c0_219, %c0_220] : memref<8x8x128xbf16, #tpu.memory_space<vmem>>, vector<1x8x128xbf16>
    %499 = vector.shape_cast %498 : vector<1x8x128xbf16> to vector<8x128xbf16>
    %500 = vector.shape_cast %494 : vector<8x128xbf16> to vector<1x8x128xbf16>
    tpu.vector_store %arg6[%497, %c0_219, %c0_220], %500 {strides = array<i32>} : memref<8x8x128xbf16, #tpu.memory_space<vmem>>, vector<1x8x128xbf16>,
    %c6_i32 = arith.constant 6 : i32
    %c7_i32_221 = arith.constant 7 : i32
    %501 = arith.subi %c7_i32_221, %c6_i32 : i32
    %502 = arith.index_cast %c6_i32 : i32 to index
    %c0_222 = arith.constant 0 : index
    %c0_223 = arith.constant 0 : index
    %503 = vector.load %arg1[%502, %c0_222, %c0_223] : memref<8x8x512xbf16, #tpu.memory_space<vmem>>, vector<1x8x512xbf16>
    %504 = vector.shape_cast %503 : vector<1x8x512xbf16> to vector<8x512xbf16>
    %c0_224 = arith.constant 0 : index
    %c0_225 = arith.constant 0 : index
    %505 = vector.load %arg9[%c0_224, %c0_225] : memref<8x128xbf16, #tpu.memory_space<vmem>>, vector<8x128xbf16>
    %c0_226 = arith.constant 0 : index
    %c0_227 = arith.constant 0 : index
    %506 = vector.load %arg10[%c0_226, %c0_227] : memref<8x128xf32, #tpu.memory_space<vmem>>, vector<8x128xf32>
    %507 = arith.extf %504 : vector<8x512xbf16> to vector<8x512xf32>
    %c0_228 = arith.constant 0 : index
    %c0_229 = arith.constant 0 : index
    %508 = vector.load %arg3[%c0_228, %c0_229] : memref<128x512xbf16, #tpu.memory_space<vmem>>, vector<128x512xbf16>
    %cst_230 = arith.constant dense<0.000000e+00> : vector<8x512xf32>
    %509 = tpu.matmul %505, %508, %cst_230 {dimension_numbers = #tpu.dot_dimension_numbers<[1], [0], [0], [1], [0, 0, 1, 1], [], []>} : vector<8x128xbf16>, vector<128x512xbf16>, vector<8x512xf32> -> vector<8x512xf32>
    %510 = arith.addf %507, %509 : vector<8x512xf32>
    %511 = vector.extract_strided_slice %510 {offsets = [0, 0], sizes = [8, 128], strides = [1, 1]} : vector<8x512xf32> to vector<8x128xf32>
    %512 = arith.negf %511 : vector<8x128xf32>
    %513 = math.exp %512 : vector<8x128xf32>
    %cst_231 = arith.constant 1.000000e+00 : f32
    %514 = vector.broadcast %cst_231 : f32 to vector<8x128xf32>
    %515 = arith.addf %514, %513 : vector<8x128xf32>
    %516 = arith.divf %514, %515 : vector<8x128xf32>
    %517 = vector.extract_strided_slice %510 {offsets = [0, 128], sizes = [8, 128], strides = [1, 1]} : vector<8x512xf32> to vector<8x128xf32>
    %518 = arith.negf %517 : vector<8x128xf32>
    %519 = math.exp %518 : vector<8x128xf32>
    %cst_232 = arith.constant 1.000000e+00 : f32
    %520 = vector.broadcast %cst_232 : f32 to vector<8x128xf32>
    %521 = arith.addf %520, %519 : vector<8x128xf32>
    %522 = arith.divf %520, %521 : vector<8x128xf32>
    %523 = vector.extract_strided_slice %510 {offsets = [0, 256], sizes = [8, 128], strides = [1, 1]} : vector<8x512xf32> to vector<8x128xf32>
    %524 = math.tanh %523 : vector<8x128xf32>
    %525 = vector.extract_strided_slice %510 {offsets = [0, 384], sizes = [8, 128], strides = [1, 1]} : vector<8x512xf32> to vector<8x128xf32>
    %526 = arith.negf %525 : vector<8x128xf32>
    %527 = math.exp %526 : vector<8x128xf32>
    %cst_233 = arith.constant 1.000000e+00 : f32
    %528 = vector.broadcast %cst_233 : f32 to vector<8x128xf32>
    %529 = arith.addf %528, %527 : vector<8x128xf32>
    %530 = arith.divf %528, %529 : vector<8x128xf32>
    %531 = arith.mulf %522, %506 : vector<8x128xf32>
    %532 = arith.mulf %516, %524 : vector<8x128xf32>
    %533 = arith.addf %531, %532 : vector<8x128xf32>
    %534 = math.tanh %533 : vector<8x128xf32>
    %535 = arith.mulf %530, %534 : vector<8x128xf32>
    %536 = arith.truncf %535 : vector<8x128xf32> to vector<8x128xbf16>
    %c0_234 = arith.constant 0 : index
    %c0_235 = arith.constant 0 : index
    %537 = vector.load %arg9[%c0_234, %c0_235] : memref<8x128xbf16, #tpu.memory_space<vmem>>, vector<8x128xbf16>
    tpu.vector_store %arg9[%c0_234, %c0_235], %536 {strides = array<i32>} : memref<8x128xbf16, #tpu.memory_space<vmem>>, vector<8x128xbf16>,
    %c0_236 = arith.constant 0 : index
    %c0_237 = arith.constant 0 : index
    %538 = vector.load %arg10[%c0_236, %c0_237] : memref<8x128xf32, #tpu.memory_space<vmem>>, vector<8x128xf32>
    tpu.vector_store %arg10[%c0_236, %c0_237], %533 {strides = array<i32>} : memref<8x128xf32, #tpu.memory_space<vmem>>, vector<8x128xf32>,
    %539 = arith.index_cast %c6_i32 : i32 to index
    %c0_238 = arith.constant 0 : index
    %c0_239 = arith.constant 0 : index
    %540 = vector.load %arg5[%539, %c0_238, %c0_239] : memref<8x8x128xbf16, #tpu.memory_space<vmem>>, vector<1x8x128xbf16>
    %541 = vector.shape_cast %540 : vector<1x8x128xbf16> to vector<8x128xbf16>
    %542 = vector.shape_cast %536 : vector<8x128xbf16> to vector<1x8x128xbf16>
    tpu.vector_store %arg5[%539, %c0_238, %c0_239], %542 {strides = array<i32>} : memref<8x8x128xbf16, #tpu.memory_space<vmem>>, vector<1x8x128xbf16>,
    %543 = arith.index_cast %501 : i32 to index
    %c0_240 = arith.constant 0 : index
    %c0_241 = arith.constant 0 : index
    %544 = vector.load %arg2[%543, %c0_240, %c0_241] : memref<8x8x512xbf16, #tpu.memory_space<vmem>>, vector<1x8x512xbf16>
    %545 = vector.shape_cast %544 : vector<1x8x512xbf16> to vector<8x512xbf16>
    %c0_242 = arith.constant 0 : index
    %c0_243 = arith.constant 0 : index
    %546 = vector.load %arg11[%c0_242, %c0_243] : memref<8x128xbf16, #tpu.memory_space<vmem>>, vector<8x128xbf16>
    %c0_244 = arith.constant 0 : index
    %c0_245 = arith.constant 0 : index
    %547 = vector.load %arg12[%c0_244, %c0_245] : memref<8x128xf32, #tpu.memory_space<vmem>>, vector<8x128xf32>
    %548 = arith.extf %545 : vector<8x512xbf16> to vector<8x512xf32>
    %c0_246 = arith.constant 0 : index
    %c0_247 = arith.constant 0 : index
    %549 = vector.load %arg4[%c0_246, %c0_247] : memref<128x512xbf16, #tpu.memory_space<vmem>>, vector<128x512xbf16>
    %cst_248 = arith.constant dense<0.000000e+00> : vector<8x512xf32>
    %550 = tpu.matmul %546, %549, %cst_248 {dimension_numbers = #tpu.dot_dimension_numbers<[1], [0], [0], [1], [0, 0, 1, 1], [], []>} : vector<8x128xbf16>, vector<128x512xbf16>, vector<8x512xf32> -> vector<8x512xf32>
    %551 = arith.addf %548, %550 : vector<8x512xf32>
    %552 = vector.extract_strided_slice %551 {offsets = [0, 0], sizes = [8, 128], strides = [1, 1]} : vector<8x512xf32> to vector<8x128xf32>
    %553 = arith.negf %552 : vector<8x128xf32>
    %554 = math.exp %553 : vector<8x128xf32>
    %cst_249 = arith.constant 1.000000e+00 : f32
    %555 = vector.broadcast %cst_249 : f32 to vector<8x128xf32>
    %556 = arith.addf %555, %554 : vector<8x128xf32>
    %557 = arith.divf %555, %556 : vector<8x128xf32>
    %558 = vector.extract_strided_slice %551 {offsets = [0, 128], sizes = [8, 128], strides = [1, 1]} : vector<8x512xf32> to vector<8x128xf32>
    %559 = arith.negf %558 : vector<8x128xf32>
    %560 = math.exp %559 : vector<8x128xf32>
    %cst_250 = arith.constant 1.000000e+00 : f32
    %561 = vector.broadcast %cst_250 : f32 to vector<8x128xf32>
    %562 = arith.addf %561, %560 : vector<8x128xf32>
    %563 = arith.divf %561, %562 : vector<8x128xf32>
    %564 = vector.extract_strided_slice %551 {offsets = [0, 256], sizes = [8, 128], strides = [1, 1]} : vector<8x512xf32> to vector<8x128xf32>
    %565 = math.tanh %564 : vector<8x128xf32>
    %566 = vector.extract_strided_slice %551 {offsets = [0, 384], sizes = [8, 128], strides = [1, 1]} : vector<8x512xf32> to vector<8x128xf32>
    %567 = arith.negf %566 : vector<8x128xf32>
    %568 = math.exp %567 : vector<8x128xf32>
    %cst_251 = arith.constant 1.000000e+00 : f32
    %569 = vector.broadcast %cst_251 : f32 to vector<8x128xf32>
    %570 = arith.addf %569, %568 : vector<8x128xf32>
    %571 = arith.divf %569, %570 : vector<8x128xf32>
    %572 = arith.mulf %563, %547 : vector<8x128xf32>
    %573 = arith.mulf %557, %565 : vector<8x128xf32>
    %574 = arith.addf %572, %573 : vector<8x128xf32>
    %575 = math.tanh %574 : vector<8x128xf32>
    %576 = arith.mulf %571, %575 : vector<8x128xf32>
    %577 = arith.truncf %576 : vector<8x128xf32> to vector<8x128xbf16>
    %c0_252 = arith.constant 0 : index
    %c0_253 = arith.constant 0 : index
    %578 = vector.load %arg11[%c0_252, %c0_253] : memref<8x128xbf16, #tpu.memory_space<vmem>>, vector<8x128xbf16>
    tpu.vector_store %arg11[%c0_252, %c0_253], %577 {strides = array<i32>} : memref<8x128xbf16, #tpu.memory_space<vmem>>, vector<8x128xbf16>,
    %c0_254 = arith.constant 0 : index
    %c0_255 = arith.constant 0 : index
    %579 = vector.load %arg12[%c0_254, %c0_255] : memref<8x128xf32, #tpu.memory_space<vmem>>, vector<8x128xf32>
    tpu.vector_store %arg12[%c0_254, %c0_255], %574 {strides = array<i32>} : memref<8x128xf32, #tpu.memory_space<vmem>>, vector<8x128xf32>,
    %580 = arith.index_cast %501 : i32 to index
    %c0_256 = arith.constant 0 : index
    %c0_257 = arith.constant 0 : index
    %581 = vector.load %arg6[%580, %c0_256, %c0_257] : memref<8x8x128xbf16, #tpu.memory_space<vmem>>, vector<1x8x128xbf16>
    %582 = vector.shape_cast %581 : vector<1x8x128xbf16> to vector<8x128xbf16>
    %583 = vector.shape_cast %577 : vector<8x128xbf16> to vector<1x8x128xbf16>
    tpu.vector_store %arg6[%580, %c0_256, %c0_257], %583 {strides = array<i32>} : memref<8x8x128xbf16, #tpu.memory_space<vmem>>, vector<1x8x128xbf16>,
    %c7_i32_258 = arith.constant 7 : i32
    %c7_i32_259 = arith.constant 7 : i32
    %584 = arith.subi %c7_i32_259, %c7_i32_258 : i32
    %585 = arith.index_cast %c7_i32_258 : i32 to index
    %c0_260 = arith.constant 0 : index
    %c0_261 = arith.constant 0 : index
    %586 = vector.load %arg1[%585, %c0_260, %c0_261] : memref<8x8x512xbf16, #tpu.memory_space<vmem>>, vector<1x8x512xbf16>
    %587 = vector.shape_cast %586 : vector<1x8x512xbf16> to vector<8x512xbf16>
    %c0_262 = arith.constant 0 : index
    %c0_263 = arith.constant 0 : index
    %588 = vector.load %arg9[%c0_262, %c0_263] : memref<8x128xbf16, #tpu.memory_space<vmem>>, vector<8x128xbf16>
    %c0_264 = arith.constant 0 : index
    %c0_265 = arith.constant 0 : index
    %589 = vector.load %arg10[%c0_264, %c0_265] : memref<8x128xf32, #tpu.memory_space<vmem>>, vector<8x128xf32>
    %590 = arith.extf %587 : vector<8x512xbf16> to vector<8x512xf32>
    %c0_266 = arith.constant 0 : index
    %c0_267 = arith.constant 0 : index
    %591 = vector.load %arg3[%c0_266, %c0_267] : memref<128x512xbf16, #tpu.memory_space<vmem>>, vector<128x512xbf16>
    %cst_268 = arith.constant dense<0.000000e+00> : vector<8x512xf32>
    %592 = tpu.matmul %588, %591, %cst_268 {dimension_numbers = #tpu.dot_dimension_numbers<[1], [0], [0], [1], [0, 0, 1, 1], [], []>} : vector<8x128xbf16>, vector<128x512xbf16>, vector<8x512xf32> -> vector<8x512xf32>
    %593 = arith.addf %590, %592 : vector<8x512xf32>
    %594 = vector.extract_strided_slice %593 {offsets = [0, 0], sizes = [8, 128], strides = [1, 1]} : vector<8x512xf32> to vector<8x128xf32>
    %595 = arith.negf %594 : vector<8x128xf32>
    %596 = math.exp %595 : vector<8x128xf32>
    %cst_269 = arith.constant 1.000000e+00 : f32
    %597 = vector.broadcast %cst_269 : f32 to vector<8x128xf32>
    %598 = arith.addf %597, %596 : vector<8x128xf32>
    %599 = arith.divf %597, %598 : vector<8x128xf32>
    %600 = vector.extract_strided_slice %593 {offsets = [0, 128], sizes = [8, 128], strides = [1, 1]} : vector<8x512xf32> to vector<8x128xf32>
    %601 = arith.negf %600 : vector<8x128xf32>
    %602 = math.exp %601 : vector<8x128xf32>
    %cst_270 = arith.constant 1.000000e+00 : f32
    %603 = vector.broadcast %cst_270 : f32 to vector<8x128xf32>
    %604 = arith.addf %603, %602 : vector<8x128xf32>
    %605 = arith.divf %603, %604 : vector<8x128xf32>
    %606 = vector.extract_strided_slice %593 {offsets = [0, 256], sizes = [8, 128], strides = [1, 1]} : vector<8x512xf32> to vector<8x128xf32>
    %607 = math.tanh %606 : vector<8x128xf32>
    %608 = vector.extract_strided_slice %593 {offsets = [0, 384], sizes = [8, 128], strides = [1, 1]} : vector<8x512xf32> to vector<8x128xf32>
    %609 = arith.negf %608 : vector<8x128xf32>
    %610 = math.exp %609 : vector<8x128xf32>
    %cst_271 = arith.constant 1.000000e+00 : f32
    %611 = vector.broadcast %cst_271 : f32 to vector<8x128xf32>
    %612 = arith.addf %611, %610 : vector<8x128xf32>
    %613 = arith.divf %611, %612 : vector<8x128xf32>
    %614 = arith.mulf %605, %589 : vector<8x128xf32>
    %615 = arith.mulf %599, %607 : vector<8x128xf32>
    %616 = arith.addf %614, %615 : vector<8x128xf32>
    %617 = math.tanh %616 : vector<8x128xf32>
    %618 = arith.mulf %613, %617 : vector<8x128xf32>
    %619 = arith.truncf %618 : vector<8x128xf32> to vector<8x128xbf16>
    %c0_272 = arith.constant 0 : index
    %c0_273 = arith.constant 0 : index
    %620 = vector.load %arg9[%c0_272, %c0_273] : memref<8x128xbf16, #tpu.memory_space<vmem>>, vector<8x128xbf16>
    tpu.vector_store %arg9[%c0_272, %c0_273], %619 {strides = array<i32>} : memref<8x128xbf16, #tpu.memory_space<vmem>>, vector<8x128xbf16>,
    %c0_274 = arith.constant 0 : index
    %c0_275 = arith.constant 0 : index
    %621 = vector.load %arg10[%c0_274, %c0_275] : memref<8x128xf32, #tpu.memory_space<vmem>>, vector<8x128xf32>
    tpu.vector_store %arg10[%c0_274, %c0_275], %616 {strides = array<i32>} : memref<8x128xf32, #tpu.memory_space<vmem>>, vector<8x128xf32>,
    %622 = arith.index_cast %c7_i32_258 : i32 to index
    %c0_276 = arith.constant 0 : index
    %c0_277 = arith.constant 0 : index
    %623 = vector.load %arg5[%622, %c0_276, %c0_277] : memref<8x8x128xbf16, #tpu.memory_space<vmem>>, vector<1x8x128xbf16>
    %624 = vector.shape_cast %623 : vector<1x8x128xbf16> to vector<8x128xbf16>
    %625 = vector.shape_cast %619 : vector<8x128xbf16> to vector<1x8x128xbf16>
    tpu.vector_store %arg5[%622, %c0_276, %c0_277], %625 {strides = array<i32>} : memref<8x8x128xbf16, #tpu.memory_space<vmem>>, vector<1x8x128xbf16>,
    %626 = arith.index_cast %584 : i32 to index
    %c0_278 = arith.constant 0 : index
    %c0_279 = arith.constant 0 : index
    %627 = vector.load %arg2[%626, %c0_278, %c0_279] : memref<8x8x512xbf16, #tpu.memory_space<vmem>>, vector<1x8x512xbf16>
    %628 = vector.shape_cast %627 : vector<1x8x512xbf16> to vector<8x512xbf16>
    %c0_280 = arith.constant 0 : index
    %c0_281 = arith.constant 0 : index
    %629 = vector.load %arg11[%c0_280, %c0_281] : memref<8x128xbf16, #tpu.memory_space<vmem>>, vector<8x128xbf16>
    %c0_282 = arith.constant 0 : index
    %c0_283 = arith.constant 0 : index
    %630 = vector.load %arg12[%c0_282, %c0_283] : memref<8x128xf32, #tpu.memory_space<vmem>>, vector<8x128xf32>
    %631 = arith.extf %628 : vector<8x512xbf16> to vector<8x512xf32>
    %c0_284 = arith.constant 0 : index
    %c0_285 = arith.constant 0 : index
    %632 = vector.load %arg4[%c0_284, %c0_285] : memref<128x512xbf16, #tpu.memory_space<vmem>>, vector<128x512xbf16>
    %cst_286 = arith.constant dense<0.000000e+00> : vector<8x512xf32>
    %633 = tpu.matmul %629, %632, %cst_286 {dimension_numbers = #tpu.dot_dimension_numbers<[1], [0], [0], [1], [0, 0, 1, 1], [], []>} : vector<8x128xbf16>, vector<128x512xbf16>, vector<8x512xf32> -> vector<8x512xf32>
    %634 = arith.addf %631, %633 : vector<8x512xf32>
    %635 = vector.extract_strided_slice %634 {offsets = [0, 0], sizes = [8, 128], strides = [1, 1]} : vector<8x512xf32> to vector<8x128xf32>
    %636 = arith.negf %635 : vector<8x128xf32>
    %637 = math.exp %636 : vector<8x128xf32>
    %cst_287 = arith.constant 1.000000e+00 : f32
    %638 = vector.broadcast %cst_287 : f32 to vector<8x128xf32>
    %639 = arith.addf %638, %637 : vector<8x128xf32>
    %640 = arith.divf %638, %639 : vector<8x128xf32>
    %641 = vector.extract_strided_slice %634 {offsets = [0, 128], sizes = [8, 128], strides = [1, 1]} : vector<8x512xf32> to vector<8x128xf32>
    %642 = arith.negf %641 : vector<8x128xf32>
    %643 = math.exp %642 : vector<8x128xf32>
    %cst_288 = arith.constant 1.000000e+00 : f32
    %644 = vector.broadcast %cst_288 : f32 to vector<8x128xf32>
    %645 = arith.addf %644, %643 : vector<8x128xf32>
    %646 = arith.divf %644, %645 : vector<8x128xf32>
    %647 = vector.extract_strided_slice %634 {offsets = [0, 256], sizes = [8, 128], strides = [1, 1]} : vector<8x512xf32> to vector<8x128xf32>
    %648 = math.tanh %647 : vector<8x128xf32>
    %649 = vector.extract_strided_slice %634 {offsets = [0, 384], sizes = [8, 128], strides = [1, 1]} : vector<8x512xf32> to vector<8x128xf32>
    %650 = arith.negf %649 : vector<8x128xf32>
    %651 = math.exp %650 : vector<8x128xf32>
    %cst_289 = arith.constant 1.000000e+00 : f32
    %652 = vector.broadcast %cst_289 : f32 to vector<8x128xf32>
    %653 = arith.addf %652, %651 : vector<8x128xf32>
    %654 = arith.divf %652, %653 : vector<8x128xf32>
    %655 = arith.mulf %646, %630 : vector<8x128xf32>
    %656 = arith.mulf %640, %648 : vector<8x128xf32>
    %657 = arith.addf %655, %656 : vector<8x128xf32>
    %658 = math.tanh %657 : vector<8x128xf32>
    %659 = arith.mulf %654, %658 : vector<8x128xf32>
    %660 = arith.truncf %659 : vector<8x128xf32> to vector<8x128xbf16>
    %c0_290 = arith.constant 0 : index
    %c0_291 = arith.constant 0 : index
    %661 = vector.load %arg11[%c0_290, %c0_291] : memref<8x128xbf16, #tpu.memory_space<vmem>>, vector<8x128xbf16>
    tpu.vector_store %arg11[%c0_290, %c0_291], %660 {strides = array<i32>} : memref<8x128xbf16, #tpu.memory_space<vmem>>, vector<8x128xbf16>,
    %c0_292 = arith.constant 0 : index
    %c0_293 = arith.constant 0 : index
    %662 = vector.load %arg12[%c0_292, %c0_293] : memref<8x128xf32, #tpu.memory_space<vmem>>, vector<8x128xf32>
    tpu.vector_store %arg12[%c0_292, %c0_293], %657 {strides = array<i32>} : memref<8x128xf32, #tpu.memory_space<vmem>>, vector<8x128xf32>,
    %663 = arith.index_cast %584 : i32 to index
    %c0_294 = arith.constant 0 : index
    %c0_295 = arith.constant 0 : index
    %664 = vector.load %arg6[%663, %c0_294, %c0_295] : memref<8x8x128xbf16, #tpu.memory_space<vmem>>, vector<1x8x128xbf16>
    %665 = vector.shape_cast %664 : vector<1x8x128xbf16> to vector<8x128xbf16>
    %666 = vector.shape_cast %660 : vector<8x128xbf16> to vector<1x8x128xbf16>
    tpu.vector_store %arg6[%663, %c0_294, %c0_295], %666 {strides = array<i32>} : memref<8x8x128xbf16, #tpu.memory_space<vmem>>, vector<1x8x128xbf16>,
    %c8_i32 = arith.constant 8 : i32
    %c0_i32_296 = arith.constant 0 : i32
    %667 = arith.cmpi eq, %arg0, %c0_i32_296 : i32
    %668 = arith.extui %667 : i1 to i32
    %c0_i32_297 = arith.constant 0 : i32
    %669 = arith.cmpi ne, %668, %c0_i32_297 : i32
    scf.if %669 {
      %c0_298 = arith.constant 0 : index
      %c0_299 = arith.constant 0 : index
      %670 = vector.load %arg9[%c0_298, %c0_299] : memref<8x128xbf16, #tpu.memory_space<vmem>>, vector<8x128xbf16>
      %c0_300 = arith.constant 0 : index
      %c0_301 = arith.constant 0 : index
      %671 = vector.load %arg7[%c0_300, %c0_301] : memref<8x128xbf16, #tpu.memory_space<vmem>>, vector<8x128xbf16>
      tpu.vector_store %arg7[%c0_300, %c0_301], %670 {strides = array<i32>} : memref<8x128xbf16, #tpu.memory_space<vmem>>, vector<8x128xbf16>,
      %c0_302 = arith.constant 0 : index
      %c0_303 = arith.constant 0 : index
      %672 = vector.load %arg11[%c0_302, %c0_303] : memref<8x128xbf16, #tpu.memory_space<vmem>>, vector<8x128xbf16>
      %c0_304 = arith.constant 0 : index
      %c0_305 = arith.constant 0 : index
      %673 = vector.load %arg8[%c0_304, %c0_305] : memref<8x128xbf16, #tpu.memory_space<vmem>>, vector<8x128xbf16>
      tpu.vector_store %arg8[%c0_304, %c0_305], %672 {strides = array<i32>} : memref<8x128xbf16, #tpu.memory_space<vmem>>, vector<8x128xbf16>,
    } else {
    }
    return
  }
  func.func @transform_0(%arg0: i32) -> (i32, i32, i32) {
    %c0_i32 = arith.constant 0 : i32
    %c0_i32_0 = arith.constant 0 : i32
    %c0_i32_1 = arith.constant 0 : i32
    return %arg0, %c0_i32, %c0_i32_0 : i32, i32, i32
  }
  func.func @transform_1(%arg0: i32) -> (i32, i32, i32) {
    %c0_i32 = arith.constant 0 : i32
    %0 = arith.subi %c0_i32, %arg0 : i32
    %c0_i32_0 = arith.constant 0 : i32
    %c1_i32 = arith.constant 1 : i32
    %c0_i32_1 = arith.constant 0 : i32
    return %0, %c0_i32_0, %c1_i32 : i32, i32, i32
  }
  func.func @transform_2(%arg0: i32) -> (i32, i32) {
    %c0_i32 = arith.constant 0 : i32
    %c0_i32_0 = arith.constant 0 : i32
    %c0_i32_1 = arith.constant 0 : i32
    return %c0_i32, %c0_i32_0 : i32, i32
  }
  func.func @transform_3(%arg0: i32) -> (i32, i32) {
    %c0_i32 = arith.constant 0 : i32
    %c0_i32_0 = arith.constant 0 : i32
    %c0_i32_1 = arith.constant 0 : i32
    return %c0_i32, %c0_i32_0 : i32, i32
  }
  func.func @transform_4(%arg0: i32) -> (i32, i32, i32) {
    %c0_i32 = arith.constant 0 : i32
    %c0_i32_0 = arith.constant 0 : i32
    %c0_i32_1 = arith.constant 0 : i32
    return %arg0, %c0_i32, %c0_i32_0 : i32, i32, i32
  }
  func.func @transform_5(%arg0: i32) -> (i32, i32, i32) {
    %c0_i32 = arith.constant 0 : i32
    %0 = arith.subi %c0_i32, %arg0 : i32
    %c0_i32_0 = arith.constant 0 : i32
    %c0_i32_1 = arith.constant 0 : i32
    %c0_i32_2 = arith.constant 0 : i32
    return %0, %c0_i32_0, %c0_i32_1 : i32, i32, i32
  }
  func.func @transform_6(%arg0: i32) -> (i32, i32) {
    %c0_i32 = arith.constant 0 : i32
    %c0_i32_0 = arith.constant 0 : i32
    %c0_i32_1 = arith.constant 0 : i32
    return %c0_i32, %c0_i32_0 : i32, i32
  }
  func.func @transform_7(%arg0: i32) -> (i32, i32) {
    %c0_i32 = arith.constant 0 : i32
    %c0_i32_0 = arith.constant 0 : i32
    %c0_i32_1 = arith.constant 0 : i32
    return %c0_i32, %c0_i32_0 : i32, i32
  }
}

module attributes {stable_mosaic.version = 11 : i64} {
  func.func @kernel(%arg0: i32, %arg1: memref<8x8x512xbf16, #tpu.memory_space<vmem>>, %arg2: memref<8x8x512xbf16, #tpu.memory_space<vmem>>, %arg3: memref<128x512xbf16, #tpu.memory_space<vmem>>, %arg4: memref<128x512xbf16, #tpu.memory_space<vmem>>, %arg5: memref<8x8x128xbf16, #tpu.memory_space<vmem>>, %arg6: memref<8x8x128xbf16, #tpu.memory_space<vmem>>, %arg7: memref<8x128xbf16, #tpu.memory_space<vmem>>, %arg8: memref<8x128xbf16, #tpu.memory_space<vmem>>, %arg9: memref<8x128xbf16, #tpu.memory_space<vmem>>, %arg10: memref<8x128xf32, #tpu.memory_space<vmem>>, %arg11: memref<8x128xbf16, #tpu.memory_space<vmem>>, %arg12: memref<8x128xf32, #tpu.memory_space<vmem>>) attributes {dimension_semantics = [#tpu.dimension_semantics<arbitrary>], iteration_bounds = array<i64: 1>, scalar_prefetch = 0 : i64, scratch_operands = 4 : i64, tpu.core_type = #tpu.core_type<tc>, window_params = [{transform_indices = @transform_0, window_bounds = array<i64: 8, 8, 512>}, {transform_indices = @transform_1, window_bounds = array<i64: 8, 8, 512>}, {pipeline_mode = #tpu.pipeline_mode<synchronous>, transform_indices = @transform_2, window_bounds = array<i64: 128, 512>}, {pipeline_mode = #tpu.pipeline_mode<synchronous>, transform_indices = @transform_3, window_bounds = array<i64: 128, 512>}, {transform_indices = @transform_4, window_bounds = array<i64: 8, 8, 128>}, {transform_indices = @transform_5, window_bounds = array<i64: 8, 8, 128>}, {pipeline_mode = #tpu.pipeline_mode<synchronous>, transform_indices = @transform_6, window_bounds = array<i64: 8, 128>}, {pipeline_mode = #tpu.pipeline_mode<synchronous>, transform_indices = @transform_7, window_bounds = array<i64: 8, 128>}]} {
    %c0_i32 = arith.constant 0 : i32
    %0 = arith.cmpi eq, %arg0, %c0_i32 : i32
    %1 = arith.extui %0 : i1 to i32
    %c0_i32_0 = arith.constant 0 : i32
    %2 = arith.cmpi ne, %1, %c0_i32_0 : i32
    scf.if %2 {
      %cst_298 = arith.constant 0.000000e+00 : bf16
      %670 = vector.broadcast %cst_298 : bf16 to vector<8x128xbf16>
      %c0_299 = arith.constant 0 : index
      %c0_300 = arith.constant 0 : index
      %671 = vector.load %arg9[%c0_299, %c0_300] : memref<8x128xbf16, #tpu.memory_space<vmem>>, vector<8x128xbf16>
      tpu.vector_store %arg9[%c0_299, %c0_300], %670 {strides = array<i32>} : memref<8x128xbf16, #tpu.memory_space<vmem>>, vector<8x128xbf16>,
      %cst_301 = arith.constant 0.000000e+00 : f32
      %672 = vector.broadcast %cst_301 : f32 to vector<8x128xf32>
      %c0_302 = arith.constant 0 : index
      %c0_303 = arith.constant 0 : index
      %673 = vector.load %arg10[%c0_302, %c0_303] : memref<8x128xf32, #tpu.memory_space<vmem>>, vector<8x128xf32>
      tpu.vector_store %arg10[%c0_302, %c0_303], %672 {strides = array<i32>} : memref<8x128xf32, #tpu.memory_space<vmem>>, vector<8x128xf32>,
      %cst_304 = arith.constant 0.000000e+00 : bf16
      %674 = vector.broadcast %cst_304 : bf16 to vector<8x128xbf16>
      %c0_305 = arith.constant 0 : index
      %c0_306 = arith.constant 0 : index
      %675 = vector.load %arg11[%c0_305, %c0_306] : memref<8x128xbf16, #tpu.memory_space<vmem>>, vector<8x128xbf16>
      tpu.vector_store %arg11[%c0_305, %c0_306], %674 {strides = array<i32>} : memref<8x128xbf16, #tpu.memory_space<vmem>>, vector<8x128xbf16>,
      %cst_307 = arith.constant 0.000000e+00 : f32
      %676 = vector.broadcast %cst_307 : f32 to vector<8x128xf32>
      %c0_308 = arith.constant 0 : index
      %c0_309 = arith.constant 0 : index
      %677 = vector.load %arg12[%c0_308, %c0_309] : memref<8x128xf32, #tpu.memory_space<vmem>>, vector<8x128xf32>
      tpu.vector_store %arg12[%c0_308, %c0_309], %676 {strides = array<i32>} : memref<8x128xf32, #tpu.memory_space<vmem>>, vector<8x128xf32>,
    } else {
    }
    %c0_i32_1 = arith.constant 0 : i32
    %c7_i32 = arith.constant 7 : i32
    %3 = arith.subi %c7_i32, %c0_i32_1 : i32
    %4 = arith.index_cast %c0_i32_1 : i32 to index
    %c0 = arith.constant 0 : index
    %c0_2 = arith.constant 0 : index
    %5 = vector.load %arg1[%4, %c0, %c0_2] : memref<8x8x512xbf16, #tpu.memory_space<vmem>>, vector<1x8x512xbf16>
    %6 = vector.shape_cast %5 : vector<1x8x512xbf16> to vector<8x512xbf16>
    %c0_3 = arith.constant 0 : index
    %c0_4 = arith.constant 0 : index
    %7 = vector.load %arg9[%c0_3, %c0_4] : memref<8x128xbf16, #tpu.memory_space<vmem>>, vector<8x128xbf16>
    %c0_5 = arith.constant 0 : index
    %c0_6 = arith.constant 0 : index
    %8 = vector.load %arg10[%c0_5, %c0_6] : memref<8x128xf32, #tpu.memory_space<vmem>>, vector<8x128xf32>
    %9 = arith.extf %6 : vector<8x512xbf16> to vector<8x512xf32>
    %c0_7 = arith.constant 0 : index
    %c0_8 = arith.constant 0 : index
    %10 = vector.load %arg3[%c0_7, %c0_8] : memref<128x512xbf16, #tpu.memory_space<vmem>>, vector<128x512xbf16>
    %cst = arith.constant dense<0.000000e+00> : vector<8x512xf32>
    %11 = tpu.matmul %7, %10, %cst {dimension_numbers = #tpu.dot_dimension_numbers<[1], [0], [0], [1], [0, 0, 1, 1], [], []>} : vector<8x128xbf16>, vector<128x512xbf16>, vector<8x512xf32> -> vector<8x512xf32>
    %12 = arith.addf %9, %11 : vector<8x512xf32>
    %13 = vector.extract_strided_slice %12 {offsets = [0, 0], sizes = [8, 128], strides = [1, 1]} : vector<8x512xf32> to vector<8x128xf32>
    %14 = arith.negf %13 : vector<8x128xf32>
    %15 = math.exp %14 : vector<8x128xf32>
    %cst_9 = arith.constant 1.000000e+00 : f32
    %16 = vector.broadcast %cst_9 : f32 to vector<8x128xf32>
    %17 = arith.addf %16, %15 : vector<8x128xf32>
    %18 = arith.divf %16, %17 : vector<8x128xf32>
    %19 = vector.extract_strided_slice %12 {offsets = [0, 128], sizes = [8, 128], strides = [1, 1]} : vector<8x512xf32> to vector<8x128xf32>
    %20 = arith.negf %19 : vector<8x128xf32>
    %21 = math.exp %20 : vector<8x128xf32>
    %cst_10 = arith.constant 1.000000e+00 : f32
    %22 = vector.broadcast %cst_10 : f32 to vector<8x128xf32>
    %23 = arith.addf %22, %21 : vector<8x128xf32>
    %24 = arith.divf %22, %23 : vector<8x128xf32>
    %25 = vector.extract_strided_slice %12 {offsets = [0, 256], sizes = [8, 128], strides = [1, 1]} : vector<8x512xf32> to vector<8x128xf32>
    %26 = math.tanh %25 : vector<8x128xf32>
    %27 = vector.extract_strided_slice %12 {offsets = [0, 384], sizes = [8, 128], strides = [1, 1]} : vector<8x512xf32> to vector<8x128xf32>
    %28 = arith.negf %27 : vector<8x128xf32>
    %29 = math.exp %28 : vector<8x128xf32>
    %cst_11 = arith.constant 1.000000e+00 : f32
    %30 = vector.broadcast %cst_11 : f32 to vector<8x128xf32>
    %31 = arith.addf %30, %29 : vector<8x128xf32>
    %32 = arith.divf %30, %31 : vector<8x128xf32>
    %33 = arith.mulf %24, %8 : vector<8x128xf32>
    %34 = arith.mulf %18, %26 : vector<8x128xf32>
    %35 = arith.addf %33, %34 : vector<8x128xf32>
    %36 = math.tanh %35 : vector<8x128xf32>
    %37 = arith.mulf %32, %36 : vector<8x128xf32>
    %38 = arith.truncf %37 : vector<8x128xf32> to vector<8x128xbf16>
    %c0_12 = arith.constant 0 : index
    %c0_13 = arith.constant 0 : index
    %39 = vector.load %arg9[%c0_12, %c0_13] : memref<8x128xbf16, #tpu.memory_space<vmem>>, vector<8x128xbf16>
    tpu.vector_store %arg9[%c0_12, %c0_13], %38 {strides = array<i32>} : memref<8x128xbf16, #tpu.memory_space<vmem>>, vector<8x128xbf16>,
    %c0_14 = arith.constant 0 : index
    %c0_15 = arith.constant 0 : index
    %40 = vector.load %arg10[%c0_14, %c0_15] : memref<8x128xf32, #tpu.memory_space<vmem>>, vector<8x128xf32>
    tpu.vector_store %arg10[%c0_14, %c0_15], %35 {strides = array<i32>} : memref<8x128xf32, #tpu.memory_space<vmem>>, vector<8x128xf32>,
    %41 = arith.index_cast %c0_i32_1 : i32 to index
    %c0_16 = arith.constant 0 : index
    %c0_17 = arith.constant 0 : index
    %42 = vector.load %arg5[%41, %c0_16, %c0_17] : memref<8x8x128xbf16, #tpu.memory_space<vmem>>, vector<1x8x128xbf16>
    %43 = vector.shape_cast %42 : vector<1x8x128xbf16> to vector<8x128xbf16>
    %44 = vector.shape_cast %38 : vector<8x128xbf16> to vector<1x8x128xbf16>
    tpu.vector_store %arg5[%41, %c0_16, %c0_17], %44 {strides = array<i32>} : memref<8x8x128xbf16, #tpu.memory_space<vmem>>, vector<1x8x128xbf16>,
    %45 = arith.index_cast %3 : i32 to index
    %c0_18 = arith.constant 0 : index
    %c0_19 = arith.constant 0 : index
    %46 = vector.load %arg2[%45, %c0_18, %c0_19] : memref<8x8x512xbf16, #tpu.memory_space<vmem>>, vector<1x8x512xbf16>
    %47 = vector.shape_cast %46 : vector<1x8x512xbf16> to vector<8x512xbf16>
    %c0_20 = arith.constant 0 : index
    %c0_21 = arith.constant 0 : index
    %48 = vector.load %arg11[%c0_20, %c0_21] : memref<8x128xbf16, #tpu.memory_space<vmem>>, vector<8x128xbf16>
    %c0_22 = arith.constant 0 : index
    %c0_23 = arith.constant 0 : index
    %49 = vector.load %arg12[%c0_22, %c0_23] : memref<8x128xf32, #tpu.memory_space<vmem>>, vector<8x128xf32>
    %50 = arith.extf %47 : vector<8x512xbf16> to vector<8x512xf32>
    %c0_24 = arith.constant 0 : index
    %c0_25 = arith.constant 0 : index
    %51 = vector.load %arg4[%c0_24, %c0_25] : memref<128x512xbf16, #tpu.memory_space<vmem>>, vector<128x512xbf16>
    %cst_26 = arith.constant dense<0.000000e+00> : vector<8x512xf32>
    %52 = tpu.matmul %48, %51, %cst_26 {dimension_numbers = #tpu.dot_dimension_numbers<[1], [0], [0], [1], [0, 0, 1, 1], [], []>} : vector<8x128xbf16>, vector<128x512xbf16>, vector<8x512xf32> -> vector<8x512xf32>
    %53 = arith.addf %50, %52 : vector<8x512xf32>
    %54 = vector.extract_strided_slice %53 {offsets = [0, 0], sizes = [8, 128], strides = [1, 1]} : vector<8x512xf32> to vector<8x128xf32>
    %55 = arith.negf %54 : vector<8x128xf32>
    %56 = math.exp %55 : vector<8x128xf32>
    %cst_27 = arith.constant 1.000000e+00 : f32
    %57 = vector.broadcast %cst_27 : f32 to vector<8x128xf32>
    %58 = arith.addf %57, %56 : vector<8x128xf32>
    %59 = arith.divf %57, %58 : vector<8x128xf32>
    %60 = vector.extract_strided_slice %53 {offsets = [0, 128], sizes = [8, 128], strides = [1, 1]} : vector<8x512xf32> to vector<8x128xf32>
    %61 = arith.negf %60 : vector<8x128xf32>
    %62 = math.exp %61 : vector<8x128xf32>
    %cst_28 = arith.constant 1.000000e+00 : f32
    %63 = vector.broadcast %cst_28 : f32 to vector<8x128xf32>
    %64 = arith.addf %63, %62 : vector<8x128xf32>
    %65 = arith.divf %63, %64 : vector<8x128xf32>
    %66 = vector.extract_strided_slice %53 {offsets = [0, 256], sizes = [8, 128], strides = [1, 1]} : vector<8x512xf32> to vector<8x128xf32>
    %67 = math.tanh %66 : vector<8x128xf32>
    %68 = vector.extract_strided_slice %53 {offsets = [0, 384], sizes = [8, 128], strides = [1, 1]} : vector<8x512xf32> to vector<8x128xf32>
    %69 = arith.negf %68 : vector<8x128xf32>
    %70 = math.exp %69 : vector<8x128xf32>
    %cst_29 = arith.constant 1.000000e+00 : f32
    %71 = vector.broadcast %cst_29 : f32 to vector<8x128xf32>
    %72 = arith.addf %71, %70 : vector<8x128xf32>
    %73 = arith.divf %71, %72 : vector<8x128xf32>
    %74 = arith.mulf %65, %49 : vector<8x128xf32>
    %75 = arith.mulf %59, %67 : vector<8x128xf32>
    %76 = arith.addf %74, %75 : vector<8x128xf32>
    %77 = math.tanh %76 : vector<8x128xf32>
    %78 = arith.mulf %73, %77 : vector<8x128xf32>
    %79 = arith.truncf %78 : vector<8x128xf32> to vector<8x128xbf16>
    %c0_30 = arith.constant 0 : index
    %c0_31 = arith.constant 0 : index
    %80 = vector.load %arg11[%c0_30, %c0_31] : memref<8x128xbf16, #tpu.memory_space<vmem>>, vector<8x128xbf16>
    tpu.vector_store %arg11[%c0_30, %c0_31], %79 {strides = array<i32>} : memref<8x128xbf16, #tpu.memory_space<vmem>>, vector<8x128xbf16>,
    %c0_32 = arith.constant 0 : index
    %c0_33 = arith.constant 0 : index
    %81 = vector.load %arg12[%c0_32, %c0_33] : memref<8x128xf32, #tpu.memory_space<vmem>>, vector<8x128xf32>
    tpu.vector_store %arg12[%c0_32, %c0_33], %76 {strides = array<i32>} : memref<8x128xf32, #tpu.memory_space<vmem>>, vector<8x128xf32>,
    %82 = arith.index_cast %3 : i32 to index
    %c0_34 = arith.constant 0 : index
    %c0_35 = arith.constant 0 : index
    %83 = vector.load %arg6[%82, %c0_34, %c0_35] : memref<8x8x128xbf16, #tpu.memory_space<vmem>>, vector<1x8x128xbf16>
    %84 = vector.shape_cast %83 : vector<1x8x128xbf16> to vector<8x128xbf16>
    %85 = vector.shape_cast %79 : vector<8x128xbf16> to vector<1x8x128xbf16>
    tpu.vector_store %arg6[%82, %c0_34, %c0_35], %85 {strides = array<i32>} : memref<8x8x128xbf16, #tpu.memory_space<vmem>>, vector<1x8x128xbf16>,
    %c1_i32 = arith.constant 1 : i32
    %c7_i32_36 = arith.constant 7 : i32
    %86 = arith.subi %c7_i32_36, %c1_i32 : i32
    %87 = arith.index_cast %c1_i32 : i32 to index
    %c0_37 = arith.constant 0 : index
    %c0_38 = arith.constant 0 : index
    %88 = vector.load %arg1[%87, %c0_37, %c0_38] : memref<8x8x512xbf16, #tpu.memory_space<vmem>>, vector<1x8x512xbf16>
    %89 = vector.shape_cast %88 : vector<1x8x512xbf16> to vector<8x512xbf16>
    %c0_39 = arith.constant 0 : index
    %c0_40 = arith.constant 0 : index
    %90 = vector.load %arg9[%c0_39, %c0_40] : memref<8x128xbf16, #tpu.memory_space<vmem>>, vector<8x128xbf16>
    %c0_41 = arith.constant 0 : index
    %c0_42 = arith.constant 0 : index
    %91 = vector.load %arg10[%c0_41, %c0_42] : memref<8x128xf32, #tpu.memory_space<vmem>>, vector<8x128xf32>
    %92 = arith.extf %89 : vector<8x512xbf16> to vector<8x512xf32>
    %c0_43 = arith.constant 0 : index
    %c0_44 = arith.constant 0 : index
    %93 = vector.load %arg3[%c0_43, %c0_44] : memref<128x512xbf16, #tpu.memory_space<vmem>>, vector<128x512xbf16>
    %cst_45 = arith.constant dense<0.000000e+00> : vector<8x512xf32>
    %94 = tpu.matmul %90, %93, %cst_45 {dimension_numbers = #tpu.dot_dimension_numbers<[1], [0], [0], [1], [0, 0, 1, 1], [], []>} : vector<8x128xbf16>, vector<128x512xbf16>, vector<8x512xf32> -> vector<8x512xf32>
    %95 = arith.addf %92, %94 : vector<8x512xf32>
    %96 = vector.extract_strided_slice %95 {offsets = [0, 0], sizes = [8, 128], strides = [1, 1]} : vector<8x512xf32> to vector<8x128xf32>
    %97 = arith.negf %96 : vector<8x128xf32>
    %98 = math.exp %97 : vector<8x128xf32>
    %cst_46 = arith.constant 1.000000e+00 : f32
    %99 = vector.broadcast %cst_46 : f32 to vector<8x128xf32>
    %100 = arith.addf %99, %98 : vector<8x128xf32>
    %101 = arith.divf %99, %100 : vector<8x128xf32>
    %102 = vector.extract_strided_slice %95 {offsets = [0, 128], sizes = [8, 128], strides = [1, 1]} : vector<8x512xf32> to vector<8x128xf32>
    %103 = arith.negf %102 : vector<8x128xf32>
    %104 = math.exp %103 : vector<8x128xf32>
    %cst_47 = arith.constant 1.000000e+00 : f32
    %105 = vector.broadcast %cst_47 : f32 to vector<8x128xf32>
    %106 = arith.addf %105, %104 : vector<8x128xf32>
    %107 = arith.divf %105, %106 : vector<8x128xf32>
    %108 = vector.extract_strided_slice %95 {offsets = [0, 256], sizes = [8, 128], strides = [1, 1]} : vector<8x512xf32> to vector<8x128xf32>
    %109 = math.tanh %108 : vector<8x128xf32>
    %110 = vector.extract_strided_slice %95 {offsets = [0, 384], sizes = [8, 128], strides = [1, 1]} : vector<8x512xf32> to vector<8x128xf32>
    %111 = arith.negf %110 : vector<8x128xf32>
    %112 = math.exp %111 : vector<8x128xf32>
    %cst_48 = arith.constant 1.000000e+00 : f32
    %113 = vector.broadcast %cst_48 : f32 to vector<8x128xf32>
    %114 = arith.addf %113, %112 : vector<8x128xf32>
    %115 = arith.divf %113, %114 : vector<8x128xf32>
    %116 = arith.mulf %107, %91 : vector<8x128xf32>
    %117 = arith.mulf %101, %109 : vector<8x128xf32>
    %118 = arith.addf %116, %117 : vector<8x128xf32>
    %119 = math.tanh %118 : vector<8x128xf32>
    %120 = arith.mulf %115, %119 : vector<8x128xf32>
    %121 = arith.truncf %120 : vector<8x128xf32> to vector<8x128xbf16>
    %c0_49 = arith.constant 0 : index
    %c0_50 = arith.constant 0 : index
    %122 = vector.load %arg9[%c0_49, %c0_50] : memref<8x128xbf16, #tpu.memory_space<vmem>>, vector<8x128xbf16>
    tpu.vector_store %arg9[%c0_49, %c0_50], %121 {strides = array<i32>} : memref<8x128xbf16, #tpu.memory_space<vmem>>, vector<8x128xbf16>,
    %c0_51 = arith.constant 0 : index
    %c0_52 = arith.constant 0 : index
    %123 = vector.load %arg10[%c0_51, %c0_52] : memref<8x128xf32, #tpu.memory_space<vmem>>, vector<8x128xf32>
    tpu.vector_store %arg10[%c0_51, %c0_52], %118 {strides = array<i32>} : memref<8x128xf32, #tpu.memory_space<vmem>>, vector<8x128xf32>,
    %124 = arith.index_cast %c1_i32 : i32 to index
    %c0_53 = arith.constant 0 : index
    %c0_54 = arith.constant 0 : index
    %125 = vector.load %arg5[%124, %c0_53, %c0_54] : memref<8x8x128xbf16, #tpu.memory_space<vmem>>, vector<1x8x128xbf16>
    %126 = vector.shape_cast %125 : vector<1x8x128xbf16> to vector<8x128xbf16>
    %127 = vector.shape_cast %121 : vector<8x128xbf16> to vector<1x8x128xbf16>
    tpu.vector_store %arg5[%124, %c0_53, %c0_54], %127 {strides = array<i32>} : memref<8x8x128xbf16, #tpu.memory_space<vmem>>, vector<1x8x128xbf16>,
    %128 = arith.index_cast %86 : i32 to index
    %c0_55 = arith.constant 0 : index
    %c0_56 = arith.constant 0 : index
    %129 = vector.load %arg2[%128, %c0_55, %c0_56] : memref<8x8x512xbf16, #tpu.memory_space<vmem>>, vector<1x8x512xbf16>
    %130 = vector.shape_cast %129 : vector<1x8x512xbf16> to vector<8x512xbf16>
    %c0_57 = arith.constant 0 : index
    %c0_58 = arith.constant 0 : index
    %131 = vector.load %arg11[%c0_57, %c0_58] : memref<8x128xbf16, #tpu.memory_space<vmem>>, vector<8x128xbf16>
    %c0_59 = arith.constant 0 : index
    %c0_60 = arith.constant 0 : index
    %132 = vector.load %arg12[%c0_59, %c0_60] : memref<8x128xf32, #tpu.memory_space<vmem>>, vector<8x128xf32>
    %133 = arith.extf %130 : vector<8x512xbf16> to vector<8x512xf32>
    %c0_61 = arith.constant 0 : index
    %c0_62 = arith.constant 0 : index
    %134 = vector.load %arg4[%c0_61, %c0_62] : memref<128x512xbf16, #tpu.memory_space<vmem>>, vector<128x512xbf16>
    %cst_63 = arith.constant dense<0.000000e+00> : vector<8x512xf32>
    %135 = tpu.matmul %131, %134, %cst_63 {dimension_numbers = #tpu.dot_dimension_numbers<[1], [0], [0], [1], [0, 0, 1, 1], [], []>} : vector<8x128xbf16>, vector<128x512xbf16>, vector<8x512xf32> -> vector<8x512xf32>
    %136 = arith.addf %133, %135 : vector<8x512xf32>
    %137 = vector.extract_strided_slice %136 {offsets = [0, 0], sizes = [8, 128], strides = [1, 1]} : vector<8x512xf32> to vector<8x128xf32>
    %138 = arith.negf %137 : vector<8x128xf32>
    %139 = math.exp %138 : vector<8x128xf32>
    %cst_64 = arith.constant 1.000000e+00 : f32
    %140 = vector.broadcast %cst_64 : f32 to vector<8x128xf32>
    %141 = arith.addf %140, %139 : vector<8x128xf32>
    %142 = arith.divf %140, %141 : vector<8x128xf32>
    %143 = vector.extract_strided_slice %136 {offsets = [0, 128], sizes = [8, 128], strides = [1, 1]} : vector<8x512xf32> to vector<8x128xf32>
    %144 = arith.negf %143 : vector<8x128xf32>
    %145 = math.exp %144 : vector<8x128xf32>
    %cst_65 = arith.constant 1.000000e+00 : f32
    %146 = vector.broadcast %cst_65 : f32 to vector<8x128xf32>
    %147 = arith.addf %146, %145 : vector<8x128xf32>
    %148 = arith.divf %146, %147 : vector<8x128xf32>
    %149 = vector.extract_strided_slice %136 {offsets = [0, 256], sizes = [8, 128], strides = [1, 1]} : vector<8x512xf32> to vector<8x128xf32>
    %150 = math.tanh %149 : vector<8x128xf32>
    %151 = vector.extract_strided_slice %136 {offsets = [0, 384], sizes = [8, 128], strides = [1, 1]} : vector<8x512xf32> to vector<8x128xf32>
    %152 = arith.negf %151 : vector<8x128xf32>
    %153 = math.exp %152 : vector<8x128xf32>
    %cst_66 = arith.constant 1.000000e+00 : f32
    %154 = vector.broadcast %cst_66 : f32 to vector<8x128xf32>
    %155 = arith.addf %154, %153 : vector<8x128xf32>
    %156 = arith.divf %154, %155 : vector<8x128xf32>
    %157 = arith.mulf %148, %132 : vector<8x128xf32>
    %158 = arith.mulf %142, %150 : vector<8x128xf32>
    %159 = arith.addf %157, %158 : vector<8x128xf32>
    %160 = math.tanh %159 : vector<8x128xf32>
    %161 = arith.mulf %156, %160 : vector<8x128xf32>
    %162 = arith.truncf %161 : vector<8x128xf32> to vector<8x128xbf16>
    %c0_67 = arith.constant 0 : index
    %c0_68 = arith.constant 0 : index
    %163 = vector.load %arg11[%c0_67, %c0_68] : memref<8x128xbf16, #tpu.memory_space<vmem>>, vector<8x128xbf16>
    tpu.vector_store %arg11[%c0_67, %c0_68], %162 {strides = array<i32>} : memref<8x128xbf16, #tpu.memory_space<vmem>>, vector<8x128xbf16>,
    %c0_69 = arith.constant 0 : index
    %c0_70 = arith.constant 0 : index
    %164 = vector.load %arg12[%c0_69, %c0_70] : memref<8x128xf32, #tpu.memory_space<vmem>>, vector<8x128xf32>
    tpu.vector_store %arg12[%c0_69, %c0_70], %159 {strides = array<i32>} : memref<8x128xf32, #tpu.memory_space<vmem>>, vector<8x128xf32>,
    %165 = arith.index_cast %86 : i32 to index
    %c0_71 = arith.constant 0 : index
    %c0_72 = arith.constant 0 : index
    %166 = vector.load %arg6[%165, %c0_71, %c0_72] : memref<8x8x128xbf16, #tpu.memory_space<vmem>>, vector<1x8x128xbf16>
    %167 = vector.shape_cast %166 : vector<1x8x128xbf16> to vector<8x128xbf16>
    %168 = vector.shape_cast %162 : vector<8x128xbf16> to vector<1x8x128xbf16>
    tpu.vector_store %arg6[%165, %c0_71, %c0_72], %168 {strides = array<i32>} : memref<8x8x128xbf16, #tpu.memory_space<vmem>>, vector<1x8x128xbf16>,
    %c2_i32 = arith.constant 2 : i32
    %c7_i32_73 = arith.constant 7 : i32
    %169 = arith.subi %c7_i32_73, %c2_i32 : i32
    %170 = arith.index_cast %c2_i32 : i32 to index
    %c0_74 = arith.constant 0 : index
    %c0_75 = arith.constant 0 : index
    %171 = vector.load %arg1[%170, %c0_74, %c0_75] : memref<8x8x512xbf16, #tpu.memory_space<vmem>>, vector<1x8x512xbf16>
    %172 = vector.shape_cast %171 : vector<1x8x512xbf16> to vector<8x512xbf16>
    %c0_76 = arith.constant 0 : index
    %c0_77 = arith.constant 0 : index
    %173 = vector.load %arg9[%c0_76, %c0_77] : memref<8x128xbf16, #tpu.memory_space<vmem>>, vector<8x128xbf16>
    %c0_78 = arith.constant 0 : index
    %c0_79 = arith.constant 0 : index
    %174 = vector.load %arg10[%c0_78, %c0_79] : memref<8x128xf32, #tpu.memory_space<vmem>>, vector<8x128xf32>
    %175 = arith.extf %172 : vector<8x512xbf16> to vector<8x512xf32>
    %c0_80 = arith.constant 0 : index
    %c0_81 = arith.constant 0 : index
    %176 = vector.load %arg3[%c0_80, %c0_81] : memref<128x512xbf16, #tpu.memory_space<vmem>>, vector<128x512xbf16>
    %cst_82 = arith.constant dense<0.000000e+00> : vector<8x512xf32>
    %177 = tpu.matmul %173, %176, %cst_82 {dimension_numbers = #tpu.dot_dimension_numbers<[1], [0], [0], [1], [0, 0, 1, 1], [], []>} : vector<8x128xbf16>, vector<128x512xbf16>, vector<8x512xf32> -> vector<8x512xf32>
    %178 = arith.addf %175, %177 : vector<8x512xf32>
    %179 = vector.extract_strided_slice %178 {offsets = [0, 0], sizes = [8, 128], strides = [1, 1]} : vector<8x512xf32> to vector<8x128xf32>
    %180 = arith.negf %179 : vector<8x128xf32>
    %181 = math.exp %180 : vector<8x128xf32>
    %cst_83 = arith.constant 1.000000e+00 : f32
    %182 = vector.broadcast %cst_83 : f32 to vector<8x128xf32>
    %183 = arith.addf %182, %181 : vector<8x128xf32>
    %184 = arith.divf %182, %183 : vector<8x128xf32>
    %185 = vector.extract_strided_slice %178 {offsets = [0, 128], sizes = [8, 128], strides = [1, 1]} : vector<8x512xf32> to vector<8x128xf32>
    %186 = arith.negf %185 : vector<8x128xf32>
    %187 = math.exp %186 : vector<8x128xf32>
    %cst_84 = arith.constant 1.000000e+00 : f32
    %188 = vector.broadcast %cst_84 : f32 to vector<8x128xf32>
    %189 = arith.addf %188, %187 : vector<8x128xf32>
    %190 = arith.divf %188, %189 : vector<8x128xf32>
    %191 = vector.extract_strided_slice %178 {offsets = [0, 256], sizes = [8, 128], strides = [1, 1]} : vector<8x512xf32> to vector<8x128xf32>
    %192 = math.tanh %191 : vector<8x128xf32>
    %193 = vector.extract_strided_slice %178 {offsets = [0, 384], sizes = [8, 128], strides = [1, 1]} : vector<8x512xf32> to vector<8x128xf32>
    %194 = arith.negf %193 : vector<8x128xf32>
    %195 = math.exp %194 : vector<8x128xf32>
    %cst_85 = arith.constant 1.000000e+00 : f32
    %196 = vector.broadcast %cst_85 : f32 to vector<8x128xf32>
    %197 = arith.addf %196, %195 : vector<8x128xf32>
    %198 = arith.divf %196, %197 : vector<8x128xf32>
    %199 = arith.mulf %190, %174 : vector<8x128xf32>
    %200 = arith.mulf %184, %192 : vector<8x128xf32>
    %201 = arith.addf %199, %200 : vector<8x128xf32>
    %202 = math.tanh %201 : vector<8x128xf32>
    %203 = arith.mulf %198, %202 : vector<8x128xf32>
    %204 = arith.truncf %203 : vector<8x128xf32> to vector<8x128xbf16>
    %c0_86 = arith.constant 0 : index
    %c0_87 = arith.constant 0 : index
    %205 = vector.load %arg9[%c0_86, %c0_87] : memref<8x128xbf16, #tpu.memory_space<vmem>>, vector<8x128xbf16>
    tpu.vector_store %arg9[%c0_86, %c0_87], %204 {strides = array<i32>} : memref<8x128xbf16, #tpu.memory_space<vmem>>, vector<8x128xbf16>,
    %c0_88 = arith.constant 0 : index
    %c0_89 = arith.constant 0 : index
    %206 = vector.load %arg10[%c0_88, %c0_89] : memref<8x128xf32, #tpu.memory_space<vmem>>, vector<8x128xf32>
    tpu.vector_store %arg10[%c0_88, %c0_89], %201 {strides = array<i32>} : memref<8x128xf32, #tpu.memory_space<vmem>>, vector<8x128xf32>,
    %207 = arith.index_cast %c2_i32 : i32 to index
    %c0_90 = arith.constant 0 : index
    %c0_91 = arith.constant 0 : index
    %208 = vector.load %arg5[%207, %c0_90, %c0_91] : memref<8x8x128xbf16, #tpu.memory_space<vmem>>, vector<1x8x128xbf16>
    %209 = vector.shape_cast %208 : vector<1x8x128xbf16> to vector<8x128xbf16>
    %210 = vector.shape_cast %204 : vector<8x128xbf16> to vector<1x8x128xbf16>
    tpu.vector_store %arg5[%207, %c0_90, %c0_91], %210 {strides = array<i32>} : memref<8x8x128xbf16, #tpu.memory_space<vmem>>, vector<1x8x128xbf16>,
    %211 = arith.index_cast %169 : i32 to index
    %c0_92 = arith.constant 0 : index
    %c0_93 = arith.constant 0 : index
    %212 = vector.load %arg2[%211, %c0_92, %c0_93] : memref<8x8x512xbf16, #tpu.memory_space<vmem>>, vector<1x8x512xbf16>
    %213 = vector.shape_cast %212 : vector<1x8x512xbf16> to vector<8x512xbf16>
    %c0_94 = arith.constant 0 : index
    %c0_95 = arith.constant 0 : index
    %214 = vector.load %arg11[%c0_94, %c0_95] : memref<8x128xbf16, #tpu.memory_space<vmem>>, vector<8x128xbf16>
    %c0_96 = arith.constant 0 : index
    %c0_97 = arith.constant 0 : index
    %215 = vector.load %arg12[%c0_96, %c0_97] : memref<8x128xf32, #tpu.memory_space<vmem>>, vector<8x128xf32>
    %216 = arith.extf %213 : vector<8x512xbf16> to vector<8x512xf32>
    %c0_98 = arith.constant 0 : index
    %c0_99 = arith.constant 0 : index
    %217 = vector.load %arg4[%c0_98, %c0_99] : memref<128x512xbf16, #tpu.memory_space<vmem>>, vector<128x512xbf16>
    %cst_100 = arith.constant dense<0.000000e+00> : vector<8x512xf32>
    %218 = tpu.matmul %214, %217, %cst_100 {dimension_numbers = #tpu.dot_dimension_numbers<[1], [0], [0], [1], [0, 0, 1, 1], [], []>} : vector<8x128xbf16>, vector<128x512xbf16>, vector<8x512xf32> -> vector<8x512xf32>
    %219 = arith.addf %216, %218 : vector<8x512xf32>
    %220 = vector.extract_strided_slice %219 {offsets = [0, 0], sizes = [8, 128], strides = [1, 1]} : vector<8x512xf32> to vector<8x128xf32>
    %221 = arith.negf %220 : vector<8x128xf32>
    %222 = math.exp %221 : vector<8x128xf32>
    %cst_101 = arith.constant 1.000000e+00 : f32
    %223 = vector.broadcast %cst_101 : f32 to vector<8x128xf32>
    %224 = arith.addf %223, %222 : vector<8x128xf32>
    %225 = arith.divf %223, %224 : vector<8x128xf32>
    %226 = vector.extract_strided_slice %219 {offsets = [0, 128], sizes = [8, 128], strides = [1, 1]} : vector<8x512xf32> to vector<8x128xf32>
    %227 = arith.negf %226 : vector<8x128xf32>
    %228 = math.exp %227 : vector<8x128xf32>
    %cst_102 = arith.constant 1.000000e+00 : f32
    %229 = vector.broadcast %cst_102 : f32 to vector<8x128xf32>
    %230 = arith.addf %229, %228 : vector<8x128xf32>
    %231 = arith.divf %229, %230 : vector<8x128xf32>
    %232 = vector.extract_strided_slice %219 {offsets = [0, 256], sizes = [8, 128], strides = [1, 1]} : vector<8x512xf32> to vector<8x128xf32>
    %233 = math.tanh %232 : vector<8x128xf32>
    %234 = vector.extract_strided_slice %219 {offsets = [0, 384], sizes = [8, 128], strides = [1, 1]} : vector<8x512xf32> to vector<8x128xf32>
    %235 = arith.negf %234 : vector<8x128xf32>
    %236 = math.exp %235 : vector<8x128xf32>
    %cst_103 = arith.constant 1.000000e+00 : f32
    %237 = vector.broadcast %cst_103 : f32 to vector<8x128xf32>
    %238 = arith.addf %237, %236 : vector<8x128xf32>
    %239 = arith.divf %237, %238 : vector<8x128xf32>
    %240 = arith.mulf %231, %215 : vector<8x128xf32>
    %241 = arith.mulf %225, %233 : vector<8x128xf32>
    %242 = arith.addf %240, %241 : vector<8x128xf32>
    %243 = math.tanh %242 : vector<8x128xf32>
    %244 = arith.mulf %239, %243 : vector<8x128xf32>
    %245 = arith.truncf %244 : vector<8x128xf32> to vector<8x128xbf16>
    %c0_104 = arith.constant 0 : index
    %c0_105 = arith.constant 0 : index
    %246 = vector.load %arg11[%c0_104, %c0_105] : memref<8x128xbf16, #tpu.memory_space<vmem>>, vector<8x128xbf16>
    tpu.vector_store %arg11[%c0_104, %c0_105], %245 {strides = array<i32>} : memref<8x128xbf16, #tpu.memory_space<vmem>>, vector<8x128xbf16>,
    %c0_106 = arith.constant 0 : index
    %c0_107 = arith.constant 0 : index
    %247 = vector.load %arg12[%c0_106, %c0_107] : memref<8x128xf32, #tpu.memory_space<vmem>>, vector<8x128xf32>
    tpu.vector_store %arg12[%c0_106, %c0_107], %242 {strides = array<i32>} : memref<8x128xf32, #tpu.memory_space<vmem>>, vector<8x128xf32>,
    %248 = arith.index_cast %169 : i32 to index
    %c0_108 = arith.constant 0 : index
    %c0_109 = arith.constant 0 : index
    %249 = vector.load %arg6[%248, %c0_108, %c0_109] : memref<8x8x128xbf16, #tpu.memory_space<vmem>>, vector<1x8x128xbf16>
    %250 = vector.shape_cast %249 : vector<1x8x128xbf16> to vector<8x128xbf16>
    %251 = vector.shape_cast %245 : vector<8x128xbf16> to vector<1x8x128xbf16>
    tpu.vector_store %arg6[%248, %c0_108, %c0_109], %251 {strides = array<i32>} : memref<8x8x128xbf16, #tpu.memory_space<vmem>>, vector<1x8x128xbf16>,
    %c3_i32 = arith.constant 3 : i32
    %c7_i32_110 = arith.constant 7 : i32
    %252 = arith.subi %c7_i32_110, %c3_i32 : i32
    %253 = arith.index_cast %c3_i32 : i32 to index
    %c0_111 = arith.constant 0 : index
    %c0_112 = arith.constant 0 : index
    %254 = vector.load %arg1[%253, %c0_111, %c0_112] : memref<8x8x512xbf16, #tpu.memory_space<vmem>>, vector<1x8x512xbf16>
    %255 = vector.shape_cast %254 : vector<1x8x512xbf16> to vector<8x512xbf16>
    %c0_113 = arith.constant 0 : index
    %c0_114 = arith.constant 0 : index
    %256 = vector.load %arg9[%c0_113, %c0_114] : memref<8x128xbf16, #tpu.memory_space<vmem>>, vector<8x128xbf16>
    %c0_115 = arith.constant 0 : index
    %c0_116 = arith.constant 0 : index
    %257 = vector.load %arg10[%c0_115, %c0_116] : memref<8x128xf32, #tpu.memory_space<vmem>>, vector<8x128xf32>
    %258 = arith.extf %255 : vector<8x512xbf16> to vector<8x512xf32>
    %c0_117 = arith.constant 0 : index
    %c0_118 = arith.constant 0 : index
    %259 = vector.load %arg3[%c0_117, %c0_118] : memref<128x512xbf16, #tpu.memory_space<vmem>>, vector<128x512xbf16>
    %cst_119 = arith.constant dense<0.000000e+00> : vector<8x512xf32>
    %260 = tpu.matmul %256, %259, %cst_119 {dimension_numbers = #tpu.dot_dimension_numbers<[1], [0], [0], [1], [0, 0, 1, 1], [], []>} : vector<8x128xbf16>, vector<128x512xbf16>, vector<8x512xf32> -> vector<8x512xf32>
    %261 = arith.addf %258, %260 : vector<8x512xf32>
    %262 = vector.extract_strided_slice %261 {offsets = [0, 0], sizes = [8, 128], strides = [1, 1]} : vector<8x512xf32> to vector<8x128xf32>
    %263 = arith.negf %262 : vector<8x128xf32>
    %264 = math.exp %263 : vector<8x128xf32>
    %cst_120 = arith.constant 1.000000e+00 : f32
    %265 = vector.broadcast %cst_120 : f32 to vector<8x128xf32>
    %266 = arith.addf %265, %264 : vector<8x128xf32>
    %267 = arith.divf %265, %266 : vector<8x128xf32>
    %268 = vector.extract_strided_slice %261 {offsets = [0, 128], sizes = [8, 128], strides = [1, 1]} : vector<8x512xf32> to vector<8x128xf32>
    %269 = arith.negf %268 : vector<8x128xf32>
    %270 = math.exp %269 : vector<8x128xf32>
    %cst_121 = arith.constant 1.000000e+00 : f32
    %271 = vector.broadcast %cst_121 : f32 to vector<8x128xf32>
    %272 = arith.addf %271, %270 : vector<8x128xf32>
    %273 = arith.divf %271, %272 : vector<8x128xf32>
    %274 = vector.extract_strided_slice %261 {offsets = [0, 256], sizes = [8, 128], strides = [1, 1]} : vector<8x512xf32> to vector<8x128xf32>
    %275 = math.tanh %274 : vector<8x128xf32>
    %276 = vector.extract_strided_slice %261 {offsets = [0, 384], sizes = [8, 128], strides = [1, 1]} : vector<8x512xf32> to vector<8x128xf32>
    %277 = arith.negf %276 : vector<8x128xf32>
    %278 = math.exp %277 : vector<8x128xf32>
    %cst_122 = arith.constant 1.000000e+00 : f32
    %279 = vector.broadcast %cst_122 : f32 to vector<8x128xf32>
    %280 = arith.addf %279, %278 : vector<8x128xf32>
    %281 = arith.divf %279, %280 : vector<8x128xf32>
    %282 = arith.mulf %273, %257 : vector<8x128xf32>
    %283 = arith.mulf %267, %275 : vector<8x128xf32>
    %284 = arith.addf %282, %283 : vector<8x128xf32>
    %285 = math.tanh %284 : vector<8x128xf32>
    %286 = arith.mulf %281, %285 : vector<8x128xf32>
    %287 = arith.truncf %286 : vector<8x128xf32> to vector<8x128xbf16>
    %c0_123 = arith.constant 0 : index
    %c0_124 = arith.constant 0 : index
    %288 = vector.load %arg9[%c0_123, %c0_124] : memref<8x128xbf16, #tpu.memory_space<vmem>>, vector<8x128xbf16>
    tpu.vector_store %arg9[%c0_123, %c0_124], %287 {strides = array<i32>} : memref<8x128xbf16, #tpu.memory_space<vmem>>, vector<8x128xbf16>,
    %c0_125 = arith.constant 0 : index
    %c0_126 = arith.constant 0 : index
    %289 = vector.load %arg10[%c0_125, %c0_126] : memref<8x128xf32, #tpu.memory_space<vmem>>, vector<8x128xf32>
    tpu.vector_store %arg10[%c0_125, %c0_126], %284 {strides = array<i32>} : memref<8x128xf32, #tpu.memory_space<vmem>>, vector<8x128xf32>,
    %290 = arith.index_cast %c3_i32 : i32 to index
    %c0_127 = arith.constant 0 : index
    %c0_128 = arith.constant 0 : index
    %291 = vector.load %arg5[%290, %c0_127, %c0_128] : memref<8x8x128xbf16, #tpu.memory_space<vmem>>, vector<1x8x128xbf16>
    %292 = vector.shape_cast %291 : vector<1x8x128xbf16> to vector<8x128xbf16>
    %293 = vector.shape_cast %287 : vector<8x128xbf16> to vector<1x8x128xbf16>
    tpu.vector_store %arg5[%290, %c0_127, %c0_128], %293 {strides = array<i32>} : memref<8x8x128xbf16, #tpu.memory_space<vmem>>, vector<1x8x128xbf16>,
    %294 = arith.index_cast %252 : i32 to index
    %c0_129 = arith.constant 0 : index
    %c0_130 = arith.constant 0 : index
    %295 = vector.load %arg2[%294, %c0_129, %c0_130] : memref<8x8x512xbf16, #tpu.memory_space<vmem>>, vector<1x8x512xbf16>
    %296 = vector.shape_cast %295 : vector<1x8x512xbf16> to vector<8x512xbf16>
    %c0_131 = arith.constant 0 : index
    %c0_132 = arith.constant 0 : index
    %297 = vector.load %arg11[%c0_131, %c0_132] : memref<8x128xbf16, #tpu.memory_space<vmem>>, vector<8x128xbf16>
    %c0_133 = arith.constant 0 : index
    %c0_134 = arith.constant 0 : index
    %298 = vector.load %arg12[%c0_133, %c0_134] : memref<8x128xf32, #tpu.memory_space<vmem>>, vector<8x128xf32>
    %299 = arith.extf %296 : vector<8x512xbf16> to vector<8x512xf32>
    %c0_135 = arith.constant 0 : index
    %c0_136 = arith.constant 0 : index
    %300 = vector.load %arg4[%c0_135, %c0_136] : memref<128x512xbf16, #tpu.memory_space<vmem>>, vector<128x512xbf16>
    %cst_137 = arith.constant dense<0.000000e+00> : vector<8x512xf32>
    %301 = tpu.matmul %297, %300, %cst_137 {dimension_numbers = #tpu.dot_dimension_numbers<[1], [0], [0], [1], [0, 0, 1, 1], [], []>} : vector<8x128xbf16>, vector<128x512xbf16>, vector<8x512xf32> -> vector<8x512xf32>
    %302 = arith.addf %299, %301 : vector<8x512xf32>
    %303 = vector.extract_strided_slice %302 {offsets = [0, 0], sizes = [8, 128], strides = [1, 1]} : vector<8x512xf32> to vector<8x128xf32>
    %304 = arith.negf %303 : vector<8x128xf32>
    %305 = math.exp %304 : vector<8x128xf32>
    %cst_138 = arith.constant 1.000000e+00 : f32
    %306 = vector.broadcast %cst_138 : f32 to vector<8x128xf32>
    %307 = arith.addf %306, %305 : vector<8x128xf32>
    %308 = arith.divf %306, %307 : vector<8x128xf32>
    %309 = vector.extract_strided_slice %302 {offsets = [0, 128], sizes = [8, 128], strides = [1, 1]} : vector<8x512xf32> to vector<8x128xf32>
    %310 = arith.negf %309 : vector<8x128xf32>
    %311 = math.exp %310 : vector<8x128xf32>
    %cst_139 = arith.constant 1.000000e+00 : f32
    %312 = vector.broadcast %cst_139 : f32 to vector<8x128xf32>
    %313 = arith.addf %312, %311 : vector<8x128xf32>
    %314 = arith.divf %312, %313 : vector<8x128xf32>
    %315 = vector.extract_strided_slice %302 {offsets = [0, 256], sizes = [8, 128], strides = [1, 1]} : vector<8x512xf32> to vector<8x128xf32>
    %316 = math.tanh %315 : vector<8x128xf32>
    %317 = vector.extract_strided_slice %302 {offsets = [0, 384], sizes = [8, 128], strides = [1, 1]} : vector<8x512xf32> to vector<8x128xf32>
    %318 = arith.negf %317 : vector<8x128xf32>
    %319 = math.exp %318 : vector<8x128xf32>
    %cst_140 = arith.constant 1.000000e+00 : f32
    %320 = vector.broadcast %cst_140 : f32 to vector<8x128xf32>
    %321 = arith.addf %320, %319 : vector<8x128xf32>
    %322 = arith.divf %320, %321 : vector<8x128xf32>
    %323 = arith.mulf %314, %298 : vector<8x128xf32>
    %324 = arith.mulf %308, %316 : vector<8x128xf32>
    %325 = arith.addf %323, %324 : vector<8x128xf32>
    %326 = math.tanh %325 : vector<8x128xf32>
    %327 = arith.mulf %322, %326 : vector<8x128xf32>
    %328 = arith.truncf %327 : vector<8x128xf32> to vector<8x128xbf16>
    %c0_141 = arith.constant 0 : index
    %c0_142 = arith.constant 0 : index
    %329 = vector.load %arg11[%c0_141, %c0_142] : memref<8x128xbf16, #tpu.memory_space<vmem>>, vector<8x128xbf16>
    tpu.vector_store %arg11[%c0_141, %c0_142], %328 {strides = array<i32>} : memref<8x128xbf16, #tpu.memory_space<vmem>>, vector<8x128xbf16>,
    %c0_143 = arith.constant 0 : index
    %c0_144 = arith.constant 0 : index
    %330 = vector.load %arg12[%c0_143, %c0_144] : memref<8x128xf32, #tpu.memory_space<vmem>>, vector<8x128xf32>
    tpu.vector_store %arg12[%c0_143, %c0_144], %325 {strides = array<i32>} : memref<8x128xf32, #tpu.memory_space<vmem>>, vector<8x128xf32>,
    %331 = arith.index_cast %252 : i32 to index
    %c0_145 = arith.constant 0 : index
    %c0_146 = arith.constant 0 : index
    %332 = vector.load %arg6[%331, %c0_145, %c0_146] : memref<8x8x128xbf16, #tpu.memory_space<vmem>>, vector<1x8x128xbf16>
    %333 = vector.shape_cast %332 : vector<1x8x128xbf16> to vector<8x128xbf16>
    %334 = vector.shape_cast %328 : vector<8x128xbf16> to vector<1x8x128xbf16>
    tpu.vector_store %arg6[%331, %c0_145, %c0_146], %334 {strides = array<i32>} : memref<8x8x128xbf16, #tpu.memory_space<vmem>>, vector<1x8x128xbf16>,
    %c4_i32 = arith.constant 4 : i32
    %c7_i32_147 = arith.constant 7 : i32
    %335 = arith.subi %c7_i32_147, %c4_i32 : i32
    %336 = arith.index_cast %c4_i32 : i32 to index
    %c0_148 = arith.constant 0 : index
    %c0_149 = arith.constant 0 : index
    %337 = vector.load %arg1[%336, %c0_148, %c0_149] : memref<8x8x512xbf16, #tpu.memory_space<vmem>>, vector<1x8x512xbf16>
    %338 = vector.shape_cast %337 : vector<1x8x512xbf16> to vector<8x512xbf16>
    %c0_150 = arith.constant 0 : index
    %c0_151 = arith.constant 0 : index
    %339 = vector.load %arg9[%c0_150, %c0_151] : memref<8x128xbf16, #tpu.memory_space<vmem>>, vector<8x128xbf16>
    %c0_152 = arith.constant 0 : index
    %c0_153 = arith.constant 0 : index
    %340 = vector.load %arg10[%c0_152, %c0_153] : memref<8x128xf32, #tpu.memory_space<vmem>>, vector<8x128xf32>
    %341 = arith.extf %338 : vector<8x512xbf16> to vector<8x512xf32>
    %c0_154 = arith.constant 0 : index
    %c0_155 = arith.constant 0 : index
    %342 = vector.load %arg3[%c0_154, %c0_155] : memref<128x512xbf16, #tpu.memory_space<vmem>>, vector<128x512xbf16>
    %cst_156 = arith.constant dense<0.000000e+00> : vector<8x512xf32>
    %343 = tpu.matmul %339, %342, %cst_156 {dimension_numbers = #tpu.dot_dimension_numbers<[1], [0], [0], [1], [0, 0, 1, 1], [], []>} : vector<8x128xbf16>, vector<128x512xbf16>, vector<8x512xf32> -> vector<8x512xf32>
    %344 = arith.addf %341, %343 : vector<8x512xf32>
    %345 = vector.extract_strided_slice %344 {offsets = [0, 0], sizes = [8, 128], strides = [1, 1]} : vector<8x512xf32> to vector<8x128xf32>
    %346 = arith.negf %345 : vector<8x128xf32>
    %347 = math.exp %346 : vector<8x128xf32>
    %cst_157 = arith.constant 1.000000e+00 : f32
    %348 = vector.broadcast %cst_157 : f32 to vector<8x128xf32>
    %349 = arith.addf %348, %347 : vector<8x128xf32>
    %350 = arith.divf %348, %349 : vector<8x128xf32>
    %351 = vector.extract_strided_slice %344 {offsets = [0, 128], sizes = [8, 128], strides = [1, 1]} : vector<8x512xf32> to vector<8x128xf32>
    %352 = arith.negf %351 : vector<8x128xf32>
    %353 = math.exp %352 : vector<8x128xf32>
    %cst_158 = arith.constant 1.000000e+00 : f32
    %354 = vector.broadcast %cst_158 : f32 to vector<8x128xf32>
    %355 = arith.addf %354, %353 : vector<8x128xf32>
    %356 = arith.divf %354, %355 : vector<8x128xf32>
    %357 = vector.extract_strided_slice %344 {offsets = [0, 256], sizes = [8, 128], strides = [1, 1]} : vector<8x512xf32> to vector<8x128xf32>
    %358 = math.tanh %357 : vector<8x128xf32>
    %359 = vector.extract_strided_slice %344 {offsets = [0, 384], sizes = [8, 128], strides = [1, 1]} : vector<8x512xf32> to vector<8x128xf32>
    %360 = arith.negf %359 : vector<8x128xf32>
    %361 = math.exp %360 : vector<8x128xf32>
    %cst_159 = arith.constant 1.000000e+00 : f32
    %362 = vector.broadcast %cst_159 : f32 to vector<8x128xf32>
    %363 = arith.addf %362, %361 : vector<8x128xf32>
    %364 = arith.divf %362, %363 : vector<8x128xf32>
    %365 = arith.mulf %356, %340 : vector<8x128xf32>
    %366 = arith.mulf %350, %358 : vector<8x128xf32>
    %367 = arith.addf %365, %366 : vector<8x128xf32>
    %368 = math.tanh %367 : vector<8x128xf32>
    %369 = arith.mulf %364, %368 : vector<8x128xf32>
    %370 = arith.truncf %369 : vector<8x128xf32> to vector<8x128xbf16>
    %c0_160 = arith.constant 0 : index
    %c0_161 = arith.constant 0 : index
    %371 = vector.load %arg9[%c0_160, %c0_161] : memref<8x128xbf16, #tpu.memory_space<vmem>>, vector<8x128xbf16>
    tpu.vector_store %arg9[%c0_160, %c0_161], %370 {strides = array<i32>} : memref<8x128xbf16, #tpu.memory_space<vmem>>, vector<8x128xbf16>,
    %c0_162 = arith.constant 0 : index
    %c0_163 = arith.constant 0 : index
    %372 = vector.load %arg10[%c0_162, %c0_163] : memref<8x128xf32, #tpu.memory_space<vmem>>, vector<8x128xf32>
    tpu.vector_store %arg10[%c0_162, %c0_163], %367 {strides = array<i32>} : memref<8x128xf32, #tpu.memory_space<vmem>>, vector<8x128xf32>,
    %373 = arith.index_cast %c4_i32 : i32 to index
    %c0_164 = arith.constant 0 : index
    %c0_165 = arith.constant 0 : index
    %374 = vector.load %arg5[%373, %c0_164, %c0_165] : memref<8x8x128xbf16, #tpu.memory_space<vmem>>, vector<1x8x128xbf16>
    %375 = vector.shape_cast %374 : vector<1x8x128xbf16> to vector<8x128xbf16>
    %376 = vector.shape_cast %370 : vector<8x128xbf16> to vector<1x8x128xbf16>
    tpu.vector_store %arg5[%373, %c0_164, %c0_165], %376 {strides = array<i32>} : memref<8x8x128xbf16, #tpu.memory_space<vmem>>, vector<1x8x128xbf16>,
    %377 = arith.index_cast %335 : i32 to index
    %c0_166 = arith.constant 0 : index
    %c0_167 = arith.constant 0 : index
    %378 = vector.load %arg2[%377, %c0_166, %c0_167] : memref<8x8x512xbf16, #tpu.memory_space<vmem>>, vector<1x8x512xbf16>
    %379 = vector.shape_cast %378 : vector<1x8x512xbf16> to vector<8x512xbf16>
    %c0_168 = arith.constant 0 : index
    %c0_169 = arith.constant 0 : index
    %380 = vector.load %arg11[%c0_168, %c0_169] : memref<8x128xbf16, #tpu.memory_space<vmem>>, vector<8x128xbf16>
    %c0_170 = arith.constant 0 : index
    %c0_171 = arith.constant 0 : index
    %381 = vector.load %arg12[%c0_170, %c0_171] : memref<8x128xf32, #tpu.memory_space<vmem>>, vector<8x128xf32>
    %382 = arith.extf %379 : vector<8x512xbf16> to vector<8x512xf32>
    %c0_172 = arith.constant 0 : index
    %c0_173 = arith.constant 0 : index
    %383 = vector.load %arg4[%c0_172, %c0_173] : memref<128x512xbf16, #tpu.memory_space<vmem>>, vector<128x512xbf16>
    %cst_174 = arith.constant dense<0.000000e+00> : vector<8x512xf32>
    %384 = tpu.matmul %380, %383, %cst_174 {dimension_numbers = #tpu.dot_dimension_numbers<[1], [0], [0], [1], [0, 0, 1, 1], [], []>} : vector<8x128xbf16>, vector<128x512xbf16>, vector<8x512xf32> -> vector<8x512xf32>
    %385 = arith.addf %382, %384 : vector<8x512xf32>
    %386 = vector.extract_strided_slice %385 {offsets = [0, 0], sizes = [8, 128], strides = [1, 1]} : vector<8x512xf32> to vector<8x128xf32>
    %387 = arith.negf %386 : vector<8x128xf32>
    %388 = math.exp %387 : vector<8x128xf32>
    %cst_175 = arith.constant 1.000000e+00 : f32
    %389 = vector.broadcast %cst_175 : f32 to vector<8x128xf32>
    %390 = arith.addf %389, %388 : vector<8x128xf32>
    %391 = arith.divf %389, %390 : vector<8x128xf32>
    %392 = vector.extract_strided_slice %385 {offsets = [0, 128], sizes = [8, 128], strides = [1, 1]} : vector<8x512xf32> to vector<8x128xf32>
    %393 = arith.negf %392 : vector<8x128xf32>
    %394 = math.exp %393 : vector<8x128xf32>
    %cst_176 = arith.constant 1.000000e+00 : f32
    %395 = vector.broadcast %cst_176 : f32 to vector<8x128xf32>
    %396 = arith.addf %395, %394 : vector<8x128xf32>
    %397 = arith.divf %395, %396 : vector<8x128xf32>
    %398 = vector.extract_strided_slice %385 {offsets = [0, 256], sizes = [8, 128], strides = [1, 1]} : vector<8x512xf32> to vector<8x128xf32>
    %399 = math.tanh %398 : vector<8x128xf32>
    %400 = vector.extract_strided_slice %385 {offsets = [0, 384], sizes = [8, 128], strides = [1, 1]} : vector<8x512xf32> to vector<8x128xf32>
    %401 = arith.negf %400 : vector<8x128xf32>
    %402 = math.exp %401 : vector<8x128xf32>
    %cst_177 = arith.constant 1.000000e+00 : f32
    %403 = vector.broadcast %cst_177 : f32 to vector<8x128xf32>
    %404 = arith.addf %403, %402 : vector<8x128xf32>
    %405 = arith.divf %403, %404 : vector<8x128xf32>
    %406 = arith.mulf %397, %381 : vector<8x128xf32>
    %407 = arith.mulf %391, %399 : vector<8x128xf32>
    %408 = arith.addf %406, %407 : vector<8x128xf32>
    %409 = math.tanh %408 : vector<8x128xf32>
    %410 = arith.mulf %405, %409 : vector<8x128xf32>
    %411 = arith.truncf %410 : vector<8x128xf32> to vector<8x128xbf16>
    %c0_178 = arith.constant 0 : index
    %c0_179 = arith.constant 0 : index
    %412 = vector.load %arg11[%c0_178, %c0_179] : memref<8x128xbf16, #tpu.memory_space<vmem>>, vector<8x128xbf16>
    tpu.vector_store %arg11[%c0_178, %c0_179], %411 {strides = array<i32>} : memref<8x128xbf16, #tpu.memory_space<vmem>>, vector<8x128xbf16>,
    %c0_180 = arith.constant 0 : index
    %c0_181 = arith.constant 0 : index
    %413 = vector.load %arg12[%c0_180, %c0_181] : memref<8x128xf32, #tpu.memory_space<vmem>>, vector<8x128xf32>
    tpu.vector_store %arg12[%c0_180, %c0_181], %408 {strides = array<i32>} : memref<8x128xf32, #tpu.memory_space<vmem>>, vector<8x128xf32>,
    %414 = arith.index_cast %335 : i32 to index
    %c0_182 = arith.constant 0 : index
    %c0_183 = arith.constant 0 : index
    %415 = vector.load %arg6[%414, %c0_182, %c0_183] : memref<8x8x128xbf16, #tpu.memory_space<vmem>>, vector<1x8x128xbf16>
    %416 = vector.shape_cast %415 : vector<1x8x128xbf16> to vector<8x128xbf16>
    %417 = vector.shape_cast %411 : vector<8x128xbf16> to vector<1x8x128xbf16>
    tpu.vector_store %arg6[%414, %c0_182, %c0_183], %417 {strides = array<i32>} : memref<8x8x128xbf16, #tpu.memory_space<vmem>>, vector<1x8x128xbf16>,
    %c5_i32 = arith.constant 5 : i32
    %c7_i32_184 = arith.constant 7 : i32
    %418 = arith.subi %c7_i32_184, %c5_i32 : i32
    %419 = arith.index_cast %c5_i32 : i32 to index
    %c0_185 = arith.constant 0 : index
    %c0_186 = arith.constant 0 : index
    %420 = vector.load %arg1[%419, %c0_185, %c0_186] : memref<8x8x512xbf16, #tpu.memory_space<vmem>>, vector<1x8x512xbf16>
    %421 = vector.shape_cast %420 : vector<1x8x512xbf16> to vector<8x512xbf16>
    %c0_187 = arith.constant 0 : index
    %c0_188 = arith.constant 0 : index
    %422 = vector.load %arg9[%c0_187, %c0_188] : memref<8x128xbf16, #tpu.memory_space<vmem>>, vector<8x128xbf16>
    %c0_189 = arith.constant 0 : index
    %c0_190 = arith.constant 0 : index
    %423 = vector.load %arg10[%c0_189, %c0_190] : memref<8x128xf32, #tpu.memory_space<vmem>>, vector<8x128xf32>
    %424 = arith.extf %421 : vector<8x512xbf16> to vector<8x512xf32>
    %c0_191 = arith.constant 0 : index
    %c0_192 = arith.constant 0 : index
    %425 = vector.load %arg3[%c0_191, %c0_192] : memref<128x512xbf16, #tpu.memory_space<vmem>>, vector<128x512xbf16>
    %cst_193 = arith.constant dense<0.000000e+00> : vector<8x512xf32>
    %426 = tpu.matmul %422, %425, %cst_193 {dimension_numbers = #tpu.dot_dimension_numbers<[1], [0], [0], [1], [0, 0, 1, 1], [], []>} : vector<8x128xbf16>, vector<128x512xbf16>, vector<8x512xf32> -> vector<8x512xf32>
    %427 = arith.addf %424, %426 : vector<8x512xf32>
    %428 = vector.extract_strided_slice %427 {offsets = [0, 0], sizes = [8, 128], strides = [1, 1]} : vector<8x512xf32> to vector<8x128xf32>
    %429 = arith.negf %428 : vector<8x128xf32>
    %430 = math.exp %429 : vector<8x128xf32>
    %cst_194 = arith.constant 1.000000e+00 : f32
    %431 = vector.broadcast %cst_194 : f32 to vector<8x128xf32>
    %432 = arith.addf %431, %430 : vector<8x128xf32>
    %433 = arith.divf %431, %432 : vector<8x128xf32>
    %434 = vector.extract_strided_slice %427 {offsets = [0, 128], sizes = [8, 128], strides = [1, 1]} : vector<8x512xf32> to vector<8x128xf32>
    %435 = arith.negf %434 : vector<8x128xf32>
    %436 = math.exp %435 : vector<8x128xf32>
    %cst_195 = arith.constant 1.000000e+00 : f32
    %437 = vector.broadcast %cst_195 : f32 to vector<8x128xf32>
    %438 = arith.addf %437, %436 : vector<8x128xf32>
    %439 = arith.divf %437, %438 : vector<8x128xf32>
    %440 = vector.extract_strided_slice %427 {offsets = [0, 256], sizes = [8, 128], strides = [1, 1]} : vector<8x512xf32> to vector<8x128xf32>
    %441 = math.tanh %440 : vector<8x128xf32>
    %442 = vector.extract_strided_slice %427 {offsets = [0, 384], sizes = [8, 128], strides = [1, 1]} : vector<8x512xf32> to vector<8x128xf32>
    %443 = arith.negf %442 : vector<8x128xf32>
    %444 = math.exp %443 : vector<8x128xf32>
    %cst_196 = arith.constant 1.000000e+00 : f32
    %445 = vector.broadcast %cst_196 : f32 to vector<8x128xf32>
    %446 = arith.addf %445, %444 : vector<8x128xf32>
    %447 = arith.divf %445, %446 : vector<8x128xf32>
    %448 = arith.mulf %439, %423 : vector<8x128xf32>
    %449 = arith.mulf %433, %441 : vector<8x128xf32>
    %450 = arith.addf %448, %449 : vector<8x128xf32>
    %451 = math.tanh %450 : vector<8x128xf32>
    %452 = arith.mulf %447, %451 : vector<8x128xf32>
    %453 = arith.truncf %452 : vector<8x128xf32> to vector<8x128xbf16>
    %c0_197 = arith.constant 0 : index
    %c0_198 = arith.constant 0 : index
    %454 = vector.load %arg9[%c0_197, %c0_198] : memref<8x128xbf16, #tpu.memory_space<vmem>>, vector<8x128xbf16>
    tpu.vector_store %arg9[%c0_197, %c0_198], %453 {strides = array<i32>} : memref<8x128xbf16, #tpu.memory_space<vmem>>, vector<8x128xbf16>,
    %c0_199 = arith.constant 0 : index
    %c0_200 = arith.constant 0 : index
    %455 = vector.load %arg10[%c0_199, %c0_200] : memref<8x128xf32, #tpu.memory_space<vmem>>, vector<8x128xf32>
    tpu.vector_store %arg10[%c0_199, %c0_200], %450 {strides = array<i32>} : memref<8x128xf32, #tpu.memory_space<vmem>>, vector<8x128xf32>,
    %456 = arith.index_cast %c5_i32 : i32 to index
    %c0_201 = arith.constant 0 : index
    %c0_202 = arith.constant 0 : index
    %457 = vector.load %arg5[%456, %c0_201, %c0_202] : memref<8x8x128xbf16, #tpu.memory_space<vmem>>, vector<1x8x128xbf16>
    %458 = vector.shape_cast %457 : vector<1x8x128xbf16> to vector<8x128xbf16>
    %459 = vector.shape_cast %453 : vector<8x128xbf16> to vector<1x8x128xbf16>
    tpu.vector_store %arg5[%456, %c0_201, %c0_202], %459 {strides = array<i32>} : memref<8x8x128xbf16, #tpu.memory_space<vmem>>, vector<1x8x128xbf16>,
    %460 = arith.index_cast %418 : i32 to index
    %c0_203 = arith.constant 0 : index
    %c0_204 = arith.constant 0 : index
    %461 = vector.load %arg2[%460, %c0_203, %c0_204] : memref<8x8x512xbf16, #tpu.memory_space<vmem>>, vector<1x8x512xbf16>
    %462 = vector.shape_cast %461 : vector<1x8x512xbf16> to vector<8x512xbf16>
    %c0_205 = arith.constant 0 : index
    %c0_206 = arith.constant 0 : index
    %463 = vector.load %arg11[%c0_205, %c0_206] : memref<8x128xbf16, #tpu.memory_space<vmem>>, vector<8x128xbf16>
    %c0_207 = arith.constant 0 : index
    %c0_208 = arith.constant 0 : index
    %464 = vector.load %arg12[%c0_207, %c0_208] : memref<8x128xf32, #tpu.memory_space<vmem>>, vector<8x128xf32>
    %465 = arith.extf %462 : vector<8x512xbf16> to vector<8x512xf32>
    %c0_209 = arith.constant 0 : index
    %c0_210 = arith.constant 0 : index
    %466 = vector.load %arg4[%c0_209, %c0_210] : memref<128x512xbf16, #tpu.memory_space<vmem>>, vector<128x512xbf16>
    %cst_211 = arith.constant dense<0.000000e+00> : vector<8x512xf32>
    %467 = tpu.matmul %463, %466, %cst_211 {dimension_numbers = #tpu.dot_dimension_numbers<[1], [0], [0], [1], [0, 0, 1, 1], [], []>} : vector<8x128xbf16>, vector<128x512xbf16>, vector<8x512xf32> -> vector<8x512xf32>
    %468 = arith.addf %465, %467 : vector<8x512xf32>
    %469 = vector.extract_strided_slice %468 {offsets = [0, 0], sizes = [8, 128], strides = [1, 1]} : vector<8x512xf32> to vector<8x128xf32>
    %470 = arith.negf %469 : vector<8x128xf32>
    %471 = math.exp %470 : vector<8x128xf32>
    %cst_212 = arith.constant 1.000000e+00 : f32
    %472 = vector.broadcast %cst_212 : f32 to vector<8x128xf32>
    %473 = arith.addf %472, %471 : vector<8x128xf32>
    %474 = arith.divf %472, %473 : vector<8x128xf32>
    %475 = vector.extract_strided_slice %468 {offsets = [0, 128], sizes = [8, 128], strides = [1, 1]} : vector<8x512xf32> to vector<8x128xf32>
    %476 = arith.negf %475 : vector<8x128xf32>
    %477 = math.exp %476 : vector<8x128xf32>
    %cst_213 = arith.constant 1.000000e+00 : f32
    %478 = vector.broadcast %cst_213 : f32 to vector<8x128xf32>
    %479 = arith.addf %478, %477 : vector<8x128xf32>
    %480 = arith.divf %478, %479 : vector<8x128xf32>
    %481 = vector.extract_strided_slice %468 {offsets = [0, 256], sizes = [8, 128], strides = [1, 1]} : vector<8x512xf32> to vector<8x128xf32>
    %482 = math.tanh %481 : vector<8x128xf32>
    %483 = vector.extract_strided_slice %468 {offsets = [0, 384], sizes = [8, 128], strides = [1, 1]} : vector<8x512xf32> to vector<8x128xf32>
    %484 = arith.negf %483 : vector<8x128xf32>
    %485 = math.exp %484 : vector<8x128xf32>
    %cst_214 = arith.constant 1.000000e+00 : f32
    %486 = vector.broadcast %cst_214 : f32 to vector<8x128xf32>
    %487 = arith.addf %486, %485 : vector<8x128xf32>
    %488 = arith.divf %486, %487 : vector<8x128xf32>
    %489 = arith.mulf %480, %464 : vector<8x128xf32>
    %490 = arith.mulf %474, %482 : vector<8x128xf32>
    %491 = arith.addf %489, %490 : vector<8x128xf32>
    %492 = math.tanh %491 : vector<8x128xf32>
    %493 = arith.mulf %488, %492 : vector<8x128xf32>
    %494 = arith.truncf %493 : vector<8x128xf32> to vector<8x128xbf16>
    %c0_215 = arith.constant 0 : index
    %c0_216 = arith.constant 0 : index
    %495 = vector.load %arg11[%c0_215, %c0_216] : memref<8x128xbf16, #tpu.memory_space<vmem>>, vector<8x128xbf16>
    tpu.vector_store %arg11[%c0_215, %c0_216], %494 {strides = array<i32>} : memref<8x128xbf16, #tpu.memory_space<vmem>>, vector<8x128xbf16>,
    %c0_217 = arith.constant 0 : index
    %c0_218 = arith.constant 0 : index
    %496 = vector.load %arg12[%c0_217, %c0_218] : memref<8x128xf32, #tpu.memory_space<vmem>>, vector<8x128xf32>
    tpu.vector_store %arg12[%c0_217, %c0_218], %491 {strides = array<i32>} : memref<8x128xf32, #tpu.memory_space<vmem>>, vector<8x128xf32>,
    %497 = arith.index_cast %418 : i32 to index
    %c0_219 = arith.constant 0 : index
    %c0_220 = arith.constant 0 : index
    %498 = vector.load %arg6[%497, %c0_219, %c0_220] : memref<8x8x128xbf16, #tpu.memory_space<vmem>>, vector<1x8x128xbf16>
    %499 = vector.shape_cast %498 : vector<1x8x128xbf16> to vector<8x128xbf16>
    %500 = vector.shape_cast %494 : vector<8x128xbf16> to vector<1x8x128xbf16>
    tpu.vector_store %arg6[%497, %c0_219, %c0_220], %500 {strides = array<i32>} : memref<8x8x128xbf16, #tpu.memory_space<vmem>>, vector<1x8x128xbf16>,
    %c6_i32 = arith.constant 6 : i32
    %c7_i32_221 = arith.constant 7 : i32
    %501 = arith.subi %c7_i32_221, %c6_i32 : i32
    %502 = arith.index_cast %c6_i32 : i32 to index
    %c0_222 = arith.constant 0 : index
    %c0_223 = arith.constant 0 : index
    %503 = vector.load %arg1[%502, %c0_222, %c0_223] : memref<8x8x512xbf16, #tpu.memory_space<vmem>>, vector<1x8x512xbf16>
    %504 = vector.shape_cast %503 : vector<1x8x512xbf16> to vector<8x512xbf16>
    %c0_224 = arith.constant 0 : index
    %c0_225 = arith.constant 0 : index
    %505 = vector.load %arg9[%c0_224, %c0_225] : memref<8x128xbf16, #tpu.memory_space<vmem>>, vector<8x128xbf16>
    %c0_226 = arith.constant 0 : index
    %c0_227 = arith.constant 0 : index
    %506 = vector.load %arg10[%c0_226, %c0_227] : memref<8x128xf32, #tpu.memory_space<vmem>>, vector<8x128xf32>
    %507 = arith.extf %504 : vector<8x512xbf16> to vector<8x512xf32>
    %c0_228 = arith.constant 0 : index
    %c0_229 = arith.constant 0 : index
    %508 = vector.load %arg3[%c0_228, %c0_229] : memref<128x512xbf16, #tpu.memory_space<vmem>>, vector<128x512xbf16>
    %cst_230 = arith.constant dense<0.000000e+00> : vector<8x512xf32>
    %509 = tpu.matmul %505, %508, %cst_230 {dimension_numbers = #tpu.dot_dimension_numbers<[1], [0], [0], [1], [0, 0, 1, 1], [], []>} : vector<8x128xbf16>, vector<128x512xbf16>, vector<8x512xf32> -> vector<8x512xf32>
    %510 = arith.addf %507, %509 : vector<8x512xf32>
    %511 = vector.extract_strided_slice %510 {offsets = [0, 0], sizes = [8, 128], strides = [1, 1]} : vector<8x512xf32> to vector<8x128xf32>
    %512 = arith.negf %511 : vector<8x128xf32>
    %513 = math.exp %512 : vector<8x128xf32>
    %cst_231 = arith.constant 1.000000e+00 : f32
    %514 = vector.broadcast %cst_231 : f32 to vector<8x128xf32>
    %515 = arith.addf %514, %513 : vector<8x128xf32>
    %516 = arith.divf %514, %515 : vector<8x128xf32>
    %517 = vector.extract_strided_slice %510 {offsets = [0, 128], sizes = [8, 128], strides = [1, 1]} : vector<8x512xf32> to vector<8x128xf32>
    %518 = arith.negf %517 : vector<8x128xf32>
    %519 = math.exp %518 : vector<8x128xf32>
    %cst_232 = arith.constant 1.000000e+00 : f32
    %520 = vector.broadcast %cst_232 : f32 to vector<8x128xf32>
    %521 = arith.addf %520, %519 : vector<8x128xf32>
    %522 = arith.divf %520, %521 : vector<8x128xf32>
    %523 = vector.extract_strided_slice %510 {offsets = [0, 256], sizes = [8, 128], strides = [1, 1]} : vector<8x512xf32> to vector<8x128xf32>
    %524 = math.tanh %523 : vector<8x128xf32>
    %525 = vector.extract_strided_slice %510 {offsets = [0, 384], sizes = [8, 128], strides = [1, 1]} : vector<8x512xf32> to vector<8x128xf32>
    %526 = arith.negf %525 : vector<8x128xf32>
    %527 = math.exp %526 : vector<8x128xf32>
    %cst_233 = arith.constant 1.000000e+00 : f32
    %528 = vector.broadcast %cst_233 : f32 to vector<8x128xf32>
    %529 = arith.addf %528, %527 : vector<8x128xf32>
    %530 = arith.divf %528, %529 : vector<8x128xf32>
    %531 = arith.mulf %522, %506 : vector<8x128xf32>
    %532 = arith.mulf %516, %524 : vector<8x128xf32>
    %533 = arith.addf %531, %532 : vector<8x128xf32>
    %534 = math.tanh %533 : vector<8x128xf32>
    %535 = arith.mulf %530, %534 : vector<8x128xf32>
    %536 = arith.truncf %535 : vector<8x128xf32> to vector<8x128xbf16>
    %c0_234 = arith.constant 0 : index
    %c0_235 = arith.constant 0 : index
    %537 = vector.load %arg9[%c0_234, %c0_235] : memref<8x128xbf16, #tpu.memory_space<vmem>>, vector<8x128xbf16>
    tpu.vector_store %arg9[%c0_234, %c0_235], %536 {strides = array<i32>} : memref<8x128xbf16, #tpu.memory_space<vmem>>, vector<8x128xbf16>,
    %c0_236 = arith.constant 0 : index
    %c0_237 = arith.constant 0 : index
    %538 = vector.load %arg10[%c0_236, %c0_237] : memref<8x128xf32, #tpu.memory_space<vmem>>, vector<8x128xf32>
    tpu.vector_store %arg10[%c0_236, %c0_237], %533 {strides = array<i32>} : memref<8x128xf32, #tpu.memory_space<vmem>>, vector<8x128xf32>,
    %539 = arith.index_cast %c6_i32 : i32 to index
    %c0_238 = arith.constant 0 : index
    %c0_239 = arith.constant 0 : index
    %540 = vector.load %arg5[%539, %c0_238, %c0_239] : memref<8x8x128xbf16, #tpu.memory_space<vmem>>, vector<1x8x128xbf16>
    %541 = vector.shape_cast %540 : vector<1x8x128xbf16> to vector<8x128xbf16>
    %542 = vector.shape_cast %536 : vector<8x128xbf16> to vector<1x8x128xbf16>
    tpu.vector_store %arg5[%539, %c0_238, %c0_239], %542 {strides = array<i32>} : memref<8x8x128xbf16, #tpu.memory_space<vmem>>, vector<1x8x128xbf16>,
    %543 = arith.index_cast %501 : i32 to index
    %c0_240 = arith.constant 0 : index
    %c0_241 = arith.constant 0 : index
    %544 = vector.load %arg2[%543, %c0_240, %c0_241] : memref<8x8x512xbf16, #tpu.memory_space<vmem>>, vector<1x8x512xbf16>
    %545 = vector.shape_cast %544 : vector<1x8x512xbf16> to vector<8x512xbf16>
    %c0_242 = arith.constant 0 : index
    %c0_243 = arith.constant 0 : index
    %546 = vector.load %arg11[%c0_242, %c0_243] : memref<8x128xbf16, #tpu.memory_space<vmem>>, vector<8x128xbf16>
    %c0_244 = arith.constant 0 : index
    %c0_245 = arith.constant 0 : index
    %547 = vector.load %arg12[%c0_244, %c0_245] : memref<8x128xf32, #tpu.memory_space<vmem>>, vector<8x128xf32>
    %548 = arith.extf %545 : vector<8x512xbf16> to vector<8x512xf32>
    %c0_246 = arith.constant 0 : index
    %c0_247 = arith.constant 0 : index
    %549 = vector.load %arg4[%c0_246, %c0_247] : memref<128x512xbf16, #tpu.memory_space<vmem>>, vector<128x512xbf16>
    %cst_248 = arith.constant dense<0.000000e+00> : vector<8x512xf32>
    %550 = tpu.matmul %546, %549, %cst_248 {dimension_numbers = #tpu.dot_dimension_numbers<[1], [0], [0], [1], [0, 0, 1, 1], [], []>} : vector<8x128xbf16>, vector<128x512xbf16>, vector<8x512xf32> -> vector<8x512xf32>
    %551 = arith.addf %548, %550 : vector<8x512xf32>
    %552 = vector.extract_strided_slice %551 {offsets = [0, 0], sizes = [8, 128], strides = [1, 1]} : vector<8x512xf32> to vector<8x128xf32>
    %553 = arith.negf %552 : vector<8x128xf32>
    %554 = math.exp %553 : vector<8x128xf32>
    %cst_249 = arith.constant 1.000000e+00 : f32
    %555 = vector.broadcast %cst_249 : f32 to vector<8x128xf32>
    %556 = arith.addf %555, %554 : vector<8x128xf32>
    %557 = arith.divf %555, %556 : vector<8x128xf32>
    %558 = vector.extract_strided_slice %551 {offsets = [0, 128], sizes = [8, 128], strides = [1, 1]} : vector<8x512xf32> to vector<8x128xf32>
    %559 = arith.negf %558 : vector<8x128xf32>
    %560 = math.exp %559 : vector<8x128xf32>
    %cst_250 = arith.constant 1.000000e+00 : f32
    %561 = vector.broadcast %cst_250 : f32 to vector<8x128xf32>
    %562 = arith.addf %561, %560 : vector<8x128xf32>
    %563 = arith.divf %561, %562 : vector<8x128xf32>
    %564 = vector.extract_strided_slice %551 {offsets = [0, 256], sizes = [8, 128], strides = [1, 1]} : vector<8x512xf32> to vector<8x128xf32>
    %565 = math.tanh %564 : vector<8x128xf32>
    %566 = vector.extract_strided_slice %551 {offsets = [0, 384], sizes = [8, 128], strides = [1, 1]} : vector<8x512xf32> to vector<8x128xf32>
    %567 = arith.negf %566 : vector<8x128xf32>
    %568 = math.exp %567 : vector<8x128xf32>
    %cst_251 = arith.constant 1.000000e+00 : f32
    %569 = vector.broadcast %cst_251 : f32 to vector<8x128xf32>
    %570 = arith.addf %569, %568 : vector<8x128xf32>
    %571 = arith.divf %569, %570 : vector<8x128xf32>
    %572 = arith.mulf %563, %547 : vector<8x128xf32>
    %573 = arith.mulf %557, %565 : vector<8x128xf32>
    %574 = arith.addf %572, %573 : vector<8x128xf32>
    %575 = math.tanh %574 : vector<8x128xf32>
    %576 = arith.mulf %571, %575 : vector<8x128xf32>
    %577 = arith.truncf %576 : vector<8x128xf32> to vector<8x128xbf16>
    %c0_252 = arith.constant 0 : index
    %c0_253 = arith.constant 0 : index
    %578 = vector.load %arg11[%c0_252, %c0_253] : memref<8x128xbf16, #tpu.memory_space<vmem>>, vector<8x128xbf16>
    tpu.vector_store %arg11[%c0_252, %c0_253], %577 {strides = array<i32>} : memref<8x128xbf16, #tpu.memory_space<vmem>>, vector<8x128xbf16>,
    %c0_254 = arith.constant 0 : index
    %c0_255 = arith.constant 0 : index
    %579 = vector.load %arg12[%c0_254, %c0_255] : memref<8x128xf32, #tpu.memory_space<vmem>>, vector<8x128xf32>
    tpu.vector_store %arg12[%c0_254, %c0_255], %574 {strides = array<i32>} : memref<8x128xf32, #tpu.memory_space<vmem>>, vector<8x128xf32>,
    %580 = arith.index_cast %501 : i32 to index
    %c0_256 = arith.constant 0 : index
    %c0_257 = arith.constant 0 : index
    %581 = vector.load %arg6[%580, %c0_256, %c0_257] : memref<8x8x128xbf16, #tpu.memory_space<vmem>>, vector<1x8x128xbf16>
    %582 = vector.shape_cast %581 : vector<1x8x128xbf16> to vector<8x128xbf16>
    %583 = vector.shape_cast %577 : vector<8x128xbf16> to vector<1x8x128xbf16>
    tpu.vector_store %arg6[%580, %c0_256, %c0_257], %583 {strides = array<i32>} : memref<8x8x128xbf16, #tpu.memory_space<vmem>>, vector<1x8x128xbf16>,
    %c7_i32_258 = arith.constant 7 : i32
    %c7_i32_259 = arith.constant 7 : i32
    %584 = arith.subi %c7_i32_259, %c7_i32_258 : i32
    %585 = arith.index_cast %c7_i32_258 : i32 to index
    %c0_260 = arith.constant 0 : index
    %c0_261 = arith.constant 0 : index
    %586 = vector.load %arg1[%585, %c0_260, %c0_261] : memref<8x8x512xbf16, #tpu.memory_space<vmem>>, vector<1x8x512xbf16>
    %587 = vector.shape_cast %586 : vector<1x8x512xbf16> to vector<8x512xbf16>
    %c0_262 = arith.constant 0 : index
    %c0_263 = arith.constant 0 : index
    %588 = vector.load %arg9[%c0_262, %c0_263] : memref<8x128xbf16, #tpu.memory_space<vmem>>, vector<8x128xbf16>
    %c0_264 = arith.constant 0 : index
    %c0_265 = arith.constant 0 : index
    %589 = vector.load %arg10[%c0_264, %c0_265] : memref<8x128xf32, #tpu.memory_space<vmem>>, vector<8x128xf32>
    %590 = arith.extf %587 : vector<8x512xbf16> to vector<8x512xf32>
    %c0_266 = arith.constant 0 : index
    %c0_267 = arith.constant 0 : index
    %591 = vector.load %arg3[%c0_266, %c0_267] : memref<128x512xbf16, #tpu.memory_space<vmem>>, vector<128x512xbf16>
    %cst_268 = arith.constant dense<0.000000e+00> : vector<8x512xf32>
    %592 = tpu.matmul %588, %591, %cst_268 {dimension_numbers = #tpu.dot_dimension_numbers<[1], [0], [0], [1], [0, 0, 1, 1], [], []>} : vector<8x128xbf16>, vector<128x512xbf16>, vector<8x512xf32> -> vector<8x512xf32>
    %593 = arith.addf %590, %592 : vector<8x512xf32>
    %594 = vector.extract_strided_slice %593 {offsets = [0, 0], sizes = [8, 128], strides = [1, 1]} : vector<8x512xf32> to vector<8x128xf32>
    %595 = arith.negf %594 : vector<8x128xf32>
    %596 = math.exp %595 : vector<8x128xf32>
    %cst_269 = arith.constant 1.000000e+00 : f32
    %597 = vector.broadcast %cst_269 : f32 to vector<8x128xf32>
    %598 = arith.addf %597, %596 : vector<8x128xf32>
    %599 = arith.divf %597, %598 : vector<8x128xf32>
    %600 = vector.extract_strided_slice %593 {offsets = [0, 128], sizes = [8, 128], strides = [1, 1]} : vector<8x512xf32> to vector<8x128xf32>
    %601 = arith.negf %600 : vector<8x128xf32>
    %602 = math.exp %601 : vector<8x128xf32>
    %cst_270 = arith.constant 1.000000e+00 : f32
    %603 = vector.broadcast %cst_270 : f32 to vector<8x128xf32>
    %604 = arith.addf %603, %602 : vector<8x128xf32>
    %605 = arith.divf %603, %604 : vector<8x128xf32>
    %606 = vector.extract_strided_slice %593 {offsets = [0, 256], sizes = [8, 128], strides = [1, 1]} : vector<8x512xf32> to vector<8x128xf32>
    %607 = math.tanh %606 : vector<8x128xf32>
    %608 = vector.extract_strided_slice %593 {offsets = [0, 384], sizes = [8, 128], strides = [1, 1]} : vector<8x512xf32> to vector<8x128xf32>
    %609 = arith.negf %608 : vector<8x128xf32>
    %610 = math.exp %609 : vector<8x128xf32>
    %cst_271 = arith.constant 1.000000e+00 : f32
    %611 = vector.broadcast %cst_271 : f32 to vector<8x128xf32>
    %612 = arith.addf %611, %610 : vector<8x128xf32>
    %613 = arith.divf %611, %612 : vector<8x128xf32>
    %614 = arith.mulf %605, %589 : vector<8x128xf32>
    %615 = arith.mulf %599, %607 : vector<8x128xf32>
    %616 = arith.addf %614, %615 : vector<8x128xf32>
    %617 = math.tanh %616 : vector<8x128xf32>
    %618 = arith.mulf %613, %617 : vector<8x128xf32>
    %619 = arith.truncf %618 : vector<8x128xf32> to vector<8x128xbf16>
    %c0_272 = arith.constant 0 : index
    %c0_273 = arith.constant 0 : index
    %620 = vector.load %arg9[%c0_272, %c0_273] : memref<8x128xbf16, #tpu.memory_space<vmem>>, vector<8x128xbf16>
    tpu.vector_store %arg9[%c0_272, %c0_273], %619 {strides = array<i32>} : memref<8x128xbf16, #tpu.memory_space<vmem>>, vector<8x128xbf16>,
    %c0_274 = arith.constant 0 : index
    %c0_275 = arith.constant 0 : index
    %621 = vector.load %arg10[%c0_274, %c0_275] : memref<8x128xf32, #tpu.memory_space<vmem>>, vector<8x128xf32>
    tpu.vector_store %arg10[%c0_274, %c0_275], %616 {strides = array<i32>} : memref<8x128xf32, #tpu.memory_space<vmem>>, vector<8x128xf32>,
    %622 = arith.index_cast %c7_i32_258 : i32 to index
    %c0_276 = arith.constant 0 : index
    %c0_277 = arith.constant 0 : index
    %623 = vector.load %arg5[%622, %c0_276, %c0_277] : memref<8x8x128xbf16, #tpu.memory_space<vmem>>, vector<1x8x128xbf16>
    %624 = vector.shape_cast %623 : vector<1x8x128xbf16> to vector<8x128xbf16>
    %625 = vector.shape_cast %619 : vector<8x128xbf16> to vector<1x8x128xbf16>
    tpu.vector_store %arg5[%622, %c0_276, %c0_277], %625 {strides = array<i32>} : memref<8x8x128xbf16, #tpu.memory_space<vmem>>, vector<1x8x128xbf16>,
    %626 = arith.index_cast %584 : i32 to index
    %c0_278 = arith.constant 0 : index
    %c0_279 = arith.constant 0 : index
    %627 = vector.load %arg2[%626, %c0_278, %c0_279] : memref<8x8x512xbf16, #tpu.memory_space<vmem>>, vector<1x8x512xbf16>
    %628 = vector.shape_cast %627 : vector<1x8x512xbf16> to vector<8x512xbf16>
    %c0_280 = arith.constant 0 : index
    %c0_281 = arith.constant 0 : index
    %629 = vector.load %arg11[%c0_280, %c0_281] : memref<8x128xbf16, #tpu.memory_space<vmem>>, vector<8x128xbf16>
    %c0_282 = arith.constant 0 : index
    %c0_283 = arith.constant 0 : index
    %630 = vector.load %arg12[%c0_282, %c0_283] : memref<8x128xf32, #tpu.memory_space<vmem>>, vector<8x128xf32>
    %631 = arith.extf %628 : vector<8x512xbf16> to vector<8x512xf32>
    %c0_284 = arith.constant 0 : index
    %c0_285 = arith.constant 0 : index
    %632 = vector.load %arg4[%c0_284, %c0_285] : memref<128x512xbf16, #tpu.memory_space<vmem>>, vector<128x512xbf16>
    %cst_286 = arith.constant dense<0.000000e+00> : vector<8x512xf32>
    %633 = tpu.matmul %629, %632, %cst_286 {dimension_numbers = #tpu.dot_dimension_numbers<[1], [0], [0], [1], [0, 0, 1, 1], [], []>} : vector<8x128xbf16>, vector<128x512xbf16>, vector<8x512xf32> -> vector<8x512xf32>
    %634 = arith.addf %631, %633 : vector<8x512xf32>
    %635 = vector.extract_strided_slice %634 {offsets = [0, 0], sizes = [8, 128], strides = [1, 1]} : vector<8x512xf32> to vector<8x128xf32>
    %636 = arith.negf %635 : vector<8x128xf32>
    %637 = math.exp %636 : vector<8x128xf32>
    %cst_287 = arith.constant 1.000000e+00 : f32
    %638 = vector.broadcast %cst_287 : f32 to vector<8x128xf32>
    %639 = arith.addf %638, %637 : vector<8x128xf32>
    %640 = arith.divf %638, %639 : vector<8x128xf32>
    %641 = vector.extract_strided_slice %634 {offsets = [0, 128], sizes = [8, 128], strides = [1, 1]} : vector<8x512xf32> to vector<8x128xf32>
    %642 = arith.negf %641 : vector<8x128xf32>
    %643 = math.exp %642 : vector<8x128xf32>
    %cst_288 = arith.constant 1.000000e+00 : f32
    %644 = vector.broadcast %cst_288 : f32 to vector<8x128xf32>
    %645 = arith.addf %644, %643 : vector<8x128xf32>
    %646 = arith.divf %644, %645 : vector<8x128xf32>
    %647 = vector.extract_strided_slice %634 {offsets = [0, 256], sizes = [8, 128], strides = [1, 1]} : vector<8x512xf32> to vector<8x128xf32>
    %648 = math.tanh %647 : vector<8x128xf32>
    %649 = vector.extract_strided_slice %634 {offsets = [0, 384], sizes = [8, 128], strides = [1, 1]} : vector<8x512xf32> to vector<8x128xf32>
    %650 = arith.negf %649 : vector<8x128xf32>
    %651 = math.exp %650 : vector<8x128xf32>
    %cst_289 = arith.constant 1.000000e+00 : f32
    %652 = vector.broadcast %cst_289 : f32 to vector<8x128xf32>
    %653 = arith.addf %652, %651 : vector<8x128xf32>
    %654 = arith.divf %652, %653 : vector<8x128xf32>
    %655 = arith.mulf %646, %630 : vector<8x128xf32>
    %656 = arith.mulf %640, %648 : vector<8x128xf32>
    %657 = arith.addf %655, %656 : vector<8x128xf32>
    %658 = math.tanh %657 : vector<8x128xf32>
    %659 = arith.mulf %654, %658 : vector<8x128xf32>
    %660 = arith.truncf %659 : vector<8x128xf32> to vector<8x128xbf16>
    %c0_290 = arith.constant 0 : index
    %c0_291 = arith.constant 0 : index
    %661 = vector.load %arg11[%c0_290, %c0_291] : memref<8x128xbf16, #tpu.memory_space<vmem>>, vector<8x128xbf16>
    tpu.vector_store %arg11[%c0_290, %c0_291], %660 {strides = array<i32>} : memref<8x128xbf16, #tpu.memory_space<vmem>>, vector<8x128xbf16>,
    %c0_292 = arith.constant 0 : index
    %c0_293 = arith.constant 0 : index
    %662 = vector.load %arg12[%c0_292, %c0_293] : memref<8x128xf32, #tpu.memory_space<vmem>>, vector<8x128xf32>
    tpu.vector_store %arg12[%c0_292, %c0_293], %657 {strides = array<i32>} : memref<8x128xf32, #tpu.memory_space<vmem>>, vector<8x128xf32>,
    %663 = arith.index_cast %584 : i32 to index
    %c0_294 = arith.constant 0 : index
    %c0_295 = arith.constant 0 : index
    %664 = vector.load %arg6[%663, %c0_294, %c0_295] : memref<8x8x128xbf16, #tpu.memory_space<vmem>>, vector<1x8x128xbf16>
    %665 = vector.shape_cast %664 : vector<1x8x128xbf16> to vector<8x128xbf16>
    %666 = vector.shape_cast %660 : vector<8x128xbf16> to vector<1x8x128xbf16>
    tpu.vector_store %arg6[%663, %c0_294, %c0_295], %666 {strides = array<i32>} : memref<8x8x128xbf16, #tpu.memory_space<vmem>>, vector<1x8x128xbf16>,
    %c8_i32 = arith.constant 8 : i32
    %c0_i32_296 = arith.constant 0 : i32
    %667 = arith.cmpi eq, %arg0, %c0_i32_296 : i32
    %668 = arith.extui %667 : i1 to i32
    %c0_i32_297 = arith.constant 0 : i32
    %669 = arith.cmpi ne, %668, %c0_i32_297 : i32
    scf.if %669 {
      %c0_298 = arith.constant 0 : index
      %c0_299 = arith.constant 0 : index
      %670 = vector.load %arg9[%c0_298, %c0_299] : memref<8x128xbf16, #tpu.memory_space<vmem>>, vector<8x128xbf16>
      %c0_300 = arith.constant 0 : index
      %c0_301 = arith.constant 0 : index
      %671 = vector.load %arg7[%c0_300, %c0_301] : memref<8x128xbf16, #tpu.memory_space<vmem>>, vector<8x128xbf16>
      tpu.vector_store %arg7[%c0_300, %c0_301], %670 {strides = array<i32>} : memref<8x128xbf16, #tpu.memory_space<vmem>>, vector<8x128xbf16>,
      %c0_302 = arith.constant 0 : index
      %c0_303 = arith.constant 0 : index
      %672 = vector.load %arg11[%c0_302, %c0_303] : memref<8x128xbf16, #tpu.memory_space<vmem>>, vector<8x128xbf16>
      %c0_304 = arith.constant 0 : index
      %c0_305 = arith.constant 0 : index
      %673 = vector.load %arg8[%c0_304, %c0_305] : memref<8x128xbf16, #tpu.memory_space<vmem>>, vector<8x128xbf16>
      tpu.vector_store %arg8[%c0_304, %c0_305], %672 {strides = array<i32>} : memref<8x128xbf16, #tpu.memory_space<vmem>>, vector<8x128xbf16>,
    } else {
    }
    return
  }
  func.func @transform_0(%arg0: i32) -> (i32, i32, i32) {
    %c0_i32 = arith.constant 0 : i32
    %c0_i32_0 = arith.constant 0 : i32
    %c0_i32_1 = arith.constant 0 : i32
    return %arg0, %c0_i32, %c0_i32_0 : i32, i32, i32
  }
  func.func @transform_1(%arg0: i32) -> (i32, i32, i32) {
    %c0_i32 = arith.constant 0 : i32
    %0 = arith.subi %c0_i32, %arg0 : i32
    %c0_i32_0 = arith.constant 0 : i32
    %c1_i32 = arith.constant 1 : i32
    %c0_i32_1 = arith.constant 0 : i32
    return %0, %c0_i32_0, %c1_i32 : i32, i32, i32
  }
  func.func @transform_2(%arg0: i32) -> (i32, i32) {
    %c0_i32 = arith.constant 0 : i32
    %c0_i32_0 = arith.constant 0 : i32
    %c0_i32_1 = arith.constant 0 : i32
    return %c0_i32, %c0_i32_0 : i32, i32
  }
  func.func @transform_3(%arg0: i32) -> (i32, i32) {
    %c0_i32 = arith.constant 0 : i32
    %c0_i32_0 = arith.constant 0 : i32
    %c0_i32_1 = arith.constant 0 : i32
    return %c0_i32, %c0_i32_0 : i32, i32
  }
  func.func @transform_4(%arg0: i32) -> (i32, i32, i32) {
    %c0_i32 = arith.constant 0 : i32
    %c0_i32_0 = arith.constant 0 : i32
    %c0_i32_1 = arith.constant 0 : i32
    return %arg0, %c0_i32, %c0_i32_0 : i32, i32, i32
  }
  func.func @transform_5(%arg0: i32) -> (i32, i32, i32) {
    %c0_i32 = arith.constant 0 : i32
    %0 = arith.subi %c0_i32, %arg0 : i32
    %c0_i32_0 = arith.constant 0 : i32
    %c0_i32_1 = arith.constant 0 : i32
    %c0_i32_2 = arith.constant 0 : i32
    return %0, %c0_i32_0, %c0_i32_1 : i32, i32, i32
  }
  func.func @transform_6(%arg0: i32) -> (i32, i32) {
    %c0_i32 = arith.constant 0 : i32
    %c0_i32_0 = arith.constant 0 : i32
    %c0_i32_1 = arith.constant 0 : i32
    return %c0_i32, %c0_i32_0 : i32, i32
  }
  func.func @transform_7(%arg0: i32) -> (i32, i32) {
    %c0_i32 = arith.constant 0 : i32
    %c0_i32_0 = arith.constant 0 : i32
    %c0_i32_1 = arith.constant 0 : i32
    return %c0_i32, %c0_i32_0 : i32, i32
  }
}

module attributes {stable_mosaic.version = 11 : i64} {
  func.func @proj2_kernel(%arg0: memref<8x128xbf16, #tpu.memory_space<vmem>>, %arg1: memref<8x128xbf16, #tpu.memory_space<vmem>>, %arg2: memref<128x128xbf16, #tpu.memory_space<vmem>>, %arg3: memref<128x128xbf16, #tpu.memory_space<vmem>>, %arg4: memref<1x128xf32, #tpu.memory_space<vmem>>, %arg5: memref<8x128xf32, #tpu.memory_space<vmem>>) attributes {dimension_semantics = [], scalar_prefetch = 0 : i64, scratch_operands = 0 : i64, tpu.core_type = #tpu.core_type<tc>} {
    %c0 = arith.constant 0 : index
    %c0_0 = arith.constant 0 : index
    %0 = vector.load %arg0[%c0, %c0_0] : memref<8x128xbf16, #tpu.memory_space<vmem>>, vector<8x128xbf16>
    %c0_1 = arith.constant 0 : index
    %c0_2 = arith.constant 0 : index
    %1 = vector.load %arg2[%c0_1, %c0_2] : memref<128x128xbf16, #tpu.memory_space<vmem>>, vector<128x128xbf16>
    %cst = arith.constant dense<0.000000e+00> : vector<8x128xf32>
    %2 = tpu.matmul %0, %1, %cst {dimension_numbers = #tpu.dot_dimension_numbers<[1], [0], [0], [1], [0, 0, 1, 1], [], []>} : vector<8x128xbf16>, vector<128x128xbf16>, vector<8x128xf32> -> vector<8x128xf32>
    %c0_3 = arith.constant 0 : index
    %c0_4 = arith.constant 0 : index
    %3 = vector.load %arg1[%c0_3, %c0_4] : memref<8x128xbf16, #tpu.memory_space<vmem>>, vector<8x128xbf16>
    %c0_5 = arith.constant 0 : index
    %c0_6 = arith.constant 0 : index
    %4 = vector.load %arg3[%c0_5, %c0_6] : memref<128x128xbf16, #tpu.memory_space<vmem>>, vector<128x128xbf16>
    %cst_7 = arith.constant dense<0.000000e+00> : vector<8x128xf32>
    %5 = tpu.matmul %3, %4, %cst_7 {dimension_numbers = #tpu.dot_dimension_numbers<[1], [0], [0], [1], [0, 0, 1, 1], [], []>} : vector<8x128xbf16>, vector<128x128xbf16>, vector<8x128xf32> -> vector<8x128xf32>
    %6 = arith.addf %2, %5 : vector<8x128xf32>
    %c0_8 = arith.constant 0 : index
    %c0_9 = arith.constant 0 : index
    %7 = vector.load %arg4[%c0_8, %c0_9] : memref<1x128xf32, #tpu.memory_space<vmem>>, vector<1x128xf32>
    %8 = vector.broadcast %7 : vector<1x128xf32> to vector<8x128xf32>
    %9 = arith.addf %6, %8 : vector<8x128xf32>
    %c0_10 = arith.constant 0 : index
    %c0_11 = arith.constant 0 : index
    %10 = vector.load %arg5[%c0_10, %c0_11] : memref<8x128xf32, #tpu.memory_space<vmem>>, vector<8x128xf32>
    tpu.vector_store %arg5[%c0_10, %c0_11], %9 {strides = array<i32>} : memref<8x128xf32, #tpu.memory_space<vmem>>, vector<8x128xf32>,
    return
  }
}

</mosaic_0001>

<bundles_post_ra>
// kernel: _lambda_.5
= control target key start
LH: loop header
LB: loop body
LE: loop exit
PB: predicated region body
PF: predicated region fallthrough
CT: control target
= control target key end

     0   :  { %8 = vsyncpa [#allocation3], 0  ;;  %s1170_s12 = smov [#allocation2]   ;;  %s1436_s0 = inlined_call_operand.vmem [shape: bf16[64,128], index: 0, kind: input, shape index: {}]   ;;  %s1437_s1 = inlined_call_operand.hbm [shape: bf16[128,1024], index: 1, kind: input, shape index: {}]   ;;  %s1438_s2 = inlined_call_operand.vmem [shape: f32[1,1024], index: 2, kind: input, shape index: {}]   ;;  %s1439_s3 = inlined_call_operand.vmem [shape: bf16[64,1024], index: 3, kind: output, shape index: {}]  }
   0x1   :  { %s16_s13 = sshll.u32 %s1170_s12, 4  ;;  %s17_s13 = int_to_ptr.vmem [resolvable:$true] %s16_s13 }
   0x2   :  { %s1156_s14 = scalar_lea.vmem %s17_s13, 8192  ;;  %p1161_p1 = scmp.lt.s32.totalorder %s17_s13, %s17_s13 }
   0x3   :  { %p1157_p0 = scmp.ne.s32.totalorder %s17_s13, %s1156_s14  ;;  %p1162_p2 = scmp.lt.s32.totalorder %s1156_s14, %s1156_s14 }
   0x5   :  { %p1163_p3 = por %p1162_p2, %p1161_p1 }
   0x7   :  { %p1164_p4 = pnand %p1163_p3, %p1157_p0 }
   0x9   :  { %1167 = shalt.err (!%p1164_p4)
}
   0xa   :  { %s1171_s15 = smov 512   ;;  %s1172_s16 = smov 32  }
   0xb   :  { %22 = dma.hbm_to_vmem [thread:$0]  %s1437_s1, 8192, %s17_s13, [#allocation3], %s1171_s15, %s1171_s15, %s1172_s16  }
   0xc   :  { %1168 = dma.done.wait [#allocation3], 8192  }
   0xd   :  { %1169 = vsyncadd [#allocation3], 4294959104  ;;  %v1173_v0 = vmov 0   ;;  %v93_v1 = vld [vmem:[#allocation2 + $0x1c0] sm:$0xff]  ;;  %v94_v3 = vld [vmem:[#allocation2 + $0x1c8] sm:$0xff] }
   0xe   :  { %519 = vmatprep.mubr.bf16.mxu0 %v1173_v0  ;;  %592 = vmatprep.mubr.bf16.mxu1 %v1173_v0  ;;  %v97_v2 = vld [vmem:[#allocation2 + $0x1e0] sm:$0xff]  ;;  %v98_v5 = vld [vmem:[#allocation2 + $0x1e8] sm:$0xff]  ;;  %v95_v63 = vld [vmem:[#allocation2 + $0x1d0] sm:$0xff] }
   0xf   :  { %v1069_v4 = vcombine.high %v93_v1, %v97_v2  ;;  %v1068_v6 = vcombine.low %v93_v1, %v97_v2  ;;  %v85_v7 = vld [vmem:[#allocation2 + $0x180] sm:$0xff]  ;;  %v1071_v9 = vcombine.high %v94_v3, %v98_v5  ;;  %v1070_v10 = vcombine.low %v94_v3, %v98_v5  ;;  %v86_v12 = vld [vmem:[#allocation2 + $0x188] sm:$0xff]  ;;  %v99_v1 = vld [vmem:[#allocation2 + $0x1f0] sm:$0xff] }
  0x10   :  { %v89_v8 = vld [vmem:[#allocation2 + $0x1a0] sm:$0xff]  ;;  %v90_v13 = vld [vmem:[#allocation2 + $0x1a8] sm:$0xff]  ;;  %v96_v2 = vld [vmem:[#allocation2 + $0x1d8] sm:$0xff] }
  0x11   :  { %v1061_v11 = vcombine.high %v85_v7, %v89_v8  ;;  %v77_v14 = vld [vmem:[#allocation2 + $0x140] sm:$0xff]  ;;  %487 = vmatprep.subr.bf16.mxu0 %v1069_v4  ;;  %v1063_v15 = vcombine.high %v86_v12, %v90_v13  ;;  %v78_v17 = vld [vmem:[#allocation2 + $0x148] sm:$0xff]  ;;  %560 = vmatprep.subr.bf16.mxu1 %v1071_v9  ;;  %v1060_v19 = vcombine.low %v85_v7, %v89_v8  ;;  %v100_v3 = vld [vmem:[#allocation2 + $0x1f8] sm:$0xff] }
  0x12   :  { %v81_v16 = vld [vmem:[#allocation2 + $0x160] sm:$0xff]  ;;  %v82_v18 = vld [vmem:[#allocation2 + $0x168] sm:$0xff]  ;;  %488 = vmatpush1.bf16.msra.mxu0 %v1068_v6  ;;  %561 = vmatpush1.bf16.msra.mxu1 %v1070_v10  ;;  %v1062_v20 = vcombine.low %v86_v12, %v90_v13  ;;  %v1073_v6 = vcombine.high %v95_v63, %v99_v1  ;;  %v1075_v7 = vcombine.high %v96_v2, %v100_v3  ;;  %v87_v8 = vld [vmem:[#allocation2 + $0x190] sm:$0xff] }
  0x13   :  { %489 = vmatprep.subr.bf16.mxu0 %v1061_v11  ;;  %v1053_v21 = vcombine.high %v77_v14, %v81_v16  ;;  %562 = vmatprep.subr.bf16.mxu1 %v1063_v15  ;;  %v1055_v22 = vcombine.high %v78_v17, %v82_v18  ;;  %v69_v23 = vld [vmem:[#allocation2 + $0x100] sm:$0xff]  ;;  %v70_v25 = vld [vmem:[#allocation2 + $0x108] sm:$0xff]  ;;  %v1052_v27 = vcombine.low %v77_v14, %v81_v16  ;;  %v91_v9 = vld [vmem:[#allocation2 + $0x1b0] sm:$0xff] }
  0x14   :  { %v73_v24 = vld [vmem:[#allocation2 + $0x120] sm:$0xff]  ;;  %v74_v26 = vld [vmem:[#allocation2 + $0x128] sm:$0xff]  ;;  %v1054_v28 = vcombine.low %v78_v17, %v82_v18  ;;  %v88_v11 = vld [vmem:[#allocation2 + $0x198] sm:$0xff]  ;;  %v1072_v13 = vcombine.low %v95_v63, %v99_v1  ;;  %v1074_v14 = vcombine.low %v96_v2, %v100_v3  ;;  %v1065_v15 = vcombine.high %v87_v8, %v91_v9 }
  0x15   :  { %v1045_v29 = vcombine.high %v69_v23, %v73_v24  ;;  %v1047_v30 = vcombine.high %v70_v25, %v74_v26  ;;  %v61_v31 = vld [vmem:[#allocation2 + $0xc0] sm:$0xff]  ;;  %v62_v33 = vld [vmem:[#allocation2 + $0xc8] sm:$0xff]  ;;  %v1044_v35 = vcombine.low %v69_v23, %v73_v24  ;;  %v1046_v36 = vcombine.low %v70_v25, %v74_v26  ;;  %v92_v12 = vld [vmem:[#allocation2 + $0x1b8] sm:$0xff] }
  0x16   :  { %490 = vmatpush1.bf16.msra.mxu0 %v1060_v19  ;;  %563 = vmatpush1.bf16.msra.mxu1 %v1062_v20  ;;  %v65_v32 = vld [vmem:[#allocation2 + $0xe0] sm:$0xff]  ;;  %v66_v34 = vld [vmem:[#allocation2 + $0xe8] sm:$0xff]  ;;  %v1067_v16 = vcombine.high %v88_v11, %v92_v12  ;;  %v79_v17 = vld [vmem:[#allocation2 + $0x150] sm:$0xff] }
  0x17   :  { %491 = vmatprep.subr.bf16.mxu0 %v1053_v21  ;;  %564 = vmatprep.subr.bf16.mxu1 %v1055_v22  ;;  %v1037_v37 = vcombine.high %v61_v31, %v65_v32  ;;  %v53_v38 = vld [vmem:[#allocation2 + $0x80] sm:$0xff]  ;;  %v1039_v39 = vcombine.high %v62_v33, %v66_v34  ;;  %v54_v41 = vld [vmem:[#allocation2 + $0x88] sm:$0xff]  ;;  %v1036_v43 = vcombine.low %v61_v31, %v65_v32  ;;  %v83_v18 = vld [vmem:[#allocation2 + $0x170] sm:$0xff] }
  0x18   :  { %v57_v40 = vld [vmem:[#allocation2 + $0xa0] sm:$0xff]  ;;  %v58_v42 = vld [vmem:[#allocation2 + $0xa8] sm:$0xff]  ;;  %v1038_v44 = vcombine.low %v62_v33, %v66_v34  ;;  %v80_v19 = vld [vmem:[#allocation2 + $0x158] sm:$0xff]  ;;  %v1064_v21 = vcombine.low %v87_v8, %v91_v9  ;;  %v1066_v22 = vcombine.low %v88_v11, %v92_v12  ;;  %v1057_v23 = vcombine.high %v79_v17, %v83_v18 }
  0x19   :  { %v1029_v45 = vcombine.high %v53_v38, %v57_v40  ;;  %v45_v46 = vld [vmem:[#allocation2 + $0x40] sm:$0xff]  ;;  %v1031_v47 = vcombine.high %v54_v41, %v58_v42  ;;  %v46_v49 = vld [vmem:[#allocation2 + $0x48] sm:$0xff]  ;;  %v1028_v51 = vcombine.low %v53_v38, %v57_v40  ;;  %v1030_v52 = vcombine.low %v54_v41, %v58_v42  ;;  %v84_v20 = vld [vmem:[#allocation2 + $0x178] sm:$0xff] }
  0x1a   :  { %492 = vmatpush1.bf16.msra.mxu0 %v1052_v27  ;;  %565 = vmatpush1.bf16.msra.mxu1 %v1054_v28  ;;  %v49_v48 = vld [vmem:[#allocation2 + $0x60] sm:$0xff]  ;;  %v50_v50 = vld [vmem:[#allocation2 + $0x68] sm:$0xff]  ;;  %v1059_v24 = vcombine.high %v80_v19, %v84_v20  ;;  %v71_v25 = vld [vmem:[#allocation2 + $0x110] sm:$0xff]  ;;  %v1058_v31 = vcombine.low %v80_v19, %v84_v20 }
  0x1b   :  { %493 = vmatprep.subr.bf16.mxu0 %v1045_v29  ;;  %566 = vmatprep.subr.bf16.mxu1 %v1047_v30  ;;  %v1021_v53 = vcombine.high %v45_v46, %v49_v48  ;;  %v1023_v54 = vcombine.high %v46_v49, %v50_v50  ;;  %v37_v55 = vld [vmem:[#allocation2] sm:$0xff]  ;;  %v38_v57 = vld [vmem:[#allocation2 + $0x8] sm:$0xff]  ;;  %v1020_v59 = vcombine.low %v45_v46, %v49_v48  ;;  %v75_v26 = vld [vmem:[#allocation2 + $0x130] sm:$0xff] }
  0x1c   :  { %v41_v56 = vld [vmem:[#allocation2 + $0x20] sm:$0xff]  ;;  %v42_v58 = vld [vmem:[#allocation2 + $0x28] sm:$0xff]  ;;  %v1022_v60 = vcombine.low %v46_v49, %v50_v50  ;;  %v72_v28 = vld [vmem:[#allocation2 + $0x118] sm:$0xff]  ;;  %v1056_v30 = vcombine.low %v79_v17, %v83_v18  ;;  %v1049_v32 = vcombine.high %v71_v25, %v75_v26  ;;  %v1048_v38 = vcombine.low %v71_v25, %v75_v26 }
  0x1d   :  { %v1013_v61 = vcombine.high %v37_v55, %v41_v56  ;;  %v1015_v62 = vcombine.high %v38_v57, %v42_v58  ;;  %v1012_v4 = vcombine.low %v37_v55, %v41_v56  ;;  %v1014_v5 = vcombine.low %v38_v57, %v42_v58  ;;  %v1202_v10 = vld [vmem:[%s1436_s0] sm:$0xff]   ;;  %v1211_v27 = vld [vmem:[%s1436_s0 + $0x8] sm:$0xff]   ;;  %v76_v29 = vld [vmem:[#allocation2 + $0x138] sm:$0xff] }
  0x1e   :  { %494 = vmatpush1.bf16.msra.mxu0 %v1044_v35  ;;  %567 = vmatpush1.bf16.msra.mxu1 %v1046_v36  ;;  %v1051_v33 = vcombine.high %v72_v28, %v76_v29  ;;  %v63_v34 = vld [vmem:[#allocation2 + $0xd0] sm:$0xff]  ;;  %v64_v36 = vld [vmem:[#allocation2 + $0xd8] sm:$0xff]  ;;  %v1244_v11 = vld [vmem:[%s1438_s2] sm:$0xff] }
  0x1f   :  { %495 = vmatprep.subr.bf16.mxu0 %v1037_v37  ;;  %568 = vmatprep.subr.bf16.mxu1 %v1039_v39  ;;  %v67_v35 = vld [vmem:[#allocation2 + $0xf0] sm:$0xff]  ;;  %v68_v37 = vld [vmem:[#allocation2 + $0xf8] sm:$0xff]  ;;  %v1050_v39 = vcombine.low %v72_v28, %v76_v29 }
  0x20   :  { %v1041_v40 = vcombine.high %v63_v34, %v67_v35  ;;  %v1043_v41 = vcombine.high %v64_v36, %v68_v37  ;;  %v55_v42 = vld [vmem:[#allocation2 + $0x90] sm:$0xff]  ;;  %v60_v46 = vld [vmem:[#allocation2 + $0xb8] sm:$0xff]  ;;  %v1042_v48 = vcombine.low %v64_v36, %v68_v37 }
  0x21   :  { %v44_v63 = vld [vmem:[#allocation2 + $0x38] sm:$0xff] }
  0x22   :  { %496 = vmatpush1.bf16.msra.mxu0 %v1036_v43  ;;  %569 = vmatpush1.bf16.msra.mxu1 %v1038_v44  ;;  %v59_v43 = vld [vmem:[#allocation2 + $0xb0] sm:$0xff] }
  0x23   :  { %497 = vmatprep.subr.bf16.mxu0 %v1029_v45  ;;  %570 = vmatprep.subr.bf16.mxu1 %v1031_v47  ;;  %v1146_v44 = vld [vmem:[%s1436_s0 + $0x10] sm:$0xff]   ;;  %v56_v45 = vld [vmem:[#allocation2 + $0x98] sm:$0xff]  ;;  %v1040_v47 = vcombine.low %v63_v34, %v67_v35  ;;  %v1033_v49 = vcombine.high %v55_v42, %v59_v43  ;;  %v1032_v55 = vcombine.low %v55_v42, %v59_v43 }
  0x24   :  { %v1035_v50 = vcombine.high %v56_v45, %v60_v46  ;;  %v1034_v56 = vcombine.low %v56_v45, %v60_v46 }
  0x26   :  { %498 = vmatpush1.bf16.msra.mxu0 %v1028_v51  ;;  %571 = vmatpush1.bf16.msra.mxu1 %v1030_v52  ;;  %v47_v51 = vld [vmem:[#allocation2 + $0x50] sm:$0xff] }
  0x27   :  { %499 = vmatprep.subr.bf16.mxu0 %v1021_v53  ;;  %572 = vmatprep.subr.bf16.mxu1 %v1023_v54  ;;  %v51_v52 = vld [vmem:[#allocation2 + $0x70] sm:$0xff]  ;;  %v48_v53 = vld [vmem:[#allocation2 + $0x58] sm:$0xff] }
  0x28   :  { %v52_v54 = vld [vmem:[#allocation2 + $0x78] sm:$0xff]  ;;  %v1025_v57 = vcombine.high %v47_v51, %v51_v52  ;;  %v1024_v1 = vcombine.low %v47_v51, %v51_v52 }
  0x29   :  { %v1027_v58 = vcombine.high %v48_v53, %v52_v54  ;;  %v1026_v2 = vcombine.low %v48_v53, %v52_v54 }
  0x2a   :  { %500 = vmatpush1.bf16.msra.mxu0 %v1020_v59  ;;  %573 = vmatpush1.bf16.msra.mxu1 %v1022_v60  ;;  %v39_v59 = vld [vmem:[#allocation2 + $0x10] sm:$0xff] }
  0x2b   :  { %501 = vmatprep.subr.bf16.mxu0 %v1013_v61  ;;  %574 = vmatprep.subr.bf16.mxu1 %v1015_v62  ;;  %v43_v60 = vld [vmem:[#allocation2 + $0x30] sm:$0xff]  ;;  %v1147_v61 = vld [vmem:[%s1436_s0 + $0x18] sm:$0xff]  }
  0x2c   :  { %v40_v62 = vld [vmem:[#allocation2 + $0x18] sm:$0xff]  ;;  %v1017_v3 = vcombine.high %v39_v59, %v43_v60 }
  0x2e   :  { %502 = vmatpush1.bf16.msra.mxu0 %v1012_v4  ;;  %575 = vmatpush1.bf16.msra.mxu1 %v1014_v5  ;;  %v1019_v4 = vcombine.high %v40_v62, %v44_v63  ;;  %v1016_v5 = vcombine.low %v39_v59, %v43_v60 }
  0x2f   :  { %633 = vmatprep.subr.bf16.mxu0 %v1073_v6  ;;  %706 = vmatprep.subr.bf16.mxu1 %v1075_v7  ;;  %v1018_v6 = vcombine.low %v40_v62, %v44_v63  ;;  %v103_v7 = vlaneseq }
  0x31   :  { %520 = vmatmul.mubr.bf16.vlgmr.msra.gmra.mxu0 %v1202_v10  ;;  %593 = vmatmul.mubr.bf16.vlgmr.msra.gmra.mxu1 %v1202_v10  ;;  %v1237_v8 = vshrl.u32 %v103_v7, 7 }
  0x32   :  { %634 = vmatpush1.bf16.msra.mxu0 %v1072_v13  ;;  %707 = vmatpush1.bf16.msra.mxu1 %v1074_v14 }
  0x33   :  { %635 = vmatprep.subr.bf16.mxu0 %v1065_v15  ;;  %708 = vmatprep.subr.bf16.mxu1 %v1067_v16  ;;  %v105_v9 = vsub.s32 0, %v1237_v8  ;;  %v113_v12 = vsub.s32 2, %v1237_v8  ;;  %v117_v13 = vsub.s32 3, %v1237_v8 }
  0x34   :  { %529 = vmatprep.mubr.bf16.mxu0 %v1173_v0  ;;  %602 = vmatprep.mubr.bf16.mxu1 %v1173_v0 }
  0x35   :  { %v1255_v16 = vrot.slane %v1244_v11, %v113_v12  ;;  %v1258_v17 = vrot.slane %v1244_v11, %v117_v13 }
  0x36   :  { %636 = vmatpush1.bf16.msra.mxu0 %v1064_v21  ;;  %709 = vmatpush1.bf16.msra.mxu1 %v1066_v22 }
  0x37   :  { %637 = vmatprep.subr.bf16.mxu0 %v1057_v23  ;;  %710 = vmatprep.subr.bf16.mxu1 %v1059_v24 }
  0x39   :  { %530 = vmatmul.mubr.bf16.gmra.mxu0 %v1211_v27  ;;  %603 = vmatmul.mubr.bf16.gmra.mxu1 %v1211_v27 }
  0x3a   :  { %638 = vmatpush1.bf16.msra.mxu0 %v1056_v30  ;;  %711 = vmatpush1.bf16.msra.mxu1 %v1058_v31 }
  0x3b   :  { %639 = vmatprep.subr.bf16.mxu0 %v1049_v32  ;;  %712 = vmatprep.subr.bf16.mxu1 %v1051_v33 }
  0x3c   :  { %539 = vmatprep.mubr.bf16.mxu0 %v1173_v0  ;;  %612 = vmatprep.mubr.bf16.mxu1 %v1173_v0 }
  0x3e   :  { %640 = vmatpush1.bf16.msra.mxu0 %v1048_v38  ;;  %713 = vmatpush1.bf16.msra.mxu1 %v1050_v39 }
  0x3f   :  { %641 = vmatprep.subr.bf16.mxu0 %v1041_v40  ;;  %714 = vmatprep.subr.bf16.mxu1 %v1043_v41 }
  0x41   :  { %540 = vmatmul.mubr.bf16.gmra.mxu0 %v1146_v44  ;;  %613 = vmatmul.mubr.bf16.gmra.mxu1 %v1146_v44 }
  0x42   :  { %642 = vmatpush1.bf16.msra.mxu0 %v1040_v47  ;;  %715 = vmatpush1.bf16.msra.mxu1 %v1042_v48 }
  0x43   :  { %643 = vmatprep.subr.bf16.mxu0 %v1033_v49  ;;  %716 = vmatprep.subr.bf16.mxu1 %v1035_v50 }
  0x44   :  { %549 = vmatprep.mubr.bf16.mxu0 %v1173_v0  ;;  %622 = vmatprep.mubr.bf16.mxu1 %v1173_v0 }
  0x46   :  { %644 = vmatpush1.bf16.msra.mxu0 %v1032_v55  ;;  %717 = vmatpush1.bf16.msra.mxu1 %v1034_v56 }
  0x47   :  { %645 = vmatprep.subr.bf16.mxu0 %v1025_v57  ;;  %718 = vmatprep.subr.bf16.mxu1 %v1027_v58 }
  0x49   :  { %550 = vmatmul.mubr.bf16.gmra.mxu0 %v1147_v61  ;;  %623 = vmatmul.mubr.bf16.gmra.mxu1 %v1147_v61 }
  0x4a   :  { %646 = vmatpush1.bf16.msra.mxu0 %v1024_v1  ;;  %719 = vmatpush1.bf16.msra.mxu1 %v1026_v2 }
  0x4b   :  { %647 = vmatprep.subr.bf16.mxu0 %v1017_v3  ;;  %720 = vmatprep.subr.bf16.mxu1 %v1019_v4 }
  0x4c   :  { %665 = vmatprep.mubr.bf16.mxu0 %v1173_v0  ;;  %738 = vmatprep.mubr.bf16.mxu1 %v1173_v0 }
  0x4e   :  { %648 = vmatpush1.bf16.msra.mxu0 %v1016_v5  ;;  %721 = vmatpush1.bf16.msra.mxu1 %v1018_v6 }
  0x51   :  { %666 = vmatmul.mubr.bf16.vlgmr.msra.gmra.mxu0 %v1202_v10  ;;  %739 = vmatmul.mubr.bf16.vlgmr.msra.gmra.mxu1 %v1202_v10  ;;  %v109_v10 = vsub.s32 1, %v1237_v8 }
  0x52   :  { %675 = vmatprep.mubr.bf16.mxu0 %v1173_v0  ;;  %748 = vmatprep.mubr.bf16.mxu1 %v1173_v0 }
  0x53   :  { %v1252_v14 = vrot.slane %v1244_v11, %v109_v10 }
  0x59   :  { %676 = vmatmul.mubr.bf16.gmra.mxu0 %v1211_v27  ;;  %749 = vmatmul.mubr.bf16.gmra.mxu1 %v1211_v27 }
  0x5a   :  { %685 = vmatprep.mubr.bf16.mxu0 %v1173_v0  ;;  %758 = vmatprep.mubr.bf16.mxu1 %v1173_v0 }
  0x61   :  { %686 = vmatmul.mubr.bf16.gmra.mxu0 %v1146_v44  ;;  %759 = vmatmul.mubr.bf16.gmra.mxu1 %v1146_v44 }
  0x62   :  { %695 = vmatprep.mubr.bf16.mxu0 %v1173_v0  ;;  %768 = vmatprep.mubr.bf16.mxu1 %v1173_v0  ;;  %v1249_v0 = vrot.slane %v1244_v11, %v105_v9 }
  0x69   :  { %696 = vmatmul.mubr.bf16.gmra.mxu0 %v1147_v61  ;;  %769 = vmatmul.mubr.bf16.gmra.mxu1 %v1147_v61 }
  0xf1   :  { %v521_v15 = vpop.f32.mrf.mxu0  ;;  %v594_v18 = vpop.f32.mrf.mxu1 }
  0xf2   :  { %v522_v20 = vadd.f32 %v521_v15, %v1249_v0  ;;  %v595_v23 = vadd.f32 %v594_v18, %v1255_v16 }
  0xf3   :  { %v523_v19 = vpop.f32.mrf.mxu0  ;;  %v596_v22 = vpop.f32.mrf.mxu1 }
  0xf4   :  { %v524_v21 = vadd.f32 %v523_v19, %v1252_v14  ;;  %v597_v24 = vadd.f32 %v596_v22, %v1258_v17 }
  0xf5   :  { %v525_v25 = vpop.f32.mrf.mxu0  ;;  %v598_v27 = vpop.f32.mrf.mxu1 }
  0xf6   :  { %v1108_v26 = vpack.c.bf16 %v524_v21, %v522_v20  ;;  %v1109_v28 = vpack.c.bf16 %v597_v24, %v595_v23  ;;  %v526_v30 = vadd.f32 %v525_v25, %v1249_v0  ;;  %v599_v33 = vadd.f32 %v598_v27, %v1255_v16 }
  0xf7   :  { %v527_v29 = vpop.f32.mrf.mxu0  ;;  %v600_v32 = vpop.f32.mrf.mxu1  ;;  %v121_v25 = vsub.s32 4, %v1237_v8 }
  0xf8   :  { %971 = vst [vmem:[%s1439_s3] sm:$0xff] %v1108_v26  ;;  %v528_v31 = vadd.f32 %v527_v29, %v1252_v14  ;;  %972 = vst [vmem:[%s1439_s3 + $0x8] sm:$0xff] %v1109_v28  ;;  %v601_v34 = vadd.f32 %v600_v32, %v1258_v17  ;;  %v125_v26 = vsub.s32 5, %v1237_v8 }
  0xf9   :  { %v531_v35 = vpop.f32.mrf.mxu0  ;;  %v604_v37 = vpop.f32.mrf.mxu1 }
  0xfa   :  { %v1112_v36 = vpack.c.bf16 %v528_v31, %v526_v30  ;;  %v1113_v38 = vpack.c.bf16 %v601_v34, %v599_v33  ;;  %v532_v40 = vadd.f32 %v531_v35, %v1249_v0  ;;  %v605_v43 = vadd.f32 %v604_v37, %v1255_v16 }
  0xfb   :  { %v533_v39 = vpop.f32.mrf.mxu0  ;;  %v606_v42 = vpop.f32.mrf.mxu1  ;;  %v129_v30 = vsub.s32 6, %v1237_v8  ;;  %v133_v31 = vsub.s32 7, %v1237_v8 }
  0xfc   :  { %975 = vst [vmem:[%s1439_s3 + $0x20] sm:$0xff] %v1112_v36  ;;  %v534_v41 = vadd.f32 %v533_v39, %v1252_v14  ;;  %976 = vst [vmem:[%s1439_s3 + $0x28] sm:$0xff] %v1113_v38  ;;  %v607_v44 = vadd.f32 %v606_v42, %v1258_v17  ;;  %v1334_v39 = vrot.slane %v1244_v11, %v121_v25 }
  0xfd   :  { %v535_v45 = vpop.f32.mrf.mxu0  ;;  %v608_v47 = vpop.f32.mrf.mxu1 }
  0xfe   :  { %v1116_v46 = vpack.c.bf16 %v534_v41, %v532_v40  ;;  %v1117_v48 = vpack.c.bf16 %v607_v44, %v605_v43  ;;  %v536_v50 = vadd.f32 %v535_v45, %v1249_v0  ;;  %v609_v53 = vadd.f32 %v608_v47, %v1255_v16 }
  0xff   :  { %v537_v49 = vpop.f32.mrf.mxu0  ;;  %v610_v52 = vpop.f32.mrf.mxu1  ;;  %v1337_v40 = vrot.slane %v1244_v11, %v125_v26 }
 0x100   :  { %979 = vst [vmem:[%s1439_s3 + $0x40] sm:$0xff] %v1116_v46  ;;  %v538_v51 = vadd.f32 %v537_v49, %v1252_v14  ;;  %980 = vst [vmem:[%s1439_s3 + $0x48] sm:$0xff] %v1117_v48  ;;  %v611_v54 = vadd.f32 %v610_v52, %v1258_v17 }
 0x101   :  { %v541_v55 = vpop.f32.mrf.mxu0  ;;  %v614_v57 = vpop.f32.mrf.mxu1 }
 0x102   :  { %v1120_v56 = vpack.c.bf16 %v538_v51, %v536_v50  ;;  %v1121_v58 = vpack.c.bf16 %v611_v54, %v609_v53  ;;  %v542_v60 = vadd.f32 %v541_v55, %v1249_v0  ;;  %v615_v63 = vadd.f32 %v614_v57, %v1255_v16 }
 0x103   :  { %v543_v59 = vpop.f32.mrf.mxu0  ;;  %v616_v62 = vpop.f32.mrf.mxu1 }
 0x104   :  { %983 = vst [vmem:[%s1439_s3 + $0x60] sm:$0xff] %v1120_v56  ;;  %v544_v61 = vadd.f32 %v543_v59, %v1252_v14  ;;  %984 = vst [vmem:[%s1439_s3 + $0x68] sm:$0xff] %v1121_v58  ;;  %v617_v1 = vadd.f32 %v616_v62, %v1258_v17 }
 0x105   :  { %v545_v2 = vpop.f32.mrf.mxu0  ;;  %v618_v4 = vpop.f32.mrf.mxu1 }
 0x106   :  { %v1124_v3 = vpack.c.bf16 %v544_v61, %v542_v60  ;;  %v1125_v5 = vpack.c.bf16 %v617_v1, %v615_v63  ;;  %v546_v7 = vadd.f32 %v545_v2, %v1249_v0  ;;  %v619_v12 = vadd.f32 %v618_v4, %v1255_v16 }
 0x107   :  { %v547_v6 = vpop.f32.mrf.mxu0  ;;  %v620_v10 = vpop.f32.mrf.mxu1 }
 0x108   :  { %987 = vst [vmem:[%s1439_s3 + $0x80] sm:$0xff] %v1124_v3  ;;  %v548_v9 = vadd.f32 %v547_v6, %v1252_v14  ;;  %988 = vst [vmem:[%s1439_s3 + $0x88] sm:$0xff] %v1125_v5  ;;  %v621_v13 = vadd.f32 %v620_v10, %v1258_v17 }
 0x109   :  { %v551_v15 = vpop.f32.mrf.mxu0  ;;  %v624_v19 = vpop.f32.mrf.mxu1 }
 0x10a   :  { %v1128_v18 = vpack.c.bf16 %v548_v9, %v546_v7  ;;  %v1129_v20 = vpack.c.bf16 %v621_v13, %v619_v12  ;;  %v552_v22 = vadd.f32 %v551_v15, %v1249_v0  ;;  %v625_v27 = vadd.f32 %v624_v19, %v1255_v16 }
 0x10b   :  { %v553_v21 = vpop.f32.mrf.mxu0  ;;  %v626_v24 = vpop.f32.mrf.mxu1 }
 0x10c   :  { %991 = vst [vmem:[%s1439_s3 + $0xa0] sm:$0xff] %v1128_v18  ;;  %v554_v23 = vadd.f32 %v553_v21, %v1252_v14  ;;  %992 = vst [vmem:[%s1439_s3 + $0xa8] sm:$0xff] %v1129_v20  ;;  %v627_v28 = vadd.f32 %v626_v24, %v1258_v17 }
 0x10d   :  { %v555_v29 = vpop.f32.mrf.mxu0  ;;  %v628_v33 = vpop.f32.mrf.mxu1 }
 0x10e   :  { %v1132_v32 = vpack.c.bf16 %v554_v23, %v552_v22  ;;  %v1133_v34 = vpack.c.bf16 %v627_v28, %v625_v27  ;;  %v556_v36 = vadd.f32 %v555_v29, %v1249_v0  ;;  %v629_v8 = vadd.f32 %v628_v33, %v1255_v16 }
 0x10f   :  { %v557_v35 = vpop.f32.mrf.mxu0  ;;  %v630_v38 = vpop.f32.mrf.mxu1  ;;  %v1345_v0 = vrot.slane %v1244_v11, %v129_v30 }
 0x110   :  { %995 = vst [vmem:[%s1439_s3 + $0xc0] sm:$0xff] %v1132_v32  ;;  %v558_v37 = vadd.f32 %v557_v35, %v1252_v14  ;;  %996 = vst [vmem:[%s1439_s3 + $0xc8] sm:$0xff] %v1133_v34  ;;  %v631_v41 = vadd.f32 %v630_v38, %v1258_v17  ;;  %v1348_v14 = vrot.slane %v1244_v11, %v133_v31 }
 0x111   :  { %v667_v42 = vpop.f32.mrf.mxu0  ;;  %v740_v44 = vpop.f32.mrf.mxu1 }
 0x112   :  { %v1136_v43 = vpack.c.bf16 %v558_v37, %v556_v36  ;;  %v1137_v45 = vpack.c.bf16 %v631_v41, %v629_v8  ;;  %v668_v47 = vadd.f32 %v667_v42, %v1334_v39  ;;  %v741_v11 = vadd.f32 %v740_v44, %v1345_v0 }
 0x113   :  { %v669_v46 = vpop.f32.mrf.mxu0  ;;  %v742_v17 = vpop.f32.mrf.mxu1 }
 0x114   :  { %999 = vst [vmem:[%s1439_s3 + $0xe0] sm:$0xff] %v1136_v43  ;;  %v670_v16 = vadd.f32 %v669_v46, %v1337_v40  ;;  %1000 = vst [vmem:[%s1439_s3 + $0xe8] sm:$0xff] %v1137_v45  ;;  %v743_v48 = vadd.f32 %v742_v17, %v1348_v14 }
 0x115   :  { %v671_v49 = vpop.f32.mrf.mxu0  ;;  %v744_v51 = vpop.f32.mrf.mxu1 }
 0x116   :  { %v1110_v50 = vpack.c.bf16 %v670_v16, %v668_v47  ;;  %v1111_v52 = vpack.c.bf16 %v743_v48, %v741_v11  ;;  %v672_v54 = vadd.f32 %v671_v49, %v1334_v39  ;;  %v745_v57 = vadd.f32 %v744_v51, %v1345_v0 }
 0x117   :  { %v673_v53 = vpop.f32.mrf.mxu0  ;;  %v746_v56 = vpop.f32.mrf.mxu1 }
 0x118   :  { %973 = vst [vmem:[%s1439_s3 + $0x10] sm:$0xff] %v1110_v50  ;;  %v674_v55 = vadd.f32 %v673_v53, %v1337_v40  ;;  %974 = vst [vmem:[%s1439_s3 + $0x18] sm:$0xff] %v1111_v52  ;;  %v747_v58 = vadd.f32 %v746_v56, %v1348_v14 }
 0x119   :  { %v677_v59 = vpop.f32.mrf.mxu0  ;;  %v750_v61 = vpop.f32.mrf.mxu1 }
 0x11a   :  { %v1114_v60 = vpack.c.bf16 %v674_v55, %v672_v54  ;;  %v1115_v62 = vpack.c.bf16 %v747_v58, %v745_v57  ;;  %v678_v1 = vadd.f32 %v677_v59, %v1334_v39  ;;  %v751_v4 = vadd.f32 %v750_v61, %v1345_v0 }
 0x11b   :  { %v679_v63 = vpop.f32.mrf.mxu0  ;;  %v752_v3 = vpop.f32.mrf.mxu1 }
 0x11c   :  { %977 = vst [vmem:[%s1439_s3 + $0x30] sm:$0xff] %v1114_v60  ;;  %v680_v2 = vadd.f32 %v679_v63, %v1337_v40  ;;  %978 = vst [vmem:[%s1439_s3 + $0x38] sm:$0xff] %v1115_v62  ;;  %v753_v5 = vadd.f32 %v752_v3, %v1348_v14 }
 0x11d   :  { %v681_v6 = vpop.f32.mrf.mxu0  ;;  %v754_v9 = vpop.f32.mrf.mxu1 }
 0x11e   :  { %v1118_v7 = vpack.c.bf16 %v680_v2, %v678_v1  ;;  %v1119_v10 = vpack.c.bf16 %v753_v5, %v751_v4  ;;  %v682_v13 = vadd.f32 %v681_v6, %v1334_v39  ;;  %v755_v19 = vadd.f32 %v754_v9, %v1345_v0 }
 0x11f   :  { %v683_v12 = vpop.f32.mrf.mxu0  ;;  %v756_v18 = vpop.f32.mrf.mxu1 }
 0x120   :  { %981 = vst [vmem:[%s1439_s3 + $0x50] sm:$0xff] %v1118_v7  ;;  %v684_v15 = vadd.f32 %v683_v12, %v1337_v40  ;;  %982 = vst [vmem:[%s1439_s3 + $0x58] sm:$0xff] %v1119_v10  ;;  %v757_v20 = vadd.f32 %v756_v18, %v1348_v14 }
 0x121   :  { %v687_v21 = vpop.f32.mrf.mxu0  ;;  %v760_v23 = vpop.f32.mrf.mxu1 }
 0x122   :  { %v1122_v22 = vpack.c.bf16 %v684_v15, %v682_v13  ;;  %v1123_v24 = vpack.c.bf16 %v757_v20, %v755_v19  ;;  %v688_v26 = vadd.f32 %v687_v21, %v1334_v39  ;;  %v761_v29 = vadd.f32 %v760_v23, %v1345_v0 }
 0x123   :  { %v689_v25 = vpop.f32.mrf.mxu0  ;;  %v762_v28 = vpop.f32.mrf.mxu1 }
 0x124   :  { %985 = vst [vmem:[%s1439_s3 + $0x70] sm:$0xff] %v1122_v22  ;;  %v690_v27 = vadd.f32 %v689_v25, %v1337_v40  ;;  %986 = vst [vmem:[%s1439_s3 + $0x78] sm:$0xff] %v1123_v24  ;;  %v763_v30 = vadd.f32 %v762_v28, %v1348_v14 }
 0x125   :  { %v691_v31 = vpop.f32.mrf.mxu0  ;;  %v764_v33 = vpop.f32.mrf.mxu1 }
 0x126   :  { %v1126_v32 = vpack.c.bf16 %v690_v27, %v688_v26  ;;  %v1127_v34 = vpack.c.bf16 %v763_v30, %v761_v29  ;;  %v692_v36 = vadd.f32 %v691_v31, %v1334_v39  ;;  %v765_v8 = vadd.f32 %v764_v33, %v1345_v0 }
 0x127   :  { %v693_v35 = vpop.f32.mrf.mxu0  ;;  %v766_v38 = vpop.f32.mrf.mxu1 }
 0x128   :  { %989 = vst [vmem:[%s1439_s3 + $0x90] sm:$0xff] %v1126_v32  ;;  %v694_v37 = vadd.f32 %v693_v35, %v1337_v40  ;;  %990 = vst [vmem:[%s1439_s3 + $0x98] sm:$0xff] %v1127_v34  ;;  %v767_v41 = vadd.f32 %v766_v38, %v1348_v14 }
 0x129   :  { %v697_v42 = vpop.f32.mrf.mxu0  ;;  %v770_v44 = vpop.f32.mrf.mxu1 }
 0x12a   :  { %v1130_v43 = vpack.c.bf16 %v694_v37, %v692_v36  ;;  %v1131_v45 = vpack.c.bf16 %v767_v41, %v765_v8  ;;  %v698_v47 = vadd.f32 %v697_v42, %v1334_v39  ;;  %v771_v11 = vadd.f32 %v770_v44, %v1345_v0 }
 0x12b   :  { %v699_v46 = vpop.f32.mrf.mxu0  ;;  %v772_v17 = vpop.f32.mrf.mxu1 }
 0x12c   :  { %993 = vst [vmem:[%s1439_s3 + $0xb0] sm:$0xff] %v1130_v43  ;;  %v700_v16 = vadd.f32 %v699_v46, %v1337_v40  ;;  %994 = vst [vmem:[%s1439_s3 + $0xb8] sm:$0xff] %v1131_v45  ;;  %v773_v48 = vadd.f32 %v772_v17, %v1348_v14 }
 0x12d   :  { %v701_v49 = vpop.f32.mrf.mxu0  ;;  %v774_v51 = vpop.f32.mrf.mxu1 }
 0x12e   :  { %v1134_v50 = vpack.c.bf16 %v700_v16, %v698_v47  ;;  %v1135_v52 = vpack.c.bf16 %v773_v48, %v771_v11  ;;  %v702_v54 = vadd.f32 %v701_v49, %v1334_v39  ;;  %v775_v57 = vadd.f32 %v774_v51, %v1345_v0 }
 0x12f   :  { %v703_v53 = vpop.f32.mrf.mxu0  ;;  %v776_v56 = vpop.f32.mrf.mxu1 }
 0x130   :  { %997 = vst [vmem:[%s1439_s3 + $0xd0] sm:$0xff] %v1134_v50  ;;  %v704_v55 = vadd.f32 %v703_v53, %v1337_v40  ;;  %998 = vst [vmem:[%s1439_s3 + $0xd8] sm:$0xff] %v1135_v52  ;;  %v777_v58 = vadd.f32 %v776_v56, %v1348_v14 }
 0x132   :  { %v1138_v59 = vpack.c.bf16 %v704_v55, %v702_v54  ;;  %v1139_v60 = vpack.c.bf16 %v777_v58, %v775_v57 }
 0x134   :  { %1001 = vst [vmem:[%s1439_s3 + $0xf0] sm:$0xff] %v1138_v59  ;;  %1002 = vst [vmem:[%s1439_s3 + $0xf8] sm:$0xff] %v1139_v60 }
 0x135   :  { %1007 = vsyncpa [#allocation3], 1 }

// kernel: _lambda_.7
= control target key start
LH: loop header
LB: loop body
LE: loop exit
PB: predicated region body
PF: predicated region fallthrough
CT: control target
= control target key end

     0   :  { %v1980_v3 = vmov 0   ;;  %s2878_s3 = inlined_call_operand.vmem [shape: bf16[128,1024], index: 3, kind: input, shape index: {}]   ;;  %s2879_s1 = inlined_call_operand.vmem [shape: bf16[64,128], index: 1, kind: input, shape index: {}]   ;;  %s2880_s0 = inlined_call_operand.vmem [shape: bf16[64,128], index: 0, kind: input, shape index: {}]   ;;  %s2881_s2 = inlined_call_operand.vmem [shape: bf16[128,1024], index: 2, kind: input, shape index: {}]   ;;  %s2882_s4 = inlined_call_operand.vmem [shape: f32[1,1024], index: 4, kind: input, shape index: {}]   ;;  %s2883_s5 = inlined_call_operand.vmem [shape: bf16[64,1024], index: 5, kind: output, shape index: {}]  }
   0x1   :  { %v157_v0 = vld [vmem:[%s2878_s3 + $0x1c0] sm:$0xff]  ;;  %v158_v2 = vld [vmem:[%s2878_s3 + $0x1c8] sm:$0xff]  ;;  %541 = vmatprep.mubr.bf16.mxu0 %v1980_v3  ;;  %614 = vmatprep.mubr.bf16.mxu1 %v1980_v3  ;;  %v159_v63 = vld [vmem:[%s2878_s3 + $0x1d0] sm:$0xff] }
   0x2   :  { %v161_v1 = vld [vmem:[%s2878_s3 + $0x1e0] sm:$0xff]  ;;  %v162_v5 = vld [vmem:[%s2878_s3 + $0x1e8] sm:$0xff] }
   0x3   :  { %v1832_v4 = vcombine.high %v157_v0, %v161_v1  ;;  %v1831_v6 = vcombine.low %v157_v0, %v161_v1  ;;  %v149_v7 = vld [vmem:[%s2878_s3 + $0x180] sm:$0xff]  ;;  %v1834_v9 = vcombine.high %v158_v2, %v162_v5  ;;  %v1833_v10 = vcombine.low %v158_v2, %v162_v5  ;;  %v150_v12 = vld [vmem:[%s2878_s3 + $0x188] sm:$0xff]  ;;  %v163_v0 = vld [vmem:[%s2878_s3 + $0x1f0] sm:$0xff] }
   0x4   :  { %v153_v8 = vld [vmem:[%s2878_s3 + $0x1a0] sm:$0xff]  ;;  %v154_v13 = vld [vmem:[%s2878_s3 + $0x1a8] sm:$0xff]  ;;  %v160_v1 = vld [vmem:[%s2878_s3 + $0x1d8] sm:$0xff] }
   0x5   :  { %v1824_v11 = vcombine.high %v149_v7, %v153_v8  ;;  %v141_v14 = vld [vmem:[%s2878_s3 + $0x140] sm:$0xff]  ;;  %509 = vmatprep.subr.bf16.mxu0 %v1832_v4  ;;  %v1826_v15 = vcombine.high %v150_v12, %v154_v13  ;;  %v142_v17 = vld [vmem:[%s2878_s3 + $0x148] sm:$0xff]  ;;  %582 = vmatprep.subr.bf16.mxu1 %v1834_v9  ;;  %v1823_v19 = vcombine.low %v149_v7, %v153_v8  ;;  %v164_v2 = vld [vmem:[%s2878_s3 + $0x1f8] sm:$0xff] }
   0x6   :  { %v145_v16 = vld [vmem:[%s2878_s3 + $0x160] sm:$0xff]  ;;  %v146_v18 = vld [vmem:[%s2878_s3 + $0x168] sm:$0xff]  ;;  %510 = vmatpush1.bf16.msra.mxu0 %v1831_v6  ;;  %583 = vmatpush1.bf16.msra.mxu1 %v1833_v10  ;;  %v1825_v20 = vcombine.low %v150_v12, %v154_v13  ;;  %v1836_v6 = vcombine.high %v159_v63, %v163_v0  ;;  %v1838_v7 = vcombine.high %v160_v1, %v164_v2  ;;  %v151_v8 = vld [vmem:[%s2878_s3 + $0x190] sm:$0xff] }
   0x7   :  { %511 = vmatprep.subr.bf16.mxu0 %v1824_v11  ;;  %v1816_v21 = vcombine.high %v141_v14, %v145_v16  ;;  %584 = vmatprep.subr.bf16.mxu1 %v1826_v15  ;;  %v1818_v22 = vcombine.high %v142_v17, %v146_v18  ;;  %v133_v23 = vld [vmem:[%s2878_s3 + $0x100] sm:$0xff]  ;;  %v134_v25 = vld [vmem:[%s2878_s3 + $0x108] sm:$0xff]  ;;  %v1815_v27 = vcombine.low %v141_v14, %v145_v16  ;;  %v155_v9 = vld [vmem:[%s2878_s3 + $0x1b0] sm:$0xff] }
   0x8   :  { %v137_v24 = vld [vmem:[%s2878_s3 + $0x120] sm:$0xff]  ;;  %v138_v26 = vld [vmem:[%s2878_s3 + $0x128] sm:$0xff]  ;;  %v1817_v28 = vcombine.low %v142_v17, %v146_v18  ;;  %v152_v11 = vld [vmem:[%s2878_s3 + $0x198] sm:$0xff]  ;;  %v1835_v13 = vcombine.low %v159_v63, %v163_v0  ;;  %v1837_v14 = vcombine.low %v160_v1, %v164_v2  ;;  %v1828_v15 = vcombine.high %v151_v8, %v155_v9 }
   0x9   :  { %v1808_v29 = vcombine.high %v133_v23, %v137_v24  ;;  %v1810_v30 = vcombine.high %v134_v25, %v138_v26  ;;  %v125_v31 = vld [vmem:[%s2878_s3 + $0xc0] sm:$0xff]  ;;  %v126_v33 = vld [vmem:[%s2878_s3 + $0xc8] sm:$0xff]  ;;  %v1807_v35 = vcombine.low %v133_v23, %v137_v24  ;;  %v1809_v36 = vcombine.low %v134_v25, %v138_v26  ;;  %v156_v12 = vld [vmem:[%s2878_s3 + $0x1b8] sm:$0xff] }
   0xa   :  { %512 = vmatpush1.bf16.msra.mxu0 %v1823_v19  ;;  %585 = vmatpush1.bf16.msra.mxu1 %v1825_v20  ;;  %v129_v32 = vld [vmem:[%s2878_s3 + $0xe0] sm:$0xff]  ;;  %v130_v34 = vld [vmem:[%s2878_s3 + $0xe8] sm:$0xff]  ;;  %v1830_v16 = vcombine.high %v152_v11, %v156_v12  ;;  %v143_v17 = vld [vmem:[%s2878_s3 + $0x150] sm:$0xff] }
   0xb   :  { %513 = vmatprep.subr.bf16.mxu0 %v1816_v21  ;;  %586 = vmatprep.subr.bf16.mxu1 %v1818_v22  ;;  %v1800_v37 = vcombine.high %v125_v31, %v129_v32  ;;  %v117_v38 = vld [vmem:[%s2878_s3 + $0x80] sm:$0xff]  ;;  %v1802_v39 = vcombine.high %v126_v33, %v130_v34  ;;  %v118_v41 = vld [vmem:[%s2878_s3 + $0x88] sm:$0xff]  ;;  %v1799_v43 = vcombine.low %v125_v31, %v129_v32  ;;  %v147_v18 = vld [vmem:[%s2878_s3 + $0x170] sm:$0xff] }
   0xc   :  { %v121_v40 = vld [vmem:[%s2878_s3 + $0xa0] sm:$0xff]  ;;  %v122_v42 = vld [vmem:[%s2878_s3 + $0xa8] sm:$0xff]  ;;  %v1801_v44 = vcombine.low %v126_v33, %v130_v34  ;;  %v144_v19 = vld [vmem:[%s2878_s3 + $0x158] sm:$0xff]  ;;  %v1827_v21 = vcombine.low %v151_v8, %v155_v9  ;;  %v1829_v22 = vcombine.low %v152_v11, %v156_v12  ;;  %v1820_v23 = vcombine.high %v143_v17, %v147_v18 }
   0xd   :  { %v1792_v45 = vcombine.high %v117_v38, %v121_v40  ;;  %v109_v46 = vld [vmem:[%s2878_s3 + $0x40] sm:$0xff]  ;;  %v1794_v47 = vcombine.high %v118_v41, %v122_v42  ;;  %v110_v49 = vld [vmem:[%s2878_s3 + $0x48] sm:$0xff]  ;;  %v1791_v51 = vcombine.low %v117_v38, %v121_v40  ;;  %v1793_v52 = vcombine.low %v118_v41, %v122_v42  ;;  %v148_v20 = vld [vmem:[%s2878_s3 + $0x178] sm:$0xff] }
   0xe   :  { %514 = vmatpush1.bf16.msra.mxu0 %v1815_v27  ;;  %587 = vmatpush1.bf16.msra.mxu1 %v1817_v28  ;;  %v113_v48 = vld [vmem:[%s2878_s3 + $0x60] sm:$0xff]  ;;  %v114_v50 = vld [vmem:[%s2878_s3 + $0x68] sm:$0xff]  ;;  %v1822_v25 = vcombine.high %v144_v19, %v148_v20  ;;  %v135_v26 = vld [vmem:[%s2878_s3 + $0x110] sm:$0xff]  ;;  %v1821_v31 = vcombine.low %v144_v19, %v148_v20 }
   0xf   :  { %515 = vmatprep.subr.bf16.mxu0 %v1808_v29  ;;  %588 = vmatprep.subr.bf16.mxu1 %v1810_v30  ;;  %v1784_v53 = vcombine.high %v109_v46, %v113_v48  ;;  %v1786_v54 = vcombine.high %v110_v49, %v114_v50  ;;  %v101_v55 = vld [vmem:[%s2878_s3] sm:$0xff]  ;;  %v102_v57 = vld [vmem:[%s2878_s3 + $0x8] sm:$0xff]  ;;  %v1783_v59 = vcombine.low %v109_v46, %v113_v48  ;;  %v139_v27 = vld [vmem:[%s2878_s3 + $0x130] sm:$0xff] }
  0x10   :  { %v105_v56 = vld [vmem:[%s2878_s3 + $0x20] sm:$0xff]  ;;  %v106_v58 = vld [vmem:[%s2878_s3 + $0x28] sm:$0xff]  ;;  %v1785_v60 = vcombine.low %v110_v49, %v114_v50  ;;  %v136_v28 = vld [vmem:[%s2878_s3 + $0x118] sm:$0xff]  ;;  %v1819_v30 = vcombine.low %v143_v17, %v147_v18  ;;  %v1812_v32 = vcombine.high %v135_v26, %v139_v27  ;;  %v1811_v38 = vcombine.low %v135_v26, %v139_v27 }
  0x11   :  { %v1776_v61 = vcombine.high %v101_v55, %v105_v56  ;;  %v1778_v62 = vcombine.high %v102_v57, %v106_v58  ;;  %v1775_v4 = vcombine.low %v101_v55, %v105_v56  ;;  %v1777_v5 = vcombine.low %v102_v57, %v106_v58  ;;  %v2130_v10 = vld [vmem:[%s2879_s1] sm:$0xff]   ;;  %v2156_v24 = vld [vmem:[%s2879_s1 + $0x8] sm:$0xff]   ;;  %v140_v29 = vld [vmem:[%s2878_s3 + $0x138] sm:$0xff] }
  0x12   :  { %516 = vmatpush1.bf16.msra.mxu0 %v1807_v35  ;;  %589 = vmatpush1.bf16.msra.mxu1 %v1809_v36  ;;  %v1814_v33 = vcombine.high %v136_v28, %v140_v29  ;;  %v127_v34 = vld [vmem:[%s2878_s3 + $0xd0] sm:$0xff]  ;;  %v128_v36 = vld [vmem:[%s2878_s3 + $0xd8] sm:$0xff]  ;;  %v90_v8 = vld [vmem:[%s2881_s2 + $0x1e8] sm:$0xff] }
  0x13   :  { %517 = vmatprep.subr.bf16.mxu0 %v1800_v37  ;;  %590 = vmatprep.subr.bf16.mxu1 %v1802_v39  ;;  %v131_v35 = vld [vmem:[%s2878_s3 + $0xf0] sm:$0xff]  ;;  %v132_v37 = vld [vmem:[%s2878_s3 + $0xf8] sm:$0xff]  ;;  %v1813_v39 = vcombine.low %v136_v28, %v140_v29  ;;  %v82_v17 = vld [vmem:[%s2881_s2 + $0x1a8] sm:$0xff] }
  0x14   :  { %v2188_v40 = vld [vmem:[%s2879_s1 + $0x10] sm:$0xff]   ;;  %v1804_v41 = vcombine.high %v127_v34, %v131_v35  ;;  %v1806_v42 = vcombine.high %v128_v36, %v132_v37  ;;  %v124_v46 = vld [vmem:[%s2878_s3 + $0xb8] sm:$0xff]  ;;  %v1805_v48 = vcombine.low %v128_v36, %v132_v37  ;;  %v74_v26 = vld [vmem:[%s2881_s2 + $0x168] sm:$0xff] }
  0x15   :  { %v108_v63 = vld [vmem:[%s2878_s3 + $0x38] sm:$0xff] }
  0x16   :  { %518 = vmatpush1.bf16.msra.mxu0 %v1799_v43  ;;  %591 = vmatpush1.bf16.msra.mxu1 %v1801_v44  ;;  %v119_v43 = vld [vmem:[%s2878_s3 + $0x90] sm:$0xff] }
  0x17   :  { %519 = vmatprep.subr.bf16.mxu0 %v1792_v45  ;;  %592 = vmatprep.subr.bf16.mxu1 %v1794_v47  ;;  %v123_v44 = vld [vmem:[%s2878_s3 + $0xb0] sm:$0xff]  ;;  %v120_v45 = vld [vmem:[%s2878_s3 + $0x98] sm:$0xff]  ;;  %v1803_v47 = vcombine.low %v127_v34, %v131_v35 }
  0x18   :  { %v1796_v49 = vcombine.high %v119_v43, %v123_v44  ;;  %v1798_v50 = vcombine.high %v120_v45, %v124_v46  ;;  %v1795_v55 = vcombine.low %v119_v43, %v123_v44  ;;  %v1797_v56 = vcombine.low %v120_v45, %v124_v46 }
  0x1a   :  { %520 = vmatpush1.bf16.msra.mxu0 %v1791_v51  ;;  %593 = vmatpush1.bf16.msra.mxu1 %v1793_v52  ;;  %v111_v51 = vld [vmem:[%s2878_s3 + $0x50] sm:$0xff] }
  0x1b   :  { %521 = vmatprep.subr.bf16.mxu0 %v1784_v53  ;;  %594 = vmatprep.subr.bf16.mxu1 %v1786_v54  ;;  %v115_v52 = vld [vmem:[%s2878_s3 + $0x70] sm:$0xff]  ;;  %v112_v53 = vld [vmem:[%s2878_s3 + $0x58] sm:$0xff] }
  0x1c   :  { %v116_v54 = vld [vmem:[%s2878_s3 + $0x78] sm:$0xff]  ;;  %v1788_v57 = vcombine.high %v111_v51, %v115_v52  ;;  %v1787_v0 = vcombine.low %v111_v51, %v115_v52 }
  0x1d   :  { %v1790_v58 = vcombine.high %v112_v53, %v116_v54  ;;  %v1789_v1 = vcombine.low %v112_v53, %v116_v54  ;;  %v37_v54 = vld [vmem:[%s2881_s2 + $0x40] sm:$0xff] }
  0x1e   :  { %522 = vmatpush1.bf16.msra.mxu0 %v1783_v59  ;;  %595 = vmatpush1.bf16.msra.mxu1 %v1785_v60  ;;  %v103_v59 = vld [vmem:[%s2878_s3 + $0x10] sm:$0xff] }
  0x1f   :  { %523 = vmatprep.subr.bf16.mxu0 %v1776_v61  ;;  %596 = vmatprep.subr.bf16.mxu1 %v1778_v62  ;;  %v107_v60 = vld [vmem:[%s2878_s3 + $0x30] sm:$0xff]  ;;  %v2229_v61 = vld [vmem:[%s2879_s1 + $0x18] sm:$0xff]  }
  0x20   :  { %v104_v62 = vld [vmem:[%s2878_s3 + $0x18] sm:$0xff]  ;;  %v1780_v2 = vcombine.high %v103_v59, %v107_v60  ;;  %v1779_v9 = vcombine.low %v103_v59, %v107_v60 }
  0x21   :  { %v1781_v11 = vcombine.low %v104_v62, %v108_v63 }
  0x22   :  { %524 = vmatpush1.bf16.msra.mxu0 %v1775_v4  ;;  %597 = vmatpush1.bf16.msra.mxu1 %v1777_v5  ;;  %v1782_v4 = vcombine.high %v104_v62, %v108_v63  ;;  %v85_v5 = vld [vmem:[%s2881_s2 + $0x1c0] sm:$0xff] }
  0x23   :  { %655 = vmatprep.subr.bf16.mxu0 %v1836_v6  ;;  %728 = vmatprep.subr.bf16.mxu1 %v1838_v7  ;;  %v89_v6 = vld [vmem:[%s2881_s2 + $0x1e0] sm:$0xff]  ;;  %v86_v7 = vld [vmem:[%s2881_s2 + $0x1c8] sm:$0xff] }
  0x24   :  { %v1900_v12 = vcombine.high %v85_v5, %v89_v6  ;;  %v1899_v18 = vcombine.low %v85_v5, %v89_v6  ;;  %v1901_v19 = vcombine.low %v86_v7, %v90_v8  ;;  %v29_v63 = vld [vmem:[%s2881_s2] sm:$0xff] }
  0x25   :  { %542 = vmatmul.mubr.bf16.vlgmr.msra.gmra.mxu0 %v2130_v10  ;;  %615 = vmatmul.mubr.bf16.vlgmr.msra.gmra.mxu1 %v2130_v10 }
  0x26   :  { %656 = vmatpush1.bf16.msra.mxu0 %v1835_v13  ;;  %729 = vmatpush1.bf16.msra.mxu1 %v1837_v14  ;;  %v1902_v13 = vcombine.high %v86_v7, %v90_v8  ;;  %v77_v14 = vld [vmem:[%s2881_s2 + $0x180] sm:$0xff]  ;;  %v87_v7 = vld [vmem:[%s2881_s2 + $0x1d0] sm:$0xff] }
  0x27   :  { %657 = vmatprep.subr.bf16.mxu0 %v1828_v15  ;;  %730 = vmatprep.subr.bf16.mxu1 %v1830_v16  ;;  %v81_v15 = vld [vmem:[%s2881_s2 + $0x1a0] sm:$0xff]  ;;  %v78_v16 = vld [vmem:[%s2881_s2 + $0x188] sm:$0xff]  ;;  %v91_v8 = vld [vmem:[%s2881_s2 + $0x1f0] sm:$0xff] }
  0x28   :  { %551 = vmatprep.mubr.bf16.mxu0 %v1980_v3  ;;  %624 = vmatprep.mubr.bf16.mxu1 %v1980_v3  ;;  %v1892_v20 = vcombine.high %v77_v14, %v81_v15  ;;  %v1891_v27 = vcombine.low %v77_v14, %v81_v15  ;;  %v1893_v28 = vcombine.low %v78_v16, %v82_v17 }
  0x29   :  { %v1904_v14 = vcombine.high %v87_v7, %v91_v8 }
  0x2a   :  { %658 = vmatpush1.bf16.msra.mxu0 %v1827_v21  ;;  %731 = vmatpush1.bf16.msra.mxu1 %v1829_v22  ;;  %v1894_v21 = vcombine.high %v78_v16, %v82_v17  ;;  %v69_v22 = vld [vmem:[%s2881_s2 + $0x140] sm:$0xff]  ;;  %v79_v16 = vld [vmem:[%s2881_s2 + $0x190] sm:$0xff] }
  0x2b   :  { %659 = vmatprep.subr.bf16.mxu0 %v1820_v23  ;;  %732 = vmatprep.subr.bf16.mxu1 %v1822_v25  ;;  %v73_v23 = vld [vmem:[%s2881_s2 + $0x160] sm:$0xff]  ;;  %v70_v25 = vld [vmem:[%s2881_s2 + $0x148] sm:$0xff]  ;;  %v83_v17 = vld [vmem:[%s2881_s2 + $0x1b0] sm:$0xff] }
  0x2c   :  { %v1884_v29 = vcombine.high %v69_v22, %v73_v23  ;;  %v1883_v34 = vcombine.low %v69_v22, %v73_v23  ;;  %v1885_v35 = vcombine.low %v70_v25, %v74_v26  ;;  %v1896_v22 = vcombine.high %v79_v16, %v83_v17 }
  0x2d   :  { %552 = vmatmul.mubr.bf16.gmra.mxu0 %v2156_v24  ;;  %625 = vmatmul.mubr.bf16.gmra.mxu1 %v2156_v24 }
  0x2e   :  { %660 = vmatpush1.bf16.msra.mxu0 %v1819_v30  ;;  %733 = vmatpush1.bf16.msra.mxu1 %v1821_v31  ;;  %v1886_v30 = vcombine.high %v70_v25, %v74_v26  ;;  %v61_v31 = vld [vmem:[%s2881_s2 + $0x100] sm:$0xff]  ;;  %v71_v25 = vld [vmem:[%s2881_s2 + $0x150] sm:$0xff] }
  0x2f   :  { %661 = vmatprep.subr.bf16.mxu0 %v1812_v32  ;;  %734 = vmatprep.subr.bf16.mxu1 %v1814_v33  ;;  %v65_v32 = vld [vmem:[%s2881_s2 + $0x120] sm:$0xff]  ;;  %v66_v33 = vld [vmem:[%s2881_s2 + $0x128] sm:$0xff]  ;;  %v75_v26 = vld [vmem:[%s2881_s2 + $0x170] sm:$0xff] }
  0x30   :  { %561 = vmatprep.mubr.bf16.mxu0 %v1980_v3  ;;  %634 = vmatprep.mubr.bf16.mxu1 %v1980_v3  ;;  %v1876_v36 = vcombine.high %v61_v31, %v65_v32  ;;  %v1875_v43 = vcombine.low %v61_v31, %v65_v32  ;;  %v1888_v31 = vcombine.high %v71_v25, %v75_v26 }
  0x32   :  { %662 = vmatpush1.bf16.msra.mxu0 %v1811_v38  ;;  %735 = vmatpush1.bf16.msra.mxu1 %v1813_v39  ;;  %v53_v38 = vld [vmem:[%s2881_s2 + $0xc0] sm:$0xff] }
  0x33   :  { %663 = vmatprep.subr.bf16.mxu0 %v1804_v41  ;;  %736 = vmatprep.subr.bf16.mxu1 %v1806_v42  ;;  %v57_v39 = vld [vmem:[%s2881_s2 + $0xe0] sm:$0xff]  ;;  %v54_v41 = vld [vmem:[%s2881_s2 + $0xc8] sm:$0xff] }
  0x34   :  { %v58_v42 = vld [vmem:[%s2881_s2 + $0xe8] sm:$0xff]  ;;  %v1868_v45 = vcombine.high %v53_v38, %v57_v39 }
  0x35   :  { %562 = vmatmul.mubr.bf16.gmra.mxu0 %v2188_v40  ;;  %635 = vmatmul.mubr.bf16.gmra.mxu1 %v2188_v40  ;;  %v1870_v46 = vcombine.high %v54_v41, %v58_v42  ;;  %v1869_v51 = vcombine.low %v54_v41, %v58_v42  ;;  %v55_v42 = vld [vmem:[%s2881_s2 + $0xd0] sm:$0xff] }
  0x36   :  { %664 = vmatpush1.bf16.msra.mxu0 %v1803_v47  ;;  %737 = vmatpush1.bf16.msra.mxu1 %v1805_v48  ;;  %v45_v47 = vld [vmem:[%s2881_s2 + $0x80] sm:$0xff] }
  0x37   :  { %665 = vmatprep.subr.bf16.mxu0 %v1796_v49  ;;  %738 = vmatprep.subr.bf16.mxu1 %v1798_v50  ;;  %v49_v48 = vld [vmem:[%s2881_s2 + $0xa0] sm:$0xff]  ;;  %v50_v49 = vld [vmem:[%s2881_s2 + $0xa8] sm:$0xff]  ;;  %v1867_v50 = vcombine.low %v53_v38, %v57_v39 }
  0x38   :  { %571 = vmatprep.mubr.bf16.mxu0 %v1980_v3  ;;  %644 = vmatprep.mubr.bf16.mxu1 %v1980_v3  ;;  %v1860_v52 = vcombine.high %v45_v47, %v49_v48 }
  0x3a   :  { %666 = vmatpush1.bf16.msra.mxu0 %v1795_v55  ;;  %739 = vmatpush1.bf16.msra.mxu1 %v1797_v56  ;;  %v41_v55 = vld [vmem:[%s2881_s2 + $0x60] sm:$0xff]  ;;  %v38_v56 = vld [vmem:[%s2881_s2 + $0x48] sm:$0xff] }
  0x3b   :  { %667 = vmatprep.subr.bf16.mxu0 %v1788_v57  ;;  %740 = vmatprep.subr.bf16.mxu1 %v1790_v58  ;;  %v42_v57 = vld [vmem:[%s2881_s2 + $0x68] sm:$0xff]  ;;  %v1859_v58 = vcombine.low %v45_v47, %v49_v48  ;;  %v1852_v60 = vcombine.high %v37_v54, %v41_v55 }
  0x3c   :  { %v1854_v62 = vcombine.high %v38_v56, %v42_v57 }
  0x3d   :  { %572 = vmatmul.mubr.bf16.gmra.mxu0 %v2229_v61  ;;  %645 = vmatmul.mubr.bf16.gmra.mxu1 %v2229_v61 }
  0x3e   :  { %668 = vmatpush1.bf16.msra.mxu0 %v1787_v0  ;;  %741 = vmatpush1.bf16.msra.mxu1 %v1789_v1  ;;  %v33_v0 = vld [vmem:[%s2881_s2 + $0x20] sm:$0xff]  ;;  %v34_v1 = vld [vmem:[%s2881_s2 + $0x28] sm:$0xff] }
  0x3f   :  { %669 = vmatprep.subr.bf16.mxu0 %v1780_v2  ;;  %742 = vmatprep.subr.bf16.mxu1 %v1782_v4  ;;  %v1851_v2 = vcombine.low %v37_v54, %v41_v55  ;;  %v1853_v4 = vcombine.low %v38_v56, %v42_v57  ;;  %v1844_v5 = vcombine.high %v29_v63, %v33_v0 }
  0x40   :  { %687 = vmatprep.mubr.bf16.mxu0 %v1980_v3  ;;  %760 = vmatprep.mubr.bf16.mxu1 %v1980_v3 }
  0x42   :  { %670 = vmatpush1.bf16.msra.mxu0 %v1779_v9  ;;  %743 = vmatpush1.bf16.msra.mxu1 %v1781_v11  ;;  %v88_v9 = vld [vmem:[%s2881_s2 + $0x1d8] sm:$0xff] }
  0x43   :  { %1145 = vmatprep.subr.bf16.mxu0 %v1900_v12  ;;  %1218 = vmatprep.subr.bf16.mxu1 %v1902_v13  ;;  %v92_v11 = vld [vmem:[%s2881_s2 + $0x1f8] sm:$0xff]  ;;  %v1843_v12 = vcombine.low %v29_v63, %v33_v0 }
  0x44   :  { %v1906_v15 = vcombine.high %v88_v9, %v92_v11 }
  0x45   :  { %688 = vmatmul.mubr.bf16.vlgmr.msra.gmra.mxu0 %v2130_v10  ;;  %761 = vmatmul.mubr.bf16.vlgmr.msra.gmra.mxu1 %v2130_v10  ;;  %v62_v10 = vld [vmem:[%s2881_s2 + $0x108] sm:$0xff] }
  0x46   :  { %1146 = vmatpush1.bf16.msra.mxu0 %v1899_v18  ;;  %1219 = vmatpush1.bf16.msra.mxu1 %v1901_v19  ;;  %v1878_v37 = vcombine.high %v62_v10, %v66_v33  ;;  %v1877_v44 = vcombine.low %v62_v10, %v66_v33  ;;  %v80_v18 = vld [vmem:[%s2881_s2 + $0x198] sm:$0xff]  ;;  %v63_v10 = vld [vmem:[%s2881_s2 + $0x110] sm:$0xff] }
  0x47   :  { %1147 = vmatprep.subr.bf16.mxu0 %v1892_v20  ;;  %1220 = vmatprep.subr.bf16.mxu1 %v1894_v21  ;;  %v84_v19 = vld [vmem:[%s2881_s2 + $0x1b8] sm:$0xff]  ;;  %v1903_v20 = vcombine.low %v87_v7, %v91_v8  ;;  %v1905_v21 = vcombine.low %v88_v9, %v92_v11  ;;  %v67_v33 = vld [vmem:[%s2881_s2 + $0x130] sm:$0xff] }
  0x48   :  { %697 = vmatprep.mubr.bf16.mxu0 %v1980_v3  ;;  %770 = vmatprep.mubr.bf16.mxu1 %v1980_v3  ;;  %v1898_v23 = vcombine.high %v80_v18, %v84_v19  ;;  %v1880_v39 = vcombine.high %v63_v10, %v67_v33  ;;  %v36_v7 = vld [vmem:[%s2881_s2 + $0x38] sm:$0xff] }
  0x4a   :  { %1148 = vmatpush1.bf16.msra.mxu0 %v1891_v27  ;;  %1221 = vmatpush1.bf16.msra.mxu1 %v1893_v28  ;;  %v72_v27 = vld [vmem:[%s2881_s2 + $0x158] sm:$0xff] }
  0x4b   :  { %1149 = vmatprep.subr.bf16.mxu0 %v1884_v29  ;;  %1222 = vmatprep.subr.bf16.mxu1 %v1886_v30  ;;  %v76_v28 = vld [vmem:[%s2881_s2 + $0x178] sm:$0xff]  ;;  %v1895_v29 = vcombine.low %v79_v16, %v83_v17  ;;  %v1897_v30 = vcombine.low %v80_v18, %v84_v19 }
  0x4c   :  { %v1890_v32 = vcombine.high %v72_v27, %v76_v28  ;;  %v1889_v38 = vcombine.low %v72_v27, %v76_v28 }
  0x4d   :  { %698 = vmatmul.mubr.bf16.gmra.mxu0 %v2156_v24  ;;  %771 = vmatmul.mubr.bf16.gmra.mxu1 %v2156_v24  ;;  %v46_v24 = vld [vmem:[%s2881_s2 + $0x88] sm:$0xff] }
  0x4e   :  { %1150 = vmatpush1.bf16.msra.mxu0 %v1883_v34  ;;  %1223 = vmatpush1.bf16.msra.mxu1 %v1885_v35  ;;  %v1862_v53 = vcombine.high %v46_v24, %v50_v49  ;;  %v1861_v59 = vcombine.low %v46_v24, %v50_v49  ;;  %v2407_v34 = vld [vmem:[%s2880_s0 + $0x8] sm:$0xff]   ;;  %v64_v35 = vld [vmem:[%s2881_s2 + $0x118] sm:$0xff]  ;;  %v47_v49 = vld [vmem:[%s2881_s2 + $0x90] sm:$0xff] }
  0x4f   :  { %1151 = vmatprep.subr.bf16.mxu0 %v1876_v36  ;;  %1224 = vmatprep.subr.bf16.mxu1 %v1878_v37  ;;  %v68_v36 = vld [vmem:[%s2881_s2 + $0x138] sm:$0xff]  ;;  %v1887_v37 = vcombine.low %v71_v25, %v75_v26 }
  0x50   :  { %707 = vmatprep.mubr.bf16.mxu0 %v1980_v3  ;;  %780 = vmatprep.mubr.bf16.mxu1 %v1980_v3  ;;  %v1882_v41 = vcombine.high %v64_v35, %v68_v36  ;;  %v1881_v47 = vcombine.low %v64_v35, %v68_v36 }
  0x52   :  { %1152 = vmatpush1.bf16.msra.mxu0 %v1875_v43  ;;  %1225 = vmatpush1.bf16.msra.mxu1 %v1877_v44  ;;  %v59_v43 = vld [vmem:[%s2881_s2 + $0xf0] sm:$0xff]  ;;  %v56_v44 = vld [vmem:[%s2881_s2 + $0xd8] sm:$0xff] }
  0x53   :  { %1153 = vmatprep.subr.bf16.mxu0 %v1868_v45  ;;  %1226 = vmatprep.subr.bf16.mxu1 %v1870_v46  ;;  %v60_v45 = vld [vmem:[%s2881_s2 + $0xf8] sm:$0xff]  ;;  %v1879_v46 = vcombine.low %v63_v10, %v67_v33  ;;  %v1872_v48 = vcombine.high %v55_v42, %v59_v43  ;;  %v1871_v54 = vcombine.low %v55_v42, %v59_v43 }
  0x54   :  { %v1874_v24 = vcombine.high %v56_v44, %v60_v45  ;;  %v1873_v55 = vcombine.low %v56_v44, %v60_v45 }
  0x55   :  { %708 = vmatmul.mubr.bf16.gmra.mxu0 %v2188_v40  ;;  %781 = vmatmul.mubr.bf16.gmra.mxu1 %v2188_v40  ;;  %v30_v40 = vld [vmem:[%s2881_s2 + $0x8] sm:$0xff] }
  0x56   :  { %1154 = vmatpush1.bf16.msra.mxu0 %v1867_v50  ;;  %1227 = vmatpush1.bf16.msra.mxu1 %v1869_v51  ;;  %v1846_v6 = vcombine.high %v30_v40, %v34_v1  ;;  %v1845_v13 = vcombine.low %v30_v40, %v34_v1  ;;  %v51_v50 = vld [vmem:[%s2881_s2 + $0xb0] sm:$0xff] }
  0x57   :  { %1155 = vmatprep.subr.bf16.mxu0 %v1860_v52  ;;  %1228 = vmatprep.subr.bf16.mxu1 %v1862_v53  ;;  %v1978_v51 = vld [vmem:[%s2880_s0 + $0x10] sm:$0xff]   ;;  %v48_v52 = vld [vmem:[%s2881_s2 + $0x98] sm:$0xff]  ;;  %v1864_v56 = vcombine.high %v47_v49, %v51_v50  ;;  %v1863_v63 = vcombine.low %v47_v49, %v51_v50 }
  0x58   :  { %717 = vmatprep.mubr.bf16.mxu0 %v1980_v3  ;;  %790 = vmatprep.mubr.bf16.mxu1 %v1980_v3  ;;  %v52_v53 = vld [vmem:[%s2881_s2 + $0xb8] sm:$0xff] }
  0x59   :  { %v1866_v57 = vcombine.high %v48_v52, %v52_v53  ;;  %v1865_v0 = vcombine.low %v48_v52, %v52_v53 }
  0x5a   :  { %1156 = vmatpush1.bf16.msra.mxu0 %v1859_v58  ;;  %1229 = vmatpush1.bf16.msra.mxu1 %v1861_v59  ;;  %v39_v58 = vld [vmem:[%s2881_s2 + $0x50] sm:$0xff] }
  0x5b   :  { %1157 = vmatprep.subr.bf16.mxu0 %v1852_v60  ;;  %1230 = vmatprep.subr.bf16.mxu1 %v1854_v62  ;;  %v43_v59 = vld [vmem:[%s2881_s2 + $0x70] sm:$0xff]  ;;  %v40_v60 = vld [vmem:[%s2881_s2 + $0x58] sm:$0xff] }
  0x5c   :  { %v44_v62 = vld [vmem:[%s2881_s2 + $0x78] sm:$0xff]  ;;  %v1856_v40 = vcombine.high %v39_v58, %v43_v59  ;;  %v1855_v8 = vcombine.low %v39_v58, %v43_v59 }
  0x5d   :  { %718 = vmatmul.mubr.bf16.gmra.mxu0 %v2229_v61  ;;  %791 = vmatmul.mubr.bf16.gmra.mxu1 %v2229_v61  ;;  %v2374_v61 = vld [vmem:[%s2880_s0] sm:$0xff]   ;;  %v1858_v1 = vcombine.high %v40_v60, %v44_v62  ;;  %v1857_v9 = vcombine.low %v40_v60, %v44_v62 }
  0x5e   :  { %1158 = vmatpush1.bf16.msra.mxu0 %v1851_v2  ;;  %1231 = vmatpush1.bf16.msra.mxu1 %v1853_v4  ;;  %v31_v2 = vld [vmem:[%s2881_s2 + $0x10] sm:$0xff] }
  0x5f   :  { %1159 = vmatprep.subr.bf16.mxu0 %v1844_v5  ;;  %1232 = vmatprep.subr.bf16.mxu1 %v1846_v6  ;;  %v35_v4 = vld [vmem:[%s2881_s2 + $0x30] sm:$0xff]  ;;  %v1979_v5 = vld [vmem:[%s2880_s0 + $0x18] sm:$0xff]  }
  0x60   :  { %1177 = vmatprep.mubr.bf16.mxu0 %v1980_v3  ;;  %1250 = vmatprep.mubr.bf16.mxu1 %v1980_v3  ;;  %v32_v6 = vld [vmem:[%s2881_s2 + $0x18] sm:$0xff]  ;;  %v1848_v11 = vcombine.high %v31_v2, %v35_v4 }
  0x62   :  { %1160 = vmatpush1.bf16.msra.mxu0 %v1843_v12  ;;  %1233 = vmatpush1.bf16.msra.mxu1 %v1845_v13  ;;  %v1850_v12 = vcombine.high %v32_v6, %v36_v7  ;;  %v1847_v13 = vcombine.low %v31_v2, %v35_v4  ;;  %v1439_v4 = vlaneseq }
  0x63   :  { %1291 = vmatprep.subr.bf16.mxu0 %v1904_v14  ;;  %1364 = vmatprep.subr.bf16.mxu1 %v1906_v15  ;;  %v1849_v14 = vcombine.low %v32_v6, %v36_v7 }
  0x65   :  { %1178 = vmatmul.mubr.bf16.vlgmr.msra.gmra.mxu0 %v2374_v61  ;;  %1251 = vmatmul.mubr.bf16.vlgmr.msra.gmra.mxu1 %v2374_v61 }
  0x66   :  { %1292 = vmatpush1.bf16.msra.mxu0 %v1903_v20  ;;  %1365 = vmatpush1.bf16.msra.mxu1 %v1905_v21 }
  0x67   :  { %1293 = vmatprep.subr.bf16.mxu0 %v1896_v22  ;;  %1366 = vmatprep.subr.bf16.mxu1 %v1898_v23 }
  0x68   :  { %1187 = vmatprep.mubr.bf16.mxu0 %v1980_v3  ;;  %1260 = vmatprep.mubr.bf16.mxu1 %v1980_v3 }
  0x6a   :  { %1294 = vmatpush1.bf16.msra.mxu0 %v1895_v29  ;;  %1367 = vmatpush1.bf16.msra.mxu1 %v1897_v30 }
  0x6b   :  { %1295 = vmatprep.subr.bf16.mxu0 %v1888_v31  ;;  %1368 = vmatprep.subr.bf16.mxu1 %v1890_v32 }
  0x6d   :  { %1188 = vmatmul.mubr.bf16.gmra.mxu0 %v2407_v34  ;;  %1261 = vmatmul.mubr.bf16.gmra.mxu1 %v2407_v34 }
  0x6e   :  { %1296 = vmatpush1.bf16.msra.mxu0 %v1887_v37  ;;  %1369 = vmatpush1.bf16.msra.mxu1 %v1889_v38 }
  0x6f   :  { %1297 = vmatprep.subr.bf16.mxu0 %v1880_v39  ;;  %1370 = vmatprep.subr.bf16.mxu1 %v1882_v41 }
  0x70   :  { %1197 = vmatprep.mubr.bf16.mxu0 %v1980_v3  ;;  %1270 = vmatprep.mubr.bf16.mxu1 %v1980_v3 }
  0x72   :  { %1298 = vmatpush1.bf16.msra.mxu0 %v1879_v46  ;;  %1371 = vmatpush1.bf16.msra.mxu1 %v1881_v47 }
  0x73   :  { %1299 = vmatprep.subr.bf16.mxu0 %v1872_v48  ;;  %1372 = vmatprep.subr.bf16.mxu1 %v1874_v24 }
  0x75   :  { %1198 = vmatmul.mubr.bf16.gmra.mxu0 %v1978_v51  ;;  %1271 = vmatmul.mubr.bf16.gmra.mxu1 %v1978_v51 }
  0x76   :  { %1300 = vmatpush1.bf16.msra.mxu0 %v1871_v54  ;;  %1373 = vmatpush1.bf16.msra.mxu1 %v1873_v55 }
  0x77   :  { %1301 = vmatprep.subr.bf16.mxu0 %v1864_v56  ;;  %1374 = vmatprep.subr.bf16.mxu1 %v1866_v57 }
  0x78   :  { %1207 = vmatprep.mubr.bf16.mxu0 %v1980_v3  ;;  %1280 = vmatprep.mubr.bf16.mxu1 %v1980_v3 }
  0x7a   :  { %1302 = vmatpush1.bf16.msra.mxu0 %v1863_v63  ;;  %1375 = vmatpush1.bf16.msra.mxu1 %v1865_v0 }
  0x7b   :  { %1303 = vmatprep.subr.bf16.mxu0 %v1856_v40  ;;  %1376 = vmatprep.subr.bf16.mxu1 %v1858_v1 }
  0x7d   :  { %1208 = vmatmul.mubr.bf16.gmra.mxu0 %v1979_v5  ;;  %1281 = vmatmul.mubr.bf16.gmra.mxu1 %v1979_v5 }
  0x7e   :  { %1304 = vmatpush1.bf16.msra.mxu0 %v1855_v8  ;;  %1377 = vmatpush1.bf16.msra.mxu1 %v1857_v9  ;;  %v2603_v9 = vshrl.u32 %v1439_v4, 7 }
  0x7f   :  { %1305 = vmatprep.subr.bf16.mxu0 %v1848_v11  ;;  %1378 = vmatprep.subr.bf16.mxu1 %v1850_v12 }
  0x80   :  { %1323 = vmatprep.mubr.bf16.mxu0 %v1980_v3  ;;  %1396 = vmatprep.mubr.bf16.mxu1 %v1980_v3  ;;  %v1449_v4 = vsub.s32 2, %v2603_v9 }
  0x82   :  { %1306 = vmatpush1.bf16.msra.mxu0 %v1847_v13  ;;  %1379 = vmatpush1.bf16.msra.mxu1 %v1849_v14 }
  0x85   :  { %1324 = vmatmul.mubr.bf16.vlgmr.msra.gmra.mxu0 %v2374_v61  ;;  %1397 = vmatmul.mubr.bf16.vlgmr.msra.gmra.mxu1 %v2374_v61 }
  0x86   :  { %1333 = vmatprep.mubr.bf16.mxu0 %v1980_v3  ;;  %1406 = vmatprep.mubr.bf16.mxu1 %v1980_v3 }
  0x8d   :  { %1334 = vmatmul.mubr.bf16.gmra.mxu0 %v2407_v34  ;;  %1407 = vmatmul.mubr.bf16.gmra.mxu1 %v2407_v34 }
  0x8e   :  { %1343 = vmatprep.mubr.bf16.mxu0 %v1980_v3  ;;  %1416 = vmatprep.mubr.bf16.mxu1 %v1980_v3 }
  0x95   :  { %1344 = vmatmul.mubr.bf16.gmra.mxu0 %v1978_v51  ;;  %1417 = vmatmul.mubr.bf16.gmra.mxu1 %v1978_v51 }
  0x96   :  { %1353 = vmatprep.mubr.bf16.mxu0 %v1980_v3  ;;  %1426 = vmatprep.mubr.bf16.mxu1 %v1980_v3 }
  0x9d   :  { %1354 = vmatmul.mubr.bf16.gmra.mxu0 %v1979_v5  ;;  %1427 = vmatmul.mubr.bf16.gmra.mxu1 %v1979_v5 }
  0xe5   :  { %v2487_v15 = vpop.f32.mrf.mxu0  ;;  %v2489_v16 = vpop.f32.mrf.mxu1 }
  0xe7   :  { %v2491_v17 = vpop.f32.mrf.mxu0  ;;  %v2493_v61 = vpop.f32.mrf.mxu1 }
  0xe9   :  { %v2495_v18 = vpop.f32.mrf.mxu0  ;;  %v2497_v19 = vpop.f32.mrf.mxu1 }
  0xeb   :  { %v2499_v20 = vpop.f32.mrf.mxu0  ;;  %v2501_v21 = vpop.f32.mrf.mxu1 }
  0xed   :  { %v2503_v22 = vpop.f32.mrf.mxu0  ;;  %v2505_v3 = vpop.f32.mrf.mxu1 }
  0xef   :  { %v2507_v23 = vpop.f32.mrf.mxu0  ;;  %v2509_v25 = vpop.f32.mrf.mxu1 }
  0xf1   :  { %v2511_v26 = vpop.f32.mrf.mxu0  ;;  %v2513_v27 = vpop.f32.mrf.mxu1 }
  0xf3   :  { %v2515_v28 = vpop.f32.mrf.mxu0  ;;  %v2517_v29 = vpop.f32.mrf.mxu1 }
  0xf5   :  { %v2519_v30 = vpop.f32.mrf.mxu0  ;;  %v2521_v31 = vpop.f32.mrf.mxu1 }
  0xf7   :  { %v2523_v32 = vpop.f32.mrf.mxu0  ;;  %v2525_v10 = vpop.f32.mrf.mxu1 }
  0xf9   :  { %v2527_v33 = vpop.f32.mrf.mxu0  ;;  %v2529_v34 = vpop.f32.mrf.mxu1 }
  0xfb   :  { %v2531_v35 = vpop.f32.mrf.mxu0  ;;  %v2533_v36 = vpop.f32.mrf.mxu1 }
  0xfd   :  { %v2535_v37 = vpop.f32.mrf.mxu0  ;;  %v2537_v38 = vpop.f32.mrf.mxu1 }
  0xff   :  { %v2539_v39 = vpop.f32.mrf.mxu0  ;;  %v2541_v41 = vpop.f32.mrf.mxu1 }
 0x101   :  { %v2543_v42 = vpop.f32.mrf.mxu0  ;;  %v2545_v43 = vpop.f32.mrf.mxu1 }
 0x103   :  { %v2547_v44 = vpop.f32.mrf.mxu0  ;;  %v2549_v45 = vpop.f32.mrf.mxu1 }
 0x105   :  { %v2551_v46 = vpop.f32.mrf.mxu0  ;;  %v2553_v47 = vpop.f32.mrf.mxu1 }
 0x107   :  { %v2555_v48 = vpop.f32.mrf.mxu0  ;;  %v2557_v24 = vpop.f32.mrf.mxu1 }
 0x109   :  { %v2559_v49 = vpop.f32.mrf.mxu0  ;;  %v2561_v50 = vpop.f32.mrf.mxu1 }
 0x10b   :  { %v2563_v51 = vpop.f32.mrf.mxu0  ;;  %v2565_v52 = vpop.f32.mrf.mxu1 }
 0x10d   :  { %v2567_v53 = vpop.f32.mrf.mxu0  ;;  %v2569_v54 = vpop.f32.mrf.mxu1 }
 0x10f   :  { %v2571_v55 = vpop.f32.mrf.mxu0  ;;  %v2573_v56 = vpop.f32.mrf.mxu1 }
 0x111   :  { %v2575_v57 = vpop.f32.mrf.mxu0  ;;  %v2577_v58 = vpop.f32.mrf.mxu1 }
 0x112   :  { %2884 = vst [vmem:[#allocation2_spill] sm:$0xff] %v2575_v57  ;;  %2885 = vst [vmem:[#allocation3_spill] sm:$0xff] %v2577_v58 }
 0x113   :  { %v2579_v59 = vpop.f32.mrf.mxu0  ;;  %v2581_v60 = vpop.f32.mrf.mxu1 }
 0x114   :  { %2886 = vst [vmem:[#allocation4_spill] sm:$0xff] %v2579_v59  ;;  %2887 = vst [vmem:[#allocation5_spill] sm:$0xff] %v2581_v60 }
 0x115   :  { %v2583_v62 = vpop.f32.mrf.mxu0  ;;  %v2585_v63 = vpop.f32.mrf.mxu1 }
 0x116   :  { %2888 = vst [vmem:[#allocation6_spill] sm:$0xff] %v2583_v62  ;;  %2889 = vst [vmem:[#allocation7_spill] sm:$0xff] %v2585_v63 }
 0x117   :  { %v2587_v0 = vpop.f32.mrf.mxu0  ;;  %v2589_v40 = vpop.f32.mrf.mxu1 }
 0x118   :  { %2890 = vst [vmem:[#allocation8_spill] sm:$0xff] %v2587_v0  ;;  %2891 = vst [vmem:[#allocation9_spill] sm:$0xff] %v2589_v40 }
 0x119   :  { %v2591_v1 = vpop.f32.mrf.mxu0  ;;  %v2593_v2 = vpop.f32.mrf.mxu1 }
 0x11a   :  { %2892 = vst [vmem:[#allocation10_spill] sm:$0xff] %v2591_v1  ;;  %2893 = vst [vmem:[#allocation11_spill] sm:$0xff] %v2593_v2  ;;  %v1441_v2 = vsub.s32 0, %v2603_v9 }
 0x11b   :  { %v2595_v5 = vpop.f32.mrf.mxu0  ;;  %v2597_v6 = vpop.f32.mrf.mxu1 }
 0x11c   :  { %2894 = vst [vmem:[#allocation12_spill] sm:$0xff] %v2595_v5  ;;  %2895 = vst [vmem:[#allocation13_spill] sm:$0xff] %v2597_v6  ;;  %v1445_v5 = vsub.s32 1, %v2603_v9 }
 0x11d   :  { %v2599_v7 = vpop.f32.mrf.mxu0  ;;  %v2601_v8 = vpop.f32.mrf.mxu1 }
 0x11e   :  { %2896 = vst [vmem:[#allocation14_spill] sm:$0xff] %v2599_v7  ;;  %2897 = vst [vmem:[#allocation15_spill] sm:$0xff] %v2601_v8  ;;  %v2620_v8 = vld [vmem:[%s2882_s4] sm:$0xff] }
 0x11f   :  { %v2605_v11 = vpop.f32.mrf.mxu0  ;;  %v2607_v12 = vpop.f32.mrf.mxu1  ;;  %v2628_v7 = vrot.slane %v2620_v8, %v1441_v2  ;;  %v2635_v0 = vrot.slane %v2620_v8, %v1449_v4 }
 0x120   :  { %2898 = vst [vmem:[#allocation16_spill] sm:$0xff] %v2605_v11  ;;  %2899 = vst [vmem:[#allocation17_spill] sm:$0xff] %v2607_v12  ;;  %v1453_v11 = vsub.s32 3, %v2603_v9 }
 0x121   :  { %v2609_v13 = vpop.f32.mrf.mxu0  ;;  %v2611_v14 = vpop.f32.mrf.mxu1 }
 0x122   :  { %2900 = vst [vmem:[#allocation18_spill] sm:$0xff] %v2609_v13  ;;  %2901 = vst [vmem:[#allocation19_spill] sm:$0xff] %v2611_v14  ;;  %v2638_v62 = vrot.slane %v2620_v8, %v1453_v11 }
 0x123   :  { %v2615_v1 = vpop.f32.mrf.mxu0  ;;  %v2624_v12 = vpop.f32.mrf.mxu1 }
 0x124   :  { %2902 = vst [vmem:[#allocation20_spill] sm:$0xff] %v2615_v1  ;;  %2903 = vst [vmem:[#allocation21_spill] sm:$0xff] %v2624_v12  ;;  %v2631_v1 = vrot.slane %v2620_v8, %v1445_v5 }
 0x125   :  { %v1179_v13 = vpop.f32.mrf.mxu0  ;;  %v1252_v6 = vpop.f32.mrf.mxu1 }
 0x126   :  { %v1180_v14 = vadd.f32 %v1179_v13, %v2487_v15  ;;  %v1253_v40 = vadd.f32 %v1252_v6, %v2489_v16 }
 0x127   :  { %v1181_v63 = vpop.f32.mrf.mxu0  ;;  %v1254_v60 = vpop.f32.mrf.mxu1 }
 0x128   :  { %v1182_v12 = vadd.f32 %v1181_v63, %v2491_v17  ;;  %v1255_v15 = vadd.f32 %v1254_v60, %v2493_v61  ;;  %v1479_v13 = vadd.f32 %v2628_v7, %v1180_v14  ;;  %v1481_v6 = vadd.f32 %v2635_v0, %v1253_v40 }
 0x129   :  { %v1183_v2 = vpop.f32.mrf.mxu0  ;;  %v1256_v16 = vpop.f32.mrf.mxu1 }
 0x12a   :  { %v1480_v5 = vadd.f32 %v2631_v1, %v1182_v12  ;;  %v1184_v59 = vadd.f32 %v1183_v2, %v2495_v18  ;;  %v1482_v4 = vadd.f32 %v2638_v62, %v1255_v15  ;;  %v1257_v11 = vadd.f32 %v1256_v16, %v2497_v19 }
 0x12b   :  { %v1185_v58 = vpop.f32.mrf.mxu0  ;;  %v1258_v63 = vpop.f32.mrf.mxu1 }
 0x12c   :  { %v1939_v57 = vpack.c.bf16 %v1480_v5, %v1479_v13  ;;  %v1186_v17 = vadd.f32 %v1185_v58, %v2499_v20  ;;  %v1940_v61 = vpack.c.bf16 %v1482_v4, %v1481_v6  ;;  %v1259_v60 = vadd.f32 %v1258_v63, %v2501_v21 }
 0x12d   :  { %v1189_v14 = vpop.f32.mrf.mxu0  ;;  %v1487_v18 = vadd.f32 %v2628_v7, %v1184_v59  ;;  %v1262_v19 = vpop.f32.mrf.mxu1  ;;  %v1489_v20 = vadd.f32 %v2635_v0, %v1257_v11 }
 0x12e   :  { %1735 = vst [vmem:[%s2883_s5] sm:$0xff] %v1939_v57  ;;  %v1488_v40 = vadd.f32 %v2631_v1, %v1186_v17  ;;  %v1190_v12 = vadd.f32 %v1189_v14, %v2503_v22  ;;  %1736 = vst [vmem:[%s2883_s5 + $0x8] sm:$0xff] %v1940_v61  ;;  %v1490_v21 = vadd.f32 %v2638_v62, %v1259_v60 }
 0x12f   :  { %v1263_v58 = vadd.f32 %v1262_v19, %v2505_v3  ;;  %v1191_v15 = vpop.f32.mrf.mxu0  ;;  %v1264_v59 = vpop.f32.mrf.mxu1 }
 0x130   :  { %v1943_v2 = vpack.c.bf16 %v1488_v40, %v1487_v18  ;;  %v1192_v57 = vadd.f32 %v1191_v15, %v2507_v23  ;;  %v1944_v13 = vpack.c.bf16 %v1490_v21, %v1489_v20  ;;  %v1265_v5 = vadd.f32 %v1264_v59, %v2509_v25 }
 0x131   :  { %v1193_v22 = vpop.f32.mrf.mxu0  ;;  %v1495_v16 = vadd.f32 %v2628_v7, %v1190_v12  ;;  %v1266_v3 = vpop.f32.mrf.mxu1  ;;  %v1497_v23 = vadd.f32 %v2635_v0, %v1263_v58 }
 0x132   :  { %1739 = vst [vmem:[%s2883_s5 + $0x20] sm:$0xff] %v1943_v2  ;;  %v1496_v6 = vadd.f32 %v2631_v1, %v1192_v57  ;;  %v1194_v4 = vadd.f32 %v1193_v22, %v2511_v26  ;;  %1740 = vst [vmem:[%s2883_s5 + $0x28] sm:$0xff] %v1944_v13  ;;  %v1498_v25 = vadd.f32 %v2638_v62, %v1265_v5 }
 0x133   :  { %v1267_v11 = vadd.f32 %v1266_v3, %v2513_v27  ;;  %v1195_v17 = vpop.f32.mrf.mxu0  ;;  %v1268_v60 = vpop.f32.mrf.mxu1 }
 0x134   :  { %v1947_v63 = vpack.c.bf16 %v1496_v6, %v1495_v16  ;;  %v1196_v61 = vadd.f32 %v1195_v17, %v2515_v28  ;;  %v1948_v14 = vpack.c.bf16 %v1498_v25, %v1497_v23  ;;  %v1269_v18 = vadd.f32 %v1268_v60, %v2517_v29 }
 0x135   :  { %v1199_v26 = vpop.f32.mrf.mxu0  ;;  %v1503_v40 = vadd.f32 %v2628_v7, %v1194_v4  ;;  %v1272_v27 = vpop.f32.mrf.mxu1  ;;  %v1505_v28 = vadd.f32 %v2635_v0, %v1267_v11 }
 0x136   :  { %1743 = vst [vmem:[%s2883_s5 + $0x40] sm:$0xff] %v1947_v63  ;;  %v1504_v12 = vadd.f32 %v2631_v1, %v1196_v61  ;;  %v1200_v19 = vadd.f32 %v1199_v26, %v2519_v30  ;;  %1744 = vst [vmem:[%s2883_s5 + $0x48] sm:$0xff] %v1948_v14  ;;  %v1506_v29 = vadd.f32 %v2638_v62, %v1269_v18 }
 0x137   :  { %v1273_v20 = vadd.f32 %v1272_v27, %v2521_v31  ;;  %v1201_v21 = vpop.f32.mrf.mxu0  ;;  %v1274_v2 = vpop.f32.mrf.mxu1  ;;  %v1457_v27 = vsub.s32 4, %v2603_v9 }
 0x138   :  { %v1951_v58 = vpack.c.bf16 %v1504_v12, %v1503_v40  ;;  %v1202_v15 = vadd.f32 %v1201_v21, %v2523_v32  ;;  %v1952_v57 = vpack.c.bf16 %v1506_v29, %v1505_v28  ;;  %v1275_v59 = vadd.f32 %v1274_v2, %v2525_v10 }
 0x139   :  { %v1203_v30 = vpop.f32.mrf.mxu0  ;;  %v1511_v13 = vadd.f32 %v2628_v7, %v1200_v19  ;;  %v1276_v31 = vpop.f32.mrf.mxu1  ;;  %v1513_v32 = vadd.f32 %v2635_v0, %v1273_v20  ;;  %v1465_v28 = vsub.s32 6, %v2603_v9  ;;  %v1461_v21 = vsub.s32 5, %v2603_v9 }
 0x13a   :  { %1747 = vst [vmem:[%s2883_s5 + $0x60] sm:$0xff] %v1951_v58  ;;  %v1512_v5 = vadd.f32 %v2631_v1, %v1202_v15  ;;  %v1204_v22 = vadd.f32 %v1203_v30, %v2527_v33  ;;  %1748 = vst [vmem:[%s2883_s5 + $0x68] sm:$0xff] %v1952_v57  ;;  %v1514_v10 = vadd.f32 %v2638_v62, %v1275_v59  ;;  %v1469_v57 = vsub.s32 7, %v2603_v9 }
 0x13b   :  { %v1277_v16 = vadd.f32 %v1276_v31, %v2529_v34  ;;  %v1205_v6 = vpop.f32.mrf.mxu0  ;;  %v1278_v23 = vpop.f32.mrf.mxu1  ;;  %v2739_v31 = vrot.slane %v2620_v8, %v1457_v27 }
 0x13c   :  { %v1955_v4 = vpack.c.bf16 %v1512_v5, %v1511_v13  ;;  %v1206_v3 = vadd.f32 %v1205_v6, %v2531_v35  ;;  %v1956_v25 = vpack.c.bf16 %v1514_v10, %v1513_v32  ;;  %v1279_v11 = vadd.f32 %v1278_v23, %v2533_v36 }
 0x13d   :  { %v1209_v33 = vpop.f32.mrf.mxu0  ;;  %v1519_v17 = vadd.f32 %v2628_v7, %v1204_v22  ;;  %v1282_v34 = vpop.f32.mrf.mxu1  ;;  %v1521_v35 = vadd.f32 %v2635_v0, %v1277_v16  ;;  %v2742_v32 = vrot.slane %v2620_v8, %v1465_v28 }
 0x13e   :  { %1751 = vst [vmem:[%s2883_s5 + $0x80] sm:$0xff] %v1955_v4  ;;  %v1520_v63 = vadd.f32 %v2631_v1, %v1206_v3  ;;  %v1210_v61 = vadd.f32 %v1209_v33, %v2535_v37  ;;  %1752 = vst [vmem:[%s2883_s5 + $0x88] sm:$0xff] %v1956_v25  ;;  %v1522_v36 = vadd.f32 %v2638_v62, %v1279_v11 }
 0x13f   :  { %v1283_v60 = vadd.f32 %v1282_v34, %v2537_v38  ;;  %v1211_v14 = vpop.f32.mrf.mxu0  ;;  %v1284_v40 = vpop.f32.mrf.mxu1 }
 0x140   :  { %v1959_v18 = vpack.c.bf16 %v1520_v63, %v1519_v17  ;;  %v1212_v26 = vadd.f32 %v1211_v14, %v2539_v39  ;;  %v1960_v12 = vpack.c.bf16 %v1522_v36, %v1521_v35  ;;  %v1285_v19 = vadd.f32 %v1284_v40, %v2541_v41 }
 0x141   :  { %v1213_v37 = vpop.f32.mrf.mxu0  ;;  %v1527_v29 = vadd.f32 %v2628_v7, %v1210_v61  ;;  %v1286_v39 = vpop.f32.mrf.mxu1  ;;  %v1529_v41 = vadd.f32 %v2635_v0, %v1283_v60 }
 0x142   :  { %1755 = vst [vmem:[%s2883_s5 + $0xa0] sm:$0xff] %v1959_v18  ;;  %v1528_v38 = vadd.f32 %v2631_v1, %v1212_v26  ;;  %v1214_v20 = vadd.f32 %v1213_v37, %v2543_v42  ;;  %1756 = vst [vmem:[%s2883_s5 + $0xa8] sm:$0xff] %v1960_v12  ;;  %v1530_v58 = vadd.f32 %v2638_v62, %v1285_v19 }
 0x143   :  { %v1287_v15 = vadd.f32 %v1286_v39, %v2545_v43  ;;  %v1215_v2 = vpop.f32.mrf.mxu0  ;;  %v1288_v42 = vpop.f32.mrf.mxu1  ;;  %v2904_v39 = vld [vmem:[#allocation2_spill] sm:$0xff] }
 0x144   :  { %v1963_v59 = vpack.c.bf16 %v1528_v38, %v1527_v29  ;;  %v1216_v30 = vadd.f32 %v1215_v2, %v2547_v44  ;;  %v1964_v13 = vpack.c.bf16 %v1530_v58, %v1529_v41  ;;  %v1289_v5 = vadd.f32 %v1288_v42, %v2549_v45  ;;  %v2905_v41 = vld [vmem:[#allocation3_spill] sm:$0xff] }
 0x145   :  { %v1325_v22 = vpop.f32.mrf.mxu0  ;;  %v1535_v43 = vadd.f32 %v2628_v7, %v1214_v20  ;;  %v1398_v10 = vpop.f32.mrf.mxu1  ;;  %v2751_v45 = vrot.slane %v2620_v8, %v1461_v21  ;;  %v1537_v16 = vadd.f32 %v2635_v0, %v1287_v15  ;;  %v2760_v7 = vrot.slane %v2620_v8, %v1469_v57  ;;  %v2906_v57 = vld [vmem:[#allocation4_spill] sm:$0xff] }
 0x146   :  { %1759 = vst [vmem:[%s2883_s5 + $0xc0] sm:$0xff] %v1963_v59  ;;  %v1536_v9 = vadd.f32 %v2631_v1, %v1216_v30  ;;  %v1326_v44 = vadd.f32 %v1325_v22, %v2551_v46  ;;  %1760 = vst [vmem:[%s2883_s5 + $0xc8] sm:$0xff] %v1964_v13  ;;  %v1538_v6 = vadd.f32 %v2638_v62, %v1289_v5  ;;  %v2907_v13 = vld [vmem:[#allocation5_spill] sm:$0xff] }
 0x147   :  { %v1399_v4 = vadd.f32 %v1398_v10, %v2553_v47  ;;  %v1327_v3 = vpop.f32.mrf.mxu0  ;;  %v1400_v23 = vpop.f32.mrf.mxu1 }
 0x148   :  { %v1967_v1 = vpack.c.bf16 %v1536_v9, %v1535_v43  ;;  %v1328_v46 = vadd.f32 %v1327_v3, %v2555_v48  ;;  %v1968_v25 = vpack.c.bf16 %v1538_v6, %v1537_v16  ;;  %v1401_v11 = vadd.f32 %v1400_v23, %v2557_v24  ;;  %v2909_v3 = vld [vmem:[#allocation7_spill] sm:$0xff] }
 0x149   :  { %v1329_v33 = vpop.f32.mrf.mxu0  ;;  %v1483_v62 = vadd.f32 %v2739_v31, %v1326_v44  ;;  %v1402_v8 = vpop.f32.mrf.mxu1  ;;  %v1485_v48 = vadd.f32 %v2742_v32, %v1399_v4  ;;  %v2908_v44 = vld [vmem:[#allocation6_spill] sm:$0xff] }
 0x14a   :  { %1763 = vst [vmem:[%s2883_s5 + $0xe0] sm:$0xff] %v1967_v1  ;;  %v1484_v47 = vadd.f32 %v2751_v45, %v1328_v46  ;;  %v1330_v0 = vadd.f32 %v1329_v33, %v2559_v49  ;;  %1764 = vst [vmem:[%s2883_s5 + $0xe8] sm:$0xff] %v1968_v25  ;;  %v1486_v24 = vadd.f32 %v2760_v7, %v1401_v11  ;;  %v2910_v25 = vld [vmem:[#allocation8_spill] sm:$0xff] }
 0x14b   :  { %v1403_v17 = vadd.f32 %v1402_v8, %v2561_v50  ;;  %v1331_v63 = vpop.f32.mrf.mxu0  ;;  %v1404_v35 = vpop.f32.mrf.mxu1 }
 0x14c   :  { %v1941_v61 = vpack.c.bf16 %v1484_v47, %v1483_v62  ;;  %v1332_v34 = vadd.f32 %v1331_v63, %v2563_v51  ;;  %v1942_v36 = vpack.c.bf16 %v1486_v24, %v1485_v48  ;;  %v1405_v60 = vadd.f32 %v1404_v35, %v2565_v52  ;;  %v2911_v47 = vld [vmem:[#allocation9_spill] sm:$0xff] }
 0x14d   :  { %v1335_v49 = vpop.f32.mrf.mxu0  ;;  %v1491_v14 = vadd.f32 %v2739_v31, %v1330_v0  ;;  %v1408_v50 = vpop.f32.mrf.mxu1  ;;  %v1493_v51 = vadd.f32 %v2742_v32, %v1403_v17  ;;  %v2912_v17 = vld [vmem:[#allocation10_spill] sm:$0xff] }
 0x14e   :  { %1737 = vst [vmem:[%s2883_s5 + $0x10] sm:$0xff] %v1941_v61  ;;  %v1492_v18 = vadd.f32 %v2751_v45, %v1332_v34  ;;  %v1336_v26 = vadd.f32 %v1335_v49, %v2567_v53  ;;  %1738 = vst [vmem:[%s2883_s5 + $0x18] sm:$0xff] %v1942_v36  ;;  %v1494_v52 = vadd.f32 %v2760_v7, %v1405_v60  ;;  %v2913_v36 = vld [vmem:[#allocation11_spill] sm:$0xff] }
 0x14f   :  { %v1409_v40 = vadd.f32 %v1408_v50, %v2569_v54  ;;  %v1337_v12 = vpop.f32.mrf.mxu0  ;;  %v1410_v27 = vpop.f32.mrf.mxu1 }
 0x150   :  { %v1945_v19 = vpack.c.bf16 %v1492_v18, %v1491_v14  ;;  %v1338_v37 = vadd.f32 %v1337_v12, %v2571_v55  ;;  %v1946_v28 = vpack.c.bf16 %v1494_v52, %v1493_v51  ;;  %v1411_v29 = vadd.f32 %v1410_v27, %v2573_v56  ;;  %v2914_v18 = vld [vmem:[#allocation12_spill] sm:$0xff]  ;;  %v2915_v52 = vld [vmem:[#allocation13_spill] sm:$0xff]  ;;  %v2916_v27 = vld [vmem:[#allocation14_spill] sm:$0xff] }
 0x151   :  { %v1339_v53 = vpop.f32.mrf.mxu0  ;;  %v1499_v38 = vadd.f32 %v2739_v31, %v1336_v26  ;;  %v1412_v54 = vpop.f32.mrf.mxu1  ;;  %v1501_v55 = vadd.f32 %v2742_v32, %v1409_v40 }
 0x152   :  { %1741 = vst [vmem:[%s2883_s5 + $0x30] sm:$0xff] %v1945_v19  ;;  %v1500_v20 = vadd.f32 %v2751_v45, %v1338_v37  ;;  %v1340_v21 = vadd.f32 %v1339_v53, %v2904_v39  ;;  %1742 = vst [vmem:[%s2883_s5 + $0x38] sm:$0xff] %v1946_v28  ;;  %v1502_v56 = vadd.f32 %v2760_v7, %v1411_v29 }
 0x153   :  { %v1413_v58 = vadd.f32 %v1412_v54, %v2905_v41  ;;  %v1341_v15 = vpop.f32.mrf.mxu0  ;;  %v1414_v30 = vpop.f32.mrf.mxu1 }
 0x154   :  { %v1949_v2 = vpack.c.bf16 %v1500_v20, %v1499_v38  ;;  %v1342_v59 = vadd.f32 %v1341_v15, %v2906_v57  ;;  %v1950_v42 = vpack.c.bf16 %v1502_v56, %v1501_v55  ;;  %v1415_v5 = vadd.f32 %v1414_v30, %v2907_v13  ;;  %v2917_v20 = vld [vmem:[#allocation15_spill] sm:$0xff]  ;;  %v2918_v55 = vld [vmem:[#allocation16_spill] sm:$0xff]  ;;  %v2919_v15 = vld [vmem:[#allocation17_spill] sm:$0xff] }
 0x155   :  { %v1345_v22 = vpop.f32.mrf.mxu0  ;;  %v1507_v43 = vadd.f32 %v2739_v31, %v1340_v21  ;;  %v1418_v16 = vpop.f32.mrf.mxu1  ;;  %v1509_v6 = vadd.f32 %v2742_v32, %v1413_v58 }
 0x156   :  { %1745 = vst [vmem:[%s2883_s5 + $0x50] sm:$0xff] %v1949_v2  ;;  %v1508_v9 = vadd.f32 %v2751_v45, %v1342_v59  ;;  %v1346_v10 = vadd.f32 %v1345_v22, %v2908_v44  ;;  %1746 = vst [vmem:[%s2883_s5 + $0x58] sm:$0xff] %v1950_v42  ;;  %v1510_v4 = vadd.f32 %v2760_v7, %v1415_v5  ;;  %v2920_v42 = vld [vmem:[#allocation18_spill] sm:$0xff] }
 0x157   :  { %v1419_v1 = vadd.f32 %v1418_v16, %v2909_v3  ;;  %v1347_v46 = vpop.f32.mrf.mxu0  ;;  %v1420_v33 = vpop.f32.mrf.mxu1 }
 0x158   :  { %v1953_v23 = vpack.c.bf16 %v1508_v9, %v1507_v43  ;;  %v1348_v11 = vadd.f32 %v1347_v46, %v2910_v25  ;;  %v1954_v62 = vpack.c.bf16 %v1510_v4, %v1509_v6  ;;  %v1421_v0 = vadd.f32 %v1420_v33, %v2911_v47  ;;  %v2921_v9 = vld [vmem:[#allocation19_spill] sm:$0xff]  ;;  %v2922_v6 = vld [vmem:[#allocation20_spill] sm:$0xff]  ;;  %v2923_v46 = vld [vmem:[#allocation21_spill] sm:$0xff] }
 0x159   :  { %v1349_v8 = vpop.f32.mrf.mxu0  ;;  %v1515_v48 = vadd.f32 %v2739_v31, %v1346_v10  ;;  %v1422_v61 = vpop.f32.mrf.mxu1  ;;  %v1517_v34 = vadd.f32 %v2742_v32, %v1419_v1 }
 0x15a   :  { %1749 = vst [vmem:[%s2883_s5 + $0x70] sm:$0xff] %v1953_v23  ;;  %v1516_v24 = vadd.f32 %v2751_v45, %v1348_v11  ;;  %v1350_v63 = vadd.f32 %v1349_v8, %v2912_v17  ;;  %1750 = vst [vmem:[%s2883_s5 + $0x78] sm:$0xff] %v1954_v62  ;;  %v1518_v35 = vadd.f32 %v2760_v7, %v1421_v0 }
 0x15b   :  { %v1423_v60 = vadd.f32 %v1422_v61, %v2913_v36  ;;  %v1351_v49 = vpop.f32.mrf.mxu0  ;;  %v1424_v50 = vpop.f32.mrf.mxu1 }
 0x15c   :  { %v1957_v14 = vpack.c.bf16 %v1516_v24, %v1515_v48  ;;  %v1352_v26 = vadd.f32 %v1351_v49, %v2914_v18  ;;  %v1958_v51 = vpack.c.bf16 %v1518_v35, %v1517_v34  ;;  %v1425_v40 = vadd.f32 %v1424_v50, %v2915_v52 }
 0x15d   :  { %v1355_v12 = vpop.f32.mrf.mxu0  ;;  %v1523_v19 = vadd.f32 %v2739_v31, %v1350_v63  ;;  %v1428_v29 = vpop.f32.mrf.mxu1  ;;  %v1525_v53 = vadd.f32 %v2742_v32, %v1423_v60 }
 0x15e   :  { %1753 = vst [vmem:[%s2883_s5 + $0x90] sm:$0xff] %v1957_v14  ;;  %v1524_v37 = vadd.f32 %v2751_v45, %v1352_v26  ;;  %v1356_v28 = vadd.f32 %v1355_v12, %v2916_v27  ;;  %1754 = vst [vmem:[%s2883_s5 + $0x98] sm:$0xff] %v1958_v51  ;;  %v1526_v38 = vadd.f32 %v2760_v7, %v1425_v40 }
 0x15f   :  { %v1429_v39 = vadd.f32 %v1428_v29, %v2917_v20  ;;  %v1357_v21 = vpop.f32.mrf.mxu0  ;;  %v1430_v41 = vpop.f32.mrf.mxu1 }
 0x160   :  { %v1961_v54 = vpack.c.bf16 %v1524_v37, %v1523_v19  ;;  %v1358_v56 = vadd.f32 %v1357_v21, %v2918_v55  ;;  %v1962_v58 = vpack.c.bf16 %v1526_v38, %v1525_v53  ;;  %v1431_v2 = vadd.f32 %v1430_v41, %v2919_v15 }
 0x161   :  { %v1359_v57 = vpop.f32.mrf.mxu0  ;;  %v1531_v59 = vadd.f32 %v2739_v31, %v1356_v28  ;;  %v1432_v5 = vpop.f32.mrf.mxu1  ;;  %v1533_v22 = vadd.f32 %v2742_v32, %v1429_v39 }
 0x162   :  { %1757 = vst [vmem:[%s2883_s5 + $0xb0] sm:$0xff] %v1961_v54  ;;  %v1532_v30 = vadd.f32 %v2751_v45, %v1358_v56  ;;  %v1360_v13 = vadd.f32 %v1359_v57, %v2920_v42  ;;  %1758 = vst [vmem:[%s2883_s5 + $0xb8] sm:$0xff] %v1962_v58  ;;  %v1534_v43 = vadd.f32 %v2760_v7, %v1431_v2 }
 0x163   :  { %v1433_v44 = vadd.f32 %v1432_v5, %v2921_v9  ;;  %v1361_v10 = vpop.f32.mrf.mxu0  ;;  %v1434_v3 = vpop.f32.mrf.mxu1 }
 0x164   :  { %v1965_v16 = vpack.c.bf16 %v1532_v30, %v1531_v59  ;;  %v1362_v4 = vadd.f32 %v1361_v10, %v2922_v6  ;;  %v1966_v1 = vpack.c.bf16 %v1534_v43, %v1533_v22  ;;  %v1435_v23 = vadd.f32 %v1434_v3, %v2923_v46 }
 0x165   :  { %v1539_v25 = vadd.f32 %v2739_v31, %v1360_v13  ;;  %v1541_v33 = vadd.f32 %v2742_v32, %v1433_v44 }
 0x166   :  { %1761 = vst [vmem:[%s2883_s5 + $0xd0] sm:$0xff] %v1965_v16  ;;  %v1540_v11 = vadd.f32 %v2751_v45, %v1362_v4  ;;  %1762 = vst [vmem:[%s2883_s5 + $0xd8] sm:$0xff] %v1966_v1  ;;  %v1542_v62 = vadd.f32 %v2760_v7, %v1435_v23 }
 0x168   :  { %v1969_v47 = vpack.c.bf16 %v1540_v11, %v1539_v25  ;;  %v1970_v0 = vpack.c.bf16 %v1542_v62, %v1541_v33 }
 0x16a   :  { %1765 = vst [vmem:[%s2883_s5 + $0xf0] sm:$0xff] %v1969_v47  ;;  %1766 = vst [vmem:[%s2883_s5 + $0xf8] sm:$0xff] %v1970_v0 }

// kernel: _lambda_.9
= control target key start
LH: loop header
LB: loop body
LE: loop exit
PB: predicated region body
PF: predicated region fallthrough
CT: control target
= control target key end

     0   :  { %v337_v0 = vmov 0.0   ;;  %vm338_vm0 = vmmov 0   ;;  %s429_s3 = inlined_call_operand.vmem [shape: bf16[128,128], index: 3, kind: input, shape index: {}]   ;;  %s430_s2 = inlined_call_operand.vmem [shape: bf16[128,128], index: 2, kind: input, shape index: {}]   ;;  %s431_s1 = inlined_call_operand.vmem [shape: bf16[8,128], index: 1, kind: input, shape index: {}]   ;;  %s432_s0 = inlined_call_operand.vmem [shape: bf16[8,128], index: 0, kind: input, shape index: {}]   ;;  %s433_s4 = inlined_call_operand.vmem [shape: f32[1,128], index: 4, kind: input, shape index: {}]   ;;  %s434_s5 = inlined_call_operand.vmem [shape: f32[8,128], index: 5, kind: output, shape index: {}]  }
   0x1   :  { %279 = vmatprep.subr.bf16.mxu0 %v337_v0  ;;  %299 = vmatprep.subr.bf16.mxu1 %v337_v0  ;;  %v321_v1 = vld [vmem:[%s429_s3 + $0x38] sm:$0xff]   ;;  %v323_v3 = vld [vmem:[%s429_s3 + $0x30] sm:$0xff]   ;;  %v325_v5 = vld [vmem:[%s429_s3 + $0x28] sm:$0xff]  }
   0x2   :  { %v322_v2 = vld [vmem:[%s430_s2 + $0x38] sm:$0xff]   ;;  %295 = vmatprep.mubr.msk.bf16.mxu0 %vm338_vm0, %v337_v0  ;;  %315 = vmatprep.mubr.msk.bf16.mxu1 %vm338_vm0, %v337_v0  ;;  %v324_v4 = vld [vmem:[%s430_s2 + $0x30] sm:$0xff]   ;;  %v326_v6 = vld [vmem:[%s430_s2 + $0x28] sm:$0xff]  }
   0x3   :  { %280 = vmatpush3.bf16.msra.mxu0 %v321_v1  ;;  %300 = vmatpush3.bf16.msra.mxu1 %v322_v2  ;;  %v327_v7 = vld [vmem:[%s429_s3 + $0x20] sm:$0xff]   ;;  %v329_v9 = vld [vmem:[%s429_s3 + $0x18] sm:$0xff]   ;;  %v331_v11 = vld [vmem:[%s429_s3 + $0x10] sm:$0xff]  }
   0x4   :  { %281 = vmatprep.subr.bf16.mxu0 %v337_v0  ;;  %301 = vmatprep.subr.bf16.mxu1 %v337_v0  ;;  %v328_v8 = vld [vmem:[%s430_s2 + $0x20] sm:$0xff]   ;;  %v330_v10 = vld [vmem:[%s430_s2 + $0x18] sm:$0xff]   ;;  %v332_v12 = vld [vmem:[%s430_s2 + $0x10] sm:$0xff]  }
   0x5   :  { %v333_v13 = vld [vmem:[%s429_s3 + $0x8] sm:$0xff]   ;;  %v335_v15 = vld [vmem:[%s429_s3] sm:$0xff]  }
   0x6   :  { %v334_v14 = vld [vmem:[%s430_s2 + $0x8] sm:$0xff]   ;;  %v336_v16 = vld [vmem:[%s430_s2] sm:$0xff]  }
   0x7   :  { %282 = vmatpush3.bf16.msra.mxu0 %v323_v3  ;;  %302 = vmatpush3.bf16.msra.mxu1 %v324_v4  ;;  %v38_v17 = vld [vmem:[%s431_s1] sm:$0xf] }
   0x8   :  { %283 = vmatprep.subr.bf16.mxu0 %v337_v0  ;;  %303 = vmatprep.subr.bf16.mxu1 %v337_v0  ;;  %v21_v18 = vld [vmem:[%s432_s0] sm:$0xf] }
   0x9   :  { %v260_v21 = vld [vmem:[%s433_s4] ss:$0 sm:$0xff] }
   0xb   :  { %284 = vmatpush3.bf16.msra.mxu0 %v325_v5  ;;  %304 = vmatpush3.bf16.msra.mxu1 %v326_v6 }
   0xc   :  { %285 = vmatprep.subr.bf16.mxu0 %v337_v0  ;;  %305 = vmatprep.subr.bf16.mxu1 %v337_v0 }
   0xf   :  { %286 = vmatpush3.bf16.msra.mxu0 %v327_v7  ;;  %306 = vmatpush3.bf16.msra.mxu1 %v328_v8 }
  0x10   :  { %287 = vmatprep.subr.bf16.mxu0 %v337_v0  ;;  %307 = vmatprep.subr.bf16.mxu1 %v337_v0 }
  0x13   :  { %288 = vmatpush3.bf16.msra.mxu0 %v329_v9  ;;  %308 = vmatpush3.bf16.msra.mxu1 %v330_v10 }
  0x14   :  { %289 = vmatprep.subr.bf16.mxu0 %v337_v0  ;;  %309 = vmatprep.subr.bf16.mxu1 %v337_v0 }
  0x17   :  { %290 = vmatpush3.bf16.msra.mxu0 %v331_v11  ;;  %310 = vmatpush3.bf16.msra.mxu1 %v332_v12 }
  0x18   :  { %291 = vmatprep.subr.bf16.mxu0 %v337_v0  ;;  %311 = vmatprep.subr.bf16.mxu1 %v337_v0 }
  0x1b   :  { %292 = vmatpush3.bf16.msra.mxu0 %v333_v13  ;;  %312 = vmatpush3.bf16.msra.mxu1 %v334_v14 }
  0x1c   :  { %293 = vmatprep.subr.bf16.mxu0 %v337_v0  ;;  %313 = vmatprep.subr.bf16.mxu1 %v337_v0 }
  0x1f   :  { %294 = vmatpush3.bf16.msra.mxu0 %v335_v15  ;;  %314 = vmatpush3.bf16.msra.mxu1 %v336_v16 }
  0x22   :  { %296 = vmatmul.mubr.bf16.vlgmr.msra.gmra.mxu0 %v38_v17  ;;  %316 = vmatmul.mubr.bf16.vlgmr.msra.gmra.mxu1 %v21_v18 }
  0xe2   :  { %v137_v19 = vpop.f32.mrf.mxu0  ;;  %v225_v20 = vpop.f32.mrf.mxu1 }
  0xe3   :  { %v226_v22 = vadd.f32 %v225_v20, %v137_v19 }
  0xe4   :  { %v297_v23 = vpop.f32.mrf.mxu0  ;;  %v317_v24 = vpop.f32.mrf.mxu1 }
  0xe5   :  { %v238_v25 = vadd.f32 %v260_v21, %v226_v22 }
  0xe6   :  { %v140_v26 = vpop.f32.mrf.mxu0  ;;  %v228_v27 = vpop.f32.mrf.mxu1 }
  0xe7   :  { %239 = vst [vmem:[%s434_s5] sm:$0xff] %v238_v25 }
  0xe8   :  { %v298_v28 = vpop.f32.mrf.mxu0  ;;  %v318_v29 = vpop.f32.mrf.mxu1 }

// kernel: _lambda_.6
= control target key start
LH: loop header
LB: loop body
LE: loop exit
PB: predicated region body
PF: predicated region fallthrough
CT: control target
= control target key end

     0   :  { %13 = vsyncpa [#allocation9], 0  ;;  %v8641_v2 = vmov 0   ;;  %s8633_s0 = inlined_call_operand.vmem [shape: bf16[8,8,1024], index: 0, kind: input, shape index: {}, may-alias: {0,1}]   ;;  %s8634_s1 = inlined_call_operand.vmem [shape: bf16[8,8,1024], index: 1, kind: input, shape index: {}, may-alias: {0,1}]   ;;  %s8635_s2 = inlined_call_operand.vmem [shape: bf16[128,512], index: 2, kind: input, shape index: {}]   ;;  %s8636_s3 = inlined_call_operand.vmem [shape: bf16[128,512], index: 3, kind: input, shape index: {}]   ;;  %s8637_s4 = inlined_call_operand.vmem [shape: bf16[8,8,128], index: 4, kind: output, shape index: {0}]   ;;  %s8638_s5 = inlined_call_operand.vmem [shape: bf16[8,8,128], index: 5, kind: output, shape index: {1}]   ;;  %s8639_s6 = inlined_call_operand.hbm [shape: bf16[8,128], index: 6, kind: output, shape index: {2}]   ;;  %s8640_s7 = inlined_call_operand.hbm [shape: bf16[8,128], index: 7, kind: output, shape index: {3}]  }
   0x1   :  { %v6604_v0 = vld [vmem:[%s8635_s2 + $0xe4] ss:$16 sps:$4 sm:$0xff]   ;;  %v6609_v1 = vld [vmem:[%s8635_s2 + $0xe0] ss:$16 sps:$4 sm:$0xff]   ;;  %384 = vmatprep.mubr.bf16.mxu0 %v8641_v2  ;;  %148 = vst [vmem:[#allocation2] sm:$0xf] %v8641_v2  ;;  %425 = vmatprep.mubr.bf16.mxu1 %v8641_v2 }
   0x2   :  { %150 = vst [vmem:[#allocation4] sm:$0xf] %v8641_v2  ;;  %352 = vmatprep.subr.bf16.mxu0 %v6604_v0  ;;  %v6619_v3 = vld [vmem:[%s8635_s2 + $0xc4] ss:$16 sps:$4 sm:$0xff]   ;;  %v6625_v4 = vld [vmem:[%s8635_s2 + $0xc0] ss:$16 sps:$4 sm:$0xff]  }
   0x3   :  { %353 = vmatpush1.bf16.msra.mxu0 %v6609_v1  ;;  %v6631_v5 = vld [vmem:[%s8635_s2 + $0xa4] ss:$16 sps:$4 sm:$0xff]   ;;  %v6636_v6 = vld [vmem:[%s8635_s2 + $0xec] ss:$16 sps:$4 sm:$0xff]   ;;  %v6641_v7 = vld [vmem:[%s8635_s2 + $0xe8] ss:$16 sps:$4 sm:$0xff]  }
   0x4   :  { %354 = vmatprep.subr.bf16.mxu0 %v6619_v3  ;;  %v6647_v8 = vld [vmem:[%s8635_s2 + $0xa0] ss:$16 sps:$4 sm:$0xff]   ;;  %393 = vmatprep.subr.bf16.mxu1 %v6636_v6  ;;  %v6654_v9 = vld [vmem:[%s8635_s2 + $0x84] ss:$16 sps:$4 sm:$0xff]   ;;  %v6660_v10 = vld [vmem:[%s8635_s2 + $0xcc] ss:$16 sps:$4 sm:$0xff]  }
   0x5   :  { %394 = vmatpush1.bf16.msra.mxu1 %v6641_v7  ;;  %v6665_v11 = vld [vmem:[%s8635_s2 + $0xc8] ss:$16 sps:$4 sm:$0xff]   ;;  %v6672_v12 = vld [vmem:[%s8635_s2 + $0x80] ss:$16 sps:$4 sm:$0xff]   ;;  %v6677_v13 = vld [vmem:[%s8635_s2 + $0x64] ss:$16 sps:$4 sm:$0xff]  }
   0x6   :  { %395 = vmatprep.subr.bf16.mxu1 %v6660_v10  ;;  %v6682_v14 = vld [vmem:[%s8635_s2 + $0xac] ss:$16 sps:$4 sm:$0xff]   ;;  %v6689_v15 = vld [vmem:[%s8635_s2 + $0xa8] ss:$16 sps:$4 sm:$0xff]   ;;  %v6701_v17 = vld [vmem:[%s8635_s2 + $0x60] ss:$16 sps:$4 sm:$0xff]  }
   0x7   :  { %355 = vmatpush1.bf16.msra.mxu0 %v6625_v4  ;;  %v6695_v16 = vld [vmem:[%s8635_s2 + $0x8c] ss:$16 sps:$4 sm:$0xff]   ;;  %v6707_v18 = vld [vmem:[%s8635_s2 + $0x44] ss:$16 sps:$4 sm:$0xff]   ;;  %v6713_v19 = vld [vmem:[%s8635_s2 + $0x88] ss:$16 sps:$4 sm:$0xff]  }
   0x8   :  { %356 = vmatprep.subr.bf16.mxu0 %v6631_v5  ;;  %v6719_v20 = vld [vmem:[%s8635_s2 + $0x6c] ss:$16 sps:$4 sm:$0xff]   ;;  %v6725_v21 = vld [vmem:[%s8635_s2 + $0x40] ss:$16 sps:$4 sm:$0xff]   ;;  %v6730_v22 = vld [vmem:[%s8635_s2 + $0x24] ss:$16 sps:$4 sm:$0xff]  }
   0x9   :  { %396 = vmatpush1.bf16.msra.mxu1 %v6665_v11  ;;  %v6737_v23 = vld [vmem:[%s8635_s2 + $0x68] ss:$16 sps:$4 sm:$0xff]   ;;  %v6743_v24 = vld [vmem:[%s8635_s2 + $0x4c] ss:$16 sps:$4 sm:$0xff]   ;;  %v6748_v25 = vld [vmem:[%s8635_s2 + $0x20] ss:$16 sps:$4 sm:$0xff]  }
   0xa   :  { %397 = vmatprep.subr.bf16.mxu1 %v6682_v14  ;;  %v6754_v26 = vld [vmem:[%s8635_s2 + $0x4] ss:$16 sps:$4 sm:$0xff]   ;;  %v6761_v27 = vld [vmem:[%s8635_s2 + $0x48] ss:$16 sps:$4 sm:$0xff]   ;;  %v6767_v28 = vld [vmem:[%s8635_s2 + $0x2c] ss:$16 sps:$4 sm:$0xff]  }
   0xb   :  { %357 = vmatpush1.bf16.msra.mxu0 %v6647_v8  ;;  %v6772_v29 = vld [vmem:[%s8635_s2] ss:$16 sps:$4 sm:$0xff]   ;;  %v6778_v30 = vld [vmem:[%s8636_s3 + $0xe4] ss:$16 sps:$4 sm:$0xff]   ;;  %v6785_v31 = vld [vmem:[%s8635_s2 + $0x28] ss:$16 sps:$4 sm:$0xff]  }
   0xc   :  { %358 = vmatprep.subr.bf16.mxu0 %v6654_v9  ;;  %v6791_v32 = vld [vmem:[%s8635_s2 + $0xc] ss:$16 sps:$4 sm:$0xff]   ;;  %v154_v33 = vld [vmem:[#allocation2] sm:$0xf]  ;;  %v6802_v35 = vld [vmem:[%s8636_s3 + $0xc4] ss:$16 sps:$4 sm:$0xff]  }
   0xd   :  { %398 = vmatpush1.bf16.msra.mxu1 %v6689_v15  ;;  %v6796_v34 = vld [vmem:[%s8636_s3 + $0xe0] ss:$16 sps:$4 sm:$0xff]   ;;  %v6809_v36 = vld [vmem:[%s8635_s2 + $0x8] ss:$16 sps:$4 sm:$0xff]   ;;  %v6815_v37 = vld [vmem:[%s8636_s3 + $0xec] ss:$16 sps:$4 sm:$0xff]  }
   0xe   :  { %399 = vmatprep.subr.bf16.mxu1 %v6695_v16  ;;  %v6820_v38 = vld [vmem:[%s8636_s3 + $0xc0] ss:$16 sps:$4 sm:$0xff]   ;;  %v6826_v39 = vld [vmem:[%s8636_s3 + $0xa4] ss:$16 sps:$4 sm:$0xff]   ;;  %v6834_v40 = vld [vmem:[%s8636_s3 + $0xe8] ss:$16 sps:$4 sm:$0xff]  }
   0xf   :  { %359 = vmatpush1.bf16.msra.mxu0 %v6672_v12  ;;  %v6840_v41 = vld [vmem:[%s8636_s3 + $0xcc] ss:$16 sps:$4 sm:$0xff]   ;;  %v6846_v42 = vld [vmem:[%s8636_s3 + $0xa0] ss:$16 sps:$4 sm:$0xff]   ;;  %v6852_v43 = vld [vmem:[%s8636_s3 + $0x84] ss:$16 sps:$4 sm:$0xff]  }
  0x10   :  { %360 = vmatprep.subr.bf16.mxu0 %v6677_v13  ;;  %v6858_v44 = vld [vmem:[%s8636_s3 + $0xc8] ss:$16 sps:$4 sm:$0xff]   ;;  %v6863_v45 = vld [vmem:[%s8636_s3 + $0x80] ss:$16 sps:$4 sm:$0xff]   ;;  %v6869_v46 = vld [vmem:[%s8636_s3 + $0xac] ss:$16 sps:$4 sm:$0xff]  }
  0x11   :  { %400 = vmatpush1.bf16.msra.mxu1 %v6713_v19  ;;  %v6875_v47 = vld [vmem:[%s8636_s3 + $0x64] ss:$16 sps:$4 sm:$0xff]   ;;  %v6881_v48 = vld [vmem:[%s8636_s3 + $0xa8] ss:$16 sps:$4 sm:$0xff]   ;;  %v6886_v49 = vld [vmem:[%s8636_s3 + $0x8c] ss:$16 sps:$4 sm:$0xff]  }
  0x12   :  { %401 = vmatprep.subr.bf16.mxu1 %v6719_v20  ;;  %v6893_v50 = vld [vmem:[%s8636_s3 + $0x60] ss:$16 sps:$4 sm:$0xff]   ;;  %v6899_v51 = vld [vmem:[%s8636_s3 + $0x44] ss:$16 sps:$4 sm:$0xff]   ;;  %v6904_v52 = vld [vmem:[%s8636_s3 + $0x88] ss:$16 sps:$4 sm:$0xff]  }
  0x13   :  { %361 = vmatpush1.bf16.msra.mxu0 %v6701_v17  ;;  %v6910_v53 = vld [vmem:[%s8636_s3 + $0x6c] ss:$16 sps:$4 sm:$0xff]   ;;  %v6917_v54 = vld [vmem:[%s8636_s3 + $0x40] ss:$16 sps:$4 sm:$0xff]   ;;  %v6923_v55 = vld [vmem:[%s8636_s3 + $0x24] ss:$16 sps:$4 sm:$0xff]  }
  0x14   :  { %362 = vmatprep.subr.bf16.mxu0 %v6707_v18  ;;  %8657 = vst [vmem:[#allocation14_spill] sm:$0xff] %v6923_v55  ;;  %v6928_v56 = vld [vmem:[%s8636_s3 + $0x68] ss:$16 sps:$4 sm:$0xff]   ;;  %v6934_v57 = vld [vmem:[%s8636_s3 + $0x4c] ss:$16 sps:$4 sm:$0xff]  }
  0x15   :  { %402 = vmatpush1.bf16.msra.mxu1 %v6737_v23  ;;  %v6941_v58 = vld [vmem:[%s8636_s3 + $0x20] ss:$16 sps:$4 sm:$0xff]   ;;  %v6947_v59 = vld [vmem:[%s8636_s3 + $0x4] ss:$16 sps:$4 sm:$0xff]   ;;  %v6952_v60 = vld [vmem:[%s8636_s3 + $0x48] ss:$16 sps:$4 sm:$0xff]  }
  0x16   :  { %403 = vmatprep.subr.bf16.mxu1 %v6743_v24  ;;  %8658 = vst [vmem:[#allocation15_spill] sm:$0xff] %v6947_v59  ;;  %v6958_v61 = vld [vmem:[%s8636_s3 + $0x2c] ss:$16 sps:$4 sm:$0xff]   ;;  %v6965_v62 = vld [vmem:[%s8636_s3] ss:$16 sps:$4 sm:$0xff]  }
  0x17   :  { %363 = vmatpush1.bf16.msra.mxu0 %v6725_v21  ;;  %v6971_v63 = vld [vmem:[%s8636_s3 + $0x28] ss:$16 sps:$4 sm:$0xff]  }
  0x18   :  { %364 = vmatprep.subr.bf16.mxu0 %v6730_v22 }
  0x19   :  { %404 = vmatpush1.bf16.msra.mxu1 %v6761_v27 }
  0x1a   :  { %405 = vmatprep.subr.bf16.mxu1 %v6767_v28 }
  0x1b   :  { %365 = vmatpush1.bf16.msra.mxu0 %v6748_v25 }
  0x1c   :  { %366 = vmatprep.subr.bf16.mxu0 %v6754_v26 }
  0x1d   :  { %406 = vmatpush1.bf16.msra.mxu1 %v6785_v31 }
  0x1e   :  { %407 = vmatprep.subr.bf16.mxu1 %v6791_v32 }
  0x1f   :  { %367 = vmatpush1.bf16.msra.mxu0 %v6772_v29 }
  0x20   :  { %667 = vmatprep.subr.bf16.mxu0 %v6778_v30 }
  0x21   :  { %408 = vmatpush1.bf16.msra.mxu1 %v6809_v36 }
  0x22   :  { %385 = vmatmul.mubr.bf16.vlgmr.msra.gmra.mxu0 %v154_v33  ;;  %708 = vmatprep.subr.bf16.mxu1 %v6815_v37 }
  0x23   :  { %668 = vmatpush1.bf16.msra.mxu0 %v6796_v34  ;;  %699 = vmatprep.mubr.bf16.mxu0 %v8641_v2 }
  0x24   :  { %669 = vmatprep.subr.bf16.mxu0 %v6802_v35  ;;  %426 = vmatmul.mubr.bf16.vlgmr.msra.gmra.mxu1 %v154_v33  ;;  %v6977_v33 = vld [vmem:[%s8636_s3 + $0xc] ss:$16 sps:$4 sm:$0xff]  }
  0x25   :  { %709 = vmatpush1.bf16.msra.mxu1 %v6834_v40  ;;  %740 = vmatprep.mubr.bf16.mxu1 %v8641_v2  ;;  %v469_v2 = vld [vmem:[#allocation4] sm:$0xf] }
  0x26   :  { %710 = vmatprep.subr.bf16.mxu1 %v6840_v41 }
  0x27   :  { %670 = vmatpush1.bf16.msra.mxu0 %v6820_v38 }
  0x28   :  { %671 = vmatprep.subr.bf16.mxu0 %v6826_v39 }
  0x29   :  { %711 = vmatpush1.bf16.msra.mxu1 %v6858_v44 }
  0x2a   :  { %712 = vmatprep.subr.bf16.mxu1 %v6869_v46 }
  0x2b   :  { %672 = vmatpush1.bf16.msra.mxu0 %v6846_v42 }
  0x2c   :  { %673 = vmatprep.subr.bf16.mxu0 %v6852_v43 }
  0x2d   :  { %713 = vmatpush1.bf16.msra.mxu1 %v6881_v48 }
  0x2e   :  { %714 = vmatprep.subr.bf16.mxu1 %v6886_v49 }
  0x2f   :  { %674 = vmatpush1.bf16.msra.mxu0 %v6863_v45 }
  0x30   :  { %675 = vmatprep.subr.bf16.mxu0 %v6875_v47 }
  0x31   :  { %715 = vmatpush1.bf16.msra.mxu1 %v6904_v52 }
  0x32   :  { %716 = vmatprep.subr.bf16.mxu1 %v6910_v53 }
  0x33   :  { %676 = vmatpush1.bf16.msra.mxu0 %v6893_v50 }
  0x34   :  { %677 = vmatprep.subr.bf16.mxu0 %v6899_v51 }
  0x35   :  { %717 = vmatpush1.bf16.msra.mxu1 %v6928_v56 }
  0x36   :  { %718 = vmatprep.subr.bf16.mxu1 %v6934_v57 }
  0x37   :  { %678 = vmatpush1.bf16.msra.mxu0 %v6917_v54 }
  0x38   :  { %679 = vmatprep.subr.bf16.mxu0 %v6923_v55  ;;  %v6985_v55 = vld [vmem:[%s8636_s3 + $0x8] ss:$16 sps:$4 sm:$0xff]  }
  0x39   :  { %719 = vmatpush1.bf16.msra.mxu1 %v6952_v60 }
  0x3a   :  { %720 = vmatprep.subr.bf16.mxu1 %v6958_v61 }
  0x3b   :  { %680 = vmatpush1.bf16.msra.mxu0 %v6941_v58 }
  0x3c   :  { %681 = vmatprep.subr.bf16.mxu0 %v6947_v59  ;;  %v8659_v59 = vmov 0  }
  0x3d   :  { %721 = vmatpush1.bf16.msra.mxu1 %v6971_v63 }
  0x3e   :  { %722 = vmatprep.subr.bf16.mxu1 %v6977_v33 }
  0x3f   :  { %682 = vmatpush1.bf16.msra.mxu0 %v6965_v62 }
  0x40   :  { %983 = vmatprep.subr.bf16.mxu0 %v6604_v0 }
  0x41   :  { %723 = vmatpush1.bf16.msra.mxu1 %v6985_v55 }
  0x42   :  { %700 = vmatmul.mubr.bf16.vlgmr.msra.gmra.mxu0 %v469_v2  ;;  %1024 = vmatprep.subr.bf16.mxu1 %v6636_v6 }
  0x43   :  { %984 = vmatpush1.bf16.msra.mxu0 %v6609_v1  ;;  %1015 = vmatprep.mubr.bf16.mxu0 %v8659_v59 }
  0x44   :  { %985 = vmatprep.subr.bf16.mxu0 %v6619_v3  ;;  %741 = vmatmul.mubr.bf16.vlgmr.msra.gmra.mxu1 %v469_v2 }
  0x45   :  { %1025 = vmatpush1.bf16.msra.mxu1 %v6641_v7  ;;  %1056 = vmatprep.mubr.bf16.mxu1 %v8659_v59 }
  0x46   :  { %1026 = vmatprep.subr.bf16.mxu1 %v6660_v10 }
  0x47   :  { %986 = vmatpush1.bf16.msra.mxu0 %v6625_v4 }
  0x48   :  { %987 = vmatprep.subr.bf16.mxu0 %v6631_v5 }
  0x49   :  { %1027 = vmatpush1.bf16.msra.mxu1 %v6665_v11 }
  0x4a   :  { %1028 = vmatprep.subr.bf16.mxu1 %v6682_v14 }
  0x4b   :  { %988 = vmatpush1.bf16.msra.mxu0 %v6647_v8 }
  0x4c   :  { %989 = vmatprep.subr.bf16.mxu0 %v6654_v9 }
  0x4d   :  { %1029 = vmatpush1.bf16.msra.mxu1 %v6689_v15 }
  0x4e   :  { %1030 = vmatprep.subr.bf16.mxu1 %v6695_v16 }
  0x4f   :  { %990 = vmatpush1.bf16.msra.mxu0 %v6672_v12 }
  0x50   :  { %991 = vmatprep.subr.bf16.mxu0 %v6677_v13 }
  0x51   :  { %1031 = vmatpush1.bf16.msra.mxu1 %v6713_v19 }
  0x52   :  { %1032 = vmatprep.subr.bf16.mxu1 %v6719_v20 }
  0x53   :  { %992 = vmatpush1.bf16.msra.mxu0 %v6701_v17 }
  0x54   :  { %993 = vmatprep.subr.bf16.mxu0 %v6707_v18 }
  0x55   :  { %1033 = vmatpush1.bf16.msra.mxu1 %v6737_v23 }
  0x56   :  { %1034 = vmatprep.subr.bf16.mxu1 %v6743_v24 }
  0x57   :  { %994 = vmatpush1.bf16.msra.mxu0 %v6725_v21 }
  0x58   :  { %995 = vmatprep.subr.bf16.mxu0 %v6730_v22 }
  0x59   :  { %1035 = vmatpush1.bf16.msra.mxu1 %v6761_v27 }
  0x5a   :  { %1036 = vmatprep.subr.bf16.mxu1 %v6767_v28 }
  0x5b   :  { %996 = vmatpush1.bf16.msra.mxu0 %v6748_v25 }
  0x5c   :  { %997 = vmatprep.subr.bf16.mxu0 %v6754_v26 }
  0x5d   :  { %1037 = vmatpush1.bf16.msra.mxu1 %v6785_v31 }
  0x5e   :  { %1038 = vmatprep.subr.bf16.mxu1 %v6791_v32 }
  0x5f   :  { %998 = vmatpush1.bf16.msra.mxu0 %v6772_v29 }
  0x60   :  { %1299 = vmatprep.subr.bf16.mxu0 %v6778_v30 }
  0x61   :  { %1039 = vmatpush1.bf16.msra.mxu1 %v6809_v36 }
  0x62   :  { %1340 = vmatprep.subr.bf16.mxu1 %v6815_v37 }
  0x63   :  { %14 = vsyncpa [#allocation11], 0  ;;  %v29_v0 = vld [vmem:[%s8633_s0] sm:$0xff]  ;;  %v31_v8 = vld [vmem:[%s8633_s0 + $0x8] sm:$0xff]  ;;  %s6559_s25 = smov [#allocation8]  }
  0x64   :  { %v156_v1 = vunpack.c.l.bf16 %v29_v0  ;;  %v157_v2 = vunpack.c.h.bf16 %v29_v0  ;;  %v159_v13 = vunpack.c.h.bf16 %v31_v8  ;;  %v158_v17 = vunpack.c.l.bf16 %v31_v8  ;;  %v5295_v25 = vld [vmem:[%s8634_s1 + $0xf0] sm:$0xff]  ;;  %s5229_s26 = sshll.u32 %s6559_s25, 4  ;;  %s5230_s26 = int_to_ptr.vmem [resolvable:$true] %s5229_s26 }
  0x65   :  { %v471_v26 = vunpack.c.l.bf16 %v5295_v25  ;;  %v472_v28 = vunpack.c.h.bf16 %v5295_v25  ;;  %s6514_s27 = scalar_lea.vmem %s5230_s26, 64  ;;  %p6519_p1 = scmp.lt.s32.totalorder %s5230_s26, %s5230_s26 }
  0x66   :  { %p6515_p0 = scmp.ne.s32.totalorder %s5230_s26, %s6514_s27  ;;  %p6520_p2 = scmp.lt.s32.totalorder %s6514_s27, %s6514_s27 }
  0x68   :  { %p6521_p3 = por %p6520_p2, %p6519_p1 }
  0x6a   :  { %p6522_p4 = pnand %p6521_p3, %p6515_p0 }
  0xe2   :  { %v386_v3 = vpop.f32.mrf.mxu0 }
  0xe3   :  { %v434_v4 = vadd.f32 %v386_v3, %v156_v1 }
  0xe4   :  { %v388_v5 = vpop.f32.mrf.mxu0  ;;  %v427_v11 = vpop.f32.mrf.mxu1 }
  0xe5   :  { %v5329_v6 = vmul.f32 -1.442695, %v434_v4  ;;  %v435_v7 = vadd.f32 %v388_v5, %v157_v2  ;;  %v436_v20 = vadd.f32 %v427_v11, %v158_v17 }
  0xe6   :  { %v390_v9 = vpop.f32.mrf.mxu0  ;;  %v429_v14 = vpop.f32.mrf.mxu1 }
  0xe7   :  { %6258 = vpow2.f32 %v5329_v6  ;;  %v5330_v10 = vmul.f32 -1.442695, %v435_v7  ;;  %v437_v16 = vadd.f32 %v429_v14, %v159_v13  ;;  %v5296_v7 = vld [vmem:[%s8634_s1 + $0xf8] sm:$0xff] }
  0xe8   :  { %v391_v12 = vpop.f32.mrf.mxu0  ;;  %v431_v15 = vpop.f32.mrf.mxu1  ;;  %v473_v14 = vunpack.c.l.bf16 %v5296_v7 }
  0xe9   :  { %6260 = vpow2.f32 %v5330_v10  ;;  %v5331_v19 = vmul.f32 -1.442695, %v437_v16  ;;  %v474_v12 = vunpack.c.h.bf16 %v5296_v7  ;;  %v7247_v7 = vld [vmem:[%s8635_s2 + $0x28] ss:$16 sps:$4 sm:$0xff]  }
  0xea   :  { %v432_v18 = vpop.f32.mrf.mxu1 }
  0xeb   :  { %6262 = vpow2.f32 %v5331_v19 }
  0xec   :  { %6264 = vtanh.f32 %v436_v20 }
  0xf4   :  { %v6259_v21 = vpop.eup %6258 }
  0xf5   :  { %v441_v22 = vadd.f32 1.0, %v6259_v21 }
  0xf6   :  { %v6261_v23 = vpop.eup %6260 }
  0xf7   :  { %6266 = vrcp.f32 %v441_v22  ;;  %v447_v24 = vadd.f32 1.0, %v6261_v23 }
  0xf8   :  { %v6263_v27 = vpop.eup %6262 }
  0xf9   :  { %6268 = vrcp.f32 %v447_v24  ;;  %v6265_v29 = vpop.eup %6264  ;;  %v454_v36 = vadd.f32 1.0, %v6263_v27 }
 0x102   :  { %v701_v30 = vpop.f32.mrf.mxu0 }
 0x103   :  { %v749_v31 = vadd.f32 %v701_v30, %v471_v26 }
 0x104   :  { %v6267_v32 = vpop.eup %6266  ;;  %v703_v37 = vpop.f32.mrf.mxu0 }
 0x105   :  { %v458_v0 = vmul.f32 %v6267_v32, %v6265_v29  ;;  %v5364_v1 = vmul.f32 -1.442695, %v749_v31  ;;  %v750_v2 = vadd.f32 %v703_v37, %v472_v28  ;;  %v742_v8 = vpop.f32.mrf.mxu1 }
 0x106   :  { %v6269_v3 = vpop.eup %6268  ;;  %v705_v4 = vpop.f32.mrf.mxu0  ;;  %v751_v17 = vadd.f32 %v742_v8, %v473_v14  ;;  %v7256_v8 = vld [vmem:[%s8635_s2 + $0x4] ss:$16 sps:$4 sm:$0xff]   ;;  %v7285_v14 = vld [vmem:[%s8636_s3 + $0xec] ss:$16 sps:$4 sm:$0xff]  }
 0x107   :  { %v457_v5 = vmul.f32 0.0, %v6269_v3  ;;  %6270 = vpow2.f32 %v5364_v1  ;;  %v5365_v6 = vmul.f32 -1.442695, %v750_v2  ;;  %v744_v11 = vpop.f32.mrf.mxu1  ;;  %v7213_v1 = vld [vmem:[%s8635_s2 + $0x4c] ss:$16 sps:$4 sm:$0xff]  }
 0x108   :  { %6272 = vrcp.f32 %v454_v36  ;;  %v706_v9 = vpop.f32.mrf.mxu0  ;;  %v752_v16 = vadd.f32 %v744_v11, %v474_v12  ;;  %v7218_v2 = vld [vmem:[%s8635_s2 + $0x40] ss:$16 sps:$4 sm:$0xff]   ;;  %v7223_v3 = vld [vmem:[%s8635_s2 + $0x48] ss:$16 sps:$4 sm:$0xff]   ;;  %v7232_v4 = vld [vmem:[%s8635_s2 + $0x24] ss:$16 sps:$4 sm:$0xff]  }
 0x109   :  { %v7039_v10 = vadd.f32 %v458_v0, %v457_v5  ;;  %6274 = vpow2.f32 %v5365_v6  ;;  %v746_v13 = vpop.f32.mrf.mxu1  ;;  %v7237_v5 = vld [vmem:[%s8635_s2 + $0x2c] ss:$16 sps:$4 sm:$0xff]   ;;  %v7242_v6 = vld [vmem:[%s8635_s2 + $0x20] ss:$16 sps:$4 sm:$0xff]   ;;  %v7271_v12 = vld [vmem:[%s8635_s2 + $0x8] ss:$16 sps:$4 sm:$0xff]  }
 0x10a   :  { %v5366_v18 = vmul.f32 -1.442695, %v752_v16  ;;  %v7261_v9 = vld [vmem:[%s8635_s2 + $0xc] ss:$16 sps:$4 sm:$0xff]   ;;  %v7266_v11 = vld [vmem:[%s8635_s2] ss:$16 sps:$4 sm:$0xff]  }
 0x10b   :  { %6276 = vtanh.f32 %v7039_v10  ;;  %v747_v15 = vpop.f32.mrf.mxu1  ;;  %v7280_v13 = vld [vmem:[%s8636_s3 + $0xe4] ss:$16 sps:$4 sm:$0xff]  }
 0x10c   :  { %6278 = vtanh.f32 %v751_v17  ;;  %v33_v15 = vld [vmem:[%s8633_s0 + $0x20] sm:$0xff] }
 0x10d   :  { %6280 = vpow2.f32 %v5366_v18  ;;  %v787_v16 = vunpack.c.l.bf16 %v33_v15  ;;  %v788_v17 = vunpack.c.h.bf16 %v33_v15 }
 0x114   :  { %v6271_v19 = vpop.eup %6270 }
 0x115   :  { %v6273_v20 = vpop.eup %6272  ;;  %v756_v21 = vadd.f32 1.0, %v6271_v19 }
 0x116   :  { %v6275_v22 = vpop.eup %6274 }
 0x117   :  { %6282 = vrcp.f32 %v756_v21  ;;  %v762_v23 = vadd.f32 1.0, %v6275_v22 }
 0x118   :  { %v6277_v24 = vpop.eup %6276 }
 0x119   :  { %v461_v25 = vmul.f32 %v6277_v24, %v6273_v20  ;;  %6284 = vrcp.f32 %v762_v23  ;;  %v6279_v27 = vpop.eup %6278 }
 0x11a   :  { %v6281_v28 = vpop.eup %6280 }
 0x11b   :  { %v462_v26 = vpack.c.bf16 %v461_v25, %v461_v25  ;;  %v769_v32 = vadd.f32 1.0, %v6281_v28 }
 0x11d   :  { %463 = vst [vmem:[#allocation2] sm:$0xf] %v462_v26  ;;  %465 = vst [vmem:[%s8637_s4] sm:$0xf] %v462_v26  ;;  %6286 = vrcp.f32 %v769_v32 }
 0x124   :  { %v6283_v29 = vpop.eup %6282  ;;  %v785_v30 = vld [vmem:[#allocation2] sm:$0xf] }
 0x125   :  { %1016 = vmatmul.mubr.bf16.vlgmr.msra.gmra.mxu0 %v785_v30  ;;  %1057 = vmatmul.mubr.bf16.vlgmr.msra.gmra.mxu1 %v785_v30  ;;  %v773_v37 = vmul.f32 %v6283_v29, %v6279_v27  ;;  %v35_v30 = vld [vmem:[%s8633_s0 + $0x28] sm:$0xff] }
 0x126   :  { %v6285_v31 = vpop.eup %6284  ;;  %1300 = vmatpush1.bf16.msra.mxu0 %v6796_v34  ;;  %1341 = vmatpush1.bf16.msra.mxu1 %v6834_v40  ;;  %v8660_v40 = vld [vmem:[#allocation14_spill] sm:$0xff] }
 0x127   :  { %v772_v36 = vmul.f32 0.0, %v6285_v31  ;;  %1301 = vmatprep.subr.bf16.mxu0 %v6802_v35  ;;  %1342 = vmatprep.subr.bf16.mxu1 %v6840_v41  ;;  %v8661_v41 = vld [vmem:[#allocation15_spill] sm:$0xff]  ;;  %v790_v31 = vunpack.c.h.bf16 %v35_v30 }
 0x128   :  { %1331 = vmatprep.mubr.bf16.mxu0 %v8659_v59  ;;  %1372 = vmatprep.mubr.bf16.mxu1 %v8659_v59 }
 0x129   :  { %v7051_v0 = vadd.f32 %v773_v37, %v772_v36  ;;  %v789_v36 = vunpack.c.l.bf16 %v35_v30 }
 0x12a   :  { %1302 = vmatpush1.bf16.msra.mxu0 %v6820_v38  ;;  %1343 = vmatpush1.bf16.msra.mxu1 %v6858_v44  ;;  %v6287_v34 = vpop.eup %6286  ;;  %v7093_v44 = vld [vmem:[%s8635_s2 + $0xec] ss:$16 sps:$4 sm:$0xff]  }
 0x12b   :  { %6288 = vtanh.f32 %v7051_v0  ;;  %1303 = vmatprep.subr.bf16.mxu0 %v6826_v39  ;;  %1344 = vmatprep.subr.bf16.mxu1 %v6869_v46  ;;  %v7103_v46 = vld [vmem:[%s8635_s2 + $0xe8] ss:$16 sps:$4 sm:$0xff]  }
 0x12e   :  { %1304 = vmatpush1.bf16.msra.mxu0 %v6846_v42  ;;  %1345 = vmatpush1.bf16.msra.mxu1 %v6881_v48  ;;  %v7117_v48 = vld [vmem:[%s8635_s2 + $0xcc] ss:$16 sps:$4 sm:$0xff]  }
 0x12f   :  { %1305 = vmatprep.subr.bf16.mxu0 %v6852_v43  ;;  %1346 = vmatprep.subr.bf16.mxu1 %v6886_v49  ;;  %v7088_v43 = vld [vmem:[%s8635_s2 + $0xe4] ss:$16 sps:$4 sm:$0xff]   ;;  %v7122_v49 = vld [vmem:[%s8635_s2 + $0xc0] ss:$16 sps:$4 sm:$0xff]  }
 0x132   :  { %1306 = vmatpush1.bf16.msra.mxu0 %v6863_v45  ;;  %1347 = vmatpush1.bf16.msra.mxu1 %v6904_v52  ;;  %v7098_v45 = vld [vmem:[%s8635_s2 + $0xe0] ss:$16 sps:$4 sm:$0xff]   ;;  %v7141_v52 = vld [vmem:[%s8635_s2 + $0xac] ss:$16 sps:$4 sm:$0xff]  }
 0x133   :  { %1307 = vmatprep.subr.bf16.mxu0 %v6875_v47  ;;  %1348 = vmatprep.subr.bf16.mxu1 %v6910_v53  ;;  %v7112_v47 = vld [vmem:[%s8635_s2 + $0xc4] ss:$16 sps:$4 sm:$0xff]   ;;  %v7146_v53 = vld [vmem:[%s8635_s2 + $0xa0] ss:$16 sps:$4 sm:$0xff]  }
 0x136   :  { %1308 = vmatpush1.bf16.msra.mxu0 %v6893_v50  ;;  %1349 = vmatpush1.bf16.msra.mxu1 %v6928_v56  ;;  %v7127_v50 = vld [vmem:[%s8635_s2 + $0xc8] ss:$16 sps:$4 sm:$0xff]   ;;  %v7165_v56 = vld [vmem:[%s8635_s2 + $0x8c] ss:$16 sps:$4 sm:$0xff]  }
 0x137   :  { %1309 = vmatprep.subr.bf16.mxu0 %v6899_v51  ;;  %1350 = vmatprep.subr.bf16.mxu1 %v6934_v57  ;;  %v7136_v51 = vld [vmem:[%s8635_s2 + $0xa4] ss:$16 sps:$4 sm:$0xff]   ;;  %v7170_v57 = vld [vmem:[%s8635_s2 + $0x80] ss:$16 sps:$4 sm:$0xff]  }
 0x138   :  { %v6289_v35 = vpop.eup %6288 }
 0x139   :  { %v776_v38 = vmul.f32 %v6289_v35, %v6287_v34 }
 0x13a   :  { %1310 = vmatpush1.bf16.msra.mxu0 %v6917_v54  ;;  %1351 = vmatpush1.bf16.msra.mxu1 %v6952_v60  ;;  %v7151_v54 = vld [vmem:[%s8635_s2 + $0xa8] ss:$16 sps:$4 sm:$0xff]   ;;  %v7184_v60 = vld [vmem:[%s8635_s2 + $0x64] ss:$16 sps:$4 sm:$0xff]  }
 0x13b   :  { %v777_v39 = vpack.c.bf16 %v776_v38, %v776_v38  ;;  %1311 = vmatprep.subr.bf16.mxu0 %v8660_v40  ;;  %1352 = vmatprep.subr.bf16.mxu1 %v6958_v61  ;;  %v7189_v61 = vld [vmem:[%s8635_s2 + $0x6c] ss:$16 sps:$4 sm:$0xff]  }
 0x13d   :  { %778 = vst [vmem:[#allocation4] sm:$0xf] %v777_v39  ;;  %5367 = vst [vmem:[%s8638_s5 + $0x1c] sm:$0xf] %v777_v39 }
 0x13e   :  { %1312 = vmatpush1.bf16.msra.mxu0 %v6941_v58  ;;  %1353 = vmatpush1.bf16.msra.mxu1 %v6971_v63  ;;  %v7175_v58 = vld [vmem:[%s8635_s2 + $0x88] ss:$16 sps:$4 sm:$0xff]  }
 0x13f   :  { %1313 = vmatprep.subr.bf16.mxu0 %v8661_v41  ;;  %1354 = vmatprep.subr.bf16.mxu1 %v6977_v33  ;;  %v7199_v63 = vld [vmem:[%s8635_s2 + $0x68] ss:$16 sps:$4 sm:$0xff]   ;;  %v7208_v33 = vld [vmem:[%s8635_s2 + $0x44] ss:$16 sps:$4 sm:$0xff]  }
 0x140   :  { %v5293_v41 = vld [vmem:[%s8634_s1 + $0xd0] sm:$0xff] }
 0x141   :  { %v1104_v15 = vunpack.c.h.bf16 %v5293_v41 }
 0x142   :  { %1314 = vmatpush1.bf16.msra.mxu0 %v6965_v62  ;;  %1355 = vmatpush1.bf16.msra.mxu1 %v6985_v55  ;;  %v7160_v55 = vld [vmem:[%s8635_s2 + $0x84] ss:$16 sps:$4 sm:$0xff]   ;;  %v7194_v62 = vld [vmem:[%s8635_s2 + $0x60] ss:$16 sps:$4 sm:$0xff]  }
 0x143   :  { %1615 = vmatprep.subr.bf16.mxu0 %v7088_v43  ;;  %1656 = vmatprep.subr.bf16.mxu1 %v7093_v44 }
 0x144   :  { %v1101_v42 = vld [vmem:[#allocation4] sm:$0xf] }
 0x145   :  { %1332 = vmatmul.mubr.bf16.vlgmr.msra.gmra.mxu0 %v1101_v42  ;;  %1373 = vmatmul.mubr.bf16.vlgmr.msra.gmra.mxu1 %v1101_v42  ;;  %v1103_v42 = vunpack.c.l.bf16 %v5293_v41 }
 0x146   :  { %1647 = vmatprep.mubr.bf16.mxu0 %v8659_v59  ;;  %1688 = vmatprep.mubr.bf16.mxu1 %v8659_v59 }
 0x147   :  { %1616 = vmatpush1.bf16.msra.mxu0 %v7098_v45  ;;  %1657 = vmatpush1.bf16.msra.mxu1 %v7103_v46 }
 0x148   :  { %1617 = vmatprep.subr.bf16.mxu0 %v7112_v47  ;;  %1658 = vmatprep.subr.bf16.mxu1 %v7117_v48 }
 0x14b   :  { %1618 = vmatpush1.bf16.msra.mxu0 %v7122_v49  ;;  %1659 = vmatpush1.bf16.msra.mxu1 %v7127_v50 }
 0x14c   :  { %1619 = vmatprep.subr.bf16.mxu0 %v7136_v51  ;;  %1660 = vmatprep.subr.bf16.mxu1 %v7141_v52 }
 0x14f   :  { %1620 = vmatpush1.bf16.msra.mxu0 %v7146_v53  ;;  %1661 = vmatpush1.bf16.msra.mxu1 %v7151_v54 }
 0x150   :  { %1621 = vmatprep.subr.bf16.mxu0 %v7160_v55  ;;  %1662 = vmatprep.subr.bf16.mxu1 %v7165_v56 }
 0x153   :  { %1622 = vmatpush1.bf16.msra.mxu0 %v7170_v57  ;;  %1663 = vmatpush1.bf16.msra.mxu1 %v7175_v58 }
 0x154   :  { %1623 = vmatprep.subr.bf16.mxu0 %v7184_v60  ;;  %1664 = vmatprep.subr.bf16.mxu1 %v7189_v61 }
 0x157   :  { %1624 = vmatpush1.bf16.msra.mxu0 %v7194_v62  ;;  %1665 = vmatpush1.bf16.msra.mxu1 %v7199_v63 }
 0x158   :  { %1625 = vmatprep.subr.bf16.mxu0 %v7208_v33  ;;  %1666 = vmatprep.subr.bf16.mxu1 %v7213_v1 }
 0x15b   :  { %1626 = vmatpush1.bf16.msra.mxu0 %v7218_v2  ;;  %1667 = vmatpush1.bf16.msra.mxu1 %v7223_v3 }
 0x15c   :  { %1627 = vmatprep.subr.bf16.mxu0 %v7232_v4  ;;  %1668 = vmatprep.subr.bf16.mxu1 %v7237_v5 }
 0x15f   :  { %1628 = vmatpush1.bf16.msra.mxu0 %v7242_v6  ;;  %1669 = vmatpush1.bf16.msra.mxu1 %v7247_v7 }
 0x160   :  { %1629 = vmatprep.subr.bf16.mxu0 %v7256_v8  ;;  %1670 = vmatprep.subr.bf16.mxu1 %v7261_v9 }
 0x163   :  { %1630 = vmatpush1.bf16.msra.mxu0 %v7266_v11  ;;  %1671 = vmatpush1.bf16.msra.mxu1 %v7271_v12 }
 0x164   :  { %1931 = vmatprep.subr.bf16.mxu0 %v7280_v13  ;;  %1972 = vmatprep.subr.bf16.mxu1 %v7285_v14 }
 0x1e5   :  { %v1017_v18 = vpop.f32.mrf.mxu0  ;;  %v1058_v19 = vpop.f32.mrf.mxu1 }
 0x1e6   :  { %v1065_v20 = vadd.f32 %v1017_v18, %v787_v16  ;;  %v1067_v35 = vadd.f32 %v1058_v19, %v789_v36 }
 0x1e7   :  { %v1019_v21 = vpop.f32.mrf.mxu0  ;;  %v1060_v22 = vpop.f32.mrf.mxu1 }
 0x1e8   :  { %v5400_v23 = vmul.f32 -1.442695, %v1065_v20  ;;  %v1066_v24 = vadd.f32 %v1019_v21, %v788_v17  ;;  %v1068_v32 = vadd.f32 %v1060_v22, %v790_v31 }
 0x1e9   :  { %v1021_v25 = vpop.f32.mrf.mxu0  ;;  %v1062_v26 = vpop.f32.mrf.mxu1 }
 0x1ea   :  { %6290 = vpow2.f32 %v5400_v23  ;;  %v5401_v27 = vmul.f32 -1.442695, %v1066_v24  ;;  %v5402_v37 = vmul.f32 -1.442695, %v1068_v32 }
 0x1eb   :  { %v1022_v28 = vpop.f32.mrf.mxu0  ;;  %v1063_v29 = vpop.f32.mrf.mxu1 }
 0x1ec   :  { %6292 = vpow2.f32 %v5401_v27 }
 0x1ed   :  { %6294 = vpow2.f32 %v5402_v37 }
 0x1f7   :  { %v6291_v34 = vpop.eup %6290 }
 0x1f8   :  { %v1072_v38 = vadd.f32 1.0, %v6291_v34 }
 0x1f9   :  { %v6293_v39 = vpop.eup %6292 }
 0x1fa   :  { %6296 = vrcp.f32 %v1072_v38  ;;  %v1078_v40 = vadd.f32 1.0, %v6293_v39  ;;  %v6295_v18 = vpop.eup %6294 }
 0x1fb   :  { %6298 = vtanh.f32 %v1067_v35  ;;  %v1085_v27 = vadd.f32 1.0, %v6295_v18  ;;  %v5294_v35 = vld [vmem:[%s8634_s1 + $0xd8] sm:$0xff] }
 0x1fc   :  { %6300 = vrcp.f32 %v1078_v40  ;;  %v1106_v38 = vunpack.c.h.bf16 %v5294_v35  ;;  %v1105_v40 = vunpack.c.l.bf16 %v5294_v35 }
 0x205   :  { %v1333_v16 = vpop.f32.mrf.mxu0  ;;  %v1374_v17 = vpop.f32.mrf.mxu1 }
 0x206   :  { %v1381_v20 = vadd.f32 %v1333_v16, %v1103_v42 }
 0x207   :  { %v6297_v21 = vpop.eup %6296  ;;  %v1335_v22 = vpop.f32.mrf.mxu0 }
 0x208   :  { %v1376_v19 = vpop.f32.mrf.mxu1  ;;  %v6299_v23 = vpop.eup %6298  ;;  %v5436_v24 = vmul.f32 -1.442695, %v1381_v20  ;;  %v1382_v25 = vadd.f32 %v1335_v22, %v1104_v15 }
 0x209   :  { %v6301_v26 = vpop.eup %6300  ;;  %v1337_v28 = vpop.f32.mrf.mxu0  ;;  %v1089_v30 = vmul.f32 %v6299_v23, %v6297_v21  ;;  %v1384_v39 = vadd.f32 %v1376_v19, %v1106_v38  ;;  %v7316_v19 = vld [vmem:[%s8636_s3 + $0xe8] ss:$16 sps:$4 sm:$0xff]   ;;  %v7346_v38 = vld [vmem:[%s8636_s3 + $0xa4] ss:$16 sps:$4 sm:$0xff]  }
 0x20a   :  { %v1378_v29 = vpop.f32.mrf.mxu1  ;;  %v1088_v31 = vmul.f32 %v6301_v26, %v7039_v10  ;;  %6302 = vpow2.f32 %v5436_v24  ;;  %v5437_v32 = vmul.f32 -1.442695, %v1382_v25  ;;  %v1383_v10 = vadd.f32 %v1374_v17, %v1105_v40  ;;  %v7311_v17 = vld [vmem:[%s8636_s3 + $0xe0] ss:$16 sps:$4 sm:$0xff]   ;;  %v7321_v25 = vld [vmem:[%s8636_s3 + $0xc4] ss:$16 sps:$4 sm:$0xff]  }
 0x20b   :  { %v1338_v36 = vpop.f32.mrf.mxu0  ;;  %v5438_v41 = vmul.f32 -1.442695, %v1384_v39  ;;  %v7326_v26 = vld [vmem:[%s8636_s3 + $0xcc] ss:$16 sps:$4 sm:$0xff]  }
 0x20c   :  { %v1379_v37 = vpop.f32.mrf.mxu1  ;;  %v7299_v34 = vadd.f32 %v1089_v30, %v1088_v31  ;;  %6304 = vpow2.f32 %v5437_v32  ;;  %v7333_v32 = vld [vmem:[%s8636_s3 + $0xc0] ss:$16 sps:$4 sm:$0xff]   ;;  %v7338_v36 = vld [vmem:[%s8636_s3 + $0xc8] ss:$16 sps:$4 sm:$0xff]   ;;  %v7351_v39 = vld [vmem:[%s8636_s3 + $0xac] ss:$16 sps:$4 sm:$0xff]  }
 0x20d   :  { %6306 = vrcp.f32 %v1085_v27 }
 0x20e   :  { %6308 = vtanh.f32 %v7299_v34 }
 0x20f   :  { %6310 = vpow2.f32 %v5438_v41  ;;  %v7367_v41 = vld [vmem:[%s8636_s3 + $0xa8] ss:$16 sps:$4 sm:$0xff]  }
 0x217   :  { %v6303_v42 = vpop.eup %6302 }
 0x218   :  { %v1388_v15 = vadd.f32 1.0, %v6303_v42  ;;  %v7375_v42 = vld [vmem:[%s8636_s3 + $0x84] ss:$16 sps:$4 sm:$0xff]  }
 0x219   :  { %v6305_v16 = vpop.eup %6304 }
 0x21a   :  { %v6307_v18 = vpop.eup %6306  ;;  %6312 = vrcp.f32 %v1388_v15  ;;  %v1394_v20 = vadd.f32 1.0, %v6305_v16  ;;  %v7387_v15 = vld [vmem:[%s8636_s3 + $0x80] ss:$16 sps:$4 sm:$0xff]   ;;  %v7392_v16 = vld [vmem:[%s8636_s3 + $0x88] ss:$16 sps:$4 sm:$0xff]  }
 0x21b   :  { %v6309_v21 = vpop.eup %6308  ;;  %6314 = vtanh.f32 %v1383_v10  ;;  %v7380_v10 = vld [vmem:[%s8636_s3 + $0x8c] ss:$16 sps:$4 sm:$0xff]  }
 0x21c   :  { %v1092_v22 = vmul.f32 %v6309_v21, %v6307_v18  ;;  %6316 = vrcp.f32 %v1394_v20  ;;  %v6311_v24 = vpop.eup %6310  ;;  %v7399_v18 = vld [vmem:[%s8636_s3 + $0x64] ss:$16 sps:$4 sm:$0xff]   ;;  %v7404_v20 = vld [vmem:[%s8636_s3 + $0x6c] ss:$16 sps:$4 sm:$0xff]   ;;  %v7411_v21 = vld [vmem:[%s8636_s3 + $0x60] ss:$16 sps:$4 sm:$0xff]  }
 0x21d   :  { %v1401_v31 = vadd.f32 1.0, %v6311_v24  ;;  %v7428_v24 = vld [vmem:[%s8636_s3 + $0x4c] ss:$16 sps:$4 sm:$0xff]  }
 0x21e   :  { %v1093_v23 = vpack.c.bf16 %v1092_v22, %v1092_v22  ;;  %v7416_v22 = vld [vmem:[%s8636_s3 + $0x68] ss:$16 sps:$4 sm:$0xff]   ;;  %8664 = vst [vmem:[#allocation16_spill] sm:$0xff] %v7428_v24 }
 0x21f   :  { %6318 = vrcp.f32 %v1401_v31  ;;  %8662 = vst [vmem:[#allocation14_spill] sm:$0xff] %v7416_v22  ;;  %v7452_v31 = vld [vmem:[%s8636_s3 + $0x2c] ss:$16 sps:$4 sm:$0xff]  }
 0x220   :  { %1094 = vst [vmem:[#allocation2] sm:$0xf] %v1093_v23  ;;  %5403 = vst [vmem:[%s8637_s4 + $0x4] sm:$0xf] %v1093_v23  ;;  %v7423_v23 = vld [vmem:[%s8636_s3 + $0x44] ss:$16 sps:$4 sm:$0xff]  }
 0x221   :  { %8663 = vst [vmem:[#allocation15_spill] sm:$0xff] %v7423_v23  ;;  %8665 = vst [vmem:[#allocation17_spill] sm:$0xff] %v7452_v31 }
 0x227   :  { %v6313_v27 = vpop.eup %6312  ;;  %v1417_v28 = vld [vmem:[#allocation2] sm:$0xf] }
 0x228   :  { %v6315_v29 = vpop.eup %6314  ;;  %1648 = vmatmul.mubr.bf16.vlgmr.msra.gmra.mxu0 %v1417_v28  ;;  %1689 = vmatmul.mubr.bf16.vlgmr.msra.gmra.mxu1 %v1417_v28  ;;  %v7440_v28 = vld [vmem:[%s8636_s3 + $0x48] ss:$16 sps:$4 sm:$0xff]  }
 0x229   :  { %v6317_v30 = vpop.eup %6316  ;;  %1932 = vmatpush1.bf16.msra.mxu0 %v7311_v17  ;;  %1973 = vmatpush1.bf16.msra.mxu1 %v7316_v19  ;;  %v1405_v37 = vmul.f32 %v6315_v29, %v6313_v27  ;;  %v7435_v27 = vld [vmem:[%s8636_s3 + $0x40] ss:$16 sps:$4 sm:$0xff]  }
 0x22a   :  { %v1404_v35 = vmul.f32 %v6317_v30, %v7051_v0  ;;  %1933 = vmatprep.subr.bf16.mxu0 %v7321_v25  ;;  %1974 = vmatprep.subr.bf16.mxu1 %v7326_v26  ;;  %v7362_v0 = vld [vmem:[%s8636_s3 + $0xa0] ss:$16 sps:$4 sm:$0xff]   ;;  %v7447_v30 = vld [vmem:[%s8636_s3 + $0x24] ss:$16 sps:$4 sm:$0xff]  }
 0x22b   :  { %1963 = vmatprep.mubr.bf16.mxu0 %v8659_v59  ;;  %2004 = vmatprep.mubr.bf16.mxu1 %v8659_v59 }
 0x22c   :  { %v7355_v40 = vadd.f32 %v1405_v37, %v1404_v35  ;;  %v6319_v29 = vpop.eup %6318 }
 0x22d   :  { %1934 = vmatpush1.bf16.msra.mxu0 %v7333_v32  ;;  %1975 = vmatpush1.bf16.msra.mxu1 %v7338_v36 }
 0x22e   :  { %6320 = vtanh.f32 %v7355_v40  ;;  %1935 = vmatprep.subr.bf16.mxu0 %v7346_v38  ;;  %1976 = vmatprep.subr.bf16.mxu1 %v7351_v39 }
 0x231   :  { %1936 = vmatpush1.bf16.msra.mxu0 %v7362_v0  ;;  %1977 = vmatpush1.bf16.msra.mxu1 %v7367_v41 }
 0x232   :  { %1937 = vmatprep.subr.bf16.mxu0 %v7375_v42  ;;  %1978 = vmatprep.subr.bf16.mxu1 %v7380_v10 }
 0x235   :  { %1938 = vmatpush1.bf16.msra.mxu0 %v7387_v15  ;;  %1979 = vmatpush1.bf16.msra.mxu1 %v7392_v16 }
 0x236   :  { %1939 = vmatprep.subr.bf16.mxu0 %v7399_v18  ;;  %1980 = vmatprep.subr.bf16.mxu1 %v7404_v20 }
 0x239   :  { %1940 = vmatpush1.bf16.msra.mxu0 %v7411_v21  ;;  %1981 = vmatpush1.bf16.msra.mxu1 %v7416_v22 }
 0x23a   :  { %1941 = vmatprep.subr.bf16.mxu0 %v7423_v23  ;;  %1982 = vmatprep.subr.bf16.mxu1 %v7428_v24  ;;  %v7459_v24 = vld [vmem:[%s8636_s3 + $0x20] ss:$16 sps:$4 sm:$0xff]   ;;  %v7464_v23 = vld [vmem:[%s8636_s3 + $0x28] ss:$16 sps:$4 sm:$0xff]  }
 0x23b   :  { %v6321_v37 = vpop.eup %6320 }
 0x23c   :  { %v1408_v35 = vmul.f32 %v6321_v37, %v6319_v29  ;;  %v7471_v29 = vld [vmem:[%s8636_s3 + $0x4] ss:$16 sps:$4 sm:$0xff]   ;;  %v7476_v37 = vld [vmem:[%s8636_s3 + $0xc] ss:$16 sps:$4 sm:$0xff]  }
 0x23d   :  { %1942 = vmatpush1.bf16.msra.mxu0 %v7435_v27  ;;  %1983 = vmatpush1.bf16.msra.mxu1 %v7440_v28 }
 0x23e   :  { %v1409_v22 = vpack.c.bf16 %v1408_v35, %v1408_v35  ;;  %1943 = vmatprep.subr.bf16.mxu0 %v7447_v30  ;;  %1984 = vmatprep.subr.bf16.mxu1 %v7452_v31  ;;  %v7486_v35 = vld [vmem:[%s8636_s3] ss:$16 sps:$4 sm:$0xff]   ;;  %v7491_v31 = vld [vmem:[%s8636_s3 + $0x8] ss:$16 sps:$4 sm:$0xff]  }
 0x240   :  { %1410 = vst [vmem:[#allocation4] sm:$0xf] %v1409_v22  ;;  %5439 = vst [vmem:[%s8638_s5 + $0x18] sm:$0xf] %v1409_v22 }
 0x241   :  { %1944 = vmatpush1.bf16.msra.mxu0 %v7459_v24  ;;  %1985 = vmatpush1.bf16.msra.mxu1 %v7464_v23 }
 0x242   :  { %1945 = vmatprep.subr.bf16.mxu0 %v7471_v29  ;;  %1986 = vmatprep.subr.bf16.mxu1 %v7476_v37 }
 0x245   :  { %1946 = vmatpush1.bf16.msra.mxu0 %v7486_v35  ;;  %1987 = vmatpush1.bf16.msra.mxu1 %v7491_v31 }
 0x246   :  { %2247 = vmatprep.subr.bf16.mxu0 %v7088_v43  ;;  %2288 = vmatprep.subr.bf16.mxu1 %v7093_v44  ;;  %v37_v43 = vld [vmem:[%s8633_s0 + $0x40] sm:$0xff] }
 0x247   :  { %v1733_v22 = vld [vmem:[#allocation4] sm:$0xf]  ;;  %v1419_v44 = vunpack.c.l.bf16 %v37_v43 }
 0x248   :  { %1964 = vmatmul.mubr.bf16.vlgmr.msra.gmra.mxu0 %v1733_v22  ;;  %2005 = vmatmul.mubr.bf16.vlgmr.msra.gmra.mxu1 %v1733_v22 }
 0x249   :  { %2248 = vmatpush1.bf16.msra.mxu0 %v7098_v45  ;;  %2289 = vmatpush1.bf16.msra.mxu1 %v7103_v46  ;;  %v1420_v45 = vunpack.c.h.bf16 %v37_v43 }
 0x24a   :  { %2249 = vmatprep.subr.bf16.mxu0 %v7112_v47  ;;  %2290 = vmatprep.subr.bf16.mxu1 %v7117_v48 }
 0x24b   :  { %2279 = vmatprep.mubr.bf16.mxu0 %v8659_v59  ;;  %2320 = vmatprep.mubr.bf16.mxu1 %v8659_v59 }
 0x24d   :  { %2250 = vmatpush1.bf16.msra.mxu0 %v7122_v49  ;;  %2291 = vmatpush1.bf16.msra.mxu1 %v7127_v50 }
 0x24e   :  { %2251 = vmatprep.subr.bf16.mxu0 %v7136_v51  ;;  %2292 = vmatprep.subr.bf16.mxu1 %v7141_v52 }
 0x251   :  { %2252 = vmatpush1.bf16.msra.mxu0 %v7146_v53  ;;  %2293 = vmatpush1.bf16.msra.mxu1 %v7151_v54 }
 0x252   :  { %2253 = vmatprep.subr.bf16.mxu0 %v7160_v55  ;;  %2294 = vmatprep.subr.bf16.mxu1 %v7165_v56 }
 0x255   :  { %2254 = vmatpush1.bf16.msra.mxu0 %v7170_v57  ;;  %2295 = vmatpush1.bf16.msra.mxu1 %v7175_v58  ;;  %v39_v58 = vld [vmem:[%s8633_s0 + $0x48] sm:$0xff] }
 0x256   :  { %2255 = vmatprep.subr.bf16.mxu0 %v7184_v60  ;;  %2296 = vmatprep.subr.bf16.mxu1 %v7189_v61  ;;  %v1422_v60 = vunpack.c.h.bf16 %v39_v58 }
 0x259   :  { %2256 = vmatpush1.bf16.msra.mxu0 %v7194_v62  ;;  %2297 = vmatpush1.bf16.msra.mxu1 %v7199_v63  ;;  %v1421_v62 = vunpack.c.l.bf16 %v39_v58 }
 0x25a   :  { %2257 = vmatprep.subr.bf16.mxu0 %v7208_v33  ;;  %2298 = vmatprep.subr.bf16.mxu1 %v7213_v1 }
 0x25d   :  { %2258 = vmatpush1.bf16.msra.mxu0 %v7218_v2  ;;  %2299 = vmatpush1.bf16.msra.mxu1 %v7223_v3 }
 0x25e   :  { %2259 = vmatprep.subr.bf16.mxu0 %v7232_v4  ;;  %2300 = vmatprep.subr.bf16.mxu1 %v7237_v5  ;;  %v5291_v5 = vld [vmem:[%s8634_s1 + $0xb0] sm:$0xff] }
 0x261   :  { %2260 = vmatpush1.bf16.msra.mxu0 %v7242_v6  ;;  %2301 = vmatpush1.bf16.msra.mxu1 %v7247_v7  ;;  %v1735_v6 = vunpack.c.l.bf16 %v5291_v5  ;;  %v1736_v7 = vunpack.c.h.bf16 %v5291_v5 }
 0x262   :  { %2261 = vmatprep.subr.bf16.mxu0 %v7256_v8  ;;  %2302 = vmatprep.subr.bf16.mxu1 %v7261_v9 }
 0x265   :  { %2262 = vmatpush1.bf16.msra.mxu0 %v7266_v11  ;;  %2303 = vmatpush1.bf16.msra.mxu1 %v7271_v12 }
 0x266   :  { %2563 = vmatprep.subr.bf16.mxu0 %v7280_v13  ;;  %2604 = vmatprep.subr.bf16.mxu1 %v7285_v14 }
 0x2e8   :  { %v1649_v46 = vpop.f32.mrf.mxu0  ;;  %v1690_v47 = vpop.f32.mrf.mxu1 }
 0x2e9   :  { %v1697_v48 = vadd.f32 %v1649_v46, %v1419_v44  ;;  %v1699_v1 = vadd.f32 %v1690_v47, %v1421_v62 }
 0x2ea   :  { %v1651_v49 = vpop.f32.mrf.mxu0  ;;  %v1692_v50 = vpop.f32.mrf.mxu1 }
 0x2eb   :  { %v5472_v51 = vmul.f32 -1.442695, %v1697_v48  ;;  %v1698_v52 = vadd.f32 %v1651_v49, %v1420_v45  ;;  %v1700_v61 = vadd.f32 %v1692_v50, %v1422_v60 }
 0x2ec   :  { %v1653_v53 = vpop.f32.mrf.mxu0  ;;  %v1694_v54 = vpop.f32.mrf.mxu1 }
 0x2ed   :  { %6322 = vpow2.f32 %v5472_v51  ;;  %v5473_v55 = vmul.f32 -1.442695, %v1698_v52  ;;  %v5474_v63 = vmul.f32 -1.442695, %v1700_v61 }
 0x2ee   :  { %v1654_v56 = vpop.f32.mrf.mxu0  ;;  %v1695_v57 = vpop.f32.mrf.mxu1 }
 0x2ef   :  { %6324 = vpow2.f32 %v5473_v55  ;;  %v5292_v56 = vld [vmem:[%s8634_s1 + $0xb8] sm:$0xff] }
 0x2f0   :  { %6326 = vpow2.f32 %v5474_v63  ;;  %v1738_v57 = vunpack.c.h.bf16 %v5292_v56  ;;  %v1737_v60 = vunpack.c.l.bf16 %v5292_v56  ;;  %v7774_v56 = vld [vmem:[%s8635_s2] ss:$16 sps:$4 sm:$0xff]  }
 0x2fa   :  { %v6323_v33 = vpop.eup %6322 }
 0x2fb   :  { %v1704_v2 = vadd.f32 1.0, %v6323_v33 }
 0x2fc   :  { %v6325_v3 = vpop.eup %6324 }
 0x2fd   :  { %6328 = vrcp.f32 %v1704_v2  ;;  %v1710_v4 = vadd.f32 1.0, %v6325_v3  ;;  %v6327_v11 = vpop.eup %6326 }
 0x2fe   :  { %6330 = vtanh.f32 %v1699_v1  ;;  %v1717_v47 = vadd.f32 1.0, %v6327_v11 }
 0x2ff   :  { %6332 = vrcp.f32 %v1710_v4 }
 0x308   :  { %v1965_v8 = vpop.f32.mrf.mxu0  ;;  %v2006_v9 = vpop.f32.mrf.mxu1 }
 0x309   :  { %v2013_v12 = vadd.f32 %v1965_v8, %v1735_v6 }
 0x30a   :  { %v6329_v13 = vpop.eup %6328  ;;  %v1967_v14 = vpop.f32.mrf.mxu0 }
 0x30b   :  { %v2008_v22 = vpop.f32.mrf.mxu1  ;;  %v6331_v43 = vpop.eup %6330  ;;  %v5508_v44 = vmul.f32 -1.442695, %v2013_v12  ;;  %v2014_v45 = vadd.f32 %v1967_v14, %v1736_v7 }
 0x30c   :  { %v6333_v46 = vpop.eup %6332  ;;  %v1969_v48 = vpop.f32.mrf.mxu0  ;;  %v1721_v50 = vmul.f32 %v6331_v43, %v6329_v13  ;;  %v2016_v58 = vadd.f32 %v2008_v22, %v1738_v57  ;;  %v7702_v43 = vld [vmem:[%s8635_s2 + $0x60] ss:$16 sps:$4 sm:$0xff]   ;;  %v7779_v57 = vld [vmem:[%s8635_s2 + $0x8] ss:$16 sps:$4 sm:$0xff]  }
 0x30d   :  { %v2010_v49 = vpop.f32.mrf.mxu1  ;;  %v1720_v51 = vmul.f32 %v6333_v46, %v7299_v34  ;;  %6334 = vpow2.f32 %v5508_v44  ;;  %v5509_v52 = vmul.f32 -1.442695, %v2014_v45  ;;  %v2015_v34 = vadd.f32 %v2006_v9, %v1737_v60  ;;  %v7707_v44 = vld [vmem:[%s8635_s2 + $0x68] ss:$16 sps:$4 sm:$0xff]   ;;  %v7716_v45 = vld [vmem:[%s8635_s2 + $0x44] ss:$16 sps:$4 sm:$0xff]  }
 0x30e   :  { %v1970_v53 = vpop.f32.mrf.mxu0  ;;  %v5510_v61 = vmul.f32 -1.442695, %v2016_v58  ;;  %v7721_v46 = vld [vmem:[%s8635_s2 + $0x4c] ss:$16 sps:$4 sm:$0xff]   ;;  %v7731_v48 = vld [vmem:[%s8635_s2 + $0x48] ss:$16 sps:$4 sm:$0xff]  }
 0x30f   :  { %v2011_v54 = vpop.f32.mrf.mxu1  ;;  %v7543_v55 = vadd.f32 %v1721_v50, %v1720_v51  ;;  %6336 = vpow2.f32 %v5509_v52  ;;  %v7740_v49 = vld [vmem:[%s8635_s2 + $0x24] ss:$16 sps:$4 sm:$0xff]   ;;  %v7745_v50 = vld [vmem:[%s8635_s2 + $0x2c] ss:$16 sps:$4 sm:$0xff]   ;;  %v7750_v51 = vld [vmem:[%s8635_s2 + $0x20] ss:$16 sps:$4 sm:$0xff]  }
 0x310   :  { %6338 = vrcp.f32 %v1717_v47  ;;  %v7726_v47 = vld [vmem:[%s8635_s2 + $0x40] ss:$16 sps:$4 sm:$0xff]   ;;  %v7755_v52 = vld [vmem:[%s8635_s2 + $0x28] ss:$16 sps:$4 sm:$0xff]   ;;  %v7764_v53 = vld [vmem:[%s8635_s2 + $0x4] ss:$16 sps:$4 sm:$0xff]  }
 0x311   :  { %6340 = vtanh.f32 %v7543_v55  ;;  %v7769_v54 = vld [vmem:[%s8635_s2 + $0xc] ss:$16 sps:$4 sm:$0xff]   ;;  %v7788_v58 = vld [vmem:[%s8636_s3 + $0xe4] ss:$16 sps:$4 sm:$0xff]  }
 0x312   :  { %6342 = vpow2.f32 %v5510_v61  ;;  %v7793_v60 = vld [vmem:[%s8636_s3 + $0xec] ss:$16 sps:$4 sm:$0xff]   ;;  %v41_v61 = vld [vmem:[%s8633_s0 + $0x60] sm:$0xff] }
 0x31a   :  { %v6335_v62 = vpop.eup %6334 }
 0x31b   :  { %v2020_v63 = vadd.f32 1.0, %v6335_v62  ;;  %v2051_v62 = vunpack.c.l.bf16 %v41_v61 }
 0x31c   :  { %v6337_v33 = vpop.eup %6336 }
 0x31d   :  { %v6339_v1 = vpop.eup %6338  ;;  %6344 = vrcp.f32 %v2020_v63  ;;  %v2026_v2 = vadd.f32 1.0, %v6337_v33 }
 0x31e   :  { %v6341_v3 = vpop.eup %6340  ;;  %6346 = vtanh.f32 %v2015_v34  ;;  %v2052_v34 = vunpack.c.h.bf16 %v41_v61 }
 0x31f   :  { %v1724_v4 = vmul.f32 %v6341_v3, %v6339_v1  ;;  %6348 = vrcp.f32 %v2026_v2  ;;  %v6343_v6 = vpop.eup %6342 }
 0x320   :  { %v2033_v12 = vadd.f32 1.0, %v6343_v6 }
 0x321   :  { %v1725_v5 = vpack.c.bf16 %v1724_v4, %v1724_v4 }
 0x322   :  { %6350 = vrcp.f32 %v2033_v12  ;;  %v43_v12 = vld [vmem:[%s8633_s0 + $0x68] sm:$0xff] }
 0x323   :  { %1726 = vst [vmem:[#allocation2] sm:$0xf] %v1725_v5  ;;  %5475 = vst [vmem:[%s8637_s4 + $0x8] sm:$0xf] %v1725_v5 }
 0x32a   :  { %v6345_v7 = vpop.eup %6344  ;;  %v2049_v8 = vld [vmem:[#allocation2] sm:$0xf] }
 0x32b   :  { %v6347_v9 = vpop.eup %6346  ;;  %2280 = vmatmul.mubr.bf16.vlgmr.msra.gmra.mxu0 %v2049_v8  ;;  %2321 = vmatmul.mubr.bf16.vlgmr.msra.gmra.mxu1 %v2049_v8 }
 0x32c   :  { %v6349_v11 = vpop.eup %6348  ;;  %2564 = vmatpush1.bf16.msra.mxu0 %v7311_v17  ;;  %2605 = vmatpush1.bf16.msra.mxu1 %v7316_v19  ;;  %v2037_v13 = vmul.f32 %v6347_v9, %v6345_v7  ;;  %v8666_v17 = vld [vmem:[#allocation14_spill] sm:$0xff] }
 0x32d   :  { %v2036_v14 = vmul.f32 %v6349_v11, %v7355_v40  ;;  %2565 = vmatprep.subr.bf16.mxu0 %v7321_v25  ;;  %2606 = vmatprep.subr.bf16.mxu1 %v7326_v26  ;;  %v8667_v25 = vld [vmem:[#allocation15_spill] sm:$0xff]  ;;  %v8668_v26 = vld [vmem:[#allocation16_spill] sm:$0xff] }
 0x32e   :  { %2595 = vmatprep.mubr.bf16.mxu0 %v8659_v59  ;;  %2636 = vmatprep.mubr.bf16.mxu1 %v8659_v59 }
 0x32f   :  { %v7559_v22 = vadd.f32 %v2037_v13, %v2036_v14  ;;  %v6351_v19 = vpop.eup %6350  ;;  %v2054_v13 = vunpack.c.h.bf16 %v43_v12 }
 0x330   :  { %2566 = vmatpush1.bf16.msra.mxu0 %v7333_v32  ;;  %2607 = vmatpush1.bf16.msra.mxu1 %v7338_v36 }
 0x331   :  { %6352 = vtanh.f32 %v7559_v22  ;;  %2567 = vmatprep.subr.bf16.mxu0 %v7346_v38  ;;  %2608 = vmatprep.subr.bf16.mxu1 %v7351_v39  ;;  %v8669_v39 = vld [vmem:[#allocation17_spill] sm:$0xff] }
 0x334   :  { %2568 = vmatpush1.bf16.msra.mxu0 %v7362_v0  ;;  %2609 = vmatpush1.bf16.msra.mxu1 %v7367_v41  ;;  %v7596_v0 = vld [vmem:[%s8635_s2 + $0xe4] ss:$16 sps:$4 sm:$0xff]   ;;  %v7601_v41 = vld [vmem:[%s8635_s2 + $0xec] ss:$16 sps:$4 sm:$0xff]  }
 0x335   :  { %2569 = vmatprep.subr.bf16.mxu0 %v7375_v42  ;;  %2610 = vmatprep.subr.bf16.mxu1 %v7380_v10  ;;  %v7606_v42 = vld [vmem:[%s8635_s2 + $0xe0] ss:$16 sps:$4 sm:$0xff]   ;;  %v7611_v10 = vld [vmem:[%s8635_s2 + $0xe8] ss:$16 sps:$4 sm:$0xff]  }
 0x338   :  { %2570 = vmatpush1.bf16.msra.mxu0 %v7387_v15  ;;  %2611 = vmatpush1.bf16.msra.mxu1 %v7392_v16  ;;  %v7620_v15 = vld [vmem:[%s8635_s2 + $0xc4] ss:$16 sps:$4 sm:$0xff]   ;;  %v7625_v16 = vld [vmem:[%s8635_s2 + $0xcc] ss:$16 sps:$4 sm:$0xff]  }
 0x339   :  { %2571 = vmatprep.subr.bf16.mxu0 %v7399_v18  ;;  %2612 = vmatprep.subr.bf16.mxu1 %v7404_v20  ;;  %v7630_v18 = vld [vmem:[%s8635_s2 + $0xc0] ss:$16 sps:$4 sm:$0xff]   ;;  %v7635_v20 = vld [vmem:[%s8635_s2 + $0xc8] ss:$16 sps:$4 sm:$0xff]  }
 0x33c   :  { %2572 = vmatpush1.bf16.msra.mxu0 %v7411_v21  ;;  %2613 = vmatpush1.bf16.msra.mxu1 %v8666_v17  ;;  %v7644_v21 = vld [vmem:[%s8635_s2 + $0xa4] ss:$16 sps:$4 sm:$0xff]   ;;  %v2053_v17 = vunpack.c.l.bf16 %v43_v12 }
 0x33d   :  { %2573 = vmatprep.subr.bf16.mxu0 %v8667_v25  ;;  %2614 = vmatprep.subr.bf16.mxu1 %v8668_v26 }
 0x33e   :  { %v6353_v32 = vpop.eup %6352 }
 0x33f   :  { %v2040_v36 = vmul.f32 %v6353_v32, %v6351_v19 }
 0x340   :  { %2574 = vmatpush1.bf16.msra.mxu0 %v7435_v27  ;;  %2615 = vmatpush1.bf16.msra.mxu1 %v7440_v28  ;;  %v7659_v27 = vld [vmem:[%s8635_s2 + $0xa8] ss:$16 sps:$4 sm:$0xff]   ;;  %v7668_v28 = vld [vmem:[%s8635_s2 + $0x84] ss:$16 sps:$4 sm:$0xff]  }
 0x341   :  { %v2041_v38 = vpack.c.bf16 %v2040_v36, %v2040_v36  ;;  %2575 = vmatprep.subr.bf16.mxu0 %v7447_v30  ;;  %2616 = vmatprep.subr.bf16.mxu1 %v8669_v39  ;;  %v7673_v30 = vld [vmem:[%s8635_s2 + $0x8c] ss:$16 sps:$4 sm:$0xff]   ;;  %v5289_v39 = vld [vmem:[%s8634_s1 + $0x90] sm:$0xff] }
 0x342   :  { %v2368_v61 = vunpack.c.h.bf16 %v5289_v39 }
 0x343   :  { %2042 = vst [vmem:[#allocation4] sm:$0xf] %v2041_v38  ;;  %5511 = vst [vmem:[%s8638_s5 + $0x14] sm:$0xf] %v2041_v38 }
 0x344   :  { %2576 = vmatpush1.bf16.msra.mxu0 %v7459_v24  ;;  %2617 = vmatpush1.bf16.msra.mxu1 %v7464_v23  ;;  %v7649_v23 = vld [vmem:[%s8635_s2 + $0xac] ss:$16 sps:$4 sm:$0xff]   ;;  %v7654_v24 = vld [vmem:[%s8635_s2 + $0xa0] ss:$16 sps:$4 sm:$0xff]  }
 0x345   :  { %2577 = vmatprep.subr.bf16.mxu0 %v7471_v29  ;;  %2618 = vmatprep.subr.bf16.mxu1 %v7476_v37  ;;  %v7683_v29 = vld [vmem:[%s8635_s2 + $0x88] ss:$16 sps:$4 sm:$0xff]   ;;  %v7692_v37 = vld [vmem:[%s8635_s2 + $0x64] ss:$16 sps:$4 sm:$0xff]  }
 0x348   :  { %2578 = vmatpush1.bf16.msra.mxu0 %v7486_v35  ;;  %2619 = vmatpush1.bf16.msra.mxu1 %v7491_v31  ;;  %v7678_v31 = vld [vmem:[%s8635_s2 + $0x80] ss:$16 sps:$4 sm:$0xff]   ;;  %v7697_v35 = vld [vmem:[%s8635_s2 + $0x6c] ss:$16 sps:$4 sm:$0xff]  }
 0x349   :  { %2879 = vmatprep.subr.bf16.mxu0 %v7596_v0  ;;  %2920 = vmatprep.subr.bf16.mxu1 %v7601_v41 }
 0x34a   :  { %v2365_v40 = vld [vmem:[#allocation4] sm:$0xf] }
 0x34b   :  { %2596 = vmatmul.mubr.bf16.vlgmr.msra.gmra.mxu0 %v2365_v40  ;;  %2637 = vmatmul.mubr.bf16.vlgmr.msra.gmra.mxu1 %v2365_v40  ;;  %v2367_v40 = vunpack.c.l.bf16 %v5289_v39 }
 0x34c   :  { %2911 = vmatprep.mubr.bf16.mxu0 %v8659_v59  ;;  %2952 = vmatprep.mubr.bf16.mxu1 %v8659_v59 }
 0x34d   :  { %2880 = vmatpush1.bf16.msra.mxu0 %v7606_v42  ;;  %2921 = vmatpush1.bf16.msra.mxu1 %v7611_v10 }
 0x34e   :  { %2881 = vmatprep.subr.bf16.mxu0 %v7620_v15  ;;  %2922 = vmatprep.subr.bf16.mxu1 %v7625_v16 }
 0x351   :  { %2882 = vmatpush1.bf16.msra.mxu0 %v7630_v18  ;;  %2923 = vmatpush1.bf16.msra.mxu1 %v7635_v20 }
 0x352   :  { %2883 = vmatprep.subr.bf16.mxu0 %v7644_v21  ;;  %2924 = vmatprep.subr.bf16.mxu1 %v7649_v23 }
 0x355   :  { %2884 = vmatpush1.bf16.msra.mxu0 %v7654_v24  ;;  %2925 = vmatpush1.bf16.msra.mxu1 %v7659_v27 }
 0x356   :  { %2885 = vmatprep.subr.bf16.mxu0 %v7668_v28  ;;  %2926 = vmatprep.subr.bf16.mxu1 %v7673_v30 }
 0x359   :  { %2886 = vmatpush1.bf16.msra.mxu0 %v7678_v31  ;;  %2927 = vmatpush1.bf16.msra.mxu1 %v7683_v29 }
 0x35a   :  { %2887 = vmatprep.subr.bf16.mxu0 %v7692_v37  ;;  %2928 = vmatprep.subr.bf16.mxu1 %v7697_v35 }
 0x35d   :  { %2888 = vmatpush1.bf16.msra.mxu0 %v7702_v43  ;;  %2929 = vmatpush1.bf16.msra.mxu1 %v7707_v44 }
 0x35e   :  { %2889 = vmatprep.subr.bf16.mxu0 %v7716_v45  ;;  %2930 = vmatprep.subr.bf16.mxu1 %v7721_v46 }
 0x361   :  { %2890 = vmatpush1.bf16.msra.mxu0 %v7726_v47  ;;  %2931 = vmatpush1.bf16.msra.mxu1 %v7731_v48 }
 0x362   :  { %2891 = vmatprep.subr.bf16.mxu0 %v7740_v49  ;;  %2932 = vmatprep.subr.bf16.mxu1 %v7745_v50 }
 0x365   :  { %2892 = vmatpush1.bf16.msra.mxu0 %v7750_v51  ;;  %2933 = vmatpush1.bf16.msra.mxu1 %v7755_v52 }
 0x366   :  { %2893 = vmatprep.subr.bf16.mxu0 %v7764_v53  ;;  %2934 = vmatprep.subr.bf16.mxu1 %v7769_v54 }
 0x369   :  { %2894 = vmatpush1.bf16.msra.mxu0 %v7774_v56  ;;  %2935 = vmatpush1.bf16.msra.mxu1 %v7779_v57 }
 0x36a   :  { %3195 = vmatprep.subr.bf16.mxu0 %v7788_v58  ;;  %3236 = vmatprep.subr.bf16.mxu1 %v7793_v60 }
 0x3eb   :  { %v2281_v63 = vpop.f32.mrf.mxu0  ;;  %v2322_v33 = vpop.f32.mrf.mxu1 }
 0x3ec   :  { %v2329_v1 = vadd.f32 %v2281_v63, %v2051_v62  ;;  %v2331_v26 = vadd.f32 %v2322_v33, %v2053_v17 }
 0x3ed   :  { %v2283_v2 = vpop.f32.mrf.mxu0  ;;  %v2324_v3 = vpop.f32.mrf.mxu1 }
 0x3ee   :  { %v5544_v4 = vmul.f32 -1.442695, %v2329_v1  ;;  %v2330_v5 = vadd.f32 %v2283_v2, %v2052_v34  ;;  %v2332_v14 = vadd.f32 %v2324_v3, %v2054_v13 }
 0x3ef   :  { %v2285_v6 = vpop.f32.mrf.mxu0  ;;  %v2326_v7 = vpop.f32.mrf.mxu1 }
 0x3f0   :  { %6354 = vpow2.f32 %v5544_v4  ;;  %v5545_v8 = vmul.f32 -1.442695, %v2330_v5  ;;  %v5546_v19 = vmul.f32 -1.442695, %v2332_v14 }
 0x3f1   :  { %v2286_v9 = vpop.f32.mrf.mxu0  ;;  %v2327_v11 = vpop.f32.mrf.mxu1 }
 0x3f2   :  { %6356 = vpow2.f32 %v5545_v8 }
 0x3f3   :  { %6358 = vpow2.f32 %v5546_v19 }
 0x3fd   :  { %v6355_v25 = vpop.eup %6354 }
 0x3fe   :  { %v2336_v32 = vadd.f32 1.0, %v6355_v25 }
 0x3ff   :  { %v6357_v36 = vpop.eup %6356 }
 0x400   :  { %6360 = vrcp.f32 %v2336_v32  ;;  %v2342_v38 = vadd.f32 1.0, %v6357_v36  ;;  %v6359_v63 = vpop.eup %6358 }
 0x401   :  { %6362 = vtanh.f32 %v2331_v26  ;;  %v2349_v8 = vadd.f32 1.0, %v6359_v63  ;;  %v5290_v26 = vld [vmem:[%s8634_s1 + $0x98] sm:$0xff] }
 0x402   :  { %6364 = vrcp.f32 %v2342_v38  ;;  %v2370_v32 = vunpack.c.h.bf16 %v5290_v26  ;;  %v2369_v38 = vunpack.c.l.bf16 %v5290_v26 }
 0x40b   :  { %v2597_v62 = vpop.f32.mrf.mxu0  ;;  %v2638_v34 = vpop.f32.mrf.mxu1 }
 0x40c   :  { %v2645_v1 = vadd.f32 %v2597_v62, %v2367_v40 }
 0x40d   :  { %v6361_v2 = vpop.eup %6360  ;;  %v2599_v3 = vpop.f32.mrf.mxu0 }
 0x40e   :  { %v2640_v33 = vpop.f32.mrf.mxu1  ;;  %v6363_v4 = vpop.eup %6362  ;;  %v5580_v5 = vmul.f32 -1.442695, %v2645_v1  ;;  %v2646_v6 = vadd.f32 %v2599_v3, %v2368_v61 }
 0x40f   :  { %v6365_v7 = vpop.eup %6364  ;;  %v2601_v9 = vpop.f32.mrf.mxu0  ;;  %v2353_v12 = vmul.f32 %v6363_v4, %v6361_v2  ;;  %v2648_v36 = vadd.f32 %v2640_v33, %v2370_v32  ;;  %v7824_v33 = vld [vmem:[%s8636_s3 + $0xe8] ss:$16 sps:$4 sm:$0xff]   ;;  %v7854_v32 = vld [vmem:[%s8636_s3 + $0xa4] ss:$16 sps:$4 sm:$0xff]  }
 0x410   :  { %v2642_v11 = vpop.f32.mrf.mxu1  ;;  %v2352_v13 = vmul.f32 %v6365_v7, %v7543_v55  ;;  %6366 = vpow2.f32 %v5580_v5  ;;  %v5581_v14 = vmul.f32 -1.442695, %v2646_v6  ;;  %v2647_v55 = vadd.f32 %v2638_v34, %v2369_v38  ;;  %v7819_v34 = vld [vmem:[%s8636_s3 + $0xe0] ss:$16 sps:$4 sm:$0xff]   ;;  %v7829_v6 = vld [vmem:[%s8636_s3 + $0xc4] ss:$16 sps:$4 sm:$0xff]  }
 0x411   :  { %v2602_v17 = vpop.f32.mrf.mxu0  ;;  %v5582_v39 = vmul.f32 -1.442695, %v2648_v36  ;;  %v7834_v7 = vld [vmem:[%s8636_s3 + $0xcc] ss:$16 sps:$4 sm:$0xff]  }
 0x412   :  { %v2643_v19 = vpop.f32.mrf.mxu1  ;;  %v7807_v25 = vadd.f32 %v2353_v12, %v2352_v13  ;;  %6368 = vpow2.f32 %v5581_v14  ;;  %v7841_v14 = vld [vmem:[%s8636_s3 + $0xc0] ss:$16 sps:$4 sm:$0xff]   ;;  %v7846_v17 = vld [vmem:[%s8636_s3 + $0xc8] ss:$16 sps:$4 sm:$0xff]   ;;  %v7859_v36 = vld [vmem:[%s8636_s3 + $0xac] ss:$16 sps:$4 sm:$0xff]  }
 0x413   :  { %6370 = vrcp.f32 %v2349_v8 }
 0x414   :  { %6372 = vtanh.f32 %v7807_v25 }
 0x415   :  { %6374 = vpow2.f32 %v5582_v39  ;;  %v7875_v39 = vld [vmem:[%s8636_s3 + $0xa8] ss:$16 sps:$4 sm:$0xff]  }
 0x41d   :  { %v6367_v40 = vpop.eup %6366 }
 0x41e   :  { %v2652_v61 = vadd.f32 1.0, %v6367_v40  ;;  %v7883_v40 = vld [vmem:[%s8636_s3 + $0x84] ss:$16 sps:$4 sm:$0xff]  }
 0x41f   :  { %v6369_v62 = vpop.eup %6368 }
 0x420   :  { %v6371_v63 = vpop.eup %6370  ;;  %6376 = vrcp.f32 %v2652_v61  ;;  %v2658_v1 = vadd.f32 1.0, %v6369_v62  ;;  %v7895_v61 = vld [vmem:[%s8636_s3 + $0x80] ss:$16 sps:$4 sm:$0xff]   ;;  %v7900_v62 = vld [vmem:[%s8636_s3 + $0x88] ss:$16 sps:$4 sm:$0xff]  }
 0x421   :  { %v6373_v2 = vpop.eup %6372  ;;  %6378 = vtanh.f32 %v2647_v55  ;;  %v7888_v55 = vld [vmem:[%s8636_s3 + $0x8c] ss:$16 sps:$4 sm:$0xff]  }
 0x422   :  { %v2356_v3 = vmul.f32 %v6373_v2, %v6371_v63  ;;  %6380 = vrcp.f32 %v2658_v1  ;;  %v6375_v5 = vpop.eup %6374  ;;  %v7907_v63 = vld [vmem:[%s8636_s3 + $0x64] ss:$16 sps:$4 sm:$0xff]   ;;  %v7912_v1 = vld [vmem:[%s8636_s3 + $0x6c] ss:$16 sps:$4 sm:$0xff]   ;;  %v7919_v2 = vld [vmem:[%s8636_s3 + $0x60] ss:$16 sps:$4 sm:$0xff]  }
 0x423   :  { %v2665_v13 = vadd.f32 1.0, %v6375_v5  ;;  %v7936_v5 = vld [vmem:[%s8636_s3 + $0x4c] ss:$16 sps:$4 sm:$0xff]  }
 0x424   :  { %v2357_v4 = vpack.c.bf16 %v2356_v3, %v2356_v3  ;;  %v7924_v3 = vld [vmem:[%s8636_s3 + $0x68] ss:$16 sps:$4 sm:$0xff]   ;;  %8672 = vst [vmem:[#allocation16_spill] sm:$0xff] %v7936_v5 }
 0x425   :  { %6382 = vrcp.f32 %v2665_v13  ;;  %8670 = vst [vmem:[#allocation14_spill] sm:$0xff] %v7924_v3  ;;  %v7960_v13 = vld [vmem:[%s8636_s3 + $0x2c] ss:$16 sps:$4 sm:$0xff]  }
 0x426   :  { %2358 = vst [vmem:[#allocation2] sm:$0xf] %v2357_v4  ;;  %5547 = vst [vmem:[%s8637_s4 + $0xc] sm:$0xf] %v2357_v4  ;;  %v7931_v4 = vld [vmem:[%s8636_s3 + $0x44] ss:$16 sps:$4 sm:$0xff]  }
 0x427   :  { %8671 = vst [vmem:[#allocation15_spill] sm:$0xff] %v7931_v4  ;;  %8673 = vst [vmem:[#allocation17_spill] sm:$0xff] %v7960_v13 }
 0x42d   :  { %v6377_v8 = vpop.eup %6376  ;;  %v2681_v9 = vld [vmem:[#allocation2] sm:$0xf] }
 0x42e   :  { %v6379_v11 = vpop.eup %6378  ;;  %2912 = vmatmul.mubr.bf16.vlgmr.msra.gmra.mxu0 %v2681_v9  ;;  %2953 = vmatmul.mubr.bf16.vlgmr.msra.gmra.mxu1 %v2681_v9  ;;  %v7948_v9 = vld [vmem:[%s8636_s3 + $0x48] ss:$16 sps:$4 sm:$0xff]  }
 0x42f   :  { %v6381_v12 = vpop.eup %6380  ;;  %3196 = vmatpush1.bf16.msra.mxu0 %v7819_v34  ;;  %3237 = vmatpush1.bf16.msra.mxu1 %v7824_v33  ;;  %v2669_v19 = vmul.f32 %v6379_v11, %v6377_v8  ;;  %v7943_v8 = vld [vmem:[%s8636_s3 + $0x40] ss:$16 sps:$4 sm:$0xff]  }
 0x430   :  { %v2668_v26 = vmul.f32 %v6381_v12, %v7559_v22  ;;  %3197 = vmatprep.subr.bf16.mxu0 %v7829_v6  ;;  %3238 = vmatprep.subr.bf16.mxu1 %v7834_v7  ;;  %v7870_v22 = vld [vmem:[%s8636_s3 + $0xa0] ss:$16 sps:$4 sm:$0xff]   ;;  %v7955_v12 = vld [vmem:[%s8636_s3 + $0x24] ss:$16 sps:$4 sm:$0xff]  }
 0x431   :  { %3227 = vmatprep.mubr.bf16.mxu0 %v8659_v59  ;;  %3268 = vmatprep.mubr.bf16.mxu1 %v8659_v59 }
 0x432   :  { %v7863_v38 = vadd.f32 %v2669_v19, %v2668_v26  ;;  %v6383_v11 = vpop.eup %6382 }
 0x433   :  { %3198 = vmatpush1.bf16.msra.mxu0 %v7841_v14  ;;  %3239 = vmatpush1.bf16.msra.mxu1 %v7846_v17 }
 0x434   :  { %6384 = vtanh.f32 %v7863_v38  ;;  %3199 = vmatprep.subr.bf16.mxu0 %v7854_v32  ;;  %3240 = vmatprep.subr.bf16.mxu1 %v7859_v36 }
 0x437   :  { %3200 = vmatpush1.bf16.msra.mxu0 %v7870_v22  ;;  %3241 = vmatpush1.bf16.msra.mxu1 %v7875_v39 }
 0x438   :  { %3201 = vmatprep.subr.bf16.mxu0 %v7883_v40  ;;  %3242 = vmatprep.subr.bf16.mxu1 %v7888_v55 }
 0x43b   :  { %3202 = vmatpush1.bf16.msra.mxu0 %v7895_v61  ;;  %3243 = vmatpush1.bf16.msra.mxu1 %v7900_v62 }
 0x43c   :  { %3203 = vmatprep.subr.bf16.mxu0 %v7907_v63  ;;  %3244 = vmatprep.subr.bf16.mxu1 %v7912_v1 }
 0x43f   :  { %3204 = vmatpush1.bf16.msra.mxu0 %v7919_v2  ;;  %3245 = vmatpush1.bf16.msra.mxu1 %v7924_v3 }
 0x440   :  { %3205 = vmatprep.subr.bf16.mxu0 %v7931_v4  ;;  %3246 = vmatprep.subr.bf16.mxu1 %v7936_v5  ;;  %v7967_v5 = vld [vmem:[%s8636_s3 + $0x20] ss:$16 sps:$4 sm:$0xff]   ;;  %v7972_v4 = vld [vmem:[%s8636_s3 + $0x28] ss:$16 sps:$4 sm:$0xff]  }
 0x441   :  { %v6385_v19 = vpop.eup %6384 }
 0x442   :  { %v2672_v26 = vmul.f32 %v6385_v19, %v6383_v11  ;;  %v7979_v11 = vld [vmem:[%s8636_s3 + $0x4] ss:$16 sps:$4 sm:$0xff]   ;;  %v7984_v19 = vld [vmem:[%s8636_s3 + $0xc] ss:$16 sps:$4 sm:$0xff]  }
 0x443   :  { %3206 = vmatpush1.bf16.msra.mxu0 %v7943_v8  ;;  %3247 = vmatpush1.bf16.msra.mxu1 %v7948_v9 }
 0x444   :  { %v2673_v3 = vpack.c.bf16 %v2672_v26, %v2672_v26  ;;  %3207 = vmatprep.subr.bf16.mxu0 %v7955_v12  ;;  %3248 = vmatprep.subr.bf16.mxu1 %v7960_v13  ;;  %v7994_v26 = vld [vmem:[%s8636_s3] ss:$16 sps:$4 sm:$0xff]   ;;  %v7999_v13 = vld [vmem:[%s8636_s3 + $0x8] ss:$16 sps:$4 sm:$0xff]  }
 0x446   :  { %2674 = vst [vmem:[#allocation4] sm:$0xf] %v2673_v3  ;;  %5583 = vst [vmem:[%s8638_s5 + $0x10] sm:$0xf] %v2673_v3 }
 0x447   :  { %3208 = vmatpush1.bf16.msra.mxu0 %v7967_v5  ;;  %3249 = vmatpush1.bf16.msra.mxu1 %v7972_v4 }
 0x448   :  { %3209 = vmatprep.subr.bf16.mxu0 %v7979_v11  ;;  %3250 = vmatprep.subr.bf16.mxu1 %v7984_v19 }
 0x44b   :  { %3210 = vmatpush1.bf16.msra.mxu0 %v7994_v26  ;;  %3251 = vmatpush1.bf16.msra.mxu1 %v7999_v13 }
 0x44c   :  { %3511 = vmatprep.subr.bf16.mxu0 %v7596_v0  ;;  %3552 = vmatprep.subr.bf16.mxu1 %v7601_v41  ;;  %v45_v0 = vld [vmem:[%s8633_s0 + $0x80] sm:$0xff] }
 0x44d   :  { %v2997_v3 = vld [vmem:[#allocation4] sm:$0xf]  ;;  %v2683_v41 = vunpack.c.l.bf16 %v45_v0 }
 0x44e   :  { %3228 = vmatmul.mubr.bf16.vlgmr.msra.gmra.mxu0 %v2997_v3  ;;  %3269 = vmatmul.mubr.bf16.vlgmr.msra.gmra.mxu1 %v2997_v3 }
 0x44f   :  { %3512 = vmatpush1.bf16.msra.mxu0 %v7606_v42  ;;  %3553 = vmatpush1.bf16.msra.mxu1 %v7611_v10  ;;  %v2684_v42 = vunpack.c.h.bf16 %v45_v0 }
 0x450   :  { %3513 = vmatprep.subr.bf16.mxu0 %v7620_v15  ;;  %3554 = vmatprep.subr.bf16.mxu1 %v7625_v16 }
 0x451   :  { %3543 = vmatprep.mubr.bf16.mxu0 %v8659_v59  ;;  %3584 = vmatprep.mubr.bf16.mxu1 %v8659_v59 }
 0x453   :  { %3514 = vmatpush1.bf16.msra.mxu0 %v7630_v18  ;;  %3555 = vmatpush1.bf16.msra.mxu1 %v7635_v20 }
 0x454   :  { %3515 = vmatprep.subr.bf16.mxu0 %v7644_v21  ;;  %3556 = vmatprep.subr.bf16.mxu1 %v7649_v23 }
 0x457   :  { %3516 = vmatpush1.bf16.msra.mxu0 %v7654_v24  ;;  %3557 = vmatpush1.bf16.msra.mxu1 %v7659_v27 }
 0x458   :  { %3517 = vmatprep.subr.bf16.mxu0 %v7668_v28  ;;  %3558 = vmatprep.subr.bf16.mxu1 %v7673_v30 }
 0x45b   :  { %3518 = vmatpush1.bf16.msra.mxu0 %v7678_v31  ;;  %3559 = vmatpush1.bf16.msra.mxu1 %v7683_v29  ;;  %v47_v29 = vld [vmem:[%s8633_s0 + $0x88] sm:$0xff] }
 0x45c   :  { %3519 = vmatprep.subr.bf16.mxu0 %v7692_v37  ;;  %3560 = vmatprep.subr.bf16.mxu1 %v7697_v35  ;;  %v2686_v37 = vunpack.c.h.bf16 %v47_v29 }
 0x45f   :  { %3520 = vmatpush1.bf16.msra.mxu0 %v7702_v43  ;;  %3561 = vmatpush1.bf16.msra.mxu1 %v7707_v44  ;;  %v2685_v43 = vunpack.c.l.bf16 %v47_v29 }
 0x460   :  { %3521 = vmatprep.subr.bf16.mxu0 %v7716_v45  ;;  %3562 = vmatprep.subr.bf16.mxu1 %v7721_v46 }
 0x463   :  { %3522 = vmatpush1.bf16.msra.mxu0 %v7726_v47  ;;  %3563 = vmatpush1.bf16.msra.mxu1 %v7731_v48 }
 0x464   :  { %3523 = vmatprep.subr.bf16.mxu0 %v7740_v49  ;;  %3564 = vmatprep.subr.bf16.mxu1 %v7745_v50  ;;  %v5287_v50 = vld [vmem:[%s8634_s1 + $0x70] sm:$0xff] }
 0x467   :  { %3524 = vmatpush1.bf16.msra.mxu0 %v7750_v51  ;;  %3565 = vmatpush1.bf16.msra.mxu1 %v7755_v52  ;;  %v2999_v51 = vunpack.c.l.bf16 %v5287_v50  ;;  %v3000_v52 = vunpack.c.h.bf16 %v5287_v50 }
 0x468   :  { %3525 = vmatprep.subr.bf16.mxu0 %v7764_v53  ;;  %3566 = vmatprep.subr.bf16.mxu1 %v7769_v54 }
 0x46b   :  { %3526 = vmatpush1.bf16.msra.mxu0 %v7774_v56  ;;  %3567 = vmatpush1.bf16.msra.mxu1 %v7779_v57 }
 0x46c   :  { %3827 = vmatprep.subr.bf16.mxu0 %v7788_v58  ;;  %3868 = vmatprep.subr.bf16.mxu1 %v7793_v60 }
 0x4ee   :  { %v2913_v10 = vpop.f32.mrf.mxu0  ;;  %v2954_v15 = vpop.f32.mrf.mxu1 }
 0x4ef   :  { %v2961_v16 = vadd.f32 %v2913_v10, %v2683_v41  ;;  %v2963_v46 = vadd.f32 %v2954_v15, %v2685_v43 }
 0x4f0   :  { %v2915_v18 = vpop.f32.mrf.mxu0  ;;  %v2956_v20 = vpop.f32.mrf.mxu1 }
 0x4f1   :  { %v5616_v21 = vmul.f32 -1.442695, %v2961_v16  ;;  %v2962_v23 = vadd.f32 %v2915_v18, %v2684_v42  ;;  %v2964_v35 = vadd.f32 %v2956_v20, %v2686_v37 }
 0x4f2   :  { %v2917_v24 = vpop.f32.mrf.mxu0  ;;  %v2958_v27 = vpop.f32.mrf.mxu1 }
 0x4f3   :  { %6386 = vpow2.f32 %v5616_v21  ;;  %v5617_v28 = vmul.f32 -1.442695, %v2962_v23  ;;  %v5618_v44 = vmul.f32 -1.442695, %v2964_v35 }
 0x4f4   :  { %v2918_v30 = vpop.f32.mrf.mxu0  ;;  %v2959_v31 = vpop.f32.mrf.mxu1 }
 0x4f5   :  { %6388 = vpow2.f32 %v5617_v28  ;;  %v5288_v30 = vld [vmem:[%s8634_s1 + $0x78] sm:$0xff] }
 0x4f6   :  { %6390 = vpow2.f32 %v5618_v44  ;;  %v3002_v31 = vunpack.c.h.bf16 %v5288_v30  ;;  %v3001_v37 = vunpack.c.l.bf16 %v5288_v30  ;;  %v8282_v30 = vld [vmem:[%s8635_s2] ss:$16 sps:$4 sm:$0xff]  }
 0x500   :  { %v6387_v45 = vpop.eup %6386 }
 0x501   :  { %v2968_v47 = vadd.f32 1.0, %v6387_v45 }
 0x502   :  { %v6389_v48 = vpop.eup %6388 }
 0x503   :  { %6392 = vrcp.f32 %v2968_v47  ;;  %v2974_v49 = vadd.f32 1.0, %v6389_v48  ;;  %v6391_v56 = vpop.eup %6390 }
 0x504   :  { %6394 = vtanh.f32 %v2963_v46  ;;  %v2981_v15 = vadd.f32 1.0, %v6391_v56 }
 0x505   :  { %6396 = vrcp.f32 %v2974_v49 }
 0x50e   :  { %v3229_v53 = vpop.f32.mrf.mxu0  ;;  %v3270_v54 = vpop.f32.mrf.mxu1 }
 0x50f   :  { %v3277_v57 = vadd.f32 %v3229_v53, %v2999_v51 }
 0x510   :  { %v6393_v58 = vpop.eup %6392  ;;  %v3231_v60 = vpop.f32.mrf.mxu0 }
 0x511   :  { %v3272_v3 = vpop.f32.mrf.mxu1  ;;  %v6395_v0 = vpop.eup %6394  ;;  %v5652_v41 = vmul.f32 -1.442695, %v3277_v57  ;;  %v3278_v42 = vadd.f32 %v3231_v60, %v3000_v52 }
 0x512   :  { %v6397_v10 = vpop.eup %6396  ;;  %v3233_v16 = vpop.f32.mrf.mxu0  ;;  %v2985_v20 = vmul.f32 %v6395_v0, %v6393_v58  ;;  %v3280_v29 = vadd.f32 %v3272_v3, %v3002_v31  ;;  %v8210_v0 = vld [vmem:[%s8635_s2 + $0x60] ss:$16 sps:$4 sm:$0xff]   ;;  %v8287_v31 = vld [vmem:[%s8635_s2 + $0x8] ss:$16 sps:$4 sm:$0xff]  }
 0x513   :  { %v3274_v18 = vpop.f32.mrf.mxu1  ;;  %v2984_v21 = vmul.f32 %v6397_v10, %v7807_v25  ;;  %6398 = vpow2.f32 %v5652_v41  ;;  %v5653_v23 = vmul.f32 -1.442695, %v3278_v42  ;;  %v3279_v25 = vadd.f32 %v3270_v54, %v3001_v37  ;;  %v8215_v41 = vld [vmem:[%s8635_s2 + $0x68] ss:$16 sps:$4 sm:$0xff]   ;;  %v8224_v42 = vld [vmem:[%s8635_s2 + $0x44] ss:$16 sps:$4 sm:$0xff]  }
 0x514   :  { %v3234_v24 = vpop.f32.mrf.mxu0  ;;  %v5654_v35 = vmul.f32 -1.442695, %v3280_v29  ;;  %v8229_v10 = vld [vmem:[%s8635_s2 + $0x4c] ss:$16 sps:$4 sm:$0xff]   ;;  %v8239_v16 = vld [vmem:[%s8635_s2 + $0x48] ss:$16 sps:$4 sm:$0xff]  }
 0x515   :  { %v3275_v27 = vpop.f32.mrf.mxu1  ;;  %v8051_v28 = vadd.f32 %v2985_v20, %v2984_v21  ;;  %6400 = vpow2.f32 %v5653_v23  ;;  %v8248_v18 = vld [vmem:[%s8635_s2 + $0x24] ss:$16 sps:$4 sm:$0xff]   ;;  %v8253_v20 = vld [vmem:[%s8635_s2 + $0x2c] ss:$16 sps:$4 sm:$0xff]   ;;  %v8258_v21 = vld [vmem:[%s8635_s2 + $0x20] ss:$16 sps:$4 sm:$0xff]  }
 0x516   :  { %6402 = vrcp.f32 %v2981_v15  ;;  %v8234_v15 = vld [vmem:[%s8635_s2 + $0x40] ss:$16 sps:$4 sm:$0xff]   ;;  %v8263_v23 = vld [vmem:[%s8635_s2 + $0x28] ss:$16 sps:$4 sm:$0xff]   ;;  %v8272_v24 = vld [vmem:[%s8635_s2 + $0x4] ss:$16 sps:$4 sm:$0xff]  }
 0x517   :  { %6404 = vtanh.f32 %v8051_v28  ;;  %v8277_v27 = vld [vmem:[%s8635_s2 + $0xc] ss:$16 sps:$4 sm:$0xff]   ;;  %v8296_v29 = vld [vmem:[%s8636_s3 + $0xe4] ss:$16 sps:$4 sm:$0xff]  }
 0x518   :  { %6406 = vpow2.f32 %v5654_v35  ;;  %v8301_v37 = vld [vmem:[%s8636_s3 + $0xec] ss:$16 sps:$4 sm:$0xff]   ;;  %v49_v35 = vld [vmem:[%s8633_s0 + $0xa0] sm:$0xff] }
 0x520   :  { %v6399_v43 = vpop.eup %6398 }
 0x521   :  { %v3284_v44 = vadd.f32 1.0, %v6399_v43  ;;  %v3315_v43 = vunpack.c.l.bf16 %v49_v35 }
 0x522   :  { %v6401_v45 = vpop.eup %6400 }
 0x523   :  { %v6403_v46 = vpop.eup %6402  ;;  %6408 = vrcp.f32 %v3284_v44  ;;  %v3290_v47 = vadd.f32 1.0, %v6401_v45 }
 0x524   :  { %v6405_v48 = vpop.eup %6404  ;;  %6410 = vtanh.f32 %v3279_v25  ;;  %v3316_v25 = vunpack.c.h.bf16 %v49_v35 }
 0x525   :  { %v2988_v49 = vmul.f32 %v6405_v48, %v6403_v46  ;;  %6412 = vrcp.f32 %v3290_v47  ;;  %v6407_v51 = vpop.eup %6406 }
 0x526   :  { %v3297_v57 = vadd.f32 1.0, %v6407_v51 }
 0x527   :  { %v2989_v50 = vpack.c.bf16 %v2988_v49, %v2988_v49 }
 0x528   :  { %6414 = vrcp.f32 %v3297_v57  ;;  %v51_v57 = vld [vmem:[%s8633_s0 + $0xa8] sm:$0xff] }
 0x529   :  { %5619 = vst [vmem:[%s8637_s4 + $0x10] sm:$0xf] %v2989_v50  ;;  %2990 = vst [vmem:[#allocation2] sm:$0xf] %v2989_v50 }
 0x530   :  { %v6409_v52 = vpop.eup %6408  ;;  %v3313_v53 = vld [vmem:[#allocation2] sm:$0xf] }
 0x531   :  { %v6411_v54 = vpop.eup %6410  ;;  %3544 = vmatmul.mubr.bf16.vlgmr.msra.gmra.mxu0 %v3313_v53  ;;  %3585 = vmatmul.mubr.bf16.vlgmr.msra.gmra.mxu1 %v3313_v53 }
 0x532   :  { %v6413_v56 = vpop.eup %6412  ;;  %3828 = vmatpush1.bf16.msra.mxu0 %v7819_v34  ;;  %3869 = vmatpush1.bf16.msra.mxu1 %v7824_v33  ;;  %v3301_v58 = vmul.f32 %v6411_v54, %v6409_v52  ;;  %v8674_v34 = vld [vmem:[#allocation14_spill] sm:$0xff] }
 0x533   :  { %v3300_v60 = vmul.f32 %v6413_v56, %v7863_v38  ;;  %3829 = vmatprep.subr.bf16.mxu0 %v7829_v6  ;;  %3870 = vmatprep.subr.bf16.mxu1 %v7834_v7  ;;  %v8675_v6 = vld [vmem:[#allocation15_spill] sm:$0xff]  ;;  %v8676_v7 = vld [vmem:[#allocation16_spill] sm:$0xff] }
 0x534   :  { %3859 = vmatprep.mubr.bf16.mxu0 %v8659_v59  ;;  %3900 = vmatprep.mubr.bf16.mxu1 %v8659_v59 }
 0x535   :  { %v8067_v3 = vadd.f32 %v3301_v58, %v3300_v60  ;;  %v6415_v33 = vpop.eup %6414  ;;  %v3318_v58 = vunpack.c.h.bf16 %v51_v57 }
 0x536   :  { %3830 = vmatpush1.bf16.msra.mxu0 %v7841_v14  ;;  %3871 = vmatpush1.bf16.msra.mxu1 %v7846_v17 }
 0x537   :  { %6416 = vtanh.f32 %v8067_v3  ;;  %3831 = vmatprep.subr.bf16.mxu0 %v7854_v32  ;;  %3872 = vmatprep.subr.bf16.mxu1 %v7859_v36  ;;  %v8677_v36 = vld [vmem:[#allocation17_spill] sm:$0xff] }
 0x53a   :  { %3832 = vmatpush1.bf16.msra.mxu0 %v7870_v22  ;;  %3873 = vmatpush1.bf16.msra.mxu1 %v7875_v39  ;;  %v8104_v22 = vld [vmem:[%s8635_s2 + $0xe4] ss:$16 sps:$4 sm:$0xff]   ;;  %v8109_v39 = vld [vmem:[%s8635_s2 + $0xec] ss:$16 sps:$4 sm:$0xff]  }
 0x53b   :  { %3833 = vmatprep.subr.bf16.mxu0 %v7883_v40  ;;  %3874 = vmatprep.subr.bf16.mxu1 %v7888_v55  ;;  %v8114_v40 = vld [vmem:[%s8635_s2 + $0xe0] ss:$16 sps:$4 sm:$0xff]   ;;  %v8119_v55 = vld [vmem:[%s8635_s2 + $0xe8] ss:$16 sps:$4 sm:$0xff]  }
 0x53e   :  { %3834 = vmatpush1.bf16.msra.mxu0 %v7895_v61  ;;  %3875 = vmatpush1.bf16.msra.mxu1 %v7900_v62  ;;  %v8128_v61 = vld [vmem:[%s8635_s2 + $0xc4] ss:$16 sps:$4 sm:$0xff]   ;;  %v8133_v62 = vld [vmem:[%s8635_s2 + $0xcc] ss:$16 sps:$4 sm:$0xff]  }
 0x53f   :  { %3835 = vmatprep.subr.bf16.mxu0 %v7907_v63  ;;  %3876 = vmatprep.subr.bf16.mxu1 %v7912_v1  ;;  %v8138_v63 = vld [vmem:[%s8635_s2 + $0xc0] ss:$16 sps:$4 sm:$0xff]   ;;  %v8143_v1 = vld [vmem:[%s8635_s2 + $0xc8] ss:$16 sps:$4 sm:$0xff]  }
 0x542   :  { %3836 = vmatpush1.bf16.msra.mxu0 %v7919_v2  ;;  %3877 = vmatpush1.bf16.msra.mxu1 %v8674_v34  ;;  %v8152_v2 = vld [vmem:[%s8635_s2 + $0xa4] ss:$16 sps:$4 sm:$0xff]   ;;  %v3317_v34 = vunpack.c.l.bf16 %v51_v57 }
 0x543   :  { %3837 = vmatprep.subr.bf16.mxu0 %v8675_v6  ;;  %3878 = vmatprep.subr.bf16.mxu1 %v8676_v7 }
 0x544   :  { %v6417_v14 = vpop.eup %6416 }
 0x545   :  { %v3304_v17 = vmul.f32 %v6417_v14, %v6415_v33 }
 0x546   :  { %3838 = vmatpush1.bf16.msra.mxu0 %v7943_v8  ;;  %3879 = vmatpush1.bf16.msra.mxu1 %v7948_v9  ;;  %v8167_v8 = vld [vmem:[%s8635_s2 + $0xa8] ss:$16 sps:$4 sm:$0xff]   ;;  %v8176_v9 = vld [vmem:[%s8635_s2 + $0x84] ss:$16 sps:$4 sm:$0xff]  }
 0x547   :  { %v3305_v32 = vpack.c.bf16 %v3304_v17, %v3304_v17  ;;  %3839 = vmatprep.subr.bf16.mxu0 %v7955_v12  ;;  %3880 = vmatprep.subr.bf16.mxu1 %v8677_v36  ;;  %v8181_v12 = vld [vmem:[%s8635_s2 + $0x8c] ss:$16 sps:$4 sm:$0xff]   ;;  %v5285_v36 = vld [vmem:[%s8634_s1 + $0x50] sm:$0xff] }
 0x548   :  { %v3632_v35 = vunpack.c.h.bf16 %v5285_v36 }
 0x549   :  { %5655 = vst [vmem:[%s8638_s5 + $0xc] sm:$0xf] %v3305_v32  ;;  %3306 = vst [vmem:[#allocation4] sm:$0xf] %v3305_v32 }
 0x54a   :  { %3840 = vmatpush1.bf16.msra.mxu0 %v7967_v5  ;;  %3881 = vmatpush1.bf16.msra.mxu1 %v7972_v4  ;;  %v8157_v4 = vld [vmem:[%s8635_s2 + $0xac] ss:$16 sps:$4 sm:$0xff]   ;;  %v8162_v5 = vld [vmem:[%s8635_s2 + $0xa0] ss:$16 sps:$4 sm:$0xff]  }
 0x54b   :  { %3841 = vmatprep.subr.bf16.mxu0 %v7979_v11  ;;  %3882 = vmatprep.subr.bf16.mxu1 %v7984_v19  ;;  %v8191_v11 = vld [vmem:[%s8635_s2 + $0x88] ss:$16 sps:$4 sm:$0xff]   ;;  %v8200_v19 = vld [vmem:[%s8635_s2 + $0x64] ss:$16 sps:$4 sm:$0xff]  }
 0x54e   :  { %3842 = vmatpush1.bf16.msra.mxu0 %v7994_v26  ;;  %3883 = vmatpush1.bf16.msra.mxu1 %v7999_v13  ;;  %v8186_v13 = vld [vmem:[%s8635_s2 + $0x80] ss:$16 sps:$4 sm:$0xff]   ;;  %v8205_v26 = vld [vmem:[%s8635_s2 + $0x6c] ss:$16 sps:$4 sm:$0xff]  }
 0x54f   :  { %4143 = vmatprep.subr.bf16.mxu0 %v8104_v22  ;;  %4184 = vmatprep.subr.bf16.mxu1 %v8109_v39 }
 0x550   :  { %v3629_v38 = vld [vmem:[#allocation4] sm:$0xf] }
 0x551   :  { %3860 = vmatmul.mubr.bf16.vlgmr.msra.gmra.mxu0 %v3629_v38  ;;  %3901 = vmatmul.mubr.bf16.vlgmr.msra.gmra.mxu1 %v3629_v38  ;;  %v3631_v38 = vunpack.c.l.bf16 %v5285_v36 }
 0x552   :  { %4175 = vmatprep.mubr.bf16.mxu0 %v8659_v59  ;;  %4216 = vmatprep.mubr.bf16.mxu1 %v8659_v59 }
 0x553   :  { %4144 = vmatpush1.bf16.msra.mxu0 %v8114_v40  ;;  %4185 = vmatpush1.bf16.msra.mxu1 %v8119_v55 }
 0x554   :  { %4145 = vmatprep.subr.bf16.mxu0 %v8128_v61  ;;  %4186 = vmatprep.subr.bf16.mxu1 %v8133_v62 }
 0x557   :  { %4146 = vmatpush1.bf16.msra.mxu0 %v8138_v63  ;;  %4187 = vmatpush1.bf16.msra.mxu1 %v8143_v1 }
 0x558   :  { %4147 = vmatprep.subr.bf16.mxu0 %v8152_v2  ;;  %4188 = vmatprep.subr.bf16.mxu1 %v8157_v4 }
 0x55b   :  { %4148 = vmatpush1.bf16.msra.mxu0 %v8162_v5  ;;  %4189 = vmatpush1.bf16.msra.mxu1 %v8167_v8 }
 0x55c   :  { %4149 = vmatprep.subr.bf16.mxu0 %v8176_v9  ;;  %4190 = vmatprep.subr.bf16.mxu1 %v8181_v12 }
 0x55f   :  { %4150 = vmatpush1.bf16.msra.mxu0 %v8186_v13  ;;  %4191 = vmatpush1.bf16.msra.mxu1 %v8191_v11 }
 0x560   :  { %4151 = vmatprep.subr.bf16.mxu0 %v8200_v19  ;;  %4192 = vmatprep.subr.bf16.mxu1 %v8205_v26 }
 0x563   :  { %4152 = vmatpush1.bf16.msra.mxu0 %v8210_v0  ;;  %4193 = vmatpush1.bf16.msra.mxu1 %v8215_v41 }
 0x564   :  { %4153 = vmatprep.subr.bf16.mxu0 %v8224_v42  ;;  %4194 = vmatprep.subr.bf16.mxu1 %v8229_v10 }
 0x567   :  { %4154 = vmatpush1.bf16.msra.mxu0 %v8234_v15  ;;  %4195 = vmatpush1.bf16.msra.mxu1 %v8239_v16 }
 0x568   :  { %4155 = vmatprep.subr.bf16.mxu0 %v8248_v18  ;;  %4196 = vmatprep.subr.bf16.mxu1 %v8253_v20 }
 0x56b   :  { %4156 = vmatpush1.bf16.msra.mxu0 %v8258_v21  ;;  %4197 = vmatpush1.bf16.msra.mxu1 %v8263_v23 }
 0x56c   :  { %4157 = vmatprep.subr.bf16.mxu0 %v8272_v24  ;;  %4198 = vmatprep.subr.bf16.mxu1 %v8277_v27 }
 0x56f   :  { %4158 = vmatpush1.bf16.msra.mxu0 %v8282_v30  ;;  %4199 = vmatpush1.bf16.msra.mxu1 %v8287_v31 }
 0x570   :  { %4459 = vmatprep.subr.bf16.mxu0 %v8296_v29  ;;  %4500 = vmatprep.subr.bf16.mxu1 %v8301_v37 }
 0x5f1   :  { %v3545_v44 = vpop.f32.mrf.mxu0  ;;  %v3586_v45 = vpop.f32.mrf.mxu1 }
 0x5f2   :  { %v3593_v46 = vadd.f32 %v3545_v44, %v3315_v43  ;;  %v3595_v7 = vadd.f32 %v3586_v45, %v3317_v34 }
 0x5f3   :  { %v3547_v47 = vpop.f32.mrf.mxu0  ;;  %v3588_v48 = vpop.f32.mrf.mxu1 }
 0x5f4   :  { %v5688_v49 = vmul.f32 -1.442695, %v3593_v46  ;;  %v3594_v50 = vadd.f32 %v3547_v47, %v3316_v25  ;;  %v3596_v60 = vadd.f32 %v3588_v48, %v3318_v58 }
 0x5f5   :  { %v3549_v51 = vpop.f32.mrf.mxu0  ;;  %v3590_v52 = vpop.f32.mrf.mxu1 }
 0x5f6   :  { %6418 = vpow2.f32 %v5688_v49  ;;  %v5689_v53 = vmul.f32 -1.442695, %v3594_v50  ;;  %v5690_v33 = vmul.f32 -1.442695, %v3596_v60 }
 0x5f7   :  { %v3550_v54 = vpop.f32.mrf.mxu0  ;;  %v3591_v56 = vpop.f32.mrf.mxu1 }
 0x5f8   :  { %6420 = vpow2.f32 %v5689_v53 }
 0x5f9   :  { %6422 = vpow2.f32 %v5690_v33 }
 0x603   :  { %v6419_v6 = vpop.eup %6418 }
 0x604   :  { %v3600_v14 = vadd.f32 1.0, %v6419_v6 }
 0x605   :  { %v6421_v17 = vpop.eup %6420 }
 0x606   :  { %6424 = vrcp.f32 %v3600_v14  ;;  %v3606_v32 = vadd.f32 1.0, %v6421_v17  ;;  %v6423_v44 = vpop.eup %6422 }
 0x607   :  { %6426 = vtanh.f32 %v3595_v7  ;;  %v3613_v53 = vadd.f32 1.0, %v6423_v44  ;;  %v5286_v7 = vld [vmem:[%s8634_s1 + $0x58] sm:$0xff] }
 0x608   :  { %6428 = vrcp.f32 %v3606_v32  ;;  %v3634_v14 = vunpack.c.h.bf16 %v5286_v7  ;;  %v3633_v32 = vunpack.c.l.bf16 %v5286_v7 }
 0x611   :  { %v3861_v43 = vpop.f32.mrf.mxu0  ;;  %v3902_v25 = vpop.f32.mrf.mxu1 }
 0x612   :  { %v3909_v46 = vadd.f32 %v3861_v43, %v3631_v38 }
 0x613   :  { %v6425_v47 = vpop.eup %6424  ;;  %v3863_v48 = vpop.f32.mrf.mxu0 }
 0x614   :  { %v3904_v45 = vpop.f32.mrf.mxu1  ;;  %v6427_v49 = vpop.eup %6426  ;;  %v5724_v50 = vmul.f32 -1.442695, %v3909_v46  ;;  %v3910_v51 = vadd.f32 %v3863_v48, %v3632_v35 }
 0x615   :  { %v6429_v52 = vpop.eup %6428  ;;  %v3865_v54 = vpop.f32.mrf.mxu0  ;;  %v3617_v57 = vmul.f32 %v6427_v49, %v6425_v47  ;;  %v3912_v17 = vadd.f32 %v3904_v45, %v3634_v14  ;;  %v8332_v45 = vld [vmem:[%s8636_s3 + $0xe8] ss:$16 sps:$4 sm:$0xff]   ;;  %v8362_v14 = vld [vmem:[%s8636_s3 + $0xa4] ss:$16 sps:$4 sm:$0xff]  }
 0x616   :  { %v3906_v56 = vpop.f32.mrf.mxu1  ;;  %v3616_v58 = vmul.f32 %v6429_v52, %v8051_v28  ;;  %6430 = vpow2.f32 %v5724_v50  ;;  %v5725_v60 = vmul.f32 -1.442695, %v3910_v51  ;;  %v3911_v28 = vadd.f32 %v3902_v25, %v3633_v32  ;;  %v8327_v25 = vld [vmem:[%s8636_s3 + $0xe0] ss:$16 sps:$4 sm:$0xff]   ;;  %v8337_v51 = vld [vmem:[%s8636_s3 + $0xc4] ss:$16 sps:$4 sm:$0xff]  }
 0x617   :  { %v3866_v34 = vpop.f32.mrf.mxu0  ;;  %v5726_v36 = vmul.f32 -1.442695, %v3912_v17  ;;  %v8342_v52 = vld [vmem:[%s8636_s3 + $0xcc] ss:$16 sps:$4 sm:$0xff]  }
 0x618   :  { %v3907_v33 = vpop.f32.mrf.mxu1  ;;  %v8315_v6 = vadd.f32 %v3617_v57, %v3616_v58  ;;  %6432 = vpow2.f32 %v5725_v60  ;;  %v8349_v60 = vld [vmem:[%s8636_s3 + $0xc0] ss:$16 sps:$4 sm:$0xff]   ;;  %v8354_v34 = vld [vmem:[%s8636_s3 + $0xc8] ss:$16 sps:$4 sm:$0xff]   ;;  %v8367_v17 = vld [vmem:[%s8636_s3 + $0xac] ss:$16 sps:$4 sm:$0xff]  }
 0x619   :  { %6434 = vrcp.f32 %v3613_v53 }
 0x61a   :  { %6436 = vtanh.f32 %v8315_v6 }
 0x61b   :  { %6438 = vpow2.f32 %v5726_v36  ;;  %v8383_v36 = vld [vmem:[%s8636_s3 + $0xa8] ss:$16 sps:$4 sm:$0xff]  }
 0x623   :  { %v6431_v38 = vpop.eup %6430 }
 0x624   :  { %v3916_v35 = vadd.f32 1.0, %v6431_v38  ;;  %v8391_v38 = vld [vmem:[%s8636_s3 + $0x84] ss:$16 sps:$4 sm:$0xff]  }
 0x625   :  { %v6433_v43 = vpop.eup %6432 }
 0x626   :  { %v6435_v44 = vpop.eup %6434  ;;  %6440 = vrcp.f32 %v3916_v35  ;;  %v3922_v46 = vadd.f32 1.0, %v6433_v43  ;;  %v8403_v35 = vld [vmem:[%s8636_s3 + $0x80] ss:$16 sps:$4 sm:$0xff]   ;;  %v8408_v43 = vld [vmem:[%s8636_s3 + $0x88] ss:$16 sps:$4 sm:$0xff]  }
 0x627   :  { %v6437_v47 = vpop.eup %6436  ;;  %6442 = vtanh.f32 %v3911_v28  ;;  %v8396_v28 = vld [vmem:[%s8636_s3 + $0x8c] ss:$16 sps:$4 sm:$0xff]  }
 0x628   :  { %v3620_v48 = vmul.f32 %v6437_v47, %v6435_v44  ;;  %6444 = vrcp.f32 %v3922_v46  ;;  %v6439_v50 = vpop.eup %6438  ;;  %v8415_v44 = vld [vmem:[%s8636_s3 + $0x64] ss:$16 sps:$4 sm:$0xff]   ;;  %v8420_v46 = vld [vmem:[%s8636_s3 + $0x6c] ss:$16 sps:$4 sm:$0xff]   ;;  %v8427_v47 = vld [vmem:[%s8636_s3 + $0x60] ss:$16 sps:$4 sm:$0xff]  }
 0x629   :  { %v3929_v58 = vadd.f32 1.0, %v6439_v50  ;;  %v8444_v50 = vld [vmem:[%s8636_s3 + $0x4c] ss:$16 sps:$4 sm:$0xff]  }
 0x62a   :  { %v3621_v49 = vpack.c.bf16 %v3620_v48, %v3620_v48  ;;  %v8432_v48 = vld [vmem:[%s8636_s3 + $0x68] ss:$16 sps:$4 sm:$0xff]   ;;  %8680 = vst [vmem:[#allocation16_spill] sm:$0xff] %v8444_v50 }
 0x62b   :  { %6446 = vrcp.f32 %v3929_v58  ;;  %8678 = vst [vmem:[#allocation14_spill] sm:$0xff] %v8432_v48  ;;  %v8468_v58 = vld [vmem:[%s8636_s3 + $0x2c] ss:$16 sps:$4 sm:$0xff]  }
 0x62c   :  { %5691 = vst [vmem:[%s8637_s4 + $0x14] sm:$0xf] %v3621_v49  ;;  %3622 = vst [vmem:[#allocation2] sm:$0xf] %v3621_v49  ;;  %v8439_v49 = vld [vmem:[%s8636_s3 + $0x44] ss:$16 sps:$4 sm:$0xff]  }
 0x62d   :  { %8679 = vst [vmem:[#allocation15_spill] sm:$0xff] %v8439_v49  ;;  %8681 = vst [vmem:[#allocation17_spill] sm:$0xff] %v8468_v58 }
 0x633   :  { %v6441_v53 = vpop.eup %6440  ;;  %v3945_v54 = vld [vmem:[#allocation2] sm:$0xf] }
 0x634   :  { %v6443_v56 = vpop.eup %6442  ;;  %4176 = vmatmul.mubr.bf16.vlgmr.msra.gmra.mxu0 %v3945_v54  ;;  %4217 = vmatmul.mubr.bf16.vlgmr.msra.gmra.mxu1 %v3945_v54  ;;  %v8456_v54 = vld [vmem:[%s8636_s3 + $0x48] ss:$16 sps:$4 sm:$0xff]  }
 0x635   :  { %v6445_v57 = vpop.eup %6444  ;;  %4460 = vmatpush1.bf16.msra.mxu0 %v8327_v25  ;;  %4501 = vmatpush1.bf16.msra.mxu1 %v8332_v45  ;;  %v3933_v33 = vmul.f32 %v6443_v56, %v6441_v53  ;;  %v8451_v53 = vld [vmem:[%s8636_s3 + $0x40] ss:$16 sps:$4 sm:$0xff]  }
 0x636   :  { %v3932_v7 = vmul.f32 %v6445_v57, %v8067_v3  ;;  %4461 = vmatprep.subr.bf16.mxu0 %v8337_v51  ;;  %4502 = vmatprep.subr.bf16.mxu1 %v8342_v52  ;;  %v8378_v3 = vld [vmem:[%s8636_s3 + $0xa0] ss:$16 sps:$4 sm:$0xff]   ;;  %v8463_v57 = vld [vmem:[%s8636_s3 + $0x24] ss:$16 sps:$4 sm:$0xff]  }
 0x637   :  { %4491 = vmatprep.mubr.bf16.mxu0 %v8659_v59  ;;  %4532 = vmatprep.mubr.bf16.mxu1 %v8659_v59 }
 0x638   :  { %v8371_v32 = vadd.f32 %v3933_v33, %v3932_v7  ;;  %v6447_v56 = vpop.eup %6446 }
 0x639   :  { %4462 = vmatpush1.bf16.msra.mxu0 %v8349_v60  ;;  %4503 = vmatpush1.bf16.msra.mxu1 %v8354_v34 }
 0x63a   :  { %6448 = vtanh.f32 %v8371_v32  ;;  %4463 = vmatprep.subr.bf16.mxu0 %v8362_v14  ;;  %4504 = vmatprep.subr.bf16.mxu1 %v8367_v17 }
 0x63d   :  { %4464 = vmatpush1.bf16.msra.mxu0 %v8378_v3  ;;  %4505 = vmatpush1.bf16.msra.mxu1 %v8383_v36 }
 0x63e   :  { %4465 = vmatprep.subr.bf16.mxu0 %v8391_v38  ;;  %4506 = vmatprep.subr.bf16.mxu1 %v8396_v28 }
 0x641   :  { %4466 = vmatpush1.bf16.msra.mxu0 %v8403_v35  ;;  %4507 = vmatpush1.bf16.msra.mxu1 %v8408_v43 }
 0x642   :  { %4467 = vmatprep.subr.bf16.mxu0 %v8415_v44  ;;  %4508 = vmatprep.subr.bf16.mxu1 %v8420_v46 }
 0x645   :  { %4468 = vmatpush1.bf16.msra.mxu0 %v8427_v47  ;;  %4509 = vmatpush1.bf16.msra.mxu1 %v8432_v48 }
 0x646   :  { %4469 = vmatprep.subr.bf16.mxu0 %v8439_v49  ;;  %4510 = vmatprep.subr.bf16.mxu1 %v8444_v50  ;;  %v8475_v50 = vld [vmem:[%s8636_s3 + $0x20] ss:$16 sps:$4 sm:$0xff]   ;;  %v8480_v49 = vld [vmem:[%s8636_s3 + $0x28] ss:$16 sps:$4 sm:$0xff]  }
 0x647   :  { %v6449_v33 = vpop.eup %6448 }
 0x648   :  { %v3936_v7 = vmul.f32 %v6449_v33, %v6447_v56  ;;  %v8487_v56 = vld [vmem:[%s8636_s3 + $0x4] ss:$16 sps:$4 sm:$0xff]   ;;  %v8492_v33 = vld [vmem:[%s8636_s3 + $0xc] ss:$16 sps:$4 sm:$0xff]  }
 0x649   :  { %4470 = vmatpush1.bf16.msra.mxu0 %v8451_v53  ;;  %4511 = vmatpush1.bf16.msra.mxu1 %v8456_v54 }
 0x64a   :  { %v3937_v48 = vpack.c.bf16 %v3936_v7, %v3936_v7  ;;  %4471 = vmatprep.subr.bf16.mxu0 %v8463_v57  ;;  %4512 = vmatprep.subr.bf16.mxu1 %v8468_v58  ;;  %v8502_v7 = vld [vmem:[%s8636_s3] ss:$16 sps:$4 sm:$0xff]   ;;  %v8507_v58 = vld [vmem:[%s8636_s3 + $0x8] ss:$16 sps:$4 sm:$0xff]  }
 0x64c   :  { %5727 = vst [vmem:[%s8638_s5 + $0x8] sm:$0xf] %v3937_v48  ;;  %3938 = vst [vmem:[#allocation4] sm:$0xf] %v3937_v48 }
 0x64d   :  { %4472 = vmatpush1.bf16.msra.mxu0 %v8475_v50  ;;  %4513 = vmatpush1.bf16.msra.mxu1 %v8480_v49 }
 0x64e   :  { %4473 = vmatprep.subr.bf16.mxu0 %v8487_v56  ;;  %4514 = vmatprep.subr.bf16.mxu1 %v8492_v33 }
 0x651   :  { %4474 = vmatpush1.bf16.msra.mxu0 %v8502_v7  ;;  %4515 = vmatpush1.bf16.msra.mxu1 %v8507_v58 }
 0x652   :  { %4775 = vmatprep.subr.bf16.mxu0 %v8104_v22  ;;  %4816 = vmatprep.subr.bf16.mxu1 %v8109_v39  ;;  %v53_v22 = vld [vmem:[%s8633_s0 + $0xc0] sm:$0xff] }
 0x653   :  { %v4261_v48 = vld [vmem:[#allocation4] sm:$0xf]  ;;  %v3947_v39 = vunpack.c.l.bf16 %v53_v22 }
 0x654   :  { %4492 = vmatmul.mubr.bf16.vlgmr.msra.gmra.mxu0 %v4261_v48  ;;  %4533 = vmatmul.mubr.bf16.vlgmr.msra.gmra.mxu1 %v4261_v48 }
 0x655   :  { %4776 = vmatpush1.bf16.msra.mxu0 %v8114_v40  ;;  %4817 = vmatpush1.bf16.msra.mxu1 %v8119_v55  ;;  %v3948_v40 = vunpack.c.h.bf16 %v53_v22 }
 0x656   :  { %4777 = vmatprep.subr.bf16.mxu0 %v8128_v61  ;;  %4818 = vmatprep.subr.bf16.mxu1 %v8133_v62 }
 0x657   :  { %4807 = vmatprep.mubr.bf16.mxu0 %v8659_v59  ;;  %4848 = vmatprep.mubr.bf16.mxu1 %v8659_v59 }
 0x659   :  { %4778 = vmatpush1.bf16.msra.mxu0 %v8138_v63  ;;  %4819 = vmatpush1.bf16.msra.mxu1 %v8143_v1 }
 0x65a   :  { %4779 = vmatprep.subr.bf16.mxu0 %v8152_v2  ;;  %4820 = vmatprep.subr.bf16.mxu1 %v8157_v4 }
 0x65d   :  { %4780 = vmatpush1.bf16.msra.mxu0 %v8162_v5  ;;  %4821 = vmatpush1.bf16.msra.mxu1 %v8167_v8 }
 0x65e   :  { %4781 = vmatprep.subr.bf16.mxu0 %v8176_v9  ;;  %4822 = vmatprep.subr.bf16.mxu1 %v8181_v12 }
 0x661   :  { %4782 = vmatpush1.bf16.msra.mxu0 %v8186_v13  ;;  %4823 = vmatpush1.bf16.msra.mxu1 %v8191_v11  ;;  %v55_v11 = vld [vmem:[%s8633_s0 + $0xc8] sm:$0xff] }
 0x662   :  { %4783 = vmatprep.subr.bf16.mxu0 %v8200_v19  ;;  %4824 = vmatprep.subr.bf16.mxu1 %v8205_v26  ;;  %v3950_v19 = vunpack.c.h.bf16 %v55_v11 }
 0x665   :  { %4784 = vmatpush1.bf16.msra.mxu0 %v8210_v0  ;;  %4825 = vmatpush1.bf16.msra.mxu1 %v8215_v41  ;;  %v3949_v0 = vunpack.c.l.bf16 %v55_v11 }
 0x666   :  { %4785 = vmatprep.subr.bf16.mxu0 %v8224_v42  ;;  %4826 = vmatprep.subr.bf16.mxu1 %v8229_v10 }
 0x669   :  { %4786 = vmatpush1.bf16.msra.mxu0 %v8234_v15  ;;  %4827 = vmatpush1.bf16.msra.mxu1 %v8239_v16 }
 0x66a   :  { %4787 = vmatprep.subr.bf16.mxu0 %v8248_v18  ;;  %4828 = vmatprep.subr.bf16.mxu1 %v8253_v20  ;;  %v5283_v20 = vld [vmem:[%s8634_s1 + $0x30] sm:$0xff] }
 0x66d   :  { %4788 = vmatpush1.bf16.msra.mxu0 %v8258_v21  ;;  %4829 = vmatpush1.bf16.msra.mxu1 %v8263_v23  ;;  %v4263_v21 = vunpack.c.l.bf16 %v5283_v20  ;;  %v4264_v23 = vunpack.c.h.bf16 %v5283_v20 }
 0x66e   :  { %4789 = vmatprep.subr.bf16.mxu0 %v8272_v24  ;;  %4830 = vmatprep.subr.bf16.mxu1 %v8277_v27 }
 0x671   :  { %4790 = vmatpush1.bf16.msra.mxu0 %v8282_v30  ;;  %4831 = vmatpush1.bf16.msra.mxu1 %v8287_v31 }
 0x672   :  { %5090 = vmatprep.subr.bf16.mxu0 %v8296_v29  ;;  %5131 = vmatprep.subr.bf16.mxu1 %v8301_v37 }
 0x6f4   :  { %v4177_v55 = vpop.f32.mrf.mxu0  ;;  %v4218_v61 = vpop.f32.mrf.mxu1 }
 0x6f5   :  { %v4225_v62 = vadd.f32 %v4177_v55, %v3947_v39  ;;  %v4227_v10 = vadd.f32 %v4218_v61, %v3949_v0 }
 0x6f6   :  { %v4179_v63 = vpop.f32.mrf.mxu0  ;;  %v4220_v1 = vpop.f32.mrf.mxu1 }
 0x6f7   :  { %v5760_v2 = vmul.f32 -1.442695, %v4225_v62  ;;  %v4226_v4 = vadd.f32 %v4179_v63, %v3948_v40  ;;  %v4228_v26 = vadd.f32 %v4220_v1, %v3950_v19 }
 0x6f8   :  { %v4181_v5 = vpop.f32.mrf.mxu0  ;;  %v4222_v8 = vpop.f32.mrf.mxu1 }
 0x6f9   :  { %6450 = vpow2.f32 %v5760_v2  ;;  %v5761_v9 = vmul.f32 -1.442695, %v4226_v4  ;;  %v5762_v41 = vmul.f32 -1.442695, %v4228_v26 }
 0x6fa   :  { %v4182_v12 = vpop.f32.mrf.mxu0  ;;  %v4223_v13 = vpop.f32.mrf.mxu1 }
 0x6fb   :  { %6452 = vpow2.f32 %v5761_v9  ;;  %v5284_v12 = vld [vmem:[%s8634_s1 + $0x38] sm:$0xff] }
 0x6fc   :  { %6454 = vpow2.f32 %v5762_v41  ;;  %v4266_v13 = vunpack.c.h.bf16 %v5284_v12  ;;  %v4265_v19 = vunpack.c.l.bf16 %v5284_v12 }
 0x706   :  { %v6451_v42 = vpop.eup %6450 }
 0x707   :  { %v4232_v15 = vadd.f32 1.0, %v6451_v42 }
 0x708   :  { %v6453_v16 = vpop.eup %6452 }
 0x709   :  { %6456 = vrcp.f32 %v4232_v15  ;;  %v4238_v18 = vadd.f32 1.0, %v6453_v16  ;;  %v6455_v30 = vpop.eup %6454 }
 0x70a   :  { %6458 = vtanh.f32 %v4227_v10  ;;  %v4245_v61 = vadd.f32 1.0, %v6455_v30 }
 0x70b   :  { %6460 = vrcp.f32 %v4238_v18 }
 0x714   :  { %v4493_v24 = vpop.f32.mrf.mxu0  ;;  %v4534_v27 = vpop.f32.mrf.mxu1 }
 0x715   :  { %v4541_v31 = vadd.f32 %v4493_v24, %v4263_v21 }
 0x716   :  { %v6457_v29 = vpop.eup %6456  ;;  %v4495_v37 = vpop.f32.mrf.mxu0 }
 0x717   :  { %v4536_v48 = vpop.f32.mrf.mxu1  ;;  %v6459_v22 = vpop.eup %6458  ;;  %v5796_v39 = vmul.f32 -1.442695, %v4541_v31  ;;  %v4542_v40 = vadd.f32 %v4495_v37, %v4264_v23 }
 0x718   :  { %v6461_v55 = vpop.eup %6460  ;;  %v4497_v62 = vpop.f32.mrf.mxu0  ;;  %v4249_v1 = vmul.f32 %v6459_v22, %v6457_v29  ;;  %v4544_v11 = vadd.f32 %v4536_v48, %v4266_v13 }
 0x719   :  { %v4538_v63 = vpop.f32.mrf.mxu1  ;;  %v4248_v2 = vmul.f32 %v6461_v55, %v8315_v6  ;;  %6462 = vpow2.f32 %v5796_v39  ;;  %v5797_v4 = vmul.f32 -1.442695, %v4542_v40  ;;  %v4543_v6 = vadd.f32 %v4534_v27, %v4265_v19 }
 0x71a   :  { %v4498_v5 = vpop.f32.mrf.mxu0  ;;  %v5798_v26 = vmul.f32 -1.442695, %v4544_v11  ;;  %v5281_v63 = vld [vmem:[%s8634_s1 + $0x10] sm:$0xff] }
 0x71b   :  { %v4539_v8 = vpop.f32.mrf.mxu1  ;;  %v8559_v9 = vadd.f32 %v4249_v1, %v4248_v2  ;;  %6464 = vpow2.f32 %v5797_v4  ;;  %v4894_v1 = vunpack.c.l.bf16 %v5281_v63  ;;  %v4895_v2 = vunpack.c.h.bf16 %v5281_v63 }
 0x71c   :  { %6466 = vrcp.f32 %v4245_v61 }
 0x71d   :  { %6468 = vtanh.f32 %v8559_v9 }
 0x71e   :  { %6470 = vpow2.f32 %v5798_v26 }
 0x726   :  { %v6463_v0 = vpop.eup %6462 }
 0x727   :  { %v4548_v41 = vadd.f32 1.0, %v6463_v0 }
 0x728   :  { %v6465_v42 = vpop.eup %6464 }
 0x729   :  { %v6467_v10 = vpop.eup %6466  ;;  %6472 = vrcp.f32 %v4548_v41  ;;  %v4554_v15 = vadd.f32 1.0, %v6465_v42 }
 0x72a   :  { %v6469_v16 = vpop.eup %6468  ;;  %6474 = vtanh.f32 %v4543_v6 }
 0x72b   :  { %v4252_v18 = vmul.f32 %v6469_v16, %v6467_v10  ;;  %6476 = vrcp.f32 %v4554_v15  ;;  %v6471_v21 = vpop.eup %6470 }
 0x72c   :  { %v4561_v31 = vadd.f32 1.0, %v6471_v21 }
 0x72d   :  { %v4253_v20 = vpack.c.bf16 %v4252_v18, %v4252_v18 }
 0x72e   :  { %6478 = vrcp.f32 %v4561_v31 }
 0x72f   :  { %5763 = vst [vmem:[%s8637_s4 + $0x18] sm:$0xf] %v4253_v20  ;;  %4254 = vst [vmem:[#allocation2] sm:$0xf] %v4253_v20 }
 0x736   :  { %v6473_v23 = vpop.eup %6472  ;;  %v4577_v24 = vld [vmem:[#allocation2] sm:$0xf] }
 0x737   :  { %v6475_v27 = vpop.eup %6474  ;;  %4808 = vmatmul.mubr.bf16.vlgmr.msra.gmra.mxu0 %v4577_v24  ;;  %4849 = vmatmul.mubr.bf16.vlgmr.msra.gmra.mxu1 %v4577_v24 }
 0x738   :  { %v6477_v30 = vpop.eup %6476  ;;  %5091 = vmatpush1.bf16.msra.mxu0 %v8327_v25  ;;  %5132 = vmatpush1.bf16.msra.mxu1 %v8332_v45  ;;  %v4565_v29 = vmul.f32 %v6475_v27, %v6473_v23  ;;  %v8683_v45 = vld [vmem:[#allocation15_spill] sm:$0xff] }
 0x739   :  { %v4564_v37 = vmul.f32 %v6477_v30, %v8371_v32  ;;  %5092 = vmatprep.subr.bf16.mxu0 %v8337_v51  ;;  %5133 = vmatprep.subr.bf16.mxu1 %v8342_v52  ;;  %v8684_v51 = vld [vmem:[#allocation16_spill] sm:$0xff]  ;;  %v5282_v27 = vld [vmem:[%s8634_s1 + $0x18] sm:$0xff] }
 0x73a   :  { %5122 = vmatprep.mubr.bf16.mxu0 %v8659_v59  ;;  %5163 = vmatprep.mubr.bf16.mxu1 %v8659_v59  ;;  %v8682_v59 = vld [vmem:[#allocation14_spill] sm:$0xff]  ;;  %v57_v32 = vld [vmem:[%s8633_s0 + $0xe0] sm:$0xff]  ;;  %v4897_v30 = vunpack.c.h.bf16 %v5282_v27 }
 0x73b   :  { %v8575_v48 = vadd.f32 %v4565_v29, %v4564_v37  ;;  %v6479_v25 = vpop.eup %6478  ;;  %v4896_v29 = vunpack.c.l.bf16 %v5282_v27 }
 0x73c   :  { %5093 = vmatpush1.bf16.msra.mxu0 %v8349_v60  ;;  %5134 = vmatpush1.bf16.msra.mxu1 %v8354_v34 }
 0x73d   :  { %6480 = vtanh.f32 %v8575_v48  ;;  %5094 = vmatprep.subr.bf16.mxu0 %v8362_v14  ;;  %5135 = vmatprep.subr.bf16.mxu1 %v8367_v17  ;;  %v8685_v14 = vld [vmem:[#allocation17_spill] sm:$0xff] }
 0x740   :  { %5095 = vmatpush1.bf16.msra.mxu0 %v8378_v3  ;;  %5136 = vmatpush1.bf16.msra.mxu1 %v8383_v36  ;;  %v4579_v3 = vunpack.c.l.bf16 %v57_v32  ;;  %v4580_v36 = vunpack.c.h.bf16 %v57_v32 }
 0x741   :  { %5096 = vmatprep.subr.bf16.mxu0 %v8391_v38  ;;  %5137 = vmatprep.subr.bf16.mxu1 %v8396_v28 }
 0x744   :  { %5097 = vmatpush1.bf16.msra.mxu0 %v8403_v35  ;;  %5138 = vmatpush1.bf16.msra.mxu1 %v8408_v43 }
 0x745   :  { %5098 = vmatprep.subr.bf16.mxu0 %v8415_v44  ;;  %5139 = vmatprep.subr.bf16.mxu1 %v8420_v46 }
 0x748   :  { %5099 = vmatpush1.bf16.msra.mxu0 %v8427_v47  ;;  %5140 = vmatpush1.bf16.msra.mxu1 %v8682_v59 }
 0x749   :  { %5100 = vmatprep.subr.bf16.mxu0 %v8683_v45  ;;  %5141 = vmatprep.subr.bf16.mxu1 %v8684_v51 }
 0x74a   :  { %v6481_v52 = vpop.eup %6480 }
 0x74b   :  { %v4568_v60 = vmul.f32 %v6481_v52, %v6479_v25 }
 0x74c   :  { %5101 = vmatpush1.bf16.msra.mxu0 %v8451_v53  ;;  %5142 = vmatpush1.bf16.msra.mxu1 %v8456_v54 }
 0x74d   :  { %v4569_v34 = vpack.c.bf16 %v4568_v60, %v4568_v60  ;;  %5102 = vmatprep.subr.bf16.mxu0 %v8463_v57  ;;  %5143 = vmatprep.subr.bf16.mxu1 %v8685_v14 }
 0x74f   :  { %5799 = vst [vmem:[%s8638_s5 + $0x4] sm:$0xf] %v4569_v34  ;;  %4570 = vst [vmem:[#allocation4] sm:$0xf] %v4569_v34 }
 0x750   :  { %5103 = vmatpush1.bf16.msra.mxu0 %v8475_v50  ;;  %5144 = vmatpush1.bf16.msra.mxu1 %v8480_v49 }
 0x751   :  { %5104 = vmatprep.subr.bf16.mxu0 %v8487_v56  ;;  %5145 = vmatprep.subr.bf16.mxu1 %v8492_v33 }
 0x754   :  { %5105 = vmatpush1.bf16.msra.mxu0 %v8502_v7  ;;  %5146 = vmatpush1.bf16.msra.mxu1 %v8507_v58  ;;  %v59_v58 = vld [vmem:[%s8633_s0 + $0xe8] sm:$0xff] }
 0x755   :  { %v4582_v56 = vunpack.c.h.bf16 %v59_v58  ;;  %v4581_v7 = vunpack.c.l.bf16 %v59_v58 }
 0x756   :  { %v4892_v17 = vld [vmem:[#allocation4] sm:$0xf] }
 0x757   :  { %5123 = vmatmul.mubr.bf16.vlgmr.msra.gmra.mxu0 %v4892_v17  ;;  %5164 = vmatmul.mubr.bf16.vlgmr.msra.gmra.mxu1 %v4892_v17 }
 0x7f7   :  { %v4809_v38 = vpop.f32.mrf.mxu0  ;;  %v4850_v28 = vpop.f32.mrf.mxu1 }
 0x7f8   :  { %v4857_v35 = vadd.f32 %v4809_v38, %v4579_v3  ;;  %v4859_v40 = vadd.f32 %v4850_v28, %v4581_v7 }
 0x7f9   :  { %v4811_v43 = vpop.f32.mrf.mxu0  ;;  %v4852_v44 = vpop.f32.mrf.mxu1 }
 0x7fa   :  { %v5832_v46 = vmul.f32 -1.442695, %v4857_v35  ;;  %v4858_v47 = vadd.f32 %v4811_v43, %v4580_v36  ;;  %v4860_v33 = vadd.f32 %v4852_v44, %v4582_v56 }
 0x7fb   :  { %v4813_v49 = vpop.f32.mrf.mxu0  ;;  %v4854_v50 = vpop.f32.mrf.mxu1 }
 0x7fc   :  { %6482 = vpow2.f32 %v5832_v46  ;;  %v5833_v53 = vmul.f32 -1.442695, %v4858_v47  ;;  %v5834_v22 = vmul.f32 -1.442695, %v4860_v33 }
 0x7fd   :  { %v4814_v54 = vpop.f32.mrf.mxu0  ;;  %v4855_v57 = vpop.f32.mrf.mxu1 }
 0x7fe   :  { %6484 = vpow2.f32 %v5833_v53 }
 0x7ff   :  { %6486 = vpow2.f32 %v5834_v22 }
 0x809   :  { %v6483_v39 = vpop.eup %6482 }
 0x80a   :  { %v4864_v55 = vadd.f32 1.0, %v6483_v39 }
 0x80b   :  { %v6485_v61 = vpop.eup %6484 }
 0x80c   :  { %6488 = vrcp.f32 %v4864_v55  ;;  %v4870_v62 = vadd.f32 1.0, %v6485_v61  ;;  %v6487_v8 = vpop.eup %6486 }
 0x80d   :  { %6490 = vtanh.f32 %v4859_v40  ;;  %v4877_v42 = vadd.f32 1.0, %v6487_v8 }
 0x80e   :  { %6492 = vrcp.f32 %v4870_v62 }
 0x817   :  { %v5124_v4 = vpop.f32.mrf.mxu0  ;;  %v5165_v5 = vpop.f32.mrf.mxu1 }
 0x818   :  { %v5172_v12 = vadd.f32 %v5124_v4, %v4894_v1  ;;  %v5174_v25 = vadd.f32 %v5165_v5, %v4896_v29 }
 0x819   :  { %v6489_v13 = vpop.eup %6488  ;;  %v5126_v11 = vpop.f32.mrf.mxu0 }
 0x81a   :  { %v5167_v19 = vpop.f32.mrf.mxu1  ;;  %v6491_v26 = vpop.eup %6490  ;;  %v5868_v0 = vmul.f32 -1.442695, %v5172_v12  ;;  %v5173_v6 = vadd.f32 %v5126_v11, %v4895_v2 }
 0x81b   :  { %v6493_v41 = vpop.eup %6492  ;;  %v5128_v10 = vpop.f32.mrf.mxu0  ;;  %v4881_v16 = vmul.f32 %v6491_v26, %v6489_v13  ;;  %v5175_v31 = vadd.f32 %v5167_v19, %v4897_v30 }
 0x81c   :  { %v5169_v15 = vpop.f32.mrf.mxu1  ;;  %v4880_v18 = vmul.f32 %v6493_v41, %v8559_v9  ;;  %6494 = vpow2.f32 %v5868_v0  ;;  %v5869_v20 = vmul.f32 -1.442695, %v5173_v6 }
 0x81d   :  { %v5129_v21 = vpop.f32.mrf.mxu0  ;;  %v5870_v37 = vmul.f32 -1.442695, %v5175_v31 }
 0x81e   :  { %v5170_v23 = vpop.f32.mrf.mxu1  ;;  %v4882_v24 = vadd.f32 %v4881_v16, %v4880_v18  ;;  %6496 = vpow2.f32 %v5869_v20 }
 0x81f   :  { %6498 = vrcp.f32 %v4877_v42 }
 0x820   :  { %6500 = vtanh.f32 %v4882_v24 }
 0x821   :  { %6502 = vpow2.f32 %v5870_v37 }
 0x829   :  { %v6495_v59 = vpop.eup %6494 }
 0x82a   :  { %v5179_v45 = vadd.f32 1.0, %v6495_v59 }
 0x82b   :  { %v6497_v9 = vpop.eup %6496 }
 0x82c   :  { %v6499_v51 = vpop.eup %6498  ;;  %6504 = vrcp.f32 %v5179_v45  ;;  %v5185_v52 = vadd.f32 1.0, %v6497_v9 }
 0x82d   :  { %v6501_v60 = vpop.eup %6500  ;;  %6506 = vtanh.f32 %v5174_v25 }
 0x82e   :  { %v4884_v34 = vmul.f32 %v6501_v60, %v6499_v51  ;;  %6508 = vrcp.f32 %v5185_v52  ;;  %v6503_v17 = vpop.eup %6502 }
 0x82f   :  { %v5192_v28 = vadd.f32 1.0, %v6503_v17 }
 0x830   :  { %v4885_v14 = vpack.c.bf16 %v4884_v34, %v4884_v34 }
 0x832   :  { %5835 = vst [vmem:[%s8637_s4 + $0x1c] sm:$0xf] %v4885_v14  ;;  %4886 = vst [vmem:[#allocation2] sm:$0xf] %v4885_v14 }
 0x839   :  { %v6505_v32 = vpop.eup %6504  ;;  %v5207_v3 = vld [vmem:[#allocation2] sm:$0xf] }
 0x83a   :  { %v6507_v36 = vpop.eup %6506  ;;  %5208 = vst [vmem:[#allocation8] sm:$0xf] %v5207_v3 }
 0x83b   :  { %v6509_v38 = vpop.eup %6508 }
 0x83c   :  { %6525 = shalt.err (!%p6522_p4)
}
 0x83d   :  { %5232 = dma.vmem_to_hbm [thread:$0]  %s5230_s26, 64, %s8639_s6, [#allocation9]   ;;  %v5196_v35 = vmul.f32 %v6507_v36, %v6505_v32  ;;  %v5195_v43 = vmul.f32 %v6509_v38, %v8575_v48  ;;  %6510 = vrcp.f32 %v5192_v28 }
 0x83e   :  { %s6560_s2 = smov [#allocation10]  }
 0x83f   :  { %v5197_v44 = vadd.f32 %v5196_v35, %v5195_v43  ;;  %s5239_s30 = sshll.u32 %s6560_s2, 4  ;;  %s5240_s30 = int_to_ptr.vmem [resolvable:$true] %s5239_s30 }
 0x840   :  { %s6534_s6 = scalar_lea.vmem %s5240_s30, 64  ;;  %p6539_p6 = scmp.lt.s32.totalorder %s5240_s30, %s5240_s30 }
 0x841   :  { %6512 = vtanh.f32 %v5197_v44  ;;  %p6535_p5 = scmp.ne.s32.totalorder %s5240_s30, %s6534_s6  ;;  %p6540_p7 = scmp.lt.s32.totalorder %s6534_s6, %s6534_s6 }
 0x843   :  { %p6541_p8 = por %p6540_p7, %p6539_p6 }
 0x845   :  { %p6542_p9 = pnand %p6541_p8, %p6535_p5 }
 0x84a   :  { %v6511_v46 = vpop.eup %6510 }
 0x84e   :  { %v6513_v47 = vpop.eup %6512 }
 0x84f   :  { %v5199_v49 = vmul.f32 %v6513_v47, %v6511_v46 }
 0x851   :  { %v5200_v50 = vpack.c.bf16 %v5199_v49, %v5199_v49 }
 0x853   :  { %5203 = vst [vmem:[%s8638_s5] sm:$0xf] %v5200_v50  ;;  %5201 = vst [vmem:[#allocation4] sm:$0xf] %v5200_v50 }
 0x85a   :  { %v5209_v53 = vld [vmem:[#allocation4] sm:$0xf] }
 0x85b   :  { %5210 = vst [vmem:[#allocation10] sm:$0xf] %v5209_v53 }
 0x85c   :  { %6545 = shalt.err (!%p6542_p9)
}
 0x85d   :  { %5242 = dma.vmem_to_hbm [thread:$0]  %s5240_s30, 64, %s8640_s7, [#allocation11]  }
 0x85e   :  { %6554 = dma.done.wait [#allocation9], 64  }
 0x85f   :  { %6555 = vsyncadd [#allocation9], 4294967232 }
 0x860   :  { %6556 = dma.done.wait [#allocation11], 64  }
 0x861   :  { %6557 = vsyncadd [#allocation11], 4294967232 }
 0x862   :  { %5259 = vsyncpa [#allocation9], 1 }
 0x863   :  { %5260 = vsyncpa [#allocation11], 1 }

// kernel: _lambda_.8
= control target key start
LH: loop header
LB: loop body
LE: loop exit
PB: predicated region body
PF: predicated region fallthrough
CT: control target
= control target key end

     0   :  { %13 = vsyncpa [#allocation9], 0  ;;  %v8571_v2 = vmov 0   ;;  %s8563_s0 = inlined_call_operand.vmem [shape: bf16[8,8,1024], index: 0, kind: input, shape index: {}, may-alias: {0,1}]   ;;  %s8564_s1 = inlined_call_operand.vmem [shape: bf16[8,8,1024], index: 1, kind: input, shape index: {}, may-alias: {0,1}]   ;;  %s8565_s2 = inlined_call_operand.vmem [shape: bf16[128,512], index: 2, kind: input, shape index: {}]   ;;  %s8566_s3 = inlined_call_operand.vmem [shape: bf16[128,512], index: 3, kind: input, shape index: {}]   ;;  %s8567_s4 = inlined_call_operand.hbm [shape: bf16[8,8,128], index: 4, kind: output, shape index: {0}]   ;;  %s8568_s5 = inlined_call_operand.hbm [shape: bf16[8,8,128], index: 5, kind: output, shape index: {1}]   ;;  %s8569_s6 = inlined_call_operand.vmem [shape: bf16[8,128], index: 6, kind: output, shape index: {2}]   ;;  %s8570_s7 = inlined_call_operand.vmem [shape: bf16[8,128], index: 7, kind: output, shape index: {3}]  }
   0x1   :  { %v6570_v0 = vld [vmem:[%s8565_s2 + $0xe4] ss:$16 sps:$4 sm:$0xff]   ;;  %v6575_v1 = vld [vmem:[%s8565_s2 + $0xe0] ss:$16 sps:$4 sm:$0xff]   ;;  %372 = vmatprep.mubr.bf16.mxu0 %v8571_v2  ;;  %136 = vst [vmem:[#allocation2] sm:$0xf] %v8571_v2  ;;  %413 = vmatprep.mubr.bf16.mxu1 %v8571_v2 }
   0x2   :  { %138 = vst [vmem:[#allocation4] sm:$0xf] %v8571_v2  ;;  %340 = vmatprep.subr.bf16.mxu0 %v6570_v0  ;;  %v6585_v3 = vld [vmem:[%s8565_s2 + $0xc4] ss:$16 sps:$4 sm:$0xff]   ;;  %v6591_v4 = vld [vmem:[%s8565_s2 + $0xc0] ss:$16 sps:$4 sm:$0xff]  }
   0x3   :  { %341 = vmatpush1.bf16.msra.mxu0 %v6575_v1  ;;  %v6597_v5 = vld [vmem:[%s8565_s2 + $0xa4] ss:$16 sps:$4 sm:$0xff]   ;;  %v6602_v6 = vld [vmem:[%s8565_s2 + $0xec] ss:$16 sps:$4 sm:$0xff]   ;;  %v6607_v7 = vld [vmem:[%s8565_s2 + $0xe8] ss:$16 sps:$4 sm:$0xff]  }
   0x4   :  { %342 = vmatprep.subr.bf16.mxu0 %v6585_v3  ;;  %v6613_v8 = vld [vmem:[%s8565_s2 + $0xa0] ss:$16 sps:$4 sm:$0xff]   ;;  %381 = vmatprep.subr.bf16.mxu1 %v6602_v6  ;;  %v6620_v9 = vld [vmem:[%s8565_s2 + $0x84] ss:$16 sps:$4 sm:$0xff]   ;;  %v6626_v10 = vld [vmem:[%s8565_s2 + $0xcc] ss:$16 sps:$4 sm:$0xff]  }
   0x5   :  { %382 = vmatpush1.bf16.msra.mxu1 %v6607_v7  ;;  %v6631_v11 = vld [vmem:[%s8565_s2 + $0xc8] ss:$16 sps:$4 sm:$0xff]   ;;  %v6638_v12 = vld [vmem:[%s8565_s2 + $0x80] ss:$16 sps:$4 sm:$0xff]   ;;  %v6643_v13 = vld [vmem:[%s8565_s2 + $0x64] ss:$16 sps:$4 sm:$0xff]  }
   0x6   :  { %383 = vmatprep.subr.bf16.mxu1 %v6626_v10  ;;  %v6648_v14 = vld [vmem:[%s8565_s2 + $0xac] ss:$16 sps:$4 sm:$0xff]   ;;  %v6655_v15 = vld [vmem:[%s8565_s2 + $0xa8] ss:$16 sps:$4 sm:$0xff]   ;;  %v6667_v17 = vld [vmem:[%s8565_s2 + $0x60] ss:$16 sps:$4 sm:$0xff]  }
   0x7   :  { %343 = vmatpush1.bf16.msra.mxu0 %v6591_v4  ;;  %v6661_v16 = vld [vmem:[%s8565_s2 + $0x8c] ss:$16 sps:$4 sm:$0xff]   ;;  %v6673_v18 = vld [vmem:[%s8565_s2 + $0x44] ss:$16 sps:$4 sm:$0xff]   ;;  %v6679_v19 = vld [vmem:[%s8565_s2 + $0x88] ss:$16 sps:$4 sm:$0xff]  }
   0x8   :  { %344 = vmatprep.subr.bf16.mxu0 %v6597_v5  ;;  %v6685_v20 = vld [vmem:[%s8565_s2 + $0x6c] ss:$16 sps:$4 sm:$0xff]   ;;  %v6691_v21 = vld [vmem:[%s8565_s2 + $0x40] ss:$16 sps:$4 sm:$0xff]   ;;  %v6696_v22 = vld [vmem:[%s8565_s2 + $0x24] ss:$16 sps:$4 sm:$0xff]  }
   0x9   :  { %384 = vmatpush1.bf16.msra.mxu1 %v6631_v11  ;;  %v6703_v23 = vld [vmem:[%s8565_s2 + $0x68] ss:$16 sps:$4 sm:$0xff]   ;;  %v6709_v24 = vld [vmem:[%s8565_s2 + $0x4c] ss:$16 sps:$4 sm:$0xff]   ;;  %v6714_v25 = vld [vmem:[%s8565_s2 + $0x20] ss:$16 sps:$4 sm:$0xff]  }
   0xa   :  { %385 = vmatprep.subr.bf16.mxu1 %v6648_v14  ;;  %v6720_v26 = vld [vmem:[%s8565_s2 + $0x4] ss:$16 sps:$4 sm:$0xff]   ;;  %v6727_v27 = vld [vmem:[%s8565_s2 + $0x48] ss:$16 sps:$4 sm:$0xff]   ;;  %v6733_v28 = vld [vmem:[%s8565_s2 + $0x2c] ss:$16 sps:$4 sm:$0xff]  }
   0xb   :  { %345 = vmatpush1.bf16.msra.mxu0 %v6613_v8  ;;  %v6738_v29 = vld [vmem:[%s8565_s2] ss:$16 sps:$4 sm:$0xff]   ;;  %v6744_v30 = vld [vmem:[%s8566_s3 + $0xe4] ss:$16 sps:$4 sm:$0xff]   ;;  %v6751_v31 = vld [vmem:[%s8565_s2 + $0x28] ss:$16 sps:$4 sm:$0xff]  }
   0xc   :  { %346 = vmatprep.subr.bf16.mxu0 %v6620_v9  ;;  %v6757_v32 = vld [vmem:[%s8565_s2 + $0xc] ss:$16 sps:$4 sm:$0xff]   ;;  %v142_v33 = vld [vmem:[#allocation2] sm:$0xf]  ;;  %v6768_v35 = vld [vmem:[%s8566_s3 + $0xc4] ss:$16 sps:$4 sm:$0xff]  }
   0xd   :  { %386 = vmatpush1.bf16.msra.mxu1 %v6655_v15  ;;  %v6762_v34 = vld [vmem:[%s8566_s3 + $0xe0] ss:$16 sps:$4 sm:$0xff]   ;;  %v6775_v36 = vld [vmem:[%s8565_s2 + $0x8] ss:$16 sps:$4 sm:$0xff]   ;;  %v6781_v37 = vld [vmem:[%s8566_s3 + $0xec] ss:$16 sps:$4 sm:$0xff]  }
   0xe   :  { %387 = vmatprep.subr.bf16.mxu1 %v6661_v16  ;;  %v6786_v38 = vld [vmem:[%s8566_s3 + $0xc0] ss:$16 sps:$4 sm:$0xff]   ;;  %v6792_v39 = vld [vmem:[%s8566_s3 + $0xa4] ss:$16 sps:$4 sm:$0xff]   ;;  %v6800_v40 = vld [vmem:[%s8566_s3 + $0xe8] ss:$16 sps:$4 sm:$0xff]  }
   0xf   :  { %347 = vmatpush1.bf16.msra.mxu0 %v6638_v12  ;;  %v6806_v41 = vld [vmem:[%s8566_s3 + $0xcc] ss:$16 sps:$4 sm:$0xff]   ;;  %v6812_v42 = vld [vmem:[%s8566_s3 + $0xa0] ss:$16 sps:$4 sm:$0xff]   ;;  %v6818_v43 = vld [vmem:[%s8566_s3 + $0x84] ss:$16 sps:$4 sm:$0xff]  }
  0x10   :  { %348 = vmatprep.subr.bf16.mxu0 %v6643_v13  ;;  %v6824_v44 = vld [vmem:[%s8566_s3 + $0xc8] ss:$16 sps:$4 sm:$0xff]   ;;  %v6829_v45 = vld [vmem:[%s8566_s3 + $0x80] ss:$16 sps:$4 sm:$0xff]   ;;  %v6835_v46 = vld [vmem:[%s8566_s3 + $0xac] ss:$16 sps:$4 sm:$0xff]  }
  0x11   :  { %388 = vmatpush1.bf16.msra.mxu1 %v6679_v19  ;;  %v6841_v47 = vld [vmem:[%s8566_s3 + $0x64] ss:$16 sps:$4 sm:$0xff]   ;;  %v6847_v48 = vld [vmem:[%s8566_s3 + $0xa8] ss:$16 sps:$4 sm:$0xff]   ;;  %v6852_v49 = vld [vmem:[%s8566_s3 + $0x8c] ss:$16 sps:$4 sm:$0xff]  }
  0x12   :  { %389 = vmatprep.subr.bf16.mxu1 %v6685_v20  ;;  %v6859_v50 = vld [vmem:[%s8566_s3 + $0x60] ss:$16 sps:$4 sm:$0xff]   ;;  %v6865_v51 = vld [vmem:[%s8566_s3 + $0x44] ss:$16 sps:$4 sm:$0xff]   ;;  %v6870_v52 = vld [vmem:[%s8566_s3 + $0x88] ss:$16 sps:$4 sm:$0xff]  }
  0x13   :  { %349 = vmatpush1.bf16.msra.mxu0 %v6667_v17  ;;  %v6876_v53 = vld [vmem:[%s8566_s3 + $0x6c] ss:$16 sps:$4 sm:$0xff]   ;;  %v6883_v54 = vld [vmem:[%s8566_s3 + $0x40] ss:$16 sps:$4 sm:$0xff]   ;;  %v6889_v55 = vld [vmem:[%s8566_s3 + $0x24] ss:$16 sps:$4 sm:$0xff]  }
  0x14   :  { %350 = vmatprep.subr.bf16.mxu0 %v6673_v18  ;;  %8587 = vst [vmem:[#allocation14_spill] sm:$0xff] %v6889_v55  ;;  %v6894_v56 = vld [vmem:[%s8566_s3 + $0x68] ss:$16 sps:$4 sm:$0xff]   ;;  %v6900_v57 = vld [vmem:[%s8566_s3 + $0x4c] ss:$16 sps:$4 sm:$0xff]  }
  0x15   :  { %390 = vmatpush1.bf16.msra.mxu1 %v6703_v23  ;;  %v6907_v58 = vld [vmem:[%s8566_s3 + $0x20] ss:$16 sps:$4 sm:$0xff]   ;;  %v6913_v59 = vld [vmem:[%s8566_s3 + $0x4] ss:$16 sps:$4 sm:$0xff]   ;;  %v6918_v60 = vld [vmem:[%s8566_s3 + $0x48] ss:$16 sps:$4 sm:$0xff]  }
  0x16   :  { %391 = vmatprep.subr.bf16.mxu1 %v6709_v24  ;;  %8588 = vst [vmem:[#allocation15_spill] sm:$0xff] %v6913_v59  ;;  %v6924_v61 = vld [vmem:[%s8566_s3 + $0x2c] ss:$16 sps:$4 sm:$0xff]   ;;  %v6931_v62 = vld [vmem:[%s8566_s3] ss:$16 sps:$4 sm:$0xff]  }
  0x17   :  { %351 = vmatpush1.bf16.msra.mxu0 %v6691_v21  ;;  %v6937_v63 = vld [vmem:[%s8566_s3 + $0x28] ss:$16 sps:$4 sm:$0xff]  }
  0x18   :  { %352 = vmatprep.subr.bf16.mxu0 %v6696_v22 }
  0x19   :  { %392 = vmatpush1.bf16.msra.mxu1 %v6727_v27 }
  0x1a   :  { %393 = vmatprep.subr.bf16.mxu1 %v6733_v28 }
  0x1b   :  { %353 = vmatpush1.bf16.msra.mxu0 %v6714_v25 }
  0x1c   :  { %354 = vmatprep.subr.bf16.mxu0 %v6720_v26 }
  0x1d   :  { %394 = vmatpush1.bf16.msra.mxu1 %v6751_v31 }
  0x1e   :  { %395 = vmatprep.subr.bf16.mxu1 %v6757_v32 }
  0x1f   :  { %355 = vmatpush1.bf16.msra.mxu0 %v6738_v29 }
  0x20   :  { %655 = vmatprep.subr.bf16.mxu0 %v6744_v30 }
  0x21   :  { %396 = vmatpush1.bf16.msra.mxu1 %v6775_v36 }
  0x22   :  { %373 = vmatmul.mubr.bf16.vlgmr.msra.gmra.mxu0 %v142_v33  ;;  %696 = vmatprep.subr.bf16.mxu1 %v6781_v37 }
  0x23   :  { %656 = vmatpush1.bf16.msra.mxu0 %v6762_v34  ;;  %687 = vmatprep.mubr.bf16.mxu0 %v8571_v2 }
  0x24   :  { %657 = vmatprep.subr.bf16.mxu0 %v6768_v35  ;;  %414 = vmatmul.mubr.bf16.vlgmr.msra.gmra.mxu1 %v142_v33  ;;  %v6943_v33 = vld [vmem:[%s8566_s3 + $0xc] ss:$16 sps:$4 sm:$0xff]  }
  0x25   :  { %697 = vmatpush1.bf16.msra.mxu1 %v6800_v40  ;;  %728 = vmatprep.mubr.bf16.mxu1 %v8571_v2  ;;  %v457_v2 = vld [vmem:[#allocation4] sm:$0xf] }
  0x26   :  { %698 = vmatprep.subr.bf16.mxu1 %v6806_v41 }
  0x27   :  { %658 = vmatpush1.bf16.msra.mxu0 %v6786_v38 }
  0x28   :  { %659 = vmatprep.subr.bf16.mxu0 %v6792_v39 }
  0x29   :  { %699 = vmatpush1.bf16.msra.mxu1 %v6824_v44 }
  0x2a   :  { %700 = vmatprep.subr.bf16.mxu1 %v6835_v46 }
  0x2b   :  { %660 = vmatpush1.bf16.msra.mxu0 %v6812_v42 }
  0x2c   :  { %661 = vmatprep.subr.bf16.mxu0 %v6818_v43 }
  0x2d   :  { %701 = vmatpush1.bf16.msra.mxu1 %v6847_v48 }
  0x2e   :  { %702 = vmatprep.subr.bf16.mxu1 %v6852_v49 }
  0x2f   :  { %662 = vmatpush1.bf16.msra.mxu0 %v6829_v45 }
  0x30   :  { %663 = vmatprep.subr.bf16.mxu0 %v6841_v47 }
  0x31   :  { %703 = vmatpush1.bf16.msra.mxu1 %v6870_v52 }
  0x32   :  { %704 = vmatprep.subr.bf16.mxu1 %v6876_v53 }
  0x33   :  { %664 = vmatpush1.bf16.msra.mxu0 %v6859_v50 }
  0x34   :  { %665 = vmatprep.subr.bf16.mxu0 %v6865_v51 }
  0x35   :  { %705 = vmatpush1.bf16.msra.mxu1 %v6894_v56 }
  0x36   :  { %706 = vmatprep.subr.bf16.mxu1 %v6900_v57 }
  0x37   :  { %666 = vmatpush1.bf16.msra.mxu0 %v6883_v54 }
  0x38   :  { %667 = vmatprep.subr.bf16.mxu0 %v6889_v55  ;;  %v6951_v55 = vld [vmem:[%s8566_s3 + $0x8] ss:$16 sps:$4 sm:$0xff]  }
  0x39   :  { %707 = vmatpush1.bf16.msra.mxu1 %v6918_v60 }
  0x3a   :  { %708 = vmatprep.subr.bf16.mxu1 %v6924_v61 }
  0x3b   :  { %668 = vmatpush1.bf16.msra.mxu0 %v6907_v58 }
  0x3c   :  { %669 = vmatprep.subr.bf16.mxu0 %v6913_v59  ;;  %v8589_v59 = vmov 0  }
  0x3d   :  { %709 = vmatpush1.bf16.msra.mxu1 %v6937_v63 }
  0x3e   :  { %710 = vmatprep.subr.bf16.mxu1 %v6943_v33 }
  0x3f   :  { %670 = vmatpush1.bf16.msra.mxu0 %v6931_v62 }
  0x40   :  { %971 = vmatprep.subr.bf16.mxu0 %v6570_v0 }
  0x41   :  { %711 = vmatpush1.bf16.msra.mxu1 %v6951_v55 }
  0x42   :  { %688 = vmatmul.mubr.bf16.vlgmr.msra.gmra.mxu0 %v457_v2  ;;  %1012 = vmatprep.subr.bf16.mxu1 %v6602_v6 }
  0x43   :  { %972 = vmatpush1.bf16.msra.mxu0 %v6575_v1  ;;  %1003 = vmatprep.mubr.bf16.mxu0 %v8589_v59 }
  0x44   :  { %973 = vmatprep.subr.bf16.mxu0 %v6585_v3  ;;  %729 = vmatmul.mubr.bf16.vlgmr.msra.gmra.mxu1 %v457_v2 }
  0x45   :  { %1013 = vmatpush1.bf16.msra.mxu1 %v6607_v7  ;;  %1044 = vmatprep.mubr.bf16.mxu1 %v8589_v59 }
  0x46   :  { %1014 = vmatprep.subr.bf16.mxu1 %v6626_v10 }
  0x47   :  { %974 = vmatpush1.bf16.msra.mxu0 %v6591_v4 }
  0x48   :  { %975 = vmatprep.subr.bf16.mxu0 %v6597_v5 }
  0x49   :  { %1015 = vmatpush1.bf16.msra.mxu1 %v6631_v11 }
  0x4a   :  { %1016 = vmatprep.subr.bf16.mxu1 %v6648_v14 }
  0x4b   :  { %976 = vmatpush1.bf16.msra.mxu0 %v6613_v8 }
  0x4c   :  { %977 = vmatprep.subr.bf16.mxu0 %v6620_v9 }
  0x4d   :  { %1017 = vmatpush1.bf16.msra.mxu1 %v6655_v15 }
  0x4e   :  { %1018 = vmatprep.subr.bf16.mxu1 %v6661_v16 }
  0x4f   :  { %978 = vmatpush1.bf16.msra.mxu0 %v6638_v12 }
  0x50   :  { %979 = vmatprep.subr.bf16.mxu0 %v6643_v13 }
  0x51   :  { %1019 = vmatpush1.bf16.msra.mxu1 %v6679_v19 }
  0x52   :  { %1020 = vmatprep.subr.bf16.mxu1 %v6685_v20 }
  0x53   :  { %980 = vmatpush1.bf16.msra.mxu0 %v6667_v17 }
  0x54   :  { %981 = vmatprep.subr.bf16.mxu0 %v6673_v18 }
  0x55   :  { %1021 = vmatpush1.bf16.msra.mxu1 %v6703_v23 }
  0x56   :  { %1022 = vmatprep.subr.bf16.mxu1 %v6709_v24 }
  0x57   :  { %982 = vmatpush1.bf16.msra.mxu0 %v6691_v21 }
  0x58   :  { %983 = vmatprep.subr.bf16.mxu0 %v6696_v22 }
  0x59   :  { %1023 = vmatpush1.bf16.msra.mxu1 %v6727_v27 }
  0x5a   :  { %1024 = vmatprep.subr.bf16.mxu1 %v6733_v28 }
  0x5b   :  { %984 = vmatpush1.bf16.msra.mxu0 %v6714_v25 }
  0x5c   :  { %985 = vmatprep.subr.bf16.mxu0 %v6720_v26 }
  0x5d   :  { %1025 = vmatpush1.bf16.msra.mxu1 %v6751_v31 }
  0x5e   :  { %1026 = vmatprep.subr.bf16.mxu1 %v6757_v32 }
  0x5f   :  { %986 = vmatpush1.bf16.msra.mxu0 %v6738_v29 }
  0x60   :  { %1287 = vmatprep.subr.bf16.mxu0 %v6744_v30 }
  0x61   :  { %1027 = vmatpush1.bf16.msra.mxu1 %v6775_v36 }
  0x62   :  { %1328 = vmatprep.subr.bf16.mxu1 %v6781_v37 }
  0x63   :  { %14 = vsyncpa [#allocation11], 0  ;;  %v29_v0 = vld [vmem:[%s8563_s0] sm:$0xff]  ;;  %v31_v8 = vld [vmem:[%s8563_s0 + $0x8] sm:$0xff]  ;;  %s6523_s19 = smov [#allocation8]  }
  0x64   :  { %v144_v1 = vunpack.c.l.bf16 %v29_v0  ;;  %v145_v2 = vunpack.c.h.bf16 %v29_v0  ;;  %v147_v13 = vunpack.c.h.bf16 %v31_v8  ;;  %v146_v17 = vunpack.c.l.bf16 %v31_v8  ;;  %v5271_v25 = vld [vmem:[%s8564_s1 + $0xf0] sm:$0xff]  ;;  %s5204_s20 = sshll.u32 %s6523_s19, 4  ;;  %s5205_s20 = int_to_ptr.vmem [resolvable:$true] %s5204_s20 }
  0x65   :  { %v459_v26 = vunpack.c.l.bf16 %v5271_v25  ;;  %v460_v28 = vunpack.c.h.bf16 %v5271_v25  ;;  %p6483_p1 = scmp.lt.s32.totalorder %s5205_s20, %s5205_s20 }
  0xe2   :  { %v374_v3 = vpop.f32.mrf.mxu0 }
  0xe3   :  { %v422_v4 = vadd.f32 %v374_v3, %v144_v1 }
  0xe4   :  { %v376_v5 = vpop.f32.mrf.mxu0  ;;  %v415_v11 = vpop.f32.mrf.mxu1 }
  0xe5   :  { %v5305_v6 = vmul.f32 -1.442695, %v422_v4  ;;  %v423_v7 = vadd.f32 %v376_v5, %v145_v2  ;;  %v424_v20 = vadd.f32 %v415_v11, %v146_v17 }
  0xe6   :  { %v378_v9 = vpop.f32.mrf.mxu0  ;;  %v417_v14 = vpop.f32.mrf.mxu1 }
  0xe7   :  { %6222 = vpow2.f32 %v5305_v6  ;;  %v5306_v10 = vmul.f32 -1.442695, %v423_v7  ;;  %v425_v16 = vadd.f32 %v417_v14, %v147_v13  ;;  %v5272_v7 = vld [vmem:[%s8564_s1 + $0xf8] sm:$0xff] }
  0xe8   :  { %v379_v12 = vpop.f32.mrf.mxu0  ;;  %v419_v15 = vpop.f32.mrf.mxu1  ;;  %v461_v14 = vunpack.c.l.bf16 %v5272_v7 }
  0xe9   :  { %6224 = vpow2.f32 %v5306_v10  ;;  %v5307_v19 = vmul.f32 -1.442695, %v425_v16  ;;  %v462_v12 = vunpack.c.h.bf16 %v5272_v7  ;;  %v7207_v7 = vld [vmem:[%s8565_s2 + $0x28] ss:$16 sps:$4 sm:$0xff]  }
  0xea   :  { %v420_v18 = vpop.f32.mrf.mxu1 }
  0xeb   :  { %6226 = vpow2.f32 %v5307_v19 }
  0xec   :  { %6228 = vtanh.f32 %v424_v20 }
  0xf4   :  { %v6223_v21 = vpop.eup %6222 }
  0xf5   :  { %v429_v22 = vadd.f32 1.0, %v6223_v21 }
  0xf6   :  { %v6225_v23 = vpop.eup %6224 }
  0xf7   :  { %6230 = vrcp.f32 %v429_v22  ;;  %v435_v24 = vadd.f32 1.0, %v6225_v23 }
  0xf8   :  { %v6227_v27 = vpop.eup %6226 }
  0xf9   :  { %6232 = vrcp.f32 %v435_v24  ;;  %v6229_v29 = vpop.eup %6228  ;;  %v442_v36 = vadd.f32 1.0, %v6227_v27 }
 0x102   :  { %v689_v30 = vpop.f32.mrf.mxu0 }
 0x103   :  { %v737_v31 = vadd.f32 %v689_v30, %v459_v26 }
 0x104   :  { %v6231_v32 = vpop.eup %6230  ;;  %v691_v37 = vpop.f32.mrf.mxu0 }
 0x105   :  { %v446_v0 = vmul.f32 %v6231_v32, %v6229_v29  ;;  %v5340_v1 = vmul.f32 -1.442695, %v737_v31  ;;  %v738_v2 = vadd.f32 %v691_v37, %v460_v28  ;;  %v730_v8 = vpop.f32.mrf.mxu1 }
 0x106   :  { %v6233_v3 = vpop.eup %6232  ;;  %v693_v4 = vpop.f32.mrf.mxu0  ;;  %v739_v17 = vadd.f32 %v730_v8, %v461_v14  ;;  %v7216_v8 = vld [vmem:[%s8565_s2 + $0x4] ss:$16 sps:$4 sm:$0xff]   ;;  %v7245_v14 = vld [vmem:[%s8566_s3 + $0xec] ss:$16 sps:$4 sm:$0xff]  }
 0x107   :  { %v445_v5 = vmul.f32 0.0, %v6233_v3  ;;  %6234 = vpow2.f32 %v5340_v1  ;;  %v5341_v6 = vmul.f32 -1.442695, %v738_v2  ;;  %v732_v11 = vpop.f32.mrf.mxu1  ;;  %v7173_v1 = vld [vmem:[%s8565_s2 + $0x4c] ss:$16 sps:$4 sm:$0xff]  }
 0x108   :  { %6236 = vrcp.f32 %v442_v36  ;;  %v694_v9 = vpop.f32.mrf.mxu0  ;;  %v740_v16 = vadd.f32 %v732_v11, %v462_v12  ;;  %v7178_v2 = vld [vmem:[%s8565_s2 + $0x40] ss:$16 sps:$4 sm:$0xff]   ;;  %v7183_v3 = vld [vmem:[%s8565_s2 + $0x48] ss:$16 sps:$4 sm:$0xff]   ;;  %v7192_v4 = vld [vmem:[%s8565_s2 + $0x24] ss:$16 sps:$4 sm:$0xff]  }
 0x109   :  { %v7005_v10 = vadd.f32 %v446_v0, %v445_v5  ;;  %6238 = vpow2.f32 %v5341_v6  ;;  %v734_v13 = vpop.f32.mrf.mxu1  ;;  %v7197_v5 = vld [vmem:[%s8565_s2 + $0x2c] ss:$16 sps:$4 sm:$0xff]   ;;  %v7202_v6 = vld [vmem:[%s8565_s2 + $0x20] ss:$16 sps:$4 sm:$0xff]   ;;  %v7231_v12 = vld [vmem:[%s8565_s2 + $0x8] ss:$16 sps:$4 sm:$0xff]  }
 0x10a   :  { %v5342_v18 = vmul.f32 -1.442695, %v740_v16  ;;  %v7221_v9 = vld [vmem:[%s8565_s2 + $0xc] ss:$16 sps:$4 sm:$0xff]   ;;  %v7226_v11 = vld [vmem:[%s8565_s2] ss:$16 sps:$4 sm:$0xff]  }
 0x10b   :  { %6240 = vtanh.f32 %v7005_v10  ;;  %v735_v15 = vpop.f32.mrf.mxu1  ;;  %v7240_v13 = vld [vmem:[%s8566_s3 + $0xe4] ss:$16 sps:$4 sm:$0xff]  }
 0x10c   :  { %6242 = vtanh.f32 %v739_v17  ;;  %v33_v15 = vld [vmem:[%s8563_s0 + $0x20] sm:$0xff] }
 0x10d   :  { %6244 = vpow2.f32 %v5342_v18  ;;  %v775_v16 = vunpack.c.l.bf16 %v33_v15  ;;  %v776_v17 = vunpack.c.h.bf16 %v33_v15 }
 0x114   :  { %v6235_v19 = vpop.eup %6234 }
 0x115   :  { %v6237_v20 = vpop.eup %6236  ;;  %v744_v21 = vadd.f32 1.0, %v6235_v19 }
 0x116   :  { %v6239_v22 = vpop.eup %6238 }
 0x117   :  { %6246 = vrcp.f32 %v744_v21  ;;  %v750_v23 = vadd.f32 1.0, %v6239_v22 }
 0x118   :  { %v6241_v24 = vpop.eup %6240 }
 0x119   :  { %v449_v25 = vmul.f32 %v6241_v24, %v6237_v20  ;;  %6248 = vrcp.f32 %v750_v23  ;;  %v6243_v27 = vpop.eup %6242 }
 0x11a   :  { %v6245_v28 = vpop.eup %6244 }
 0x11b   :  { %v450_v26 = vpack.c.bf16 %v449_v25, %v449_v25  ;;  %v757_v32 = vadd.f32 1.0, %v6245_v28 }
 0x11d   :  { %451 = vst [vmem:[#allocation2] sm:$0xf] %v450_v26  ;;  %453 = vst [vmem:[#allocation8] sm:$0xf] %v450_v26  ;;  %6250 = vrcp.f32 %v757_v32 }
 0x124   :  { %v6247_v29 = vpop.eup %6246  ;;  %v773_v30 = vld [vmem:[#allocation2] sm:$0xf] }
 0x125   :  { %1004 = vmatmul.mubr.bf16.vlgmr.msra.gmra.mxu0 %v773_v30  ;;  %1045 = vmatmul.mubr.bf16.vlgmr.msra.gmra.mxu1 %v773_v30  ;;  %v761_v37 = vmul.f32 %v6247_v29, %v6243_v27  ;;  %v35_v30 = vld [vmem:[%s8563_s0 + $0x28] sm:$0xff] }
 0x126   :  { %v6249_v31 = vpop.eup %6248  ;;  %1288 = vmatpush1.bf16.msra.mxu0 %v6762_v34  ;;  %1329 = vmatpush1.bf16.msra.mxu1 %v6800_v40  ;;  %v8590_v40 = vld [vmem:[#allocation14_spill] sm:$0xff] }
 0x127   :  { %v760_v36 = vmul.f32 0.0, %v6249_v31  ;;  %1289 = vmatprep.subr.bf16.mxu0 %v6768_v35  ;;  %1330 = vmatprep.subr.bf16.mxu1 %v6806_v41  ;;  %v8591_v41 = vld [vmem:[#allocation15_spill] sm:$0xff]  ;;  %v778_v31 = vunpack.c.h.bf16 %v35_v30 }
 0x128   :  { %1319 = vmatprep.mubr.bf16.mxu0 %v8589_v59  ;;  %1360 = vmatprep.mubr.bf16.mxu1 %v8589_v59 }
 0x129   :  { %v7014_v0 = vadd.f32 %v761_v37, %v760_v36  ;;  %v777_v36 = vunpack.c.l.bf16 %v35_v30 }
 0x12a   :  { %1290 = vmatpush1.bf16.msra.mxu0 %v6786_v38  ;;  %1331 = vmatpush1.bf16.msra.mxu1 %v6824_v44  ;;  %v6251_v34 = vpop.eup %6250  ;;  %v7053_v44 = vld [vmem:[%s8565_s2 + $0xec] ss:$16 sps:$4 sm:$0xff]  }
 0x12b   :  { %6252 = vtanh.f32 %v7014_v0  ;;  %1291 = vmatprep.subr.bf16.mxu0 %v6792_v39  ;;  %1332 = vmatprep.subr.bf16.mxu1 %v6835_v46  ;;  %v7063_v46 = vld [vmem:[%s8565_s2 + $0xe8] ss:$16 sps:$4 sm:$0xff]  }
 0x12e   :  { %1292 = vmatpush1.bf16.msra.mxu0 %v6812_v42  ;;  %1333 = vmatpush1.bf16.msra.mxu1 %v6847_v48  ;;  %v7077_v48 = vld [vmem:[%s8565_s2 + $0xcc] ss:$16 sps:$4 sm:$0xff]  }
 0x12f   :  { %1293 = vmatprep.subr.bf16.mxu0 %v6818_v43  ;;  %1334 = vmatprep.subr.bf16.mxu1 %v6852_v49  ;;  %v7048_v43 = vld [vmem:[%s8565_s2 + $0xe4] ss:$16 sps:$4 sm:$0xff]   ;;  %v7082_v49 = vld [vmem:[%s8565_s2 + $0xc0] ss:$16 sps:$4 sm:$0xff]  }
 0x132   :  { %1294 = vmatpush1.bf16.msra.mxu0 %v6829_v45  ;;  %1335 = vmatpush1.bf16.msra.mxu1 %v6870_v52  ;;  %v7058_v45 = vld [vmem:[%s8565_s2 + $0xe0] ss:$16 sps:$4 sm:$0xff]   ;;  %v7101_v52 = vld [vmem:[%s8565_s2 + $0xac] ss:$16 sps:$4 sm:$0xff]  }
 0x133   :  { %1295 = vmatprep.subr.bf16.mxu0 %v6841_v47  ;;  %1336 = vmatprep.subr.bf16.mxu1 %v6876_v53  ;;  %v7072_v47 = vld [vmem:[%s8565_s2 + $0xc4] ss:$16 sps:$4 sm:$0xff]   ;;  %v7106_v53 = vld [vmem:[%s8565_s2 + $0xa0] ss:$16 sps:$4 sm:$0xff]  }
 0x136   :  { %1296 = vmatpush1.bf16.msra.mxu0 %v6859_v50  ;;  %1337 = vmatpush1.bf16.msra.mxu1 %v6894_v56  ;;  %v7087_v50 = vld [vmem:[%s8565_s2 + $0xc8] ss:$16 sps:$4 sm:$0xff]   ;;  %v7125_v56 = vld [vmem:[%s8565_s2 + $0x8c] ss:$16 sps:$4 sm:$0xff]  }
 0x137   :  { %1297 = vmatprep.subr.bf16.mxu0 %v6865_v51  ;;  %1338 = vmatprep.subr.bf16.mxu1 %v6900_v57  ;;  %v7096_v51 = vld [vmem:[%s8565_s2 + $0xa4] ss:$16 sps:$4 sm:$0xff]   ;;  %v7130_v57 = vld [vmem:[%s8565_s2 + $0x80] ss:$16 sps:$4 sm:$0xff]  }
 0x138   :  { %v6253_v35 = vpop.eup %6252 }
 0x139   :  { %v764_v38 = vmul.f32 %v6253_v35, %v6251_v34 }
 0x13a   :  { %1298 = vmatpush1.bf16.msra.mxu0 %v6883_v54  ;;  %1339 = vmatpush1.bf16.msra.mxu1 %v6918_v60  ;;  %v7111_v54 = vld [vmem:[%s8565_s2 + $0xa8] ss:$16 sps:$4 sm:$0xff]   ;;  %v7144_v60 = vld [vmem:[%s8565_s2 + $0x64] ss:$16 sps:$4 sm:$0xff]  }
 0x13b   :  { %v765_v39 = vpack.c.bf16 %v764_v38, %v764_v38  ;;  %1299 = vmatprep.subr.bf16.mxu0 %v8590_v40  ;;  %1340 = vmatprep.subr.bf16.mxu1 %v6924_v61  ;;  %v7149_v61 = vld [vmem:[%s8565_s2 + $0x6c] ss:$16 sps:$4 sm:$0xff]  }
 0x13d   :  { %766 = vst [vmem:[#allocation4] sm:$0xf] %v765_v39  ;;  %769 = vst [vmem:[#allocation10 + $0x1c] sm:$0xf] %v765_v39 }
 0x13e   :  { %1300 = vmatpush1.bf16.msra.mxu0 %v6907_v58  ;;  %1341 = vmatpush1.bf16.msra.mxu1 %v6937_v63  ;;  %v7135_v58 = vld [vmem:[%s8565_s2 + $0x88] ss:$16 sps:$4 sm:$0xff]  }
 0x13f   :  { %1301 = vmatprep.subr.bf16.mxu0 %v8591_v41  ;;  %1342 = vmatprep.subr.bf16.mxu1 %v6943_v33  ;;  %v7159_v63 = vld [vmem:[%s8565_s2 + $0x68] ss:$16 sps:$4 sm:$0xff]   ;;  %v7168_v33 = vld [vmem:[%s8565_s2 + $0x44] ss:$16 sps:$4 sm:$0xff]  }
 0x140   :  { %v5269_v41 = vld [vmem:[%s8564_s1 + $0xd0] sm:$0xff] }
 0x141   :  { %v1092_v15 = vunpack.c.h.bf16 %v5269_v41 }
 0x142   :  { %1302 = vmatpush1.bf16.msra.mxu0 %v6931_v62  ;;  %1343 = vmatpush1.bf16.msra.mxu1 %v6951_v55  ;;  %v7120_v55 = vld [vmem:[%s8565_s2 + $0x84] ss:$16 sps:$4 sm:$0xff]   ;;  %v7154_v62 = vld [vmem:[%s8565_s2 + $0x60] ss:$16 sps:$4 sm:$0xff]  }
 0x143   :  { %1603 = vmatprep.subr.bf16.mxu0 %v7048_v43  ;;  %1644 = vmatprep.subr.bf16.mxu1 %v7053_v44 }
 0x144   :  { %v1089_v42 = vld [vmem:[#allocation4] sm:$0xf] }
 0x145   :  { %1320 = vmatmul.mubr.bf16.vlgmr.msra.gmra.mxu0 %v1089_v42  ;;  %1361 = vmatmul.mubr.bf16.vlgmr.msra.gmra.mxu1 %v1089_v42  ;;  %v1091_v42 = vunpack.c.l.bf16 %v5269_v41 }
 0x146   :  { %1635 = vmatprep.mubr.bf16.mxu0 %v8589_v59  ;;  %1676 = vmatprep.mubr.bf16.mxu1 %v8589_v59 }
 0x147   :  { %1604 = vmatpush1.bf16.msra.mxu0 %v7058_v45  ;;  %1645 = vmatpush1.bf16.msra.mxu1 %v7063_v46 }
 0x148   :  { %1605 = vmatprep.subr.bf16.mxu0 %v7072_v47  ;;  %1646 = vmatprep.subr.bf16.mxu1 %v7077_v48 }
 0x14b   :  { %1606 = vmatpush1.bf16.msra.mxu0 %v7082_v49  ;;  %1647 = vmatpush1.bf16.msra.mxu1 %v7087_v50 }
 0x14c   :  { %1607 = vmatprep.subr.bf16.mxu0 %v7096_v51  ;;  %1648 = vmatprep.subr.bf16.mxu1 %v7101_v52 }
 0x14f   :  { %1608 = vmatpush1.bf16.msra.mxu0 %v7106_v53  ;;  %1649 = vmatpush1.bf16.msra.mxu1 %v7111_v54 }
 0x150   :  { %1609 = vmatprep.subr.bf16.mxu0 %v7120_v55  ;;  %1650 = vmatprep.subr.bf16.mxu1 %v7125_v56 }
 0x153   :  { %1610 = vmatpush1.bf16.msra.mxu0 %v7130_v57  ;;  %1651 = vmatpush1.bf16.msra.mxu1 %v7135_v58 }
 0x154   :  { %1611 = vmatprep.subr.bf16.mxu0 %v7144_v60  ;;  %1652 = vmatprep.subr.bf16.mxu1 %v7149_v61 }
 0x157   :  { %1612 = vmatpush1.bf16.msra.mxu0 %v7154_v62  ;;  %1653 = vmatpush1.bf16.msra.mxu1 %v7159_v63 }
 0x158   :  { %1613 = vmatprep.subr.bf16.mxu0 %v7168_v33  ;;  %1654 = vmatprep.subr.bf16.mxu1 %v7173_v1 }
 0x15b   :  { %1614 = vmatpush1.bf16.msra.mxu0 %v7178_v2  ;;  %1655 = vmatpush1.bf16.msra.mxu1 %v7183_v3 }
 0x15c   :  { %1615 = vmatprep.subr.bf16.mxu0 %v7192_v4  ;;  %1656 = vmatprep.subr.bf16.mxu1 %v7197_v5 }
 0x15f   :  { %1616 = vmatpush1.bf16.msra.mxu0 %v7202_v6  ;;  %1657 = vmatpush1.bf16.msra.mxu1 %v7207_v7 }
 0x160   :  { %1617 = vmatprep.subr.bf16.mxu0 %v7216_v8  ;;  %1658 = vmatprep.subr.bf16.mxu1 %v7221_v9 }
 0x163   :  { %1618 = vmatpush1.bf16.msra.mxu0 %v7226_v11  ;;  %1659 = vmatpush1.bf16.msra.mxu1 %v7231_v12 }
 0x164   :  { %1919 = vmatprep.subr.bf16.mxu0 %v7240_v13  ;;  %1960 = vmatprep.subr.bf16.mxu1 %v7245_v14 }
 0x1e5   :  { %v1005_v18 = vpop.f32.mrf.mxu0  ;;  %v1046_v19 = vpop.f32.mrf.mxu1 }
 0x1e6   :  { %v1053_v20 = vadd.f32 %v1005_v18, %v775_v16  ;;  %v1055_v35 = vadd.f32 %v1046_v19, %v777_v36 }
 0x1e7   :  { %v1007_v21 = vpop.f32.mrf.mxu0  ;;  %v1048_v22 = vpop.f32.mrf.mxu1 }
 0x1e8   :  { %v5375_v23 = vmul.f32 -1.442695, %v1053_v20  ;;  %v1054_v24 = vadd.f32 %v1007_v21, %v776_v17  ;;  %v1056_v32 = vadd.f32 %v1048_v22, %v778_v31 }
 0x1e9   :  { %v1009_v25 = vpop.f32.mrf.mxu0  ;;  %v1050_v26 = vpop.f32.mrf.mxu1 }
 0x1ea   :  { %6254 = vpow2.f32 %v5375_v23  ;;  %v5376_v27 = vmul.f32 -1.442695, %v1054_v24  ;;  %v5377_v37 = vmul.f32 -1.442695, %v1056_v32 }
 0x1eb   :  { %v1010_v28 = vpop.f32.mrf.mxu0  ;;  %v1051_v29 = vpop.f32.mrf.mxu1 }
 0x1ec   :  { %6256 = vpow2.f32 %v5376_v27 }
 0x1ed   :  { %6258 = vpow2.f32 %v5377_v37 }
 0x1f7   :  { %v6255_v34 = vpop.eup %6254 }
 0x1f8   :  { %v1060_v38 = vadd.f32 1.0, %v6255_v34 }
 0x1f9   :  { %v6257_v39 = vpop.eup %6256 }
 0x1fa   :  { %6260 = vrcp.f32 %v1060_v38  ;;  %v1066_v40 = vadd.f32 1.0, %v6257_v39  ;;  %v6259_v18 = vpop.eup %6258 }
 0x1fb   :  { %6262 = vtanh.f32 %v1055_v35  ;;  %v1073_v27 = vadd.f32 1.0, %v6259_v18  ;;  %v5270_v35 = vld [vmem:[%s8564_s1 + $0xd8] sm:$0xff] }
 0x1fc   :  { %6264 = vrcp.f32 %v1066_v40  ;;  %v1094_v38 = vunpack.c.h.bf16 %v5270_v35  ;;  %v1093_v40 = vunpack.c.l.bf16 %v5270_v35 }
 0x205   :  { %v1321_v16 = vpop.f32.mrf.mxu0  ;;  %v1362_v17 = vpop.f32.mrf.mxu1 }
 0x206   :  { %v1369_v20 = vadd.f32 %v1321_v16, %v1091_v42 }
 0x207   :  { %v6261_v21 = vpop.eup %6260  ;;  %v1323_v22 = vpop.f32.mrf.mxu0 }
 0x208   :  { %v1364_v19 = vpop.f32.mrf.mxu1  ;;  %v6263_v23 = vpop.eup %6262  ;;  %v5410_v24 = vmul.f32 -1.442695, %v1369_v20  ;;  %v1370_v25 = vadd.f32 %v1323_v22, %v1092_v15 }
 0x209   :  { %v6265_v26 = vpop.eup %6264  ;;  %v1325_v28 = vpop.f32.mrf.mxu0  ;;  %v1077_v30 = vmul.f32 %v6263_v23, %v6261_v21  ;;  %v1372_v39 = vadd.f32 %v1364_v19, %v1094_v38  ;;  %v7268_v19 = vld [vmem:[%s8566_s3 + $0xe0] ss:$16 sps:$4 sm:$0xff]   ;;  %v7303_v38 = vld [vmem:[%s8566_s3 + $0xa4] ss:$16 sps:$4 sm:$0xff]  }
 0x20a   :  { %v1366_v29 = vpop.f32.mrf.mxu1  ;;  %v1076_v31 = vmul.f32 %v6265_v26, %v7005_v10  ;;  %6266 = vpow2.f32 %v5410_v24  ;;  %v5411_v32 = vmul.f32 -1.442695, %v1370_v25  ;;  %v1371_v10 = vadd.f32 %v1362_v17, %v1093_v40  ;;  %v7273_v17 = vld [vmem:[%s8566_s3 + $0xe8] ss:$16 sps:$4 sm:$0xff]   ;;  %v7278_v25 = vld [vmem:[%s8566_s3 + $0xc4] ss:$16 sps:$4 sm:$0xff]  }
 0x20b   :  { %v1326_v36 = vpop.f32.mrf.mxu0  ;;  %v5412_v41 = vmul.f32 -1.442695, %v1372_v39  ;;  %v7283_v26 = vld [vmem:[%s8566_s3 + $0xcc] ss:$16 sps:$4 sm:$0xff]  }
 0x20c   :  { %v1367_v37 = vpop.f32.mrf.mxu1  ;;  %v7259_v34 = vadd.f32 %v1077_v30, %v1076_v31  ;;  %6268 = vpow2.f32 %v5411_v32  ;;  %v7290_v32 = vld [vmem:[%s8566_s3 + $0xc0] ss:$16 sps:$4 sm:$0xff]   ;;  %v7295_v36 = vld [vmem:[%s8566_s3 + $0xc8] ss:$16 sps:$4 sm:$0xff]   ;;  %v7308_v39 = vld [vmem:[%s8566_s3 + $0xac] ss:$16 sps:$4 sm:$0xff]  }
 0x20d   :  { %6270 = vrcp.f32 %v1073_v27 }
 0x20e   :  { %6272 = vtanh.f32 %v7259_v34 }
 0x20f   :  { %6274 = vpow2.f32 %v5412_v41  ;;  %v7324_v41 = vld [vmem:[%s8566_s3 + $0xa8] ss:$16 sps:$4 sm:$0xff]  }
 0x217   :  { %v6267_v42 = vpop.eup %6266 }
 0x218   :  { %v1376_v15 = vadd.f32 1.0, %v6267_v42  ;;  %v7332_v42 = vld [vmem:[%s8566_s3 + $0x84] ss:$16 sps:$4 sm:$0xff]  }
 0x219   :  { %v6269_v16 = vpop.eup %6268 }
 0x21a   :  { %v6271_v18 = vpop.eup %6270  ;;  %6276 = vrcp.f32 %v1376_v15  ;;  %v1382_v20 = vadd.f32 1.0, %v6269_v16  ;;  %v7344_v15 = vld [vmem:[%s8566_s3 + $0x80] ss:$16 sps:$4 sm:$0xff]   ;;  %v7349_v16 = vld [vmem:[%s8566_s3 + $0x88] ss:$16 sps:$4 sm:$0xff]  }
 0x21b   :  { %v6273_v21 = vpop.eup %6272  ;;  %6278 = vtanh.f32 %v1371_v10  ;;  %v7337_v10 = vld [vmem:[%s8566_s3 + $0x8c] ss:$16 sps:$4 sm:$0xff]  }
 0x21c   :  { %v1080_v22 = vmul.f32 %v6273_v21, %v6271_v18  ;;  %6280 = vrcp.f32 %v1382_v20  ;;  %v6275_v24 = vpop.eup %6274  ;;  %v7356_v18 = vld [vmem:[%s8566_s3 + $0x64] ss:$16 sps:$4 sm:$0xff]   ;;  %v7361_v20 = vld [vmem:[%s8566_s3 + $0x6c] ss:$16 sps:$4 sm:$0xff]   ;;  %v7368_v21 = vld [vmem:[%s8566_s3 + $0x60] ss:$16 sps:$4 sm:$0xff]  }
 0x21d   :  { %v1389_v31 = vadd.f32 1.0, %v6275_v24  ;;  %v7385_v24 = vld [vmem:[%s8566_s3 + $0x4c] ss:$16 sps:$4 sm:$0xff]  }
 0x21e   :  { %v1081_v23 = vpack.c.bf16 %v1080_v22, %v1080_v22  ;;  %v7373_v22 = vld [vmem:[%s8566_s3 + $0x68] ss:$16 sps:$4 sm:$0xff]   ;;  %8594 = vst [vmem:[#allocation16_spill] sm:$0xff] %v7385_v24 }
 0x21f   :  { %6282 = vrcp.f32 %v1389_v31  ;;  %8592 = vst [vmem:[#allocation14_spill] sm:$0xff] %v7373_v22  ;;  %v7409_v31 = vld [vmem:[%s8566_s3 + $0x2c] ss:$16 sps:$4 sm:$0xff]  }
 0x220   :  { %1082 = vst [vmem:[#allocation2] sm:$0xf] %v1081_v23  ;;  %1085 = vst [vmem:[#allocation8 + $0x4] sm:$0xf] %v1081_v23  ;;  %v7380_v23 = vld [vmem:[%s8566_s3 + $0x44] ss:$16 sps:$4 sm:$0xff]  }
 0x221   :  { %8593 = vst [vmem:[#allocation15_spill] sm:$0xff] %v7380_v23  ;;  %8595 = vst [vmem:[#allocation17_spill] sm:$0xff] %v7409_v31 }
 0x227   :  { %v6277_v27 = vpop.eup %6276  ;;  %v1405_v28 = vld [vmem:[#allocation2] sm:$0xf] }
 0x228   :  { %v6279_v29 = vpop.eup %6278  ;;  %1636 = vmatmul.mubr.bf16.vlgmr.msra.gmra.mxu0 %v1405_v28  ;;  %1677 = vmatmul.mubr.bf16.vlgmr.msra.gmra.mxu1 %v1405_v28  ;;  %v7397_v28 = vld [vmem:[%s8566_s3 + $0x48] ss:$16 sps:$4 sm:$0xff]  }
 0x229   :  { %v6281_v30 = vpop.eup %6280  ;;  %1920 = vmatpush1.bf16.msra.mxu0 %v7268_v19  ;;  %1961 = vmatpush1.bf16.msra.mxu1 %v7273_v17  ;;  %v1393_v37 = vmul.f32 %v6279_v29, %v6277_v27  ;;  %v7392_v27 = vld [vmem:[%s8566_s3 + $0x40] ss:$16 sps:$4 sm:$0xff]  }
 0x22a   :  { %v1392_v35 = vmul.f32 %v6281_v30, %v7014_v0  ;;  %1921 = vmatprep.subr.bf16.mxu0 %v7278_v25  ;;  %1962 = vmatprep.subr.bf16.mxu1 %v7283_v26  ;;  %v7319_v0 = vld [vmem:[%s8566_s3 + $0xa0] ss:$16 sps:$4 sm:$0xff]   ;;  %v7404_v30 = vld [vmem:[%s8566_s3 + $0x24] ss:$16 sps:$4 sm:$0xff]  }
 0x22b   :  { %1951 = vmatprep.mubr.bf16.mxu0 %v8589_v59  ;;  %1992 = vmatprep.mubr.bf16.mxu1 %v8589_v59 }
 0x22c   :  { %v7312_v40 = vadd.f32 %v1393_v37, %v1392_v35  ;;  %v6283_v29 = vpop.eup %6282 }
 0x22d   :  { %1922 = vmatpush1.bf16.msra.mxu0 %v7290_v32  ;;  %1963 = vmatpush1.bf16.msra.mxu1 %v7295_v36 }
 0x22e   :  { %6284 = vtanh.f32 %v7312_v40  ;;  %1923 = vmatprep.subr.bf16.mxu0 %v7303_v38  ;;  %1964 = vmatprep.subr.bf16.mxu1 %v7308_v39 }
 0x231   :  { %1924 = vmatpush1.bf16.msra.mxu0 %v7319_v0  ;;  %1965 = vmatpush1.bf16.msra.mxu1 %v7324_v41 }
 0x232   :  { %1925 = vmatprep.subr.bf16.mxu0 %v7332_v42  ;;  %1966 = vmatprep.subr.bf16.mxu1 %v7337_v10 }
 0x235   :  { %1926 = vmatpush1.bf16.msra.mxu0 %v7344_v15  ;;  %1967 = vmatpush1.bf16.msra.mxu1 %v7349_v16 }
 0x236   :  { %1927 = vmatprep.subr.bf16.mxu0 %v7356_v18  ;;  %1968 = vmatprep.subr.bf16.mxu1 %v7361_v20 }
 0x239   :  { %1928 = vmatpush1.bf16.msra.mxu0 %v7368_v21  ;;  %1969 = vmatpush1.bf16.msra.mxu1 %v7373_v22 }
 0x23a   :  { %1929 = vmatprep.subr.bf16.mxu0 %v7380_v23  ;;  %1970 = vmatprep.subr.bf16.mxu1 %v7385_v24  ;;  %v7416_v24 = vld [vmem:[%s8566_s3 + $0x20] ss:$16 sps:$4 sm:$0xff]   ;;  %v7421_v23 = vld [vmem:[%s8566_s3 + $0x28] ss:$16 sps:$4 sm:$0xff]  }
 0x23b   :  { %v6285_v37 = vpop.eup %6284 }
 0x23c   :  { %v1396_v35 = vmul.f32 %v6285_v37, %v6283_v29  ;;  %v7428_v29 = vld [vmem:[%s8566_s3 + $0x4] ss:$16 sps:$4 sm:$0xff]   ;;  %v7433_v37 = vld [vmem:[%s8566_s3 + $0xc] ss:$16 sps:$4 sm:$0xff]  }
 0x23d   :  { %1930 = vmatpush1.bf16.msra.mxu0 %v7392_v27  ;;  %1971 = vmatpush1.bf16.msra.mxu1 %v7397_v28 }
 0x23e   :  { %v1397_v22 = vpack.c.bf16 %v1396_v35, %v1396_v35  ;;  %1931 = vmatprep.subr.bf16.mxu0 %v7404_v30  ;;  %1972 = vmatprep.subr.bf16.mxu1 %v7409_v31  ;;  %v7440_v35 = vld [vmem:[%s8566_s3] ss:$16 sps:$4 sm:$0xff]   ;;  %v7445_v31 = vld [vmem:[%s8566_s3 + $0x8] ss:$16 sps:$4 sm:$0xff]  }
 0x240   :  { %1398 = vst [vmem:[#allocation4] sm:$0xf] %v1397_v22  ;;  %1401 = vst [vmem:[#allocation10 + $0x18] sm:$0xf] %v1397_v22 }
 0x241   :  { %1932 = vmatpush1.bf16.msra.mxu0 %v7416_v24  ;;  %1973 = vmatpush1.bf16.msra.mxu1 %v7421_v23 }
 0x242   :  { %1933 = vmatprep.subr.bf16.mxu0 %v7428_v29  ;;  %1974 = vmatprep.subr.bf16.mxu1 %v7433_v37 }
 0x245   :  { %1934 = vmatpush1.bf16.msra.mxu0 %v7440_v35  ;;  %1975 = vmatpush1.bf16.msra.mxu1 %v7445_v31 }
 0x246   :  { %2235 = vmatprep.subr.bf16.mxu0 %v7048_v43  ;;  %2276 = vmatprep.subr.bf16.mxu1 %v7053_v44  ;;  %v37_v43 = vld [vmem:[%s8563_s0 + $0x40] sm:$0xff] }
 0x247   :  { %v1721_v22 = vld [vmem:[#allocation4] sm:$0xf]  ;;  %v1407_v44 = vunpack.c.l.bf16 %v37_v43 }
 0x248   :  { %1952 = vmatmul.mubr.bf16.vlgmr.msra.gmra.mxu0 %v1721_v22  ;;  %1993 = vmatmul.mubr.bf16.vlgmr.msra.gmra.mxu1 %v1721_v22 }
 0x249   :  { %2236 = vmatpush1.bf16.msra.mxu0 %v7058_v45  ;;  %2277 = vmatpush1.bf16.msra.mxu1 %v7063_v46  ;;  %v1408_v45 = vunpack.c.h.bf16 %v37_v43 }
 0x24a   :  { %2237 = vmatprep.subr.bf16.mxu0 %v7072_v47  ;;  %2278 = vmatprep.subr.bf16.mxu1 %v7077_v48 }
 0x24b   :  { %2267 = vmatprep.mubr.bf16.mxu0 %v8589_v59  ;;  %2308 = vmatprep.mubr.bf16.mxu1 %v8589_v59 }
 0x24d   :  { %2238 = vmatpush1.bf16.msra.mxu0 %v7082_v49  ;;  %2279 = vmatpush1.bf16.msra.mxu1 %v7087_v50 }
 0x24e   :  { %2239 = vmatprep.subr.bf16.mxu0 %v7096_v51  ;;  %2280 = vmatprep.subr.bf16.mxu1 %v7101_v52 }
 0x251   :  { %2240 = vmatpush1.bf16.msra.mxu0 %v7106_v53  ;;  %2281 = vmatpush1.bf16.msra.mxu1 %v7111_v54 }
 0x252   :  { %2241 = vmatprep.subr.bf16.mxu0 %v7120_v55  ;;  %2282 = vmatprep.subr.bf16.mxu1 %v7125_v56 }
 0x255   :  { %2242 = vmatpush1.bf16.msra.mxu0 %v7130_v57  ;;  %2283 = vmatpush1.bf16.msra.mxu1 %v7135_v58  ;;  %v39_v58 = vld [vmem:[%s8563_s0 + $0x48] sm:$0xff] }
 0x256   :  { %2243 = vmatprep.subr.bf16.mxu0 %v7144_v60  ;;  %2284 = vmatprep.subr.bf16.mxu1 %v7149_v61  ;;  %v1410_v60 = vunpack.c.h.bf16 %v39_v58 }
 0x259   :  { %2244 = vmatpush1.bf16.msra.mxu0 %v7154_v62  ;;  %2285 = vmatpush1.bf16.msra.mxu1 %v7159_v63  ;;  %v1409_v62 = vunpack.c.l.bf16 %v39_v58 }
 0x25a   :  { %2245 = vmatprep.subr.bf16.mxu0 %v7168_v33  ;;  %2286 = vmatprep.subr.bf16.mxu1 %v7173_v1 }
 0x25d   :  { %2246 = vmatpush1.bf16.msra.mxu0 %v7178_v2  ;;  %2287 = vmatpush1.bf16.msra.mxu1 %v7183_v3 }
 0x25e   :  { %2247 = vmatprep.subr.bf16.mxu0 %v7192_v4  ;;  %2288 = vmatprep.subr.bf16.mxu1 %v7197_v5  ;;  %v5267_v5 = vld [vmem:[%s8564_s1 + $0xb0] sm:$0xff] }
 0x261   :  { %2248 = vmatpush1.bf16.msra.mxu0 %v7202_v6  ;;  %2289 = vmatpush1.bf16.msra.mxu1 %v7207_v7  ;;  %v1723_v6 = vunpack.c.l.bf16 %v5267_v5  ;;  %v1724_v7 = vunpack.c.h.bf16 %v5267_v5 }
 0x262   :  { %2249 = vmatprep.subr.bf16.mxu0 %v7216_v8  ;;  %2290 = vmatprep.subr.bf16.mxu1 %v7221_v9 }
 0x265   :  { %2250 = vmatpush1.bf16.msra.mxu0 %v7226_v11  ;;  %2291 = vmatpush1.bf16.msra.mxu1 %v7231_v12 }
 0x266   :  { %2551 = vmatprep.subr.bf16.mxu0 %v7240_v13  ;;  %2592 = vmatprep.subr.bf16.mxu1 %v7245_v14 }
 0x2e8   :  { %v1637_v46 = vpop.f32.mrf.mxu0  ;;  %v1678_v47 = vpop.f32.mrf.mxu1 }
 0x2e9   :  { %v1685_v48 = vadd.f32 %v1637_v46, %v1407_v44  ;;  %v1687_v1 = vadd.f32 %v1678_v47, %v1409_v62 }
 0x2ea   :  { %v1639_v49 = vpop.f32.mrf.mxu0  ;;  %v1680_v50 = vpop.f32.mrf.mxu1 }
 0x2eb   :  { %v5445_v51 = vmul.f32 -1.442695, %v1685_v48  ;;  %v1686_v52 = vadd.f32 %v1639_v49, %v1408_v45  ;;  %v1688_v61 = vadd.f32 %v1680_v50, %v1410_v60 }
 0x2ec   :  { %v1641_v53 = vpop.f32.mrf.mxu0  ;;  %v1682_v54 = vpop.f32.mrf.mxu1 }
 0x2ed   :  { %6286 = vpow2.f32 %v5445_v51  ;;  %v5446_v55 = vmul.f32 -1.442695, %v1686_v52  ;;  %v5447_v63 = vmul.f32 -1.442695, %v1688_v61 }
 0x2ee   :  { %v1642_v56 = vpop.f32.mrf.mxu0  ;;  %v1683_v57 = vpop.f32.mrf.mxu1 }
 0x2ef   :  { %6288 = vpow2.f32 %v5446_v55  ;;  %v5268_v56 = vld [vmem:[%s8564_s1 + $0xb8] sm:$0xff] }
 0x2f0   :  { %6290 = vpow2.f32 %v5447_v63  ;;  %v1726_v57 = vunpack.c.h.bf16 %v5268_v56  ;;  %v1725_v60 = vunpack.c.l.bf16 %v5268_v56  ;;  %v7722_v56 = vld [vmem:[%s8565_s2] ss:$16 sps:$4 sm:$0xff]  }
 0x2fa   :  { %v6287_v33 = vpop.eup %6286 }
 0x2fb   :  { %v1692_v2 = vadd.f32 1.0, %v6287_v33 }
 0x2fc   :  { %v6289_v3 = vpop.eup %6288 }
 0x2fd   :  { %6292 = vrcp.f32 %v1692_v2  ;;  %v1698_v4 = vadd.f32 1.0, %v6289_v3  ;;  %v6291_v11 = vpop.eup %6290 }
 0x2fe   :  { %6294 = vtanh.f32 %v1687_v1  ;;  %v1705_v47 = vadd.f32 1.0, %v6291_v11 }
 0x2ff   :  { %6296 = vrcp.f32 %v1698_v4 }
 0x308   :  { %v1953_v8 = vpop.f32.mrf.mxu0  ;;  %v1994_v9 = vpop.f32.mrf.mxu1 }
 0x309   :  { %v2001_v12 = vadd.f32 %v1953_v8, %v1723_v6 }
 0x30a   :  { %v6293_v13 = vpop.eup %6292  ;;  %v1955_v14 = vpop.f32.mrf.mxu0 }
 0x30b   :  { %v1996_v22 = vpop.f32.mrf.mxu1  ;;  %v6295_v43 = vpop.eup %6294  ;;  %v5480_v44 = vmul.f32 -1.442695, %v2001_v12  ;;  %v2002_v45 = vadd.f32 %v1955_v14, %v1724_v7 }
 0x30c   :  { %v6297_v46 = vpop.eup %6296  ;;  %v1957_v48 = vpop.f32.mrf.mxu0  ;;  %v1709_v50 = vmul.f32 %v6295_v43, %v6293_v13  ;;  %v2004_v58 = vadd.f32 %v1996_v22, %v1726_v57  ;;  %v7650_v43 = vld [vmem:[%s8565_s2 + $0x60] ss:$16 sps:$4 sm:$0xff]   ;;  %v7727_v57 = vld [vmem:[%s8565_s2 + $0x8] ss:$16 sps:$4 sm:$0xff]  }
 0x30d   :  { %v1998_v49 = vpop.f32.mrf.mxu1  ;;  %v1708_v51 = vmul.f32 %v6297_v46, %v7259_v34  ;;  %6298 = vpow2.f32 %v5480_v44  ;;  %v5481_v52 = vmul.f32 -1.442695, %v2002_v45  ;;  %v2003_v34 = vadd.f32 %v1994_v9, %v1725_v60  ;;  %v7655_v44 = vld [vmem:[%s8565_s2 + $0x68] ss:$16 sps:$4 sm:$0xff]   ;;  %v7664_v45 = vld [vmem:[%s8565_s2 + $0x44] ss:$16 sps:$4 sm:$0xff]  }
 0x30e   :  { %v1958_v53 = vpop.f32.mrf.mxu0  ;;  %v5482_v61 = vmul.f32 -1.442695, %v2004_v58  ;;  %v7669_v46 = vld [vmem:[%s8565_s2 + $0x4c] ss:$16 sps:$4 sm:$0xff]   ;;  %v7679_v48 = vld [vmem:[%s8565_s2 + $0x48] ss:$16 sps:$4 sm:$0xff]  }
 0x30f   :  { %v1999_v54 = vpop.f32.mrf.mxu1  ;;  %v7497_v55 = vadd.f32 %v1709_v50, %v1708_v51  ;;  %6300 = vpow2.f32 %v5481_v52  ;;  %v7688_v49 = vld [vmem:[%s8565_s2 + $0x24] ss:$16 sps:$4 sm:$0xff]   ;;  %v7693_v50 = vld [vmem:[%s8565_s2 + $0x2c] ss:$16 sps:$4 sm:$0xff]   ;;  %v7698_v51 = vld [vmem:[%s8565_s2 + $0x20] ss:$16 sps:$4 sm:$0xff]  }
 0x310   :  { %6302 = vrcp.f32 %v1705_v47  ;;  %v7674_v47 = vld [vmem:[%s8565_s2 + $0x40] ss:$16 sps:$4 sm:$0xff]   ;;  %v7703_v52 = vld [vmem:[%s8565_s2 + $0x28] ss:$16 sps:$4 sm:$0xff]   ;;  %v7712_v53 = vld [vmem:[%s8565_s2 + $0x4] ss:$16 sps:$4 sm:$0xff]  }
 0x311   :  { %6304 = vtanh.f32 %v7497_v55  ;;  %v7717_v54 = vld [vmem:[%s8565_s2 + $0xc] ss:$16 sps:$4 sm:$0xff]   ;;  %v7736_v58 = vld [vmem:[%s8566_s3 + $0xe4] ss:$16 sps:$4 sm:$0xff]  }
 0x312   :  { %6306 = vpow2.f32 %v5482_v61  ;;  %v7741_v60 = vld [vmem:[%s8566_s3 + $0xec] ss:$16 sps:$4 sm:$0xff]   ;;  %v41_v61 = vld [vmem:[%s8563_s0 + $0x60] sm:$0xff] }
 0x31a   :  { %v6299_v62 = vpop.eup %6298 }
 0x31b   :  { %v2008_v63 = vadd.f32 1.0, %v6299_v62  ;;  %v2039_v62 = vunpack.c.l.bf16 %v41_v61 }
 0x31c   :  { %v6301_v33 = vpop.eup %6300 }
 0x31d   :  { %v6303_v1 = vpop.eup %6302  ;;  %6308 = vrcp.f32 %v2008_v63  ;;  %v2014_v2 = vadd.f32 1.0, %v6301_v33 }
 0x31e   :  { %v6305_v3 = vpop.eup %6304  ;;  %6310 = vtanh.f32 %v2003_v34  ;;  %v2040_v34 = vunpack.c.h.bf16 %v41_v61 }
 0x31f   :  { %v1712_v4 = vmul.f32 %v6305_v3, %v6303_v1  ;;  %6312 = vrcp.f32 %v2014_v2  ;;  %v6307_v6 = vpop.eup %6306 }
 0x320   :  { %v2021_v12 = vadd.f32 1.0, %v6307_v6 }
 0x321   :  { %v1713_v5 = vpack.c.bf16 %v1712_v4, %v1712_v4 }
 0x322   :  { %6314 = vrcp.f32 %v2021_v12  ;;  %v43_v12 = vld [vmem:[%s8563_s0 + $0x68] sm:$0xff] }
 0x323   :  { %1714 = vst [vmem:[#allocation2] sm:$0xf] %v1713_v5  ;;  %1717 = vst [vmem:[#allocation8 + $0x8] sm:$0xf] %v1713_v5 }
 0x32a   :  { %v6309_v7 = vpop.eup %6308  ;;  %v2037_v8 = vld [vmem:[#allocation2] sm:$0xf] }
 0x32b   :  { %v6311_v11 = vpop.eup %6310  ;;  %2268 = vmatmul.mubr.bf16.vlgmr.msra.gmra.mxu0 %v2037_v8  ;;  %2309 = vmatmul.mubr.bf16.vlgmr.msra.gmra.mxu1 %v2037_v8 }
 0x32c   :  { %v6313_v9 = vpop.eup %6312  ;;  %2552 = vmatpush1.bf16.msra.mxu0 %v7268_v19  ;;  %2593 = vmatpush1.bf16.msra.mxu1 %v7273_v17  ;;  %v2025_v13 = vmul.f32 %v6311_v11, %v6309_v7  ;;  %v8596_v19 = vld [vmem:[#allocation14_spill] sm:$0xff] }
 0x32d   :  { %v2024_v14 = vmul.f32 %v6313_v9, %v7312_v40  ;;  %2553 = vmatprep.subr.bf16.mxu0 %v7278_v25  ;;  %2594 = vmatprep.subr.bf16.mxu1 %v7283_v26  ;;  %v8597_v25 = vld [vmem:[#allocation15_spill] sm:$0xff]  ;;  %v8598_v26 = vld [vmem:[#allocation16_spill] sm:$0xff] }
 0x32e   :  { %2583 = vmatprep.mubr.bf16.mxu0 %v8589_v59  ;;  %2624 = vmatprep.mubr.bf16.mxu1 %v8589_v59 }
 0x32f   :  { %v7510_v22 = vadd.f32 %v2025_v13, %v2024_v14  ;;  %v6315_v17 = vpop.eup %6314  ;;  %v2042_v13 = vunpack.c.h.bf16 %v43_v12 }
 0x330   :  { %2554 = vmatpush1.bf16.msra.mxu0 %v7290_v32  ;;  %2595 = vmatpush1.bf16.msra.mxu1 %v7295_v36 }
 0x331   :  { %6316 = vtanh.f32 %v7510_v22  ;;  %2555 = vmatprep.subr.bf16.mxu0 %v7303_v38  ;;  %2596 = vmatprep.subr.bf16.mxu1 %v7308_v39  ;;  %v8599_v39 = vld [vmem:[#allocation17_spill] sm:$0xff] }
 0x334   :  { %2556 = vmatpush1.bf16.msra.mxu0 %v7319_v0  ;;  %2597 = vmatpush1.bf16.msra.mxu1 %v7324_v41  ;;  %v7544_v0 = vld [vmem:[%s8565_s2 + $0xe4] ss:$16 sps:$4 sm:$0xff]   ;;  %v7549_v41 = vld [vmem:[%s8565_s2 + $0xec] ss:$16 sps:$4 sm:$0xff]  }
 0x335   :  { %2557 = vmatprep.subr.bf16.mxu0 %v7332_v42  ;;  %2598 = vmatprep.subr.bf16.mxu1 %v7337_v10  ;;  %v7554_v42 = vld [vmem:[%s8565_s2 + $0xe0] ss:$16 sps:$4 sm:$0xff]   ;;  %v7559_v10 = vld [vmem:[%s8565_s2 + $0xe8] ss:$16 sps:$4 sm:$0xff]  }
 0x338   :  { %2558 = vmatpush1.bf16.msra.mxu0 %v7344_v15  ;;  %2599 = vmatpush1.bf16.msra.mxu1 %v7349_v16  ;;  %v7568_v15 = vld [vmem:[%s8565_s2 + $0xc4] ss:$16 sps:$4 sm:$0xff]   ;;  %v7573_v16 = vld [vmem:[%s8565_s2 + $0xcc] ss:$16 sps:$4 sm:$0xff]  }
 0x339   :  { %2559 = vmatprep.subr.bf16.mxu0 %v7356_v18  ;;  %2600 = vmatprep.subr.bf16.mxu1 %v7361_v20  ;;  %v7578_v18 = vld [vmem:[%s8565_s2 + $0xc0] ss:$16 sps:$4 sm:$0xff]   ;;  %v7583_v20 = vld [vmem:[%s8565_s2 + $0xc8] ss:$16 sps:$4 sm:$0xff]  }
 0x33c   :  { %2560 = vmatpush1.bf16.msra.mxu0 %v7368_v21  ;;  %2601 = vmatpush1.bf16.msra.mxu1 %v8596_v19  ;;  %v7592_v21 = vld [vmem:[%s8565_s2 + $0xa4] ss:$16 sps:$4 sm:$0xff]   ;;  %v2041_v19 = vunpack.c.l.bf16 %v43_v12 }
 0x33d   :  { %2561 = vmatprep.subr.bf16.mxu0 %v8597_v25  ;;  %2602 = vmatprep.subr.bf16.mxu1 %v8598_v26 }
 0x33e   :  { %v6317_v32 = vpop.eup %6316 }
 0x33f   :  { %v2028_v36 = vmul.f32 %v6317_v32, %v6315_v17 }
 0x340   :  { %2562 = vmatpush1.bf16.msra.mxu0 %v7392_v27  ;;  %2603 = vmatpush1.bf16.msra.mxu1 %v7397_v28  ;;  %v7607_v27 = vld [vmem:[%s8565_s2 + $0xa8] ss:$16 sps:$4 sm:$0xff]   ;;  %v7616_v28 = vld [vmem:[%s8565_s2 + $0x84] ss:$16 sps:$4 sm:$0xff]  }
 0x341   :  { %v2029_v38 = vpack.c.bf16 %v2028_v36, %v2028_v36  ;;  %2563 = vmatprep.subr.bf16.mxu0 %v7404_v30  ;;  %2604 = vmatprep.subr.bf16.mxu1 %v8599_v39  ;;  %v7621_v30 = vld [vmem:[%s8565_s2 + $0x8c] ss:$16 sps:$4 sm:$0xff]   ;;  %v5265_v39 = vld [vmem:[%s8564_s1 + $0x90] sm:$0xff] }
 0x342   :  { %v2356_v61 = vunpack.c.h.bf16 %v5265_v39 }
 0x343   :  { %2030 = vst [vmem:[#allocation4] sm:$0xf] %v2029_v38  ;;  %2033 = vst [vmem:[#allocation10 + $0x14] sm:$0xf] %v2029_v38 }
 0x344   :  { %2564 = vmatpush1.bf16.msra.mxu0 %v7416_v24  ;;  %2605 = vmatpush1.bf16.msra.mxu1 %v7421_v23  ;;  %v7597_v23 = vld [vmem:[%s8565_s2 + $0xac] ss:$16 sps:$4 sm:$0xff]   ;;  %v7602_v24 = vld [vmem:[%s8565_s2 + $0xa0] ss:$16 sps:$4 sm:$0xff]  }
 0x345   :  { %2565 = vmatprep.subr.bf16.mxu0 %v7428_v29  ;;  %2606 = vmatprep.subr.bf16.mxu1 %v7433_v37  ;;  %v7631_v29 = vld [vmem:[%s8565_s2 + $0x88] ss:$16 sps:$4 sm:$0xff]   ;;  %v7640_v37 = vld [vmem:[%s8565_s2 + $0x64] ss:$16 sps:$4 sm:$0xff]  }
 0x348   :  { %2566 = vmatpush1.bf16.msra.mxu0 %v7440_v35  ;;  %2607 = vmatpush1.bf16.msra.mxu1 %v7445_v31  ;;  %v7626_v31 = vld [vmem:[%s8565_s2 + $0x80] ss:$16 sps:$4 sm:$0xff]   ;;  %v7645_v35 = vld [vmem:[%s8565_s2 + $0x6c] ss:$16 sps:$4 sm:$0xff]  }
 0x349   :  { %2867 = vmatprep.subr.bf16.mxu0 %v7544_v0  ;;  %2908 = vmatprep.subr.bf16.mxu1 %v7549_v41 }
 0x34a   :  { %v2353_v40 = vld [vmem:[#allocation4] sm:$0xf] }
 0x34b   :  { %2584 = vmatmul.mubr.bf16.vlgmr.msra.gmra.mxu0 %v2353_v40  ;;  %2625 = vmatmul.mubr.bf16.vlgmr.msra.gmra.mxu1 %v2353_v40  ;;  %v2355_v40 = vunpack.c.l.bf16 %v5265_v39 }
 0x34c   :  { %2899 = vmatprep.mubr.bf16.mxu0 %v8589_v59  ;;  %2940 = vmatprep.mubr.bf16.mxu1 %v8589_v59 }
 0x34d   :  { %2868 = vmatpush1.bf16.msra.mxu0 %v7554_v42  ;;  %2909 = vmatpush1.bf16.msra.mxu1 %v7559_v10 }
 0x34e   :  { %2869 = vmatprep.subr.bf16.mxu0 %v7568_v15  ;;  %2910 = vmatprep.subr.bf16.mxu1 %v7573_v16 }
 0x351   :  { %2870 = vmatpush1.bf16.msra.mxu0 %v7578_v18  ;;  %2911 = vmatpush1.bf16.msra.mxu1 %v7583_v20 }
 0x352   :  { %2871 = vmatprep.subr.bf16.mxu0 %v7592_v21  ;;  %2912 = vmatprep.subr.bf16.mxu1 %v7597_v23 }
 0x355   :  { %2872 = vmatpush1.bf16.msra.mxu0 %v7602_v24  ;;  %2913 = vmatpush1.bf16.msra.mxu1 %v7607_v27 }
 0x356   :  { %2873 = vmatprep.subr.bf16.mxu0 %v7616_v28  ;;  %2914 = vmatprep.subr.bf16.mxu1 %v7621_v30 }
 0x359   :  { %2874 = vmatpush1.bf16.msra.mxu0 %v7626_v31  ;;  %2915 = vmatpush1.bf16.msra.mxu1 %v7631_v29 }
 0x35a   :  { %2875 = vmatprep.subr.bf16.mxu0 %v7640_v37  ;;  %2916 = vmatprep.subr.bf16.mxu1 %v7645_v35 }
 0x35d   :  { %2876 = vmatpush1.bf16.msra.mxu0 %v7650_v43  ;;  %2917 = vmatpush1.bf16.msra.mxu1 %v7655_v44 }
 0x35e   :  { %2877 = vmatprep.subr.bf16.mxu0 %v7664_v45  ;;  %2918 = vmatprep.subr.bf16.mxu1 %v7669_v46 }
 0x361   :  { %2878 = vmatpush1.bf16.msra.mxu0 %v7674_v47  ;;  %2919 = vmatpush1.bf16.msra.mxu1 %v7679_v48 }
 0x362   :  { %2879 = vmatprep.subr.bf16.mxu0 %v7688_v49  ;;  %2920 = vmatprep.subr.bf16.mxu1 %v7693_v50 }
 0x365   :  { %2880 = vmatpush1.bf16.msra.mxu0 %v7698_v51  ;;  %2921 = vmatpush1.bf16.msra.mxu1 %v7703_v52 }
 0x366   :  { %2881 = vmatprep.subr.bf16.mxu0 %v7712_v53  ;;  %2922 = vmatprep.subr.bf16.mxu1 %v7717_v54 }
 0x369   :  { %2882 = vmatpush1.bf16.msra.mxu0 %v7722_v56  ;;  %2923 = vmatpush1.bf16.msra.mxu1 %v7727_v57 }
 0x36a   :  { %3183 = vmatprep.subr.bf16.mxu0 %v7736_v58  ;;  %3224 = vmatprep.subr.bf16.mxu1 %v7741_v60 }
 0x3eb   :  { %v2269_v63 = vpop.f32.mrf.mxu0  ;;  %v2310_v33 = vpop.f32.mrf.mxu1 }
 0x3ec   :  { %v2317_v1 = vadd.f32 %v2269_v63, %v2039_v62  ;;  %v2319_v26 = vadd.f32 %v2310_v33, %v2041_v19 }
 0x3ed   :  { %v2271_v2 = vpop.f32.mrf.mxu0  ;;  %v2312_v3 = vpop.f32.mrf.mxu1 }
 0x3ee   :  { %v5515_v4 = vmul.f32 -1.442695, %v2317_v1  ;;  %v2318_v5 = vadd.f32 %v2271_v2, %v2040_v34  ;;  %v2320_v14 = vadd.f32 %v2312_v3, %v2042_v13 }
 0x3ef   :  { %v2273_v6 = vpop.f32.mrf.mxu0  ;;  %v2314_v7 = vpop.f32.mrf.mxu1 }
 0x3f0   :  { %6318 = vpow2.f32 %v5515_v4  ;;  %v5516_v8 = vmul.f32 -1.442695, %v2318_v5  ;;  %v5517_v17 = vmul.f32 -1.442695, %v2320_v14 }
 0x3f1   :  { %v2274_v11 = vpop.f32.mrf.mxu0  ;;  %v2315_v9 = vpop.f32.mrf.mxu1 }
 0x3f2   :  { %6320 = vpow2.f32 %v5516_v8 }
 0x3f3   :  { %6322 = vpow2.f32 %v5517_v17 }
 0x3fd   :  { %v6319_v25 = vpop.eup %6318 }
 0x3fe   :  { %v2324_v32 = vadd.f32 1.0, %v6319_v25 }
 0x3ff   :  { %v6321_v36 = vpop.eup %6320 }
 0x400   :  { %6324 = vrcp.f32 %v2324_v32  ;;  %v2330_v38 = vadd.f32 1.0, %v6321_v36  ;;  %v6323_v63 = vpop.eup %6322 }
 0x401   :  { %6326 = vtanh.f32 %v2319_v26  ;;  %v2337_v8 = vadd.f32 1.0, %v6323_v63  ;;  %v5266_v26 = vld [vmem:[%s8564_s1 + $0x98] sm:$0xff] }
 0x402   :  { %6328 = vrcp.f32 %v2330_v38  ;;  %v2358_v32 = vunpack.c.h.bf16 %v5266_v26  ;;  %v2357_v38 = vunpack.c.l.bf16 %v5266_v26 }
 0x40b   :  { %v2585_v62 = vpop.f32.mrf.mxu0  ;;  %v2626_v34 = vpop.f32.mrf.mxu1 }
 0x40c   :  { %v2633_v1 = vadd.f32 %v2585_v62, %v2355_v40 }
 0x40d   :  { %v6325_v2 = vpop.eup %6324  ;;  %v2587_v3 = vpop.f32.mrf.mxu0 }
 0x40e   :  { %v2628_v33 = vpop.f32.mrf.mxu1  ;;  %v6327_v4 = vpop.eup %6326  ;;  %v5550_v5 = vmul.f32 -1.442695, %v2633_v1  ;;  %v2634_v6 = vadd.f32 %v2587_v3, %v2356_v61 }
 0x40f   :  { %v6329_v7 = vpop.eup %6328  ;;  %v2589_v11 = vpop.f32.mrf.mxu0  ;;  %v2341_v12 = vmul.f32 %v6327_v4, %v6325_v2  ;;  %v2636_v36 = vadd.f32 %v2628_v33, %v2358_v32  ;;  %v7764_v33 = vld [vmem:[%s8566_s3 + $0xe0] ss:$16 sps:$4 sm:$0xff]   ;;  %v7799_v32 = vld [vmem:[%s8566_s3 + $0xa4] ss:$16 sps:$4 sm:$0xff]  }
 0x410   :  { %v2630_v9 = vpop.f32.mrf.mxu1  ;;  %v2340_v13 = vmul.f32 %v6329_v7, %v7497_v55  ;;  %6330 = vpow2.f32 %v5550_v5  ;;  %v5551_v14 = vmul.f32 -1.442695, %v2634_v6  ;;  %v2635_v55 = vadd.f32 %v2626_v34, %v2357_v38  ;;  %v7769_v34 = vld [vmem:[%s8566_s3 + $0xe8] ss:$16 sps:$4 sm:$0xff]   ;;  %v7774_v6 = vld [vmem:[%s8566_s3 + $0xc4] ss:$16 sps:$4 sm:$0xff]  }
 0x411   :  { %v2590_v19 = vpop.f32.mrf.mxu0  ;;  %v5552_v39 = vmul.f32 -1.442695, %v2636_v36  ;;  %v7779_v7 = vld [vmem:[%s8566_s3 + $0xcc] ss:$16 sps:$4 sm:$0xff]  }
 0x412   :  { %v2631_v17 = vpop.f32.mrf.mxu1  ;;  %v7755_v25 = vadd.f32 %v2341_v12, %v2340_v13  ;;  %6332 = vpow2.f32 %v5551_v14  ;;  %v7786_v14 = vld [vmem:[%s8566_s3 + $0xc0] ss:$16 sps:$4 sm:$0xff]   ;;  %v7791_v19 = vld [vmem:[%s8566_s3 + $0xc8] ss:$16 sps:$4 sm:$0xff]   ;;  %v7804_v36 = vld [vmem:[%s8566_s3 + $0xac] ss:$16 sps:$4 sm:$0xff]  }
 0x413   :  { %6334 = vrcp.f32 %v2337_v8 }
 0x414   :  { %6336 = vtanh.f32 %v7755_v25 }
 0x415   :  { %6338 = vpow2.f32 %v5552_v39  ;;  %v7820_v39 = vld [vmem:[%s8566_s3 + $0xa8] ss:$16 sps:$4 sm:$0xff]  }
 0x41d   :  { %v6331_v40 = vpop.eup %6330 }
 0x41e   :  { %v2640_v61 = vadd.f32 1.0, %v6331_v40  ;;  %v7828_v40 = vld [vmem:[%s8566_s3 + $0x84] ss:$16 sps:$4 sm:$0xff]  }
 0x41f   :  { %v6333_v62 = vpop.eup %6332 }
 0x420   :  { %v6335_v63 = vpop.eup %6334  ;;  %6340 = vrcp.f32 %v2640_v61  ;;  %v2646_v1 = vadd.f32 1.0, %v6333_v62  ;;  %v7840_v61 = vld [vmem:[%s8566_s3 + $0x80] ss:$16 sps:$4 sm:$0xff]   ;;  %v7845_v62 = vld [vmem:[%s8566_s3 + $0x88] ss:$16 sps:$4 sm:$0xff]  }
 0x421   :  { %v6337_v2 = vpop.eup %6336  ;;  %6342 = vtanh.f32 %v2635_v55  ;;  %v7833_v55 = vld [vmem:[%s8566_s3 + $0x8c] ss:$16 sps:$4 sm:$0xff]  }
 0x422   :  { %v2344_v3 = vmul.f32 %v6337_v2, %v6335_v63  ;;  %6344 = vrcp.f32 %v2646_v1  ;;  %v6339_v5 = vpop.eup %6338  ;;  %v7852_v63 = vld [vmem:[%s8566_s3 + $0x64] ss:$16 sps:$4 sm:$0xff]   ;;  %v7857_v1 = vld [vmem:[%s8566_s3 + $0x6c] ss:$16 sps:$4 sm:$0xff]   ;;  %v7864_v2 = vld [vmem:[%s8566_s3 + $0x60] ss:$16 sps:$4 sm:$0xff]  }
 0x423   :  { %v2653_v13 = vadd.f32 1.0, %v6339_v5  ;;  %v7881_v5 = vld [vmem:[%s8566_s3 + $0x4c] ss:$16 sps:$4 sm:$0xff]  }
 0x424   :  { %v2345_v4 = vpack.c.bf16 %v2344_v3, %v2344_v3  ;;  %v7869_v3 = vld [vmem:[%s8566_s3 + $0x68] ss:$16 sps:$4 sm:$0xff]   ;;  %8602 = vst [vmem:[#allocation16_spill] sm:$0xff] %v7881_v5 }
 0x425   :  { %6346 = vrcp.f32 %v2653_v13  ;;  %8600 = vst [vmem:[#allocation14_spill] sm:$0xff] %v7869_v3  ;;  %v7905_v13 = vld [vmem:[%s8566_s3 + $0x2c] ss:$16 sps:$4 sm:$0xff]  }
 0x426   :  { %2346 = vst [vmem:[#allocation2] sm:$0xf] %v2345_v4  ;;  %2349 = vst [vmem:[#allocation8 + $0xc] sm:$0xf] %v2345_v4  ;;  %v7876_v4 = vld [vmem:[%s8566_s3 + $0x44] ss:$16 sps:$4 sm:$0xff]  }
 0x427   :  { %8601 = vst [vmem:[#allocation15_spill] sm:$0xff] %v7876_v4  ;;  %8603 = vst [vmem:[#allocation17_spill] sm:$0xff] %v7905_v13 }
 0x42d   :  { %v6341_v8 = vpop.eup %6340  ;;  %v2669_v11 = vld [vmem:[#allocation2] sm:$0xf] }
 0x42e   :  { %v6343_v9 = vpop.eup %6342  ;;  %2900 = vmatmul.mubr.bf16.vlgmr.msra.gmra.mxu0 %v2669_v11  ;;  %2941 = vmatmul.mubr.bf16.vlgmr.msra.gmra.mxu1 %v2669_v11  ;;  %v7893_v11 = vld [vmem:[%s8566_s3 + $0x48] ss:$16 sps:$4 sm:$0xff]  }
 0x42f   :  { %v6345_v12 = vpop.eup %6344  ;;  %3184 = vmatpush1.bf16.msra.mxu0 %v7764_v33  ;;  %3225 = vmatpush1.bf16.msra.mxu1 %v7769_v34  ;;  %v2657_v17 = vmul.f32 %v6343_v9, %v6341_v8  ;;  %v7888_v8 = vld [vmem:[%s8566_s3 + $0x40] ss:$16 sps:$4 sm:$0xff]  }
 0x430   :  { %v2656_v26 = vmul.f32 %v6345_v12, %v7510_v22  ;;  %3185 = vmatprep.subr.bf16.mxu0 %v7774_v6  ;;  %3226 = vmatprep.subr.bf16.mxu1 %v7779_v7  ;;  %v7815_v22 = vld [vmem:[%s8566_s3 + $0xa0] ss:$16 sps:$4 sm:$0xff]   ;;  %v7900_v12 = vld [vmem:[%s8566_s3 + $0x24] ss:$16 sps:$4 sm:$0xff]  }
 0x431   :  { %3215 = vmatprep.mubr.bf16.mxu0 %v8589_v59  ;;  %3256 = vmatprep.mubr.bf16.mxu1 %v8589_v59 }
 0x432   :  { %v7808_v38 = vadd.f32 %v2657_v17, %v2656_v26  ;;  %v6347_v9 = vpop.eup %6346 }
 0x433   :  { %3186 = vmatpush1.bf16.msra.mxu0 %v7786_v14  ;;  %3227 = vmatpush1.bf16.msra.mxu1 %v7791_v19 }
 0x434   :  { %6348 = vtanh.f32 %v7808_v38  ;;  %3187 = vmatprep.subr.bf16.mxu0 %v7799_v32  ;;  %3228 = vmatprep.subr.bf16.mxu1 %v7804_v36 }
 0x437   :  { %3188 = vmatpush1.bf16.msra.mxu0 %v7815_v22  ;;  %3229 = vmatpush1.bf16.msra.mxu1 %v7820_v39 }
 0x438   :  { %3189 = vmatprep.subr.bf16.mxu0 %v7828_v40  ;;  %3230 = vmatprep.subr.bf16.mxu1 %v7833_v55 }
 0x43b   :  { %3190 = vmatpush1.bf16.msra.mxu0 %v7840_v61  ;;  %3231 = vmatpush1.bf16.msra.mxu1 %v7845_v62 }
 0x43c   :  { %3191 = vmatprep.subr.bf16.mxu0 %v7852_v63  ;;  %3232 = vmatprep.subr.bf16.mxu1 %v7857_v1 }
 0x43f   :  { %3192 = vmatpush1.bf16.msra.mxu0 %v7864_v2  ;;  %3233 = vmatpush1.bf16.msra.mxu1 %v7869_v3 }
 0x440   :  { %3193 = vmatprep.subr.bf16.mxu0 %v7876_v4  ;;  %3234 = vmatprep.subr.bf16.mxu1 %v7881_v5  ;;  %v7912_v5 = vld [vmem:[%s8566_s3 + $0x20] ss:$16 sps:$4 sm:$0xff]   ;;  %v7917_v4 = vld [vmem:[%s8566_s3 + $0x28] ss:$16 sps:$4 sm:$0xff]  }
 0x441   :  { %v6349_v17 = vpop.eup %6348 }
 0x442   :  { %v2660_v26 = vmul.f32 %v6349_v17, %v6347_v9  ;;  %v7924_v9 = vld [vmem:[%s8566_s3 + $0x4] ss:$16 sps:$4 sm:$0xff]   ;;  %v7929_v17 = vld [vmem:[%s8566_s3 + $0xc] ss:$16 sps:$4 sm:$0xff]  }
 0x443   :  { %3194 = vmatpush1.bf16.msra.mxu0 %v7888_v8  ;;  %3235 = vmatpush1.bf16.msra.mxu1 %v7893_v11 }
 0x444   :  { %v2661_v3 = vpack.c.bf16 %v2660_v26, %v2660_v26  ;;  %3195 = vmatprep.subr.bf16.mxu0 %v7900_v12  ;;  %3236 = vmatprep.subr.bf16.mxu1 %v7905_v13  ;;  %v7936_v26 = vld [vmem:[%s8566_s3] ss:$16 sps:$4 sm:$0xff]   ;;  %v7941_v13 = vld [vmem:[%s8566_s3 + $0x8] ss:$16 sps:$4 sm:$0xff]  }
 0x446   :  { %2662 = vst [vmem:[#allocation4] sm:$0xf] %v2661_v3  ;;  %2665 = vst [vmem:[#allocation10 + $0x10] sm:$0xf] %v2661_v3 }
 0x447   :  { %3196 = vmatpush1.bf16.msra.mxu0 %v7912_v5  ;;  %3237 = vmatpush1.bf16.msra.mxu1 %v7917_v4 }
 0x448   :  { %3197 = vmatprep.subr.bf16.mxu0 %v7924_v9  ;;  %3238 = vmatprep.subr.bf16.mxu1 %v7929_v17 }
 0x44b   :  { %3198 = vmatpush1.bf16.msra.mxu0 %v7936_v26  ;;  %3239 = vmatpush1.bf16.msra.mxu1 %v7941_v13 }
 0x44c   :  { %3499 = vmatprep.subr.bf16.mxu0 %v7544_v0  ;;  %3540 = vmatprep.subr.bf16.mxu1 %v7549_v41  ;;  %v45_v0 = vld [vmem:[%s8563_s0 + $0x80] sm:$0xff] }
 0x44d   :  { %v2985_v3 = vld [vmem:[#allocation4] sm:$0xf]  ;;  %v2671_v41 = vunpack.c.l.bf16 %v45_v0 }
 0x44e   :  { %3216 = vmatmul.mubr.bf16.vlgmr.msra.gmra.mxu0 %v2985_v3  ;;  %3257 = vmatmul.mubr.bf16.vlgmr.msra.gmra.mxu1 %v2985_v3 }
 0x44f   :  { %3500 = vmatpush1.bf16.msra.mxu0 %v7554_v42  ;;  %3541 = vmatpush1.bf16.msra.mxu1 %v7559_v10  ;;  %v2672_v42 = vunpack.c.h.bf16 %v45_v0 }
 0x450   :  { %3501 = vmatprep.subr.bf16.mxu0 %v7568_v15  ;;  %3542 = vmatprep.subr.bf16.mxu1 %v7573_v16 }
 0x451   :  { %3531 = vmatprep.mubr.bf16.mxu0 %v8589_v59  ;;  %3572 = vmatprep.mubr.bf16.mxu1 %v8589_v59 }
 0x453   :  { %3502 = vmatpush1.bf16.msra.mxu0 %v7578_v18  ;;  %3543 = vmatpush1.bf16.msra.mxu1 %v7583_v20 }
 0x454   :  { %3503 = vmatprep.subr.bf16.mxu0 %v7592_v21  ;;  %3544 = vmatprep.subr.bf16.mxu1 %v7597_v23 }
 0x457   :  { %3504 = vmatpush1.bf16.msra.mxu0 %v7602_v24  ;;  %3545 = vmatpush1.bf16.msra.mxu1 %v7607_v27 }
 0x458   :  { %3505 = vmatprep.subr.bf16.mxu0 %v7616_v28  ;;  %3546 = vmatprep.subr.bf16.mxu1 %v7621_v30 }
 0x45b   :  { %3506 = vmatpush1.bf16.msra.mxu0 %v7626_v31  ;;  %3547 = vmatpush1.bf16.msra.mxu1 %v7631_v29  ;;  %v47_v29 = vld [vmem:[%s8563_s0 + $0x88] sm:$0xff] }
 0x45c   :  { %3507 = vmatprep.subr.bf16.mxu0 %v7640_v37  ;;  %3548 = vmatprep.subr.bf16.mxu1 %v7645_v35  ;;  %v2674_v37 = vunpack.c.h.bf16 %v47_v29 }
 0x45f   :  { %3508 = vmatpush1.bf16.msra.mxu0 %v7650_v43  ;;  %3549 = vmatpush1.bf16.msra.mxu1 %v7655_v44  ;;  %v2673_v43 = vunpack.c.l.bf16 %v47_v29 }
 0x460   :  { %3509 = vmatprep.subr.bf16.mxu0 %v7664_v45  ;;  %3550 = vmatprep.subr.bf16.mxu1 %v7669_v46 }
 0x463   :  { %3510 = vmatpush1.bf16.msra.mxu0 %v7674_v47  ;;  %3551 = vmatpush1.bf16.msra.mxu1 %v7679_v48 }
 0x464   :  { %3511 = vmatprep.subr.bf16.mxu0 %v7688_v49  ;;  %3552 = vmatprep.subr.bf16.mxu1 %v7693_v50  ;;  %v5263_v50 = vld [vmem:[%s8564_s1 + $0x70] sm:$0xff] }
 0x467   :  { %3512 = vmatpush1.bf16.msra.mxu0 %v7698_v51  ;;  %3553 = vmatpush1.bf16.msra.mxu1 %v7703_v52  ;;  %v2987_v51 = vunpack.c.l.bf16 %v5263_v50  ;;  %v2988_v52 = vunpack.c.h.bf16 %v5263_v50 }
 0x468   :  { %3513 = vmatprep.subr.bf16.mxu0 %v7712_v53  ;;  %3554 = vmatprep.subr.bf16.mxu1 %v7717_v54 }
 0x46b   :  { %3514 = vmatpush1.bf16.msra.mxu0 %v7722_v56  ;;  %3555 = vmatpush1.bf16.msra.mxu1 %v7727_v57 }
 0x46c   :  { %3815 = vmatprep.subr.bf16.mxu0 %v7736_v58  ;;  %3856 = vmatprep.subr.bf16.mxu1 %v7741_v60 }
 0x4ee   :  { %v2901_v10 = vpop.f32.mrf.mxu0  ;;  %v2942_v15 = vpop.f32.mrf.mxu1 }
 0x4ef   :  { %v2949_v16 = vadd.f32 %v2901_v10, %v2671_v41  ;;  %v2951_v46 = vadd.f32 %v2942_v15, %v2673_v43 }
 0x4f0   :  { %v2903_v18 = vpop.f32.mrf.mxu0  ;;  %v2944_v20 = vpop.f32.mrf.mxu1 }
 0x4f1   :  { %v5585_v21 = vmul.f32 -1.442695, %v2949_v16  ;;  %v2950_v23 = vadd.f32 %v2903_v18, %v2672_v42  ;;  %v2952_v35 = vadd.f32 %v2944_v20, %v2674_v37 }
 0x4f2   :  { %v2905_v24 = vpop.f32.mrf.mxu0  ;;  %v2946_v27 = vpop.f32.mrf.mxu1 }
 0x4f3   :  { %6350 = vpow2.f32 %v5585_v21  ;;  %v5586_v28 = vmul.f32 -1.442695, %v2950_v23  ;;  %v5587_v44 = vmul.f32 -1.442695, %v2952_v35 }
 0x4f4   :  { %v2906_v30 = vpop.f32.mrf.mxu0  ;;  %v2947_v31 = vpop.f32.mrf.mxu1 }
 0x4f5   :  { %6352 = vpow2.f32 %v5586_v28  ;;  %v5264_v30 = vld [vmem:[%s8564_s1 + $0x78] sm:$0xff] }
 0x4f6   :  { %6354 = vpow2.f32 %v5587_v44  ;;  %v2990_v31 = vunpack.c.h.bf16 %v5264_v30  ;;  %v2989_v37 = vunpack.c.l.bf16 %v5264_v30  ;;  %v8218_v30 = vld [vmem:[%s8565_s2] ss:$16 sps:$4 sm:$0xff]  }
 0x500   :  { %v6351_v45 = vpop.eup %6350 }
 0x501   :  { %v2956_v47 = vadd.f32 1.0, %v6351_v45 }
 0x502   :  { %v6353_v48 = vpop.eup %6352 }
 0x503   :  { %6356 = vrcp.f32 %v2956_v47  ;;  %v2962_v49 = vadd.f32 1.0, %v6353_v48  ;;  %v6355_v56 = vpop.eup %6354 }
 0x504   :  { %6358 = vtanh.f32 %v2951_v46  ;;  %v2969_v15 = vadd.f32 1.0, %v6355_v56 }
 0x505   :  { %6360 = vrcp.f32 %v2962_v49 }
 0x50e   :  { %v3217_v53 = vpop.f32.mrf.mxu0  ;;  %v3258_v54 = vpop.f32.mrf.mxu1 }
 0x50f   :  { %v3265_v57 = vadd.f32 %v3217_v53, %v2987_v51 }
 0x510   :  { %v6357_v58 = vpop.eup %6356  ;;  %v3219_v60 = vpop.f32.mrf.mxu0 }
 0x511   :  { %v3260_v3 = vpop.f32.mrf.mxu1  ;;  %v6359_v0 = vpop.eup %6358  ;;  %v5620_v41 = vmul.f32 -1.442695, %v3265_v57  ;;  %v3266_v42 = vadd.f32 %v3219_v60, %v2988_v52 }
 0x512   :  { %v6361_v10 = vpop.eup %6360  ;;  %v3221_v16 = vpop.f32.mrf.mxu0  ;;  %v2973_v20 = vmul.f32 %v6359_v0, %v6357_v58  ;;  %v3268_v29 = vadd.f32 %v3260_v3, %v2990_v31  ;;  %v8146_v0 = vld [vmem:[%s8565_s2 + $0x60] ss:$16 sps:$4 sm:$0xff]   ;;  %v8223_v31 = vld [vmem:[%s8565_s2 + $0x8] ss:$16 sps:$4 sm:$0xff]  }
 0x513   :  { %v3262_v18 = vpop.f32.mrf.mxu1  ;;  %v2972_v21 = vmul.f32 %v6361_v10, %v7755_v25  ;;  %6362 = vpow2.f32 %v5620_v41  ;;  %v5621_v23 = vmul.f32 -1.442695, %v3266_v42  ;;  %v3267_v25 = vadd.f32 %v3258_v54, %v2989_v37  ;;  %v8151_v41 = vld [vmem:[%s8565_s2 + $0x68] ss:$16 sps:$4 sm:$0xff]   ;;  %v8160_v42 = vld [vmem:[%s8565_s2 + $0x44] ss:$16 sps:$4 sm:$0xff]  }
 0x514   :  { %v3222_v24 = vpop.f32.mrf.mxu0  ;;  %v5622_v35 = vmul.f32 -1.442695, %v3268_v29  ;;  %v8165_v10 = vld [vmem:[%s8565_s2 + $0x4c] ss:$16 sps:$4 sm:$0xff]   ;;  %v8175_v16 = vld [vmem:[%s8565_s2 + $0x48] ss:$16 sps:$4 sm:$0xff]  }
 0x515   :  { %v3263_v27 = vpop.f32.mrf.mxu1  ;;  %v7993_v28 = vadd.f32 %v2973_v20, %v2972_v21  ;;  %6364 = vpow2.f32 %v5621_v23  ;;  %v8184_v18 = vld [vmem:[%s8565_s2 + $0x24] ss:$16 sps:$4 sm:$0xff]   ;;  %v8189_v20 = vld [vmem:[%s8565_s2 + $0x2c] ss:$16 sps:$4 sm:$0xff]   ;;  %v8194_v21 = vld [vmem:[%s8565_s2 + $0x20] ss:$16 sps:$4 sm:$0xff]  }
 0x516   :  { %6366 = vrcp.f32 %v2969_v15  ;;  %v8170_v15 = vld [vmem:[%s8565_s2 + $0x40] ss:$16 sps:$4 sm:$0xff]   ;;  %v8199_v23 = vld [vmem:[%s8565_s2 + $0x28] ss:$16 sps:$4 sm:$0xff]   ;;  %v8208_v24 = vld [vmem:[%s8565_s2 + $0x4] ss:$16 sps:$4 sm:$0xff]  }
 0x517   :  { %6368 = vtanh.f32 %v7993_v28  ;;  %v8213_v27 = vld [vmem:[%s8565_s2 + $0xc] ss:$16 sps:$4 sm:$0xff]   ;;  %v8232_v29 = vld [vmem:[%s8566_s3 + $0xe4] ss:$16 sps:$4 sm:$0xff]  }
 0x518   :  { %6370 = vpow2.f32 %v5622_v35  ;;  %v8237_v37 = vld [vmem:[%s8566_s3 + $0xec] ss:$16 sps:$4 sm:$0xff]   ;;  %v49_v35 = vld [vmem:[%s8563_s0 + $0xa0] sm:$0xff] }
 0x520   :  { %v6363_v43 = vpop.eup %6362 }
 0x521   :  { %v3272_v44 = vadd.f32 1.0, %v6363_v43  ;;  %v3303_v43 = vunpack.c.l.bf16 %v49_v35 }
 0x522   :  { %v6365_v45 = vpop.eup %6364 }
 0x523   :  { %v6367_v46 = vpop.eup %6366  ;;  %6372 = vrcp.f32 %v3272_v44  ;;  %v3278_v47 = vadd.f32 1.0, %v6365_v45 }
 0x524   :  { %v6369_v48 = vpop.eup %6368  ;;  %6374 = vtanh.f32 %v3267_v25  ;;  %v3304_v25 = vunpack.c.h.bf16 %v49_v35 }
 0x525   :  { %v2976_v49 = vmul.f32 %v6369_v48, %v6367_v46  ;;  %6376 = vrcp.f32 %v3278_v47  ;;  %v6371_v51 = vpop.eup %6370 }
 0x526   :  { %v3285_v57 = vadd.f32 1.0, %v6371_v51 }
 0x527   :  { %v2977_v50 = vpack.c.bf16 %v2976_v49, %v2976_v49 }
 0x528   :  { %6378 = vrcp.f32 %v3285_v57  ;;  %v51_v57 = vld [vmem:[%s8563_s0 + $0xa8] sm:$0xff] }
 0x529   :  { %2981 = vst [vmem:[#allocation8 + $0x10] sm:$0xf] %v2977_v50  ;;  %2978 = vst [vmem:[#allocation2] sm:$0xf] %v2977_v50 }
 0x530   :  { %v6373_v52 = vpop.eup %6372  ;;  %v3301_v53 = vld [vmem:[#allocation2] sm:$0xf] }
 0x531   :  { %v6375_v56 = vpop.eup %6374  ;;  %3532 = vmatmul.mubr.bf16.vlgmr.msra.gmra.mxu0 %v3301_v53  ;;  %3573 = vmatmul.mubr.bf16.vlgmr.msra.gmra.mxu1 %v3301_v53 }
 0x532   :  { %v6377_v54 = vpop.eup %6376  ;;  %3816 = vmatpush1.bf16.msra.mxu0 %v7764_v33  ;;  %3857 = vmatpush1.bf16.msra.mxu1 %v7769_v34  ;;  %v3289_v58 = vmul.f32 %v6375_v56, %v6373_v52  ;;  %v8604_v33 = vld [vmem:[#allocation14_spill] sm:$0xff] }
 0x533   :  { %v3288_v60 = vmul.f32 %v6377_v54, %v7808_v38  ;;  %3817 = vmatprep.subr.bf16.mxu0 %v7774_v6  ;;  %3858 = vmatprep.subr.bf16.mxu1 %v7779_v7  ;;  %v8605_v6 = vld [vmem:[#allocation15_spill] sm:$0xff]  ;;  %v8606_v7 = vld [vmem:[#allocation16_spill] sm:$0xff] }
 0x534   :  { %3847 = vmatprep.mubr.bf16.mxu0 %v8589_v59  ;;  %3888 = vmatprep.mubr.bf16.mxu1 %v8589_v59 }
 0x535   :  { %v8006_v3 = vadd.f32 %v3289_v58, %v3288_v60  ;;  %v6379_v34 = vpop.eup %6378  ;;  %v3306_v58 = vunpack.c.h.bf16 %v51_v57 }
 0x536   :  { %3818 = vmatpush1.bf16.msra.mxu0 %v7786_v14  ;;  %3859 = vmatpush1.bf16.msra.mxu1 %v7791_v19 }
 0x537   :  { %6380 = vtanh.f32 %v8006_v3  ;;  %3819 = vmatprep.subr.bf16.mxu0 %v7799_v32  ;;  %3860 = vmatprep.subr.bf16.mxu1 %v7804_v36  ;;  %v8607_v36 = vld [vmem:[#allocation17_spill] sm:$0xff] }
 0x53a   :  { %3820 = vmatpush1.bf16.msra.mxu0 %v7815_v22  ;;  %3861 = vmatpush1.bf16.msra.mxu1 %v7820_v39  ;;  %v8040_v22 = vld [vmem:[%s8565_s2 + $0xe4] ss:$16 sps:$4 sm:$0xff]   ;;  %v8045_v39 = vld [vmem:[%s8565_s2 + $0xec] ss:$16 sps:$4 sm:$0xff]  }
 0x53b   :  { %3821 = vmatprep.subr.bf16.mxu0 %v7828_v40  ;;  %3862 = vmatprep.subr.bf16.mxu1 %v7833_v55  ;;  %v8050_v40 = vld [vmem:[%s8565_s2 + $0xe0] ss:$16 sps:$4 sm:$0xff]   ;;  %v8055_v55 = vld [vmem:[%s8565_s2 + $0xe8] ss:$16 sps:$4 sm:$0xff]  }
 0x53e   :  { %3822 = vmatpush1.bf16.msra.mxu0 %v7840_v61  ;;  %3863 = vmatpush1.bf16.msra.mxu1 %v7845_v62  ;;  %v8064_v61 = vld [vmem:[%s8565_s2 + $0xc4] ss:$16 sps:$4 sm:$0xff]   ;;  %v8069_v62 = vld [vmem:[%s8565_s2 + $0xcc] ss:$16 sps:$4 sm:$0xff]  }
 0x53f   :  { %3823 = vmatprep.subr.bf16.mxu0 %v7852_v63  ;;  %3864 = vmatprep.subr.bf16.mxu1 %v7857_v1  ;;  %v8074_v63 = vld [vmem:[%s8565_s2 + $0xc0] ss:$16 sps:$4 sm:$0xff]   ;;  %v8079_v1 = vld [vmem:[%s8565_s2 + $0xc8] ss:$16 sps:$4 sm:$0xff]  }
 0x542   :  { %3824 = vmatpush1.bf16.msra.mxu0 %v7864_v2  ;;  %3865 = vmatpush1.bf16.msra.mxu1 %v8604_v33  ;;  %v8088_v2 = vld [vmem:[%s8565_s2 + $0xa4] ss:$16 sps:$4 sm:$0xff]   ;;  %v3305_v33 = vunpack.c.l.bf16 %v51_v57 }
 0x543   :  { %3825 = vmatprep.subr.bf16.mxu0 %v8605_v6  ;;  %3866 = vmatprep.subr.bf16.mxu1 %v8606_v7 }
 0x544   :  { %v6381_v14 = vpop.eup %6380 }
 0x545   :  { %v3292_v19 = vmul.f32 %v6381_v14, %v6379_v34 }
 0x546   :  { %3826 = vmatpush1.bf16.msra.mxu0 %v7888_v8  ;;  %3867 = vmatpush1.bf16.msra.mxu1 %v7893_v11  ;;  %v8103_v8 = vld [vmem:[%s8565_s2 + $0xa8] ss:$16 sps:$4 sm:$0xff]   ;;  %v8112_v11 = vld [vmem:[%s8565_s2 + $0x84] ss:$16 sps:$4 sm:$0xff]  }
 0x547   :  { %v3293_v32 = vpack.c.bf16 %v3292_v19, %v3292_v19  ;;  %3827 = vmatprep.subr.bf16.mxu0 %v7900_v12  ;;  %3868 = vmatprep.subr.bf16.mxu1 %v8607_v36  ;;  %v8117_v12 = vld [vmem:[%s8565_s2 + $0x8c] ss:$16 sps:$4 sm:$0xff]   ;;  %v5261_v36 = vld [vmem:[%s8564_s1 + $0x50] sm:$0xff] }
 0x548   :  { %v3620_v35 = vunpack.c.h.bf16 %v5261_v36 }
 0x549   :  { %3297 = vst [vmem:[#allocation10 + $0xc] sm:$0xf] %v3293_v32  ;;  %3294 = vst [vmem:[#allocation4] sm:$0xf] %v3293_v32 }
 0x54a   :  { %3828 = vmatpush1.bf16.msra.mxu0 %v7912_v5  ;;  %3869 = vmatpush1.bf16.msra.mxu1 %v7917_v4  ;;  %v8093_v4 = vld [vmem:[%s8565_s2 + $0xac] ss:$16 sps:$4 sm:$0xff]   ;;  %v8098_v5 = vld [vmem:[%s8565_s2 + $0xa0] ss:$16 sps:$4 sm:$0xff]  }
 0x54b   :  { %3829 = vmatprep.subr.bf16.mxu0 %v7924_v9  ;;  %3870 = vmatprep.subr.bf16.mxu1 %v7929_v17  ;;  %v8127_v9 = vld [vmem:[%s8565_s2 + $0x88] ss:$16 sps:$4 sm:$0xff]   ;;  %v8136_v17 = vld [vmem:[%s8565_s2 + $0x64] ss:$16 sps:$4 sm:$0xff]  }
 0x54e   :  { %3830 = vmatpush1.bf16.msra.mxu0 %v7936_v26  ;;  %3871 = vmatpush1.bf16.msra.mxu1 %v7941_v13  ;;  %v8122_v13 = vld [vmem:[%s8565_s2 + $0x80] ss:$16 sps:$4 sm:$0xff]   ;;  %v8141_v26 = vld [vmem:[%s8565_s2 + $0x6c] ss:$16 sps:$4 sm:$0xff]  }
 0x54f   :  { %4131 = vmatprep.subr.bf16.mxu0 %v8040_v22  ;;  %4172 = vmatprep.subr.bf16.mxu1 %v8045_v39 }
 0x550   :  { %v3617_v38 = vld [vmem:[#allocation4] sm:$0xf] }
 0x551   :  { %3848 = vmatmul.mubr.bf16.vlgmr.msra.gmra.mxu0 %v3617_v38  ;;  %3889 = vmatmul.mubr.bf16.vlgmr.msra.gmra.mxu1 %v3617_v38  ;;  %v3619_v38 = vunpack.c.l.bf16 %v5261_v36 }
 0x552   :  { %4163 = vmatprep.mubr.bf16.mxu0 %v8589_v59  ;;  %4204 = vmatprep.mubr.bf16.mxu1 %v8589_v59 }
 0x553   :  { %4132 = vmatpush1.bf16.msra.mxu0 %v8050_v40  ;;  %4173 = vmatpush1.bf16.msra.mxu1 %v8055_v55 }
 0x554   :  { %4133 = vmatprep.subr.bf16.mxu0 %v8064_v61  ;;  %4174 = vmatprep.subr.bf16.mxu1 %v8069_v62 }
 0x557   :  { %4134 = vmatpush1.bf16.msra.mxu0 %v8074_v63  ;;  %4175 = vmatpush1.bf16.msra.mxu1 %v8079_v1 }
 0x558   :  { %4135 = vmatprep.subr.bf16.mxu0 %v8088_v2  ;;  %4176 = vmatprep.subr.bf16.mxu1 %v8093_v4 }
 0x55b   :  { %4136 = vmatpush1.bf16.msra.mxu0 %v8098_v5  ;;  %4177 = vmatpush1.bf16.msra.mxu1 %v8103_v8 }
 0x55c   :  { %4137 = vmatprep.subr.bf16.mxu0 %v8112_v11  ;;  %4178 = vmatprep.subr.bf16.mxu1 %v8117_v12 }
 0x55f   :  { %4138 = vmatpush1.bf16.msra.mxu0 %v8122_v13  ;;  %4179 = vmatpush1.bf16.msra.mxu1 %v8127_v9 }
 0x560   :  { %4139 = vmatprep.subr.bf16.mxu0 %v8136_v17  ;;  %4180 = vmatprep.subr.bf16.mxu1 %v8141_v26 }
 0x563   :  { %4140 = vmatpush1.bf16.msra.mxu0 %v8146_v0  ;;  %4181 = vmatpush1.bf16.msra.mxu1 %v8151_v41 }
 0x564   :  { %4141 = vmatprep.subr.bf16.mxu0 %v8160_v42  ;;  %4182 = vmatprep.subr.bf16.mxu1 %v8165_v10 }
 0x567   :  { %4142 = vmatpush1.bf16.msra.mxu0 %v8170_v15  ;;  %4183 = vmatpush1.bf16.msra.mxu1 %v8175_v16 }
 0x568   :  { %4143 = vmatprep.subr.bf16.mxu0 %v8184_v18  ;;  %4184 = vmatprep.subr.bf16.mxu1 %v8189_v20 }
 0x56b   :  { %4144 = vmatpush1.bf16.msra.mxu0 %v8194_v21  ;;  %4185 = vmatpush1.bf16.msra.mxu1 %v8199_v23 }
 0x56c   :  { %4145 = vmatprep.subr.bf16.mxu0 %v8208_v24  ;;  %4186 = vmatprep.subr.bf16.mxu1 %v8213_v27 }
 0x56f   :  { %4146 = vmatpush1.bf16.msra.mxu0 %v8218_v30  ;;  %4187 = vmatpush1.bf16.msra.mxu1 %v8223_v31 }
 0x570   :  { %4447 = vmatprep.subr.bf16.mxu0 %v8232_v29  ;;  %4488 = vmatprep.subr.bf16.mxu1 %v8237_v37 }
 0x5f1   :  { %v3533_v44 = vpop.f32.mrf.mxu0  ;;  %v3574_v45 = vpop.f32.mrf.mxu1 }
 0x5f2   :  { %v3581_v46 = vadd.f32 %v3533_v44, %v3303_v43  ;;  %v3583_v7 = vadd.f32 %v3574_v45, %v3305_v33 }
 0x5f3   :  { %v3535_v47 = vpop.f32.mrf.mxu0  ;;  %v3576_v48 = vpop.f32.mrf.mxu1 }
 0x5f4   :  { %v5655_v49 = vmul.f32 -1.442695, %v3581_v46  ;;  %v3582_v50 = vadd.f32 %v3535_v47, %v3304_v25  ;;  %v3584_v60 = vadd.f32 %v3576_v48, %v3306_v58 }
 0x5f5   :  { %v3537_v51 = vpop.f32.mrf.mxu0  ;;  %v3578_v52 = vpop.f32.mrf.mxu1 }
 0x5f6   :  { %6382 = vpow2.f32 %v5655_v49  ;;  %v5656_v53 = vmul.f32 -1.442695, %v3582_v50  ;;  %v5657_v34 = vmul.f32 -1.442695, %v3584_v60 }
 0x5f7   :  { %v3538_v56 = vpop.f32.mrf.mxu0  ;;  %v3579_v54 = vpop.f32.mrf.mxu1 }
 0x5f8   :  { %6384 = vpow2.f32 %v5656_v53 }
 0x5f9   :  { %6386 = vpow2.f32 %v5657_v34 }
 0x603   :  { %v6383_v6 = vpop.eup %6382 }
 0x604   :  { %v3588_v14 = vadd.f32 1.0, %v6383_v6 }
 0x605   :  { %v6385_v19 = vpop.eup %6384 }
 0x606   :  { %6388 = vrcp.f32 %v3588_v14  ;;  %v3594_v32 = vadd.f32 1.0, %v6385_v19  ;;  %v6387_v44 = vpop.eup %6386 }
 0x607   :  { %6390 = vtanh.f32 %v3583_v7  ;;  %v3601_v53 = vadd.f32 1.0, %v6387_v44  ;;  %v5262_v7 = vld [vmem:[%s8564_s1 + $0x58] sm:$0xff] }
 0x608   :  { %6392 = vrcp.f32 %v3594_v32  ;;  %v3622_v14 = vunpack.c.h.bf16 %v5262_v7  ;;  %v3621_v32 = vunpack.c.l.bf16 %v5262_v7 }
 0x611   :  { %v3849_v43 = vpop.f32.mrf.mxu0  ;;  %v3890_v25 = vpop.f32.mrf.mxu1 }
 0x612   :  { %v3897_v46 = vadd.f32 %v3849_v43, %v3619_v38 }
 0x613   :  { %v6389_v47 = vpop.eup %6388  ;;  %v3851_v48 = vpop.f32.mrf.mxu0 }
 0x614   :  { %v3892_v45 = vpop.f32.mrf.mxu1  ;;  %v6391_v49 = vpop.eup %6390  ;;  %v5690_v50 = vmul.f32 -1.442695, %v3897_v46  ;;  %v3898_v51 = vadd.f32 %v3851_v48, %v3620_v35 }
 0x615   :  { %v6393_v52 = vpop.eup %6392  ;;  %v3853_v56 = vpop.f32.mrf.mxu0  ;;  %v3605_v57 = vmul.f32 %v6391_v49, %v6389_v47  ;;  %v3900_v19 = vadd.f32 %v3892_v45, %v3622_v14  ;;  %v8260_v45 = vld [vmem:[%s8566_s3 + $0xe0] ss:$16 sps:$4 sm:$0xff]   ;;  %v8295_v14 = vld [vmem:[%s8566_s3 + $0xa4] ss:$16 sps:$4 sm:$0xff]  }
 0x616   :  { %v3894_v54 = vpop.f32.mrf.mxu1  ;;  %v3604_v58 = vmul.f32 %v6393_v52, %v7993_v28  ;;  %6394 = vpow2.f32 %v5690_v50  ;;  %v5691_v60 = vmul.f32 -1.442695, %v3898_v51  ;;  %v3899_v28 = vadd.f32 %v3890_v25, %v3621_v32  ;;  %v8265_v25 = vld [vmem:[%s8566_s3 + $0xe8] ss:$16 sps:$4 sm:$0xff]   ;;  %v8270_v51 = vld [vmem:[%s8566_s3 + $0xc4] ss:$16 sps:$4 sm:$0xff]  }
 0x617   :  { %v3854_v33 = vpop.f32.mrf.mxu0  ;;  %v5692_v36 = vmul.f32 -1.442695, %v3900_v19  ;;  %v8275_v52 = vld [vmem:[%s8566_s3 + $0xcc] ss:$16 sps:$4 sm:$0xff]  }
 0x618   :  { %v3895_v34 = vpop.f32.mrf.mxu1  ;;  %v8251_v6 = vadd.f32 %v3605_v57, %v3604_v58  ;;  %6396 = vpow2.f32 %v5691_v60  ;;  %v8282_v60 = vld [vmem:[%s8566_s3 + $0xc0] ss:$16 sps:$4 sm:$0xff]   ;;  %v8287_v33 = vld [vmem:[%s8566_s3 + $0xc8] ss:$16 sps:$4 sm:$0xff]   ;;  %v8300_v19 = vld [vmem:[%s8566_s3 + $0xac] ss:$16 sps:$4 sm:$0xff]  }
 0x619   :  { %6398 = vrcp.f32 %v3601_v53 }
 0x61a   :  { %6400 = vtanh.f32 %v8251_v6 }
 0x61b   :  { %6402 = vpow2.f32 %v5692_v36  ;;  %v8316_v36 = vld [vmem:[%s8566_s3 + $0xa8] ss:$16 sps:$4 sm:$0xff]  }
 0x623   :  { %v6395_v38 = vpop.eup %6394 }
 0x624   :  { %v3904_v35 = vadd.f32 1.0, %v6395_v38  ;;  %v8324_v38 = vld [vmem:[%s8566_s3 + $0x84] ss:$16 sps:$4 sm:$0xff]  }
 0x625   :  { %v6397_v43 = vpop.eup %6396 }
 0x626   :  { %v6399_v44 = vpop.eup %6398  ;;  %6404 = vrcp.f32 %v3904_v35  ;;  %v3910_v46 = vadd.f32 1.0, %v6397_v43  ;;  %v8336_v35 = vld [vmem:[%s8566_s3 + $0x80] ss:$16 sps:$4 sm:$0xff]   ;;  %v8341_v43 = vld [vmem:[%s8566_s3 + $0x88] ss:$16 sps:$4 sm:$0xff]  }
 0x627   :  { %v6401_v47 = vpop.eup %6400  ;;  %6406 = vtanh.f32 %v3899_v28  ;;  %v8329_v28 = vld [vmem:[%s8566_s3 + $0x8c] ss:$16 sps:$4 sm:$0xff]  }
 0x628   :  { %v3608_v48 = vmul.f32 %v6401_v47, %v6399_v44  ;;  %6408 = vrcp.f32 %v3910_v46  ;;  %v6403_v50 = vpop.eup %6402  ;;  %v8348_v44 = vld [vmem:[%s8566_s3 + $0x64] ss:$16 sps:$4 sm:$0xff]   ;;  %v8353_v46 = vld [vmem:[%s8566_s3 + $0x6c] ss:$16 sps:$4 sm:$0xff]   ;;  %v8360_v47 = vld [vmem:[%s8566_s3 + $0x60] ss:$16 sps:$4 sm:$0xff]  }
 0x629   :  { %v3917_v58 = vadd.f32 1.0, %v6403_v50  ;;  %v8377_v50 = vld [vmem:[%s8566_s3 + $0x4c] ss:$16 sps:$4 sm:$0xff]  }
 0x62a   :  { %v3609_v49 = vpack.c.bf16 %v3608_v48, %v3608_v48  ;;  %v8365_v48 = vld [vmem:[%s8566_s3 + $0x68] ss:$16 sps:$4 sm:$0xff]   ;;  %8610 = vst [vmem:[#allocation16_spill] sm:$0xff] %v8377_v50 }
 0x62b   :  { %6410 = vrcp.f32 %v3917_v58  ;;  %8608 = vst [vmem:[#allocation14_spill] sm:$0xff] %v8365_v48  ;;  %v8401_v58 = vld [vmem:[%s8566_s3 + $0x2c] ss:$16 sps:$4 sm:$0xff]  }
 0x62c   :  { %3613 = vst [vmem:[#allocation8 + $0x14] sm:$0xf] %v3609_v49  ;;  %3610 = vst [vmem:[#allocation2] sm:$0xf] %v3609_v49  ;;  %v8372_v49 = vld [vmem:[%s8566_s3 + $0x44] ss:$16 sps:$4 sm:$0xff]  }
 0x62d   :  { %8609 = vst [vmem:[#allocation15_spill] sm:$0xff] %v8372_v49  ;;  %8611 = vst [vmem:[#allocation17_spill] sm:$0xff] %v8401_v58 }
 0x633   :  { %v6405_v53 = vpop.eup %6404  ;;  %v3933_v56 = vld [vmem:[#allocation2] sm:$0xf] }
 0x634   :  { %v6407_v54 = vpop.eup %6406  ;;  %4164 = vmatmul.mubr.bf16.vlgmr.msra.gmra.mxu0 %v3933_v56  ;;  %4205 = vmatmul.mubr.bf16.vlgmr.msra.gmra.mxu1 %v3933_v56  ;;  %v8389_v56 = vld [vmem:[%s8566_s3 + $0x48] ss:$16 sps:$4 sm:$0xff]  }
 0x635   :  { %v6409_v57 = vpop.eup %6408  ;;  %4448 = vmatpush1.bf16.msra.mxu0 %v8260_v45  ;;  %4489 = vmatpush1.bf16.msra.mxu1 %v8265_v25  ;;  %v3921_v34 = vmul.f32 %v6407_v54, %v6405_v53  ;;  %v8384_v53 = vld [vmem:[%s8566_s3 + $0x40] ss:$16 sps:$4 sm:$0xff]  }
 0x636   :  { %v3920_v7 = vmul.f32 %v6409_v57, %v8006_v3  ;;  %4449 = vmatprep.subr.bf16.mxu0 %v8270_v51  ;;  %4490 = vmatprep.subr.bf16.mxu1 %v8275_v52  ;;  %v8311_v3 = vld [vmem:[%s8566_s3 + $0xa0] ss:$16 sps:$4 sm:$0xff]   ;;  %v8396_v57 = vld [vmem:[%s8566_s3 + $0x24] ss:$16 sps:$4 sm:$0xff]  }
 0x637   :  { %4479 = vmatprep.mubr.bf16.mxu0 %v8589_v59  ;;  %4520 = vmatprep.mubr.bf16.mxu1 %v8589_v59 }
 0x638   :  { %v8304_v32 = vadd.f32 %v3921_v34, %v3920_v7  ;;  %v6411_v54 = vpop.eup %6410 }
 0x639   :  { %4450 = vmatpush1.bf16.msra.mxu0 %v8282_v60  ;;  %4491 = vmatpush1.bf16.msra.mxu1 %v8287_v33 }
 0x63a   :  { %6412 = vtanh.f32 %v8304_v32  ;;  %4451 = vmatprep.subr.bf16.mxu0 %v8295_v14  ;;  %4492 = vmatprep.subr.bf16.mxu1 %v8300_v19 }
 0x63d   :  { %4452 = vmatpush1.bf16.msra.mxu0 %v8311_v3  ;;  %4493 = vmatpush1.bf16.msra.mxu1 %v8316_v36 }
 0x63e   :  { %4453 = vmatprep.subr.bf16.mxu0 %v8324_v38  ;;  %4494 = vmatprep.subr.bf16.mxu1 %v8329_v28 }
 0x641   :  { %4454 = vmatpush1.bf16.msra.mxu0 %v8336_v35  ;;  %4495 = vmatpush1.bf16.msra.mxu1 %v8341_v43 }
 0x642   :  { %4455 = vmatprep.subr.bf16.mxu0 %v8348_v44  ;;  %4496 = vmatprep.subr.bf16.mxu1 %v8353_v46 }
 0x645   :  { %4456 = vmatpush1.bf16.msra.mxu0 %v8360_v47  ;;  %4497 = vmatpush1.bf16.msra.mxu1 %v8365_v48 }
 0x646   :  { %4457 = vmatprep.subr.bf16.mxu0 %v8372_v49  ;;  %4498 = vmatprep.subr.bf16.mxu1 %v8377_v50  ;;  %v8408_v50 = vld [vmem:[%s8566_s3 + $0x20] ss:$16 sps:$4 sm:$0xff]   ;;  %v8413_v49 = vld [vmem:[%s8566_s3 + $0x28] ss:$16 sps:$4 sm:$0xff]  }
 0x647   :  { %v6413_v34 = vpop.eup %6412 }
 0x648   :  { %v3924_v7 = vmul.f32 %v6413_v34, %v6411_v54  ;;  %v8420_v54 = vld [vmem:[%s8566_s3 + $0x4] ss:$16 sps:$4 sm:$0xff]   ;;  %v8425_v34 = vld [vmem:[%s8566_s3 + $0xc] ss:$16 sps:$4 sm:$0xff]  }
 0x649   :  { %4458 = vmatpush1.bf16.msra.mxu0 %v8384_v53  ;;  %4499 = vmatpush1.bf16.msra.mxu1 %v8389_v56 }
 0x64a   :  { %v3925_v48 = vpack.c.bf16 %v3924_v7, %v3924_v7  ;;  %4459 = vmatprep.subr.bf16.mxu0 %v8396_v57  ;;  %4500 = vmatprep.subr.bf16.mxu1 %v8401_v58  ;;  %v8432_v7 = vld [vmem:[%s8566_s3] ss:$16 sps:$4 sm:$0xff]   ;;  %v8437_v58 = vld [vmem:[%s8566_s3 + $0x8] ss:$16 sps:$4 sm:$0xff]  }
 0x64c   :  { %3929 = vst [vmem:[#allocation10 + $0x8] sm:$0xf] %v3925_v48  ;;  %3926 = vst [vmem:[#allocation4] sm:$0xf] %v3925_v48 }
 0x64d   :  { %4460 = vmatpush1.bf16.msra.mxu0 %v8408_v50  ;;  %4501 = vmatpush1.bf16.msra.mxu1 %v8413_v49 }
 0x64e   :  { %4461 = vmatprep.subr.bf16.mxu0 %v8420_v54  ;;  %4502 = vmatprep.subr.bf16.mxu1 %v8425_v34 }
 0x651   :  { %4462 = vmatpush1.bf16.msra.mxu0 %v8432_v7  ;;  %4503 = vmatpush1.bf16.msra.mxu1 %v8437_v58 }
 0x652   :  { %4763 = vmatprep.subr.bf16.mxu0 %v8040_v22  ;;  %4804 = vmatprep.subr.bf16.mxu1 %v8045_v39  ;;  %v53_v22 = vld [vmem:[%s8563_s0 + $0xc0] sm:$0xff] }
 0x653   :  { %v4249_v48 = vld [vmem:[#allocation4] sm:$0xf]  ;;  %v3935_v39 = vunpack.c.l.bf16 %v53_v22 }
 0x654   :  { %4480 = vmatmul.mubr.bf16.vlgmr.msra.gmra.mxu0 %v4249_v48  ;;  %4521 = vmatmul.mubr.bf16.vlgmr.msra.gmra.mxu1 %v4249_v48 }
 0x655   :  { %4764 = vmatpush1.bf16.msra.mxu0 %v8050_v40  ;;  %4805 = vmatpush1.bf16.msra.mxu1 %v8055_v55  ;;  %v3936_v40 = vunpack.c.h.bf16 %v53_v22 }
 0x656   :  { %4765 = vmatprep.subr.bf16.mxu0 %v8064_v61  ;;  %4806 = vmatprep.subr.bf16.mxu1 %v8069_v62 }
 0x657   :  { %4795 = vmatprep.mubr.bf16.mxu0 %v8589_v59  ;;  %4836 = vmatprep.mubr.bf16.mxu1 %v8589_v59 }
 0x659   :  { %4766 = vmatpush1.bf16.msra.mxu0 %v8074_v63  ;;  %4807 = vmatpush1.bf16.msra.mxu1 %v8079_v1 }
 0x65a   :  { %4767 = vmatprep.subr.bf16.mxu0 %v8088_v2  ;;  %4808 = vmatprep.subr.bf16.mxu1 %v8093_v4 }
 0x65d   :  { %4768 = vmatpush1.bf16.msra.mxu0 %v8098_v5  ;;  %4809 = vmatpush1.bf16.msra.mxu1 %v8103_v8 }
 0x65e   :  { %4769 = vmatprep.subr.bf16.mxu0 %v8112_v11  ;;  %4810 = vmatprep.subr.bf16.mxu1 %v8117_v12 }
 0x661   :  { %4770 = vmatpush1.bf16.msra.mxu0 %v8122_v13  ;;  %4811 = vmatpush1.bf16.msra.mxu1 %v8127_v9  ;;  %v55_v9 = vld [vmem:[%s8563_s0 + $0xc8] sm:$0xff] }
 0x662   :  { %4771 = vmatprep.subr.bf16.mxu0 %v8136_v17  ;;  %4812 = vmatprep.subr.bf16.mxu1 %v8141_v26  ;;  %v3938_v17 = vunpack.c.h.bf16 %v55_v9 }
 0x665   :  { %4772 = vmatpush1.bf16.msra.mxu0 %v8146_v0  ;;  %4813 = vmatpush1.bf16.msra.mxu1 %v8151_v41  ;;  %v3937_v0 = vunpack.c.l.bf16 %v55_v9 }
 0x666   :  { %4773 = vmatprep.subr.bf16.mxu0 %v8160_v42  ;;  %4814 = vmatprep.subr.bf16.mxu1 %v8165_v10 }
 0x669   :  { %4774 = vmatpush1.bf16.msra.mxu0 %v8170_v15  ;;  %4815 = vmatpush1.bf16.msra.mxu1 %v8175_v16 }
 0x66a   :  { %4775 = vmatprep.subr.bf16.mxu0 %v8184_v18  ;;  %4816 = vmatprep.subr.bf16.mxu1 %v8189_v20  ;;  %v5259_v20 = vld [vmem:[%s8564_s1 + $0x30] sm:$0xff] }
 0x66d   :  { %4776 = vmatpush1.bf16.msra.mxu0 %v8194_v21  ;;  %4817 = vmatpush1.bf16.msra.mxu1 %v8199_v23  ;;  %v4251_v21 = vunpack.c.l.bf16 %v5259_v20  ;;  %v4252_v23 = vunpack.c.h.bf16 %v5259_v20 }
 0x66e   :  { %4777 = vmatprep.subr.bf16.mxu0 %v8208_v24  ;;  %4818 = vmatprep.subr.bf16.mxu1 %v8213_v27 }
 0x671   :  { %4778 = vmatpush1.bf16.msra.mxu0 %v8218_v30  ;;  %4819 = vmatpush1.bf16.msra.mxu1 %v8223_v31 }
 0x672   :  { %5078 = vmatprep.subr.bf16.mxu0 %v8232_v29  ;;  %5119 = vmatprep.subr.bf16.mxu1 %v8237_v37 }
 0x6f4   :  { %v4165_v55 = vpop.f32.mrf.mxu0  ;;  %v4206_v61 = vpop.f32.mrf.mxu1 }
 0x6f5   :  { %v4213_v62 = vadd.f32 %v4165_v55, %v3935_v39  ;;  %v4215_v10 = vadd.f32 %v4206_v61, %v3937_v0 }
 0x6f6   :  { %v4167_v63 = vpop.f32.mrf.mxu0  ;;  %v4208_v1 = vpop.f32.mrf.mxu1 }
 0x6f7   :  { %v5725_v2 = vmul.f32 -1.442695, %v4213_v62  ;;  %v4214_v4 = vadd.f32 %v4167_v63, %v3936_v40  ;;  %v4216_v26 = vadd.f32 %v4208_v1, %v3938_v17 }
 0x6f8   :  { %v4169_v5 = vpop.f32.mrf.mxu0  ;;  %v4210_v8 = vpop.f32.mrf.mxu1 }
 0x6f9   :  { %6414 = vpow2.f32 %v5725_v2  ;;  %v5726_v11 = vmul.f32 -1.442695, %v4214_v4  ;;  %v5727_v41 = vmul.f32 -1.442695, %v4216_v26 }
 0x6fa   :  { %v4170_v12 = vpop.f32.mrf.mxu0  ;;  %v4211_v13 = vpop.f32.mrf.mxu1 }
 0x6fb   :  { %6416 = vpow2.f32 %v5726_v11  ;;  %v5260_v12 = vld [vmem:[%s8564_s1 + $0x38] sm:$0xff] }
 0x6fc   :  { %6418 = vpow2.f32 %v5727_v41  ;;  %v4254_v13 = vunpack.c.h.bf16 %v5260_v12  ;;  %v4253_v17 = vunpack.c.l.bf16 %v5260_v12 }
 0x706   :  { %v6415_v42 = vpop.eup %6414 }
 0x707   :  { %v4220_v15 = vadd.f32 1.0, %v6415_v42 }
 0x708   :  { %v6417_v16 = vpop.eup %6416 }
 0x709   :  { %6420 = vrcp.f32 %v4220_v15  ;;  %v4226_v18 = vadd.f32 1.0, %v6417_v16  ;;  %v6419_v30 = vpop.eup %6418 }
 0x70a   :  { %6422 = vtanh.f32 %v4215_v10  ;;  %v4233_v61 = vadd.f32 1.0, %v6419_v30 }
 0x70b   :  { %6424 = vrcp.f32 %v4226_v18 }
 0x714   :  { %v4481_v24 = vpop.f32.mrf.mxu0  ;;  %v4522_v27 = vpop.f32.mrf.mxu1 }
 0x715   :  { %v4529_v31 = vadd.f32 %v4481_v24, %v4251_v21 }
 0x716   :  { %v6421_v29 = vpop.eup %6420  ;;  %v4483_v37 = vpop.f32.mrf.mxu0 }
 0x717   :  { %v4524_v48 = vpop.f32.mrf.mxu1  ;;  %v6423_v22 = vpop.eup %6422  ;;  %v5760_v39 = vmul.f32 -1.442695, %v4529_v31  ;;  %v4530_v40 = vadd.f32 %v4483_v37, %v4252_v23 }
 0x718   :  { %v6425_v55 = vpop.eup %6424  ;;  %v4485_v62 = vpop.f32.mrf.mxu0  ;;  %v4237_v1 = vmul.f32 %v6423_v22, %v6421_v29  ;;  %v4532_v9 = vadd.f32 %v4524_v48, %v4254_v13 }
 0x719   :  { %v4526_v63 = vpop.f32.mrf.mxu1  ;;  %v4236_v2 = vmul.f32 %v6425_v55, %v8251_v6  ;;  %6426 = vpow2.f32 %v5760_v39  ;;  %v5761_v4 = vmul.f32 -1.442695, %v4530_v40  ;;  %v4531_v6 = vadd.f32 %v4522_v27, %v4253_v17 }
 0x71a   :  { %v4486_v5 = vpop.f32.mrf.mxu0  ;;  %v5762_v26 = vmul.f32 -1.442695, %v4532_v9  ;;  %v5257_v63 = vld [vmem:[%s8564_s1 + $0x10] sm:$0xff] }
 0x71b   :  { %v4527_v8 = vpop.f32.mrf.mxu1  ;;  %v8489_v11 = vadd.f32 %v4237_v1, %v4236_v2  ;;  %6428 = vpow2.f32 %v5761_v4  ;;  %v4882_v1 = vunpack.c.l.bf16 %v5257_v63  ;;  %v4883_v2 = vunpack.c.h.bf16 %v5257_v63 }
 0x71c   :  { %6430 = vrcp.f32 %v4233_v61 }
 0x71d   :  { %6432 = vtanh.f32 %v8489_v11 }
 0x71e   :  { %6434 = vpow2.f32 %v5762_v26 }
 0x726   :  { %v6427_v0 = vpop.eup %6426 }
 0x727   :  { %v4536_v41 = vadd.f32 1.0, %v6427_v0 }
 0x728   :  { %v6429_v42 = vpop.eup %6428 }
 0x729   :  { %v6431_v10 = vpop.eup %6430  ;;  %6436 = vrcp.f32 %v4536_v41  ;;  %v4542_v15 = vadd.f32 1.0, %v6429_v42 }
 0x72a   :  { %v6433_v16 = vpop.eup %6432  ;;  %6438 = vtanh.f32 %v4531_v6 }
 0x72b   :  { %v4240_v18 = vmul.f32 %v6433_v16, %v6431_v10  ;;  %6440 = vrcp.f32 %v4542_v15  ;;  %v6435_v21 = vpop.eup %6434 }
 0x72c   :  { %v4549_v31 = vadd.f32 1.0, %v6435_v21 }
 0x72d   :  { %v4241_v20 = vpack.c.bf16 %v4240_v18, %v4240_v18 }
 0x72e   :  { %6442 = vrcp.f32 %v4549_v31 }
 0x72f   :  { %4245 = vst [vmem:[#allocation8 + $0x18] sm:$0xf] %v4241_v20  ;;  %4242 = vst [vmem:[#allocation2] sm:$0xf] %v4241_v20 }
 0x736   :  { %v6437_v23 = vpop.eup %6436  ;;  %v4565_v24 = vld [vmem:[#allocation2] sm:$0xf] }
 0x737   :  { %v6439_v30 = vpop.eup %6438  ;;  %4796 = vmatmul.mubr.bf16.vlgmr.msra.gmra.mxu0 %v4565_v24  ;;  %4837 = vmatmul.mubr.bf16.vlgmr.msra.gmra.mxu1 %v4565_v24 }
 0x738   :  { %v6441_v27 = vpop.eup %6440  ;;  %5079 = vmatpush1.bf16.msra.mxu0 %v8260_v45  ;;  %5120 = vmatpush1.bf16.msra.mxu1 %v8265_v25  ;;  %v4553_v29 = vmul.f32 %v6439_v30, %v6437_v23  ;;  %v8613_v25 = vld [vmem:[#allocation15_spill] sm:$0xff]  ;;  %v5258_v30 = vld [vmem:[%s8564_s1 + $0x18] sm:$0xff]  ;;  %s6478_s1 = scalar_lea.vmem %s5205_s20, 512 }
 0x739   :  { %v4552_v37 = vmul.f32 %v6441_v27, %v8304_v32  ;;  %5080 = vmatprep.subr.bf16.mxu0 %v8270_v51  ;;  %5121 = vmatprep.subr.bf16.mxu1 %v8275_v52  ;;  %v8614_v51 = vld [vmem:[#allocation16_spill] sm:$0xff]  ;;  %v57_v32 = vld [vmem:[%s8563_s0 + $0xe0] sm:$0xff]  ;;  %v4885_v27 = vunpack.c.h.bf16 %v5258_v30  ;;  %p6479_p0 = scmp.ne.s32.totalorder %s5205_s20, %s6478_s1  ;;  %p6484_p2 = scmp.lt.s32.totalorder %s6478_s1, %s6478_s1 }
 0x73a   :  { %5110 = vmatprep.mubr.bf16.mxu0 %v8589_v59  ;;  %5151 = vmatprep.mubr.bf16.mxu1 %v8589_v59  ;;  %v8612_v59 = vld [vmem:[#allocation14_spill] sm:$0xff] }
 0x73b   :  { %v8502_v48 = vadd.f32 %v4553_v29, %v4552_v37  ;;  %v6443_v45 = vpop.eup %6442  ;;  %v4884_v29 = vunpack.c.l.bf16 %v5258_v30  ;;  %p6485_p3 = por %p6484_p2, %p6483_p1 }
 0x73c   :  { %5081 = vmatpush1.bf16.msra.mxu0 %v8282_v60  ;;  %5122 = vmatpush1.bf16.msra.mxu1 %v8287_v33 }
 0x73d   :  { %6444 = vtanh.f32 %v8502_v48  ;;  %5082 = vmatprep.subr.bf16.mxu0 %v8295_v14  ;;  %5123 = vmatprep.subr.bf16.mxu1 %v8300_v19  ;;  %v8615_v14 = vld [vmem:[#allocation17_spill] sm:$0xff]  ;;  %p6486_p4 = pnand %p6485_p3, %p6479_p0 }
 0x740   :  { %5083 = vmatpush1.bf16.msra.mxu0 %v8311_v3  ;;  %5124 = vmatpush1.bf16.msra.mxu1 %v8316_v36  ;;  %v4567_v3 = vunpack.c.l.bf16 %v57_v32  ;;  %v4568_v36 = vunpack.c.h.bf16 %v57_v32 }
 0x741   :  { %5084 = vmatprep.subr.bf16.mxu0 %v8324_v38  ;;  %5125 = vmatprep.subr.bf16.mxu1 %v8329_v28 }
 0x744   :  { %5085 = vmatpush1.bf16.msra.mxu0 %v8336_v35  ;;  %5126 = vmatpush1.bf16.msra.mxu1 %v8341_v43 }
 0x745   :  { %5086 = vmatprep.subr.bf16.mxu0 %v8348_v44  ;;  %5127 = vmatprep.subr.bf16.mxu1 %v8353_v46 }
 0x748   :  { %5087 = vmatpush1.bf16.msra.mxu0 %v8360_v47  ;;  %5128 = vmatpush1.bf16.msra.mxu1 %v8612_v59 }
 0x749   :  { %5088 = vmatprep.subr.bf16.mxu0 %v8613_v25  ;;  %5129 = vmatprep.subr.bf16.mxu1 %v8614_v51 }
 0x74a   :  { %v6445_v52 = vpop.eup %6444 }
 0x74b   :  { %v4556_v60 = vmul.f32 %v6445_v52, %v6443_v45 }
 0x74c   :  { %5089 = vmatpush1.bf16.msra.mxu0 %v8384_v53  ;;  %5130 = vmatpush1.bf16.msra.mxu1 %v8389_v56 }
 0x74d   :  { %v4557_v33 = vpack.c.bf16 %v4556_v60, %v4556_v60  ;;  %5090 = vmatprep.subr.bf16.mxu0 %v8396_v57  ;;  %5131 = vmatprep.subr.bf16.mxu1 %v8615_v14 }
 0x74f   :  { %4561 = vst [vmem:[#allocation10 + $0x4] sm:$0xf] %v4557_v33  ;;  %4558 = vst [vmem:[#allocation4] sm:$0xf] %v4557_v33 }
 0x750   :  { %5091 = vmatpush1.bf16.msra.mxu0 %v8408_v50  ;;  %5132 = vmatpush1.bf16.msra.mxu1 %v8413_v49 }
 0x751   :  { %5092 = vmatprep.subr.bf16.mxu0 %v8420_v54  ;;  %5133 = vmatprep.subr.bf16.mxu1 %v8425_v34 }
 0x754   :  { %5093 = vmatpush1.bf16.msra.mxu0 %v8432_v7  ;;  %5134 = vmatpush1.bf16.msra.mxu1 %v8437_v58  ;;  %v59_v58 = vld [vmem:[%s8563_s0 + $0xe8] sm:$0xff] }
 0x755   :  { %v4570_v54 = vunpack.c.h.bf16 %v59_v58  ;;  %v4569_v7 = vunpack.c.l.bf16 %v59_v58 }
 0x756   :  { %v4880_v19 = vld [vmem:[#allocation4] sm:$0xf] }
 0x757   :  { %5111 = vmatmul.mubr.bf16.vlgmr.msra.gmra.mxu0 %v4880_v19  ;;  %5152 = vmatmul.mubr.bf16.vlgmr.msra.gmra.mxu1 %v4880_v19 }
 0x7f7   :  { %v4797_v38 = vpop.f32.mrf.mxu0  ;;  %v4838_v28 = vpop.f32.mrf.mxu1 }
 0x7f8   :  { %v4845_v35 = vadd.f32 %v4797_v38, %v4567_v3  ;;  %v4847_v40 = vadd.f32 %v4838_v28, %v4569_v7 }
 0x7f9   :  { %v4799_v43 = vpop.f32.mrf.mxu0  ;;  %v4840_v44 = vpop.f32.mrf.mxu1 }
 0x7fa   :  { %v5795_v46 = vmul.f32 -1.442695, %v4845_v35  ;;  %v4846_v47 = vadd.f32 %v4799_v43, %v4568_v36  ;;  %v4848_v34 = vadd.f32 %v4840_v44, %v4570_v54 }
 0x7fb   :  { %v4801_v49 = vpop.f32.mrf.mxu0  ;;  %v4842_v50 = vpop.f32.mrf.mxu1 }
 0x7fc   :  { %6446 = vpow2.f32 %v5795_v46  ;;  %v5796_v53 = vmul.f32 -1.442695, %v4846_v47  ;;  %v5797_v22 = vmul.f32 -1.442695, %v4848_v34 }
 0x7fd   :  { %v4802_v56 = vpop.f32.mrf.mxu0  ;;  %v4843_v57 = vpop.f32.mrf.mxu1 }
 0x7fe   :  { %6448 = vpow2.f32 %v5796_v53 }
 0x7ff   :  { %6450 = vpow2.f32 %v5797_v22 }
 0x809   :  { %v6447_v39 = vpop.eup %6446 }
 0x80a   :  { %v4852_v55 = vadd.f32 1.0, %v6447_v39 }
 0x80b   :  { %v6449_v61 = vpop.eup %6448 }
 0x80c   :  { %6452 = vrcp.f32 %v4852_v55  ;;  %v4858_v62 = vadd.f32 1.0, %v6449_v61  ;;  %v6451_v8 = vpop.eup %6450 }
 0x80d   :  { %6454 = vtanh.f32 %v4847_v40  ;;  %v4865_v42 = vadd.f32 1.0, %v6451_v8 }
 0x80e   :  { %6456 = vrcp.f32 %v4858_v62 }
 0x817   :  { %v5112_v4 = vpop.f32.mrf.mxu0  ;;  %v5153_v5 = vpop.f32.mrf.mxu1 }
 0x818   :  { %v5160_v12 = vadd.f32 %v5112_v4, %v4882_v1  ;;  %v5162_v45 = vadd.f32 %v5153_v5, %v4884_v29 }
 0x819   :  { %v6453_v13 = vpop.eup %6452  ;;  %v5114_v9 = vpop.f32.mrf.mxu0 }
 0x81a   :  { %v5155_v17 = vpop.f32.mrf.mxu1  ;;  %v6455_v26 = vpop.eup %6454  ;;  %v5830_v0 = vmul.f32 -1.442695, %v5160_v12  ;;  %v5161_v6 = vadd.f32 %v5114_v9, %v4883_v2 }
 0x81b   :  { %v6457_v41 = vpop.eup %6456  ;;  %v5116_v10 = vpop.f32.mrf.mxu0  ;;  %v4869_v16 = vmul.f32 %v6455_v26, %v6453_v13  ;;  %v5163_v31 = vadd.f32 %v5155_v17, %v4885_v27 }
 0x81c   :  { %v5157_v15 = vpop.f32.mrf.mxu1  ;;  %v4868_v18 = vmul.f32 %v6457_v41, %v8489_v11  ;;  %6458 = vpow2.f32 %v5830_v0  ;;  %v5831_v20 = vmul.f32 -1.442695, %v5161_v6 }
 0x81d   :  { %v5117_v21 = vpop.f32.mrf.mxu0  ;;  %v5832_v37 = vmul.f32 -1.442695, %v5163_v31 }
 0x81e   :  { %v5158_v23 = vpop.f32.mrf.mxu1  ;;  %v4870_v24 = vadd.f32 %v4869_v16, %v4868_v18  ;;  %6460 = vpow2.f32 %v5831_v20 }
 0x81f   :  { %6462 = vrcp.f32 %v4865_v42 }
 0x820   :  { %6464 = vtanh.f32 %v4870_v24 }
 0x821   :  { %6466 = vpow2.f32 %v5832_v37 }
 0x829   :  { %v6459_v59 = vpop.eup %6458 }
 0x82a   :  { %v5167_v25 = vadd.f32 1.0, %v6459_v59 }
 0x82b   :  { %v6461_v11 = vpop.eup %6460 }
 0x82c   :  { %v6463_v51 = vpop.eup %6462  ;;  %6468 = vrcp.f32 %v5167_v25  ;;  %v5173_v52 = vadd.f32 1.0, %v6461_v11 }
 0x82d   :  { %v6465_v60 = vpop.eup %6464  ;;  %6470 = vtanh.f32 %v5162_v45 }
 0x82e   :  { %v4872_v33 = vmul.f32 %v6465_v60, %v6463_v51  ;;  %6472 = vrcp.f32 %v5173_v52 }
 0x830   :  { %v4873_v14 = vpack.c.bf16 %v4872_v33, %v4872_v33 }
 0x832   :  { %4874 = vst [vmem:[#allocation2] sm:$0xf] %v4873_v14  ;;  %4877 = vst [vmem:[#allocation8 + $0x1c] sm:$0xf] %v4873_v14 }
 0x833   :  { %6489 = shalt.err (!%p6486_p4)
}
 0x834   :  { %s6524_s21 = smov 64   ;;  %s6525_s22 = smov 4   ;;  %v6467_v19 = vpop.eup %6466 }
 0x835   :  { %5210 = dma.vmem_to_hbm [thread:$0]  %s5205_s20, 512, %s8567_s4, [#allocation9], %s6524_s21, %s6524_s21, %s6525_s22   ;;  %v5180_v28 = vadd.f32 1.0, %v6467_v19 }
 0x836   :  { %s6526_s27 = smov [#allocation10]  }
 0x837   :  { %6474 = vrcp.f32 %v5180_v28  ;;  %s5220_s4 = sshll.u32 %s6526_s27, 4  ;;  %s5221_s4 = int_to_ptr.vmem [resolvable:$true] %s5220_s4 }
 0x838   :  { %s6498_s28 = scalar_lea.vmem %s5221_s4, 512  ;;  %p6503_p6 = scmp.lt.s32.totalorder %s5221_s4, %s5221_s4 }
 0x839   :  { %v6469_v32 = vpop.eup %6468  ;;  %v5195_v3 = vld [vmem:[#allocation2] sm:$0xf]  ;;  %p6499_p5 = scmp.ne.s32.totalorder %s5221_s4, %s6498_s28  ;;  %p6504_p7 = scmp.lt.s32.totalorder %s6498_s28, %s6498_s28 }
 0x83a   :  { %v6471_v36 = vpop.eup %6470  ;;  %5196 = vst [vmem:[%s8569_s6] sm:$0xf] %v5195_v3 }
 0x83b   :  { %v6473_v38 = vpop.eup %6472  ;;  %v5184_v35 = vmul.f32 %v6471_v36, %v6469_v32  ;;  %p6505_p8 = por %p6504_p7, %p6503_p6 }
 0x83c   :  { %v5183_v43 = vmul.f32 %v6473_v38, %v8502_v48 }
 0x83d   :  { %p6506_p9 = pnand %p6505_p8, %p6499_p5 }
 0x83e   :  { %v5185_v44 = vadd.f32 %v5184_v35, %v5183_v43 }
 0x840   :  { %6476 = vtanh.f32 %v5185_v44 }
 0x844   :  { %v6475_v46 = vpop.eup %6474 }
 0x84d   :  { %v6477_v47 = vpop.eup %6476 }
 0x84e   :  { %v5187_v49 = vmul.f32 %v6477_v47, %v6475_v46 }
 0x850   :  { %v5188_v50 = vpack.c.bf16 %v5187_v49, %v5187_v49 }
 0x852   :  { %5189 = vst [vmem:[#allocation4] sm:$0xf] %v5188_v50  ;;  %5191 = vst [vmem:[#allocation10] sm:$0xf] %v5188_v50 }
 0x853   :  { %6509 = shalt.err (!%p6506_p9)
}
 0x854   :  { %5226 = dma.vmem_to_hbm [thread:$0]  %s5221_s4, 512, %s8568_s5, [#allocation11], %s6524_s21, %s6524_s21, %s6525_s22  }
 0x859   :  { %v5197_v48 = vld [vmem:[#allocation4] sm:$0xf] }
 0x85a   :  { %5198 = vst [vmem:[%s8570_s7] sm:$0xf] %v5197_v48 }
 0x85b   :  { %6518 = dma.done.wait [#allocation9], 512  }
 0x85c   :  { %6519 = vsyncadd [#allocation9], 4294966784 }
 0x85d   :  { %6520 = dma.done.wait [#allocation11], 512  }
 0x85e   :  { %6521 = vsyncadd [#allocation11], 4294966784 }
 0x85f   :  { %5241 = vsyncpa [#allocation9], 1 }
 0x860   :  { %5242 = vsyncpa [#allocation11], 1 }

</bundles_post_ra>
